<compile_context>
chip_gen: v6e
topology: v6e:2x2x1
jax: 0.10.0
libtpu: 0.0.40
codegen_flags: <defaults>
</compile_context>

<pallas_src>
import jax
import jax.numpy as jnp
from jax.experimental import pallas as pl
from jax.experimental.pallas import tpu as pltpu

# ---- constants (the `c.` module in the original code) -----------------------
MAX_SENT_LENGTH = 16   # c.MAX_SENT_LENGTH
MAX_SENTS = 4          # c.MAX_SENTS
NPRATIO = 3            # c.npratio  -> 1 + npratio = 4 candidates
EMB_DIM = 300
CONV_OUT = 400
ATTN_DIM = 200
WORD_DICT_LENGTH = 50


def _round_up(n, m):
    return ((n + m - 1) // m) * m


# =============================== kernels =====================================

def _conv_kernel(x_ref, w_ref, b_ref, mask_ref, o_ref):
    # x_ref   : (BLK, 900)  3-tap rows, one row per (title, position)
    # w_ref   : (900, 400)  [W_k0; W_k1; W_k2] of the Conv1d weight (transposed)
    # b_ref   : (1, 400)    bias, broadcast over rows
    # mask_ref: (BLK, 1)    ConstantPad1d(1, 0) row mask (1.0 for pos 1..L-2, else 0.0)
    # o_ref   : (BLK, 400)  lane-dense conv output (rows=(title,pos), lanes=channel)
    acc = jnp.dot(x_ref[...], w_ref[...], preferred_element_type=jnp.float32)
    o_ref[...] = (acc + b_ref[...]) * mask_ref[...]


def _make_attn_pool_kernel(nb, s_pad, s_valid):
    def kernel(v_ref, q_ref, wa_ref, ba_ref, ww_ref, bw_ref, o_ref):
        # v_ref : (nb*s_pad, 400) rows of the torch ".view(-1, S, 400)" score input
        # q_ref : (nb, s_pad, 400) lane-dense tensor the weighted sum runs over
        # wa_ref: (400, 200)  ba_ref: (1, 200)  ww_ref: (1, 200)
        # bw_ref: (1, 1) scalar in SMEM
        # o_ref : (nb, 400)   lane-dense pooled embeddings
        a1 = jnp.tanh(jnp.dot(v_ref[...], wa_ref[...],
                              preferred_element_type=jnp.float32) + ba_ref[...])
        a1 = a1.reshape(nb, s_pad, ATTN_DIM)                    # split items (s_pad % 8 == 0)
        z = jnp.sum(a1 * ww_ref[...].reshape(1, 1, ATTN_DIM), axis=-1, keepdims=True)
        z = z + bw_ref[0, 0]                                    # (nb, s_pad, 1)
        if s_valid < s_pad:                                     # mask glue-padded positions
            pos = jax.lax.broadcasted_iota(jnp.int32, z.shape, 1)
            z = jnp.where(pos < s_valid, z, -1e30)
        m = jnp.max(z, axis=1, keepdims=True)                   # per-item softmax over S
        e = jnp.exp(z - m)
        attn = e / jnp.sum(e, axis=1, keepdims=True)            # (nb, s_pad, 1)
        # weighted sum: lane-broadcast mul + sublane reduce on the lane-dense q
        o_ref[...] = jnp.sum(q_ref[...] * attn, axis=1)
    return kernel


# =============================== wrappers ====================================

def conv1d_pallas(xf3, w_catT, b_row, blk_rows, seq_len):
    """xf3: (n_blk*L, 900) f32 3-tap rows -> padded conv output (n_blk*L, 400)."""
    nl, ck = xf3.shape
    grid = nl // blk_rows
    # hoisted ConstantPad1d(1,0) mask: identical for every grid step
    pos = jnp.arange(blk_rows, dtype=jnp.int32) % seq_len
    pad_mask = jnp.logical_and(pos >= 1, pos <= seq_len - 2)
    pad_mask = pad_mask.astype(jnp.float32).reshape(blk_rows, 1)
    return pl.pallas_call(
        _conv_kernel,
        out_shape=jax.ShapeDtypeStruct((nl, CONV_OUT), jnp.float32),
        grid_spec=pltpu.PrefetchScalarGridSpec(
            num_scalar_prefetch=0,
            grid=(grid,),
            in_specs=[
                pl.BlockSpec((blk_rows, ck), lambda n: (n, 0)),
                pl.BlockSpec((ck, CONV_OUT), lambda n: (0, 0)),
                pl.BlockSpec((1, CONV_OUT), lambda n: (0, 0)),
                pl.BlockSpec((blk_rows, 1), lambda n: (0, 0)),
            ],
            out_specs=pl.BlockSpec((blk_rows, CONV_OUT), lambda n: (n, 0)),
        ),
        compiler_params=pltpu.CompilerParams(dimension_semantics=("parallel",)),
    )(xf3, w_catT, b_row, pad_mask)


def attn_pool_pallas(v2, qT, wa, ba, ww, bw, s_valid):
    """v2: (N*S, 400) score rows, qT: (N, S, 400) lane-dense -> pooled (N, 400)."""
    n_items, s_pad, _ = qT.shape
    nb = min(_round_up(n_items, 8), 16)                 # items per grid step
    n_pad = _round_up(n_items, nb)
    if n_pad != n_items:                                # zero items: finite math, sliced off
        qT = jnp.pad(qT, ((0, n_pad - n_items), (0, 0), (0, 0)))
        v2 = jnp.pad(v2, ((0, (n_pad - n_items) * s_pad), (0, 0)))
    out = pl.pallas_call(
        _make_attn_pool_kernel(nb, s_pad, s_valid),
        out_shape=jax.ShapeDtypeStruct((n_pad, CONV_OUT), jnp.float32),
        grid_spec=pltpu.PrefetchScalarGridSpec(
            num_scalar_prefetch=0,
            grid=(n_pad // nb,),
            in_specs=[
                pl.BlockSpec((nb * s_pad, CONV_OUT), lambda n: (n, 0)),
                pl.BlockSpec((nb, s_pad, CONV_OUT), lambda n: (n, 0, 0)),
                pl.BlockSpec((CONV_OUT, ATTN_DIM), lambda n: (0, 0)),
                pl.BlockSpec((1, ATTN_DIM), lambda n: (0, 0)),
                pl.BlockSpec((1, ATTN_DIM), lambda n: (0, 0)),
                pl.BlockSpec(memory_space=pltpu.MemorySpace.SMEM),   # bw (1,1) scalar
            ],
            out_specs=pl.BlockSpec((nb, CONV_OUT), lambda n: (n, 0)),
        ),
        compiler_params=pltpu.CompilerParams(dimension_semantics=("parallel",)),
    )(v2, qT, wa, ba, ww, bw)
    return out[:n_items]


# =========================== model (JAX glue) ================================

def _encode_all_titles(tokens, kp):
    """tokens: (N, L) int32 -> news embeddings (N, 400) (conv + word-level attention)."""
    n, l = tokens.shape
    emb = kp["embedding"][tokens]                        # (N, L, 300)
    # TODO(synk): dropout(p=0.2) omitted (eval-mode semantics).
    x = emb.reshape(n, EMB_DIM, l)                       # torch .view(-1, 300, L)  (raw reinterpret)
    n_blk16 = _round_up(n, 16)
    blk_items = 16 if n_blk16 <= 32 else 32              # 256 or 512 conv rows per grid step
    n_blk = _round_up(n, blk_items)
    if n_blk != n:
        x = jnp.pad(x, ((0, n_blk - n), (0, 0), (0, 0)))
    xt = jnp.transpose(x, (0, 2, 1))                     # (n_blk, L, 300): per-position channel rows
    zrow = jnp.zeros((n_blk, 1, EMB_DIM), jnp.float32)
    # 3-tap im2col along the last axis; taps never mix titles by construction.
    xf3 = jnp.concatenate(
        [jnp.concatenate([zrow, xt[:, :l - 1, :]], axis=1),   # tap 0 -> position p-1
         xt,                                                  # tap 1 -> position p
         jnp.concatenate([xt[:, 1:, :], zrow], axis=1)],      # tap 2 -> position p+1
        axis=2).reshape(n_blk * l, 3 * EMB_DIM)               # (n_blk*L, 900)

    pfT = conv1d_pallas(xf3, kp["conv_wcatT"], kp["conv_brow"],
                        blk_rows=blk_items * l, seq_len=l)    # (n_blk*L, 400) lane-dense
    q = pfT.reshape(n_blk, l, CONV_OUT)                       # true (title, pos, chan): FREE reshape
    # bug-compatible torch .view(-1, L, 400) rows (raw reinterpret of the (N,400,L) tensor)
    v2 = jnp.transpose(q, (0, 2, 1)).reshape(n_blk * l, CONV_OUT)

    enc = attn_pool_pallas(v2, q, kp["enc_wa"], kp["enc_ba"],
                           kp["enc_ww"], kp["enc_bw"], s_valid=l)
    return enc[:n]                                            # (N, 400)


def forward(browsed_news, candidate_news, kp):
    """browsed_news: (MAX_SENTS, B, L) int32, candidate_news: (1+npratio, B, L) int32."""
    ms, b, l = browsed_news.shape
    k = candidate_news.shape[0]

    # one shared encoder pass for browsed + candidate titles (same weights)
    tokens = jnp.concatenate(
        [browsed_news.reshape(ms * b, l), candidate_news.reshape(k * b, l)], axis=0)
    enc = _encode_all_titles(tokens, kp)                               # ((ms+k)*b, 400)
    browsed_vecs = enc[:ms * b].reshape(ms, b, CONV_OUT)
    cand_vecs = enc[ms * b:].reshape(k, b, CONV_OUT)

    # user tower: news-level attentive pooling over the MS browsed titles
    rep = jnp.transpose(browsed_vecs, (1, 0, 2))                       # (B, MS, 400) true rows
    rep_view = rep.reshape(b, CONV_OUT, ms)          # torch .view(-1, 400, MS) (raw reinterpret)
    qn = jnp.transpose(rep_view, (0, 2, 1))          # (B, MS, 400) lane-dense weighted-sum operand
    s_pad = _round_up(ms, 8)                         # pad S to the sublane multiple
    rep_p = jnp.pad(rep, ((0, 0), (0, s_pad - ms), (0, 0)))
    qn_p = jnp.pad(qn, ((0, 0), (0, s_pad - ms), (0, 0)))
    user_emb = attn_pool_pallas(rep_p.reshape(b * s_pad, CONV_OUT), qn_p,
                                kp["news_wa"], kp["news_ba"],
                                kp["news_ww"], kp["news_bw"], s_valid=ms)   # (B, 400)

    # candidate scoring: tiny -> plain XLA (cheaper than one pallas_call launch)
    cand = jnp.transpose(cand_vecs, (1, 0, 2))                         # (B, K, 400)
    scores = jnp.einsum('bd,bkd->bk', user_emb, cand)
    return jax.nn.softmax(scores, axis=-1)


# =========================== parameters ======================================

def init_params(key):
    ks = jax.random.split(key, 11)

    def norm(k, shape, scale):
        return (scale * jax.random.normal(k, shape)).astype(jnp.float32)

    return {
        "embedding":       norm(ks[0], (WORD_DICT_LENGTH, EMB_DIM), 0.1),
        "conv_w":          norm(ks[1], (CONV_OUT, EMB_DIM, 3), 0.05),   # torch Conv1d weight
        "conv_b":          norm(ks[2], (CONV_OUT,), 0.05),
        "enc_attn_w":      norm(ks[3], (ATTN_DIM, CONV_OUT), 0.05),     # Linear(400,200)
        "enc_attn_b":      norm(ks[4], (ATTN_DIM,), 0.05),
        "enc_attn_out_w":  norm(ks[5], (1, ATTN_DIM), 0.05),            # Linear(200,1)
        "enc_attn_out_b":  norm(ks[6], (1,), 0.05),
        "news_attn_w":     norm(ks[7], (ATTN_DIM, CONV_OUT), 0.05),
        "news_attn_b":     norm(ks[8], (ATTN_DIM,), 0.05),
        "news_attn_out_w": norm(ks[9], (1, ATTN_DIM), 0.05),
        "news_attn_out_b": norm(ks[10], (1,), 0.05),
    }


def prepare_params(params):
    """Hoist all weight transposes/reshapes out of the per-forward path."""
    # conv_wcatT[300*k + c, o] == conv_w[o, c, k]
    wcatT = jnp.transpose(params["conv_w"], (2, 1, 0)).reshape(3 * EMB_DIM, CONV_OUT)
    return {
        "embedding":  params["embedding"],
        "conv_wcatT": wcatT,                                            # (900, 400)
        "conv_brow":  params["conv_b"].reshape(1, CONV_OUT),
        "enc_wa":     params["enc_attn_w"].T,                           # (400, 200)
        "enc_ba":     params["enc_attn_b"].reshape(1, ATTN_DIM),
        "enc_ww":     params["enc_attn_out_w"].reshape(1, ATTN_DIM),
        "enc_bw":     params["enc_attn_out_b"].reshape(1, 1),
        "news_wa":    params["news_attn_w"].T,
        "news_ba":    params["news_attn_b"].reshape(1, ATTN_DIM),
        "news_ww":    params["news_attn_out_w"].reshape(1, ATTN_DIM),
        "news_bw":    params["news_attn_out_b"].reshape(1, 1),
    }


# ===================== pure-JAX reference (spec transcription) ===============

def _encoder_reference(tokens, params):
    l = tokens.shape[-1]
    emb = params["embedding"][tokens]                           # (B, L, 300)
    x = emb.reshape(-1, EMB_DIM, l)                             # .view(-1, 300, L)
    w, bias = params["conv_w"], params["conv_b"]
    lc = l - 2
    acc = jnp.zeros((x.shape[0], CONV_OUT, lc), jnp.float32) + bias[None, :, None]
    for k in range(3):
        acc = acc + jnp.einsum('oc,ncl->nol', w[:, :, k], x[:, :, k:k + lc])
    padded = jnp.pad(acc, ((0, 0), (0, 0), (1, 1)))             # ConstantPad1d(1, 0)
    v = padded.reshape(-1, l, CONV_OUT)                         # .view(-1, L, 400)
    a1 = jnp.tanh(v @ params["enc_attn_w"].T + params["enc_attn_b"])
    a2 = a1 @ params["enc_attn_out_w"].T + params["enc_attn_out_b"]
    attn = jax.nn.softmax(a2, axis=1)
    p = padded.reshape(-1, CONV_OUT, l)                         # .view(-1, 400, L)
    return jnp.matmul(p, attn).reshape(-1, CONV_OUT)


def forward_reference(browsed_news, candidate_news, params):
    ms, b, _ = browsed_news.shape
    k = candidate_news.shape[0]
    browsed = [_encoder_reference(browsed_news[i], params) for i in range(ms)]
    rep = jnp.stack(browsed, axis=1)                            # (B, MS, 400)
    a1 = jnp.tanh(rep @ params["news_attn_w"].T + params["news_attn_b"])
    a2 = a1 @ params["news_attn_out_w"].T + params["news_attn_out_b"]
    attn = jax.nn.softmax(a2, axis=1)
    rep_view = rep.reshape(b, CONV_OUT, ms)                     # .view(-1, 400, MS)
    user = jnp.matmul(rep_view, attn).reshape(b, CONV_OUT)
    cands = [_encoder_reference(candidate_news[i], params) for i in range(k)]
    logits = jnp.stack([jnp.sum(user * c, axis=1) for c in cands], axis=1)
    return jax.nn.softmax(logits, axis=1)


# ================================ main =======================================

if __name__ == "__main__":
    key = jax.random.PRNGKey(0)
    pkey, bkey, ckey = jax.random.split(key, 3)
    params = init_params(pkey)
    kparams = prepare_params(params)        # hoisted: done once, not per forward

    B = 2
    browsed = jax.random.randint(
        bkey, (MAX_SENTS, B, MAX_SENT_LENGTH), 0, WORD_DICT_LENGTH, dtype=jnp.int32)
    candidates = jax.random.randint(
        ckey, (1 + NPRATIO, B, MAX_SENT_LENGTH), 0, WORD_DICT_LENGTH, dtype=jnp.int32)

    fwd = jax.jit(forward)
    logits = fwd(browsed, candidates, kparams)
    jax.block_until_ready(logits)

    assert logits.shape == (B, 1 + NPRATIO), logits.shape
    assert bool(jnp.all(jnp.isfinite(logits)))
    # each row is a softmax -> sums to 1
    assert bool(jnp.allclose(jnp.sum(logits, axis=1), 1.0, atol=1e-5))

    # correctness vs. a pure-JAX transcription of the PyTorch module
    ref = forward_reference(browsed, candidates, params)
    assert bool(jnp.allclose(logits, ref, atol=2e-3, rtol=2e-3)), (logits, ref)

    print("KERNEL_OK")
</pallas_src>

<mosaic_0001>
module attributes {stable_mosaic.version = 11 : i64} {
  func.func @_conv_kernel(%arg0: i32, %arg1: memref<256x900xf32, #tpu.memory_space<vmem>>, %arg2: memref<900x400xf32, #tpu.memory_space<vmem>>, %arg3: memref<1x400xf32, #tpu.memory_space<vmem>>, %arg4: memref<256x1xf32, #tpu.memory_space<vmem>>, %arg5: memref<256x400xf32, #tpu.memory_space<vmem>>) attributes {dimension_semantics = [#tpu.dimension_semantics<parallel>], iteration_bounds = array<i64: 1>, scalar_prefetch = 0 : i64, scratch_operands = 0 : i64, tpu.core_type = #tpu.core_type<tc>, window_params = [{transform_indices = @transform_0, window_bounds = array<i64: 256, 900>}, {pipeline_mode = #tpu.pipeline_mode<synchronous>, transform_indices = @transform_1, window_bounds = array<i64: 900, 400>}, {pipeline_mode = #tpu.pipeline_mode<synchronous>, transform_indices = @transform_2, window_bounds = array<i64: 1, 400>}, {pipeline_mode = #tpu.pipeline_mode<synchronous>, transform_indices = @transform_3, window_bounds = array<i64: 256, 1>}, {transform_indices = @transform_4, window_bounds = array<i64: 256, 400>}]} {
    %c0 = arith.constant 0 : index
    %c0_0 = arith.constant 0 : index
    %0 = vector.load %arg1[%c0, %c0_0] : memref<256x900xf32, #tpu.memory_space<vmem>>, vector<256x900xf32>
    %c0_1 = arith.constant 0 : index
    %c0_2 = arith.constant 0 : index
    %1 = vector.load %arg2[%c0_1, %c0_2] : memref<900x400xf32, #tpu.memory_space<vmem>>, vector<900x400xf32>
    %cst = arith.constant dense<0.000000e+00> : vector<256x400xf32>
    %2 = tpu.matmul %0, %1, %cst {dimension_numbers = #tpu.dot_dimension_numbers<[1], [0], [0], [1], [0, 0, 1, 1], [], []>} : vector<256x900xf32>, vector<900x400xf32>, vector<256x400xf32> -> vector<256x400xf32>
    %c0_3 = arith.constant 0 : index
    %c0_4 = arith.constant 0 : index
    %3 = vector.load %arg3[%c0_3, %c0_4] : memref<1x400xf32, #tpu.memory_space<vmem>>, vector<1x400xf32>
    %4 = vector.broadcast %3 : vector<1x400xf32> to vector<256x400xf32>
    %5 = arith.addf %2, %4 : vector<256x400xf32>
    %c0_5 = arith.constant 0 : index
    %c0_6 = arith.constant 0 : index
    %6 = vector.load %arg4[%c0_5, %c0_6] : memref<256x1xf32, #tpu.memory_space<vmem>>, vector<256x1xf32>
    %7 = vector.broadcast %6 : vector<256x1xf32> to vector<256x400xf32>
    %8 = arith.mulf %5, %7 : vector<256x400xf32>
    %c0_7 = arith.constant 0 : index
    %c0_8 = arith.constant 0 : index
    %9 = vector.load %arg5[%c0_7, %c0_8] : memref<256x400xf32, #tpu.memory_space<vmem>>, vector<256x400xf32>
    tpu.vector_store %arg5[%c0_7, %c0_8], %8 {strides = array<i32>} : memref<256x400xf32, #tpu.memory_space<vmem>>, vector<256x400xf32>,
    return
  }
  func.func @transform_0(%arg0: i32) -> (i32, i32) {
    %c0_i32 = arith.constant 0 : i32
    %c0_i32_0 = arith.constant 0 : i32
    return %arg0, %c0_i32 : i32, i32
  }
  func.func @transform_1(%arg0: i32) -> (i32, i32) {
    %c0_i32 = arith.constant 0 : i32
    %c0_i32_0 = arith.constant 0 : i32
    %c0_i32_1 = arith.constant 0 : i32
    return %c0_i32, %c0_i32_0 : i32, i32
  }
  func.func @transform_2(%arg0: i32) -> (i32, i32) {
    %c0_i32 = arith.constant 0 : i32
    %c0_i32_0 = arith.constant 0 : i32
    %c0_i32_1 = arith.constant 0 : i32
    return %c0_i32, %c0_i32_0 : i32, i32
  }
  func.func @transform_3(%arg0: i32) -> (i32, i32) {
    %c0_i32 = arith.constant 0 : i32
    %c0_i32_0 = arith.constant 0 : i32
    %c0_i32_1 = arith.constant 0 : i32
    return %c0_i32, %c0_i32_0 : i32, i32
  }
  func.func @transform_4(%arg0: i32) -> (i32, i32) {
    %c0_i32 = arith.constant 0 : i32
    %c0_i32_0 = arith.constant 0 : i32
    return %arg0, %c0_i32 : i32, i32
  }
}

module attributes {stable_mosaic.version = 11 : i64} {
  func.func @kernel(%arg0: i32, %arg1: memref<256x400xf32, #tpu.memory_space<vmem>>, %arg2: memref<16x16x400xf32, #tpu.memory_space<vmem>>, %arg3: memref<400x200xf32, #tpu.memory_space<vmem>>, %arg4: memref<1x200xf32, #tpu.memory_space<vmem>>, %arg5: memref<1x200xf32, #tpu.memory_space<vmem>>, %arg6: memref<1x1xf32, #tpu.memory_space<smem>>, %arg7: memref<16x400xf32, #tpu.memory_space<vmem>>) attributes {dimension_semantics = [#tpu.dimension_semantics<parallel>], iteration_bounds = array<i64: 1>, scalar_prefetch = 0 : i64, scratch_operands = 0 : i64, tpu.core_type = #tpu.core_type<tc>, window_params = [{transform_indices = @transform_0, window_bounds = array<i64: 256, 400>}, {transform_indices = @transform_1, window_bounds = array<i64: 16, 16, 400>}, {pipeline_mode = #tpu.pipeline_mode<synchronous>, transform_indices = @transform_2, window_bounds = array<i64: 400, 200>}, {pipeline_mode = #tpu.pipeline_mode<synchronous>, transform_indices = @transform_3, window_bounds = array<i64: 1, 200>}, {pipeline_mode = #tpu.pipeline_mode<synchronous>, transform_indices = @transform_4, window_bounds = array<i64: 1, 200>}, {transform_indices = @transform_5, window_bounds = array<i64: 1, 1>}, {transform_indices = @transform_6, window_bounds = array<i64: 16, 400>}]} {
    %c0 = arith.constant 0 : index
    %c0_0 = arith.constant 0 : index
    %0 = vector.load %arg1[%c0, %c0_0] : memref<256x400xf32, #tpu.memory_space<vmem>>, vector<256x400xf32>
    %c0_1 = arith.constant 0 : index
    %c0_2 = arith.constant 0 : index
    %1 = vector.load %arg3[%c0_1, %c0_2] : memref<400x200xf32, #tpu.memory_space<vmem>>, vector<400x200xf32>
    %cst = arith.constant dense<0.000000e+00> : vector<256x200xf32>
    %2 = tpu.matmul %0, %1, %cst {dimension_numbers = #tpu.dot_dimension_numbers<[1], [0], [0], [1], [0, 0, 1, 1], [], []>} : vector<256x400xf32>, vector<400x200xf32>, vector<256x200xf32> -> vector<256x200xf32>
    %c0_3 = arith.constant 0 : index
    %c0_4 = arith.constant 0 : index
    %3 = vector.load %arg4[%c0_3, %c0_4] : memref<1x200xf32, #tpu.memory_space<vmem>>, vector<1x200xf32>
    %4 = vector.broadcast %3 : vector<1x200xf32> to vector<256x200xf32>
    %5 = arith.addf %2, %4 : vector<256x200xf32>
    %6 = math.tanh %5 : vector<256x200xf32>
    %7 = vector.shape_cast %6 : vector<256x200xf32> to vector<16x16x200xf32>
    %c0_5 = arith.constant 0 : index
    %c0_6 = arith.constant 0 : index
    %8 = vector.load %arg5[%c0_5, %c0_6] : memref<1x200xf32, #tpu.memory_space<vmem>>, vector<1x200xf32>
    %9 = vector.shape_cast %8 : vector<1x200xf32> to vector<1x1x200xf32>
    %10 = vector.broadcast %9 : vector<1x1x200xf32> to vector<16x16x200xf32>
    %11 = arith.mulf %7, %10 : vector<16x16x200xf32>
    %cst_7 = arith.constant dense<0.000000e+00> : vector<16x16xf32>
    %12 = vector.multi_reduction <add>, %11, %cst_7 [2] : vector<16x16x200xf32> to vector<16x16xf32>
    %13 = vector.shape_cast %12 : vector<16x16xf32> to vector<16x16x1xf32>
    %c0_8 = arith.constant 0 : index
    %c0_9 = arith.constant 0 : index
    %14 = memref.load %arg6[%c0_8, %c0_9] : memref<1x1xf32, #tpu.memory_space<smem>>
    %15 = vector.broadcast %14 : f32 to vector<16x16x1xf32>
    %16 = arith.addf %13, %15 : vector<16x16x1xf32>
    %cst_10 = arith.constant dense<0xFF800000> : vector<16x1xf32>
    %17 = vector.multi_reduction <maximumf>, %16, %cst_10 [1] : vector<16x16x1xf32> to vector<16x1xf32>
    %18 = vector.shape_cast %17 : vector<16x1xf32> to vector<16x1x1xf32>
    %19 = vector.broadcast %18 : vector<16x1x1xf32> to vector<16x16x1xf32>
    %20 = arith.subf %16, %19 : vector<16x16x1xf32>
    %21 = math.exp %20 : vector<16x16x1xf32>
    %cst_11 = arith.constant dense<0.000000e+00> : vector<16x1xf32>
    %22 = vector.multi_reduction <add>, %21, %cst_11 [1] : vector<16x16x1xf32> to vector<16x1xf32>
    %23 = vector.shape_cast %22 : vector<16x1xf32> to vector<16x1x1xf32>
    %24 = vector.broadcast %23 : vector<16x1x1xf32> to vector<16x16x1xf32>
    %25 = arith.divf %21, %24 : vector<16x16x1xf32>
    %c0_12 = arith.constant 0 : index
    %c0_13 = arith.constant 0 : index
    %c0_14 = arith.constant 0 : index
    %26 = vector.load %arg2[%c0_12, %c0_13, %c0_14] : memref<16x16x400xf32, #tpu.memory_space<vmem>>, vector<16x16x400xf32>
    %27 = vector.broadcast %25 : vector<16x16x1xf32> to vector<16x16x400xf32>
    %28 = arith.mulf %26, %27 : vector<16x16x400xf32>
    %cst_15 = arith.constant dense<0.000000e+00> : vector<16x400xf32>
    %29 = vector.multi_reduction <add>, %28, %cst_15 [1] : vector<16x16x400xf32> to vector<16x400xf32>
    %c0_16 = arith.constant 0 : index
    %c0_17 = arith.constant 0 : index
    %30 = vector.load %arg7[%c0_16, %c0_17] : memref<16x400xf32, #tpu.memory_space<vmem>>, vector<16x400xf32>
    tpu.vector_store %arg7[%c0_16, %c0_17], %29 {strides = array<i32>} : memref<16x400xf32, #tpu.memory_space<vmem>>, vector<16x400xf32>,
    return
  }
  func.func @transform_0(%arg0: i32) -> (i32, i32) {
    %c0_i32 = arith.constant 0 : i32
    %c0_i32_0 = arith.constant 0 : i32
    return %arg0, %c0_i32 : i32, i32
  }
  func.func @transform_1(%arg0: i32) -> (i32, i32, i32) {
    %c0_i32 = arith.constant 0 : i32
    %c0_i32_0 = arith.constant 0 : i32
    %c0_i32_1 = arith.constant 0 : i32
    return %arg0, %c0_i32, %c0_i32_0 : i32, i32, i32
  }
  func.func @transform_2(%arg0: i32) -> (i32, i32) {
    %c0_i32 = arith.constant 0 : i32
    %c0_i32_0 = arith.constant 0 : i32
    %c0_i32_1 = arith.constant 0 : i32
    return %c0_i32, %c0_i32_0 : i32, i32
  }
  func.func @transform_3(%arg0: i32) -> (i32, i32) {
    %c0_i32 = arith.constant 0 : i32
    %c0_i32_0 = arith.constant 0 : i32
    %c0_i32_1 = arith.constant 0 : i32
    return %c0_i32, %c0_i32_0 : i32, i32
  }
  func.func @transform_4(%arg0: i32) -> (i32, i32) {
    %c0_i32 = arith.constant 0 : i32
    %c0_i32_0 = arith.constant 0 : i32
    %c0_i32_1 = arith.constant 0 : i32
    return %c0_i32, %c0_i32_0 : i32, i32
  }
  func.func @transform_5(%arg0: i32) -> (i32, i32) {
    %c0_i32 = arith.constant 0 : i32
    %c0_i32_0 = arith.constant 0 : i32
    %c0_i32_1 = arith.constant 0 : i32
    return %c0_i32, %c0_i32_0 : i32, i32
  }
  func.func @transform_6(%arg0: i32) -> (i32, i32) {
    %c0_i32 = arith.constant 0 : i32
    %c0_i32_0 = arith.constant 0 : i32
    return %arg0, %c0_i32 : i32, i32
  }
}

module attributes {stable_mosaic.version = 11 : i64} {
  func.func @kernel(%arg0: i32, %arg1: memref<64x400xf32, #tpu.memory_space<vmem>>, %arg2: memref<8x8x400xf32, #tpu.memory_space<vmem>>, %arg3: memref<400x200xf32, #tpu.memory_space<vmem>>, %arg4: memref<1x200xf32, #tpu.memory_space<vmem>>, %arg5: memref<1x200xf32, #tpu.memory_space<vmem>>, %arg6: memref<1x1xf32, #tpu.memory_space<smem>>, %arg7: memref<8x400xf32, #tpu.memory_space<vmem>>) attributes {dimension_semantics = [#tpu.dimension_semantics<parallel>], iteration_bounds = array<i64: 1>, scalar_prefetch = 0 : i64, scratch_operands = 0 : i64, tpu.core_type = #tpu.core_type<tc>, window_params = [{transform_indices = @transform_0, window_bounds = array<i64: 64, 400>}, {transform_indices = @transform_1, window_bounds = array<i64: 8, 8, 400>}, {pipeline_mode = #tpu.pipeline_mode<synchronous>, transform_indices = @transform_2, window_bounds = array<i64: 400, 200>}, {pipeline_mode = #tpu.pipeline_mode<synchronous>, transform_indices = @transform_3, window_bounds = array<i64: 1, 200>}, {pipeline_mode = #tpu.pipeline_mode<synchronous>, transform_indices = @transform_4, window_bounds = array<i64: 1, 200>}, {transform_indices = @transform_5, window_bounds = array<i64: 1, 1>}, {transform_indices = @transform_6, window_bounds = array<i64: 8, 400>}]} {
    %c0 = arith.constant 0 : index
    %c0_0 = arith.constant 0 : index
    %0 = vector.load %arg1[%c0, %c0_0] : memref<64x400xf32, #tpu.memory_space<vmem>>, vector<64x400xf32>
    %c0_1 = arith.constant 0 : index
    %c0_2 = arith.constant 0 : index
    %1 = vector.load %arg3[%c0_1, %c0_2] : memref<400x200xf32, #tpu.memory_space<vmem>>, vector<400x200xf32>
    %cst = arith.constant dense<0.000000e+00> : vector<64x200xf32>
    %2 = tpu.matmul %0, %1, %cst {dimension_numbers = #tpu.dot_dimension_numbers<[1], [0], [0], [1], [0, 0, 1, 1], [], []>} : vector<64x400xf32>, vector<400x200xf32>, vector<64x200xf32> -> vector<64x200xf32>
    %c0_3 = arith.constant 0 : index
    %c0_4 = arith.constant 0 : index
    %3 = vector.load %arg4[%c0_3, %c0_4] : memref<1x200xf32, #tpu.memory_space<vmem>>, vector<1x200xf32>
    %4 = vector.broadcast %3 : vector<1x200xf32> to vector<64x200xf32>
    %5 = arith.addf %2, %4 : vector<64x200xf32>
    %6 = math.tanh %5 : vector<64x200xf32>
    %7 = vector.shape_cast %6 : vector<64x200xf32> to vector<8x8x200xf32>
    %c0_5 = arith.constant 0 : index
    %c0_6 = arith.constant 0 : index
    %8 = vector.load %arg5[%c0_5, %c0_6] : memref<1x200xf32, #tpu.memory_space<vmem>>, vector<1x200xf32>
    %9 = vector.shape_cast %8 : vector<1x200xf32> to vector<1x1x200xf32>
    %10 = vector.broadcast %9 : vector<1x1x200xf32> to vector<8x8x200xf32>
    %11 = arith.mulf %7, %10 : vector<8x8x200xf32>
    %cst_7 = arith.constant dense<0.000000e+00> : vector<8x8xf32>
    %12 = vector.multi_reduction <add>, %11, %cst_7 [2] : vector<8x8x200xf32> to vector<8x8xf32>
    %13 = vector.shape_cast %12 : vector<8x8xf32> to vector<8x8x1xf32>
    %c0_8 = arith.constant 0 : index
    %c0_9 = arith.constant 0 : index
    %14 = memref.load %arg6[%c0_8, %c0_9] : memref<1x1xf32, #tpu.memory_space<smem>>
    %15 = vector.broadcast %14 : f32 to vector<8x8x1xf32>
    %16 = arith.addf %13, %15 : vector<8x8x1xf32>
    %17 = tpu.iota {dimensions = array<i32: 1>} : vector<8x8x1xi32>
    %c4_i32 = arith.constant 4 : i32
    %18 = vector.broadcast %c4_i32 : i32 to vector<8x8x1xi32>
    %19 = arith.cmpi slt, %17, %18 : vector<8x8x1xi32>
    %cst_10 = arith.constant -1.000000e+30 : f32
    %20 = vector.broadcast %cst_10 : f32 to vector<8x8x1xf32>
    %21 = arith.select %19, %16, %20 : vector<8x8x1xi1>, vector<8x8x1xf32>
    %cst_11 = arith.constant dense<0xFF800000> : vector<8x1xf32>
    %22 = vector.multi_reduction <maximumf>, %21, %cst_11 [1] : vector<8x8x1xf32> to vector<8x1xf32>
    %23 = vector.shape_cast %22 : vector<8x1xf32> to vector<8x1x1xf32>
    %24 = vector.broadcast %23 : vector<8x1x1xf32> to vector<8x8x1xf32>
    %25 = arith.subf %21, %24 : vector<8x8x1xf32>
    %26 = math.exp %25 : vector<8x8x1xf32>
    %cst_12 = arith.constant dense<0.000000e+00> : vector<8x1xf32>
    %27 = vector.multi_reduction <add>, %26, %cst_12 [1] : vector<8x8x1xf32> to vector<8x1xf32>
    %28 = vector.shape_cast %27 : vector<8x1xf32> to vector<8x1x1xf32>
    %29 = vector.broadcast %28 : vector<8x1x1xf32> to vector<8x8x1xf32>
    %30 = arith.divf %26, %29 : vector<8x8x1xf32>
    %c0_13 = arith.constant 0 : index
    %c0_14 = arith.constant 0 : index
    %c0_15 = arith.constant 0 : index
    %31 = vector.load %arg2[%c0_13, %c0_14, %c0_15] : memref<8x8x400xf32, #tpu.memory_space<vmem>>, vector<8x8x400xf32>
    %32 = vector.broadcast %30 : vector<8x8x1xf32> to vector<8x8x400xf32>
    %33 = arith.mulf %31, %32 : vector<8x8x400xf32>
    %cst_16 = arith.constant dense<0.000000e+00> : vector<8x400xf32>
    %34 = vector.multi_reduction <add>, %33, %cst_16 [1] : vector<8x8x400xf32> to vector<8x400xf32>
    %c0_17 = arith.constant 0 : index
    %c0_18 = arith.constant 0 : index
    %35 = vector.load %arg7[%c0_17, %c0_18] : memref<8x400xf32, #tpu.memory_space<vmem>>, vector<8x400xf32>
    tpu.vector_store %arg7[%c0_17, %c0_18], %34 {strides = array<i32>} : memref<8x400xf32, #tpu.memory_space<vmem>>, vector<8x400xf32>,
    return
  }
  func.func @transform_0(%arg0: i32) -> (i32, i32) {
    %c0_i32 = arith.constant 0 : i32
    %c0_i32_0 = arith.constant 0 : i32
    return %arg0, %c0_i32 : i32, i32
  }
  func.func @transform_1(%arg0: i32) -> (i32, i32, i32) {
    %c0_i32 = arith.constant 0 : i32
    %c0_i32_0 = arith.constant 0 : i32
    %c0_i32_1 = arith.constant 0 : i32
    return %arg0, %c0_i32, %c0_i32_0 : i32, i32, i32
  }
  func.func @transform_2(%arg0: i32) -> (i32, i32) {
    %c0_i32 = arith.constant 0 : i32
    %c0_i32_0 = arith.constant 0 : i32
    %c0_i32_1 = arith.constant 0 : i32
    return %c0_i32, %c0_i32_0 : i32, i32
  }
  func.func @transform_3(%arg0: i32) -> (i32, i32) {
    %c0_i32 = arith.constant 0 : i32
    %c0_i32_0 = arith.constant 0 : i32
    %c0_i32_1 = arith.constant 0 : i32
    return %c0_i32, %c0_i32_0 : i32, i32
  }
  func.func @transform_4(%arg0: i32) -> (i32, i32) {
    %c0_i32 = arith.constant 0 : i32
    %c0_i32_0 = arith.constant 0 : i32
    %c0_i32_1 = arith.constant 0 : i32
    return %c0_i32, %c0_i32_0 : i32, i32
  }
  func.func @transform_5(%arg0: i32) -> (i32, i32) {
    %c0_i32 = arith.constant 0 : i32
    %c0_i32_0 = arith.constant 0 : i32
    %c0_i32_1 = arith.constant 0 : i32
    return %c0_i32, %c0_i32_0 : i32, i32
  }
  func.func @transform_6(%arg0: i32) -> (i32, i32) {
    %c0_i32 = arith.constant 0 : i32
    %c0_i32_0 = arith.constant 0 : i32
    return %arg0, %c0_i32 : i32, i32
  }
}

</mosaic_0001>

<bundles_post_ra>
// kernel: forward.3
= control target key start
LH: loop header
LB: loop body
LE: loop exit
PB: predicated region body
PF: predicated region fallthrough
CT: control target
= control target key end

     0   :  { %vm844_vm0 = vcmask 1043456   ;;  %vm747_vm1 = vcmask 31744   ;;  %vm3236_vm2 = vcmask 130048   ;;  %s7916_s1 = inlined_call_operand.vmem [shape: f32[900,400], index: 1, kind: input, shape index: {}]   ;;  %s7917_s0 = inlined_call_operand.vmem [shape: f32[256,900], index: 0, kind: input, shape index: {}]   ;;  %s7918_s3 = inlined_call_operand.vmem [shape: f32[256,1], index: 3, kind: input, shape index: {}]   ;;  %s7919_s2 = inlined_call_operand.vmem [shape: f32[1,400], index: 2, kind: input, shape index: {}]   ;;  %s7920_s4 = inlined_call_operand.vmem [shape: f32[256,400], index: 4, kind: output, shape index: {}]  }
   0x1   :  { %v334_v0 = vld [vmem:[%s7916_s1 + $0x1e8] sm:$0xff]  ;;  %v333_v1 = vld [vmem:[%s7916_s1 + $0x1e0] sm:$0xff] }
   0x2   :  { %v462_v2 = vld [vmem:[%s7916_s1 + $0x5e8] sm:$0xff]  ;;  %857 = vmatprep.subr.mxu0 %v334_v0  ;;  %v461_v4 = vld [vmem:[%s7916_s1 + $0x5e0] sm:$0xff] }
   0x3   :  { %1114 = vmatprep.subr.mxu1 %v462_v2  ;;  %v330_v3 = vld [vmem:[%s7916_s1 + $0x1c8] sm:$0xff]  ;;  %v329_v5 = vld [vmem:[%s7916_s1 + $0x1c0] sm:$0xff]  ;;  %858 = vmatpush1.msra.mxu0 %v333_v1 }
   0x4   :  { %1115 = vmatpush1.msra.mxu1 %v461_v4  ;;  %v458_v6 = vld [vmem:[%s7916_s1 + $0x5c8] sm:$0xff]  ;;  %v457_v8 = vld [vmem:[%s7916_s1 + $0x5c0] sm:$0xff]  ;;  %859 = vmatprep.subr.mxu0 %v330_v3 }
   0x5   :  { %v326_v7 = vld [vmem:[%s7916_s1 + $0x1a8] sm:$0xff]  ;;  %1116 = vmatprep.subr.mxu1 %v458_v6  ;;  %v325_v9 = vld [vmem:[%s7916_s1 + $0x1a0] sm:$0xff]  ;;  %860 = vmatpush1.msra.mxu0 %v329_v5 }
   0x6   :  { %v454_v10 = vld [vmem:[%s7916_s1 + $0x5a8] sm:$0xff]  ;;  %1117 = vmatpush1.msra.mxu1 %v457_v8  ;;  %v453_v12 = vld [vmem:[%s7916_s1 + $0x5a0] sm:$0xff]  ;;  %861 = vmatprep.subr.mxu0 %v326_v7 }
   0x7   :  { %v322_v11 = vld [vmem:[%s7916_s1 + $0x188] sm:$0xff]  ;;  %1118 = vmatprep.subr.mxu1 %v454_v10  ;;  %v321_v14 = vld [vmem:[%s7916_s1 + $0x180] sm:$0xff]  ;;  %862 = vmatpush1.msra.mxu0 %v325_v9 }
   0x8   :  { %v450_v13 = vld [vmem:[%s7916_s1 + $0x588] sm:$0xff]  ;;  %v449_v15 = vld [vmem:[%s7916_s1 + $0x580] sm:$0xff]  ;;  %1119 = vmatpush1.msra.mxu1 %v453_v12  ;;  %863 = vmatprep.subr.mxu0 %v322_v11 }
   0x9   :  { %v318_v16 = vld [vmem:[%s7916_s1 + $0x168] sm:$0xff]  ;;  %1120 = vmatprep.subr.mxu1 %v450_v13  ;;  %v317_v18 = vld [vmem:[%s7916_s1 + $0x160] sm:$0xff]  ;;  %864 = vmatpush1.msra.mxu0 %v321_v14 }
   0xa   :  { %v446_v17 = vld [vmem:[%s7916_s1 + $0x568] sm:$0xff]  ;;  %v445_v19 = vld [vmem:[%s7916_s1 + $0x560] sm:$0xff]  ;;  %1121 = vmatpush1.msra.mxu1 %v449_v15  ;;  %865 = vmatprep.subr.mxu0 %v318_v16 }
   0xb   :  { %v314_v20 = vld [vmem:[%s7916_s1 + $0x148] sm:$0xff]  ;;  %1122 = vmatprep.subr.mxu1 %v446_v17  ;;  %v313_v22 = vld [vmem:[%s7916_s1 + $0x140] sm:$0xff]  ;;  %866 = vmatpush1.msra.mxu0 %v317_v18 }
   0xc   :  { %v442_v21 = vld [vmem:[%s7916_s1 + $0x548] sm:$0xff]  ;;  %v441_v23 = vld [vmem:[%s7916_s1 + $0x540] sm:$0xff]  ;;  %1123 = vmatpush1.msra.mxu1 %v445_v19  ;;  %867 = vmatprep.subr.mxu0 %v314_v20 }
   0xd   :  { %v310_v24 = vld [vmem:[%s7916_s1 + $0x128] sm:$0xff]  ;;  %1124 = vmatprep.subr.mxu1 %v442_v21  ;;  %v309_v26 = vld [vmem:[%s7916_s1 + $0x120] sm:$0xff]  ;;  %868 = vmatpush1.msra.mxu0 %v313_v22 }
   0xe   :  { %v438_v25 = vld [vmem:[%s7916_s1 + $0x528] sm:$0xff]  ;;  %v437_v27 = vld [vmem:[%s7916_s1 + $0x520] sm:$0xff]  ;;  %1125 = vmatpush1.msra.mxu1 %v441_v23  ;;  %869 = vmatprep.subr.mxu0 %v310_v24 }
   0xf   :  { %v306_v28 = vld [vmem:[%s7916_s1 + $0x108] sm:$0xff]  ;;  %1126 = vmatprep.subr.mxu1 %v438_v25  ;;  %v305_v30 = vld [vmem:[%s7916_s1 + $0x100] sm:$0xff]  ;;  %870 = vmatpush1.msra.mxu0 %v309_v26 }
  0x10   :  { %v434_v29 = vld [vmem:[%s7916_s1 + $0x508] sm:$0xff]  ;;  %v433_v31 = vld [vmem:[%s7916_s1 + $0x500] sm:$0xff]  ;;  %1127 = vmatpush1.msra.mxu1 %v437_v27  ;;  %871 = vmatprep.subr.mxu0 %v306_v28 }
  0x11   :  { %v302_v32 = vld [vmem:[%s7916_s1 + $0xe8] sm:$0xff]  ;;  %1128 = vmatprep.subr.mxu1 %v434_v29  ;;  %v301_v34 = vld [vmem:[%s7916_s1 + $0xe0] sm:$0xff]  ;;  %872 = vmatpush1.msra.mxu0 %v305_v30 }
  0x12   :  { %v430_v33 = vld [vmem:[%s7916_s1 + $0x4e8] sm:$0xff]  ;;  %v429_v35 = vld [vmem:[%s7916_s1 + $0x4e0] sm:$0xff]  ;;  %1129 = vmatpush1.msra.mxu1 %v433_v31  ;;  %873 = vmatprep.subr.mxu0 %v302_v32 }
  0x13   :  { %v298_v36 = vld [vmem:[%s7916_s1 + $0xc8] sm:$0xff]  ;;  %1130 = vmatprep.subr.mxu1 %v430_v33  ;;  %v297_v38 = vld [vmem:[%s7916_s1 + $0xc0] sm:$0xff]  ;;  %874 = vmatpush1.msra.mxu0 %v301_v34 }
  0x14   :  { %v426_v37 = vld [vmem:[%s7916_s1 + $0x4c8] sm:$0xff]  ;;  %v425_v39 = vld [vmem:[%s7916_s1 + $0x4c0] sm:$0xff]  ;;  %1131 = vmatpush1.msra.mxu1 %v429_v35  ;;  %875 = vmatprep.subr.mxu0 %v298_v36 }
  0x15   :  { %v294_v40 = vld [vmem:[%s7916_s1 + $0xa8] sm:$0xff]  ;;  %1132 = vmatprep.subr.mxu1 %v426_v37  ;;  %v293_v42 = vld [vmem:[%s7916_s1 + $0xa0] sm:$0xff]  ;;  %876 = vmatpush1.msra.mxu0 %v297_v38 }
  0x16   :  { %v422_v41 = vld [vmem:[%s7916_s1 + $0x4a8] sm:$0xff]  ;;  %v421_v43 = vld [vmem:[%s7916_s1 + $0x4a0] sm:$0xff]  ;;  %1133 = vmatpush1.msra.mxu1 %v425_v39  ;;  %877 = vmatprep.subr.mxu0 %v294_v40 }
  0x17   :  { %v290_v44 = vld [vmem:[%s7916_s1 + $0x88] sm:$0xff]  ;;  %1134 = vmatprep.subr.mxu1 %v422_v41  ;;  %v289_v46 = vld [vmem:[%s7916_s1 + $0x80] sm:$0xff]  ;;  %878 = vmatpush1.msra.mxu0 %v293_v42 }
  0x18   :  { %v418_v45 = vld [vmem:[%s7916_s1 + $0x488] sm:$0xff]  ;;  %v417_v47 = vld [vmem:[%s7916_s1 + $0x480] sm:$0xff]  ;;  %1135 = vmatpush1.msra.mxu1 %v421_v43  ;;  %879 = vmatprep.subr.mxu0 %v290_v44 }
  0x19   :  { %v286_v48 = vld [vmem:[%s7916_s1 + $0x68] sm:$0xff]  ;;  %1136 = vmatprep.subr.mxu1 %v418_v45  ;;  %v285_v50 = vld [vmem:[%s7916_s1 + $0x60] sm:$0xff]  ;;  %880 = vmatpush1.msra.mxu0 %v289_v46 }
  0x1a   :  { %v414_v49 = vld [vmem:[%s7916_s1 + $0x468] sm:$0xff]  ;;  %v413_v51 = vld [vmem:[%s7916_s1 + $0x460] sm:$0xff]  ;;  %1137 = vmatpush1.msra.mxu1 %v417_v47  ;;  %881 = vmatprep.subr.mxu0 %v286_v48 }
  0x1b   :  { %v282_v52 = vld [vmem:[%s7916_s1 + $0x48] sm:$0xff]  ;;  %1138 = vmatprep.subr.mxu1 %v414_v49  ;;  %v281_v54 = vld [vmem:[%s7916_s1 + $0x40] sm:$0xff]  ;;  %882 = vmatpush1.msra.mxu0 %v285_v50 }
  0x1c   :  { %v410_v53 = vld [vmem:[%s7916_s1 + $0x448] sm:$0xff]  ;;  %v409_v55 = vld [vmem:[%s7916_s1 + $0x440] sm:$0xff]  ;;  %1139 = vmatpush1.msra.mxu1 %v413_v51  ;;  %883 = vmatprep.subr.mxu0 %v282_v52 }
  0x1d   :  { %v278_v56 = vld [vmem:[%s7916_s1 + $0x28] sm:$0xff]  ;;  %1140 = vmatprep.subr.mxu1 %v410_v53  ;;  %v277_v58 = vld [vmem:[%s7916_s1 + $0x20] sm:$0xff]  ;;  %884 = vmatpush1.msra.mxu0 %v281_v54 }
  0x1e   :  { %v406_v57 = vld [vmem:[%s7916_s1 + $0x428] sm:$0xff]  ;;  %v405_v59 = vld [vmem:[%s7916_s1 + $0x420] sm:$0xff]  ;;  %1141 = vmatpush1.msra.mxu1 %v409_v55  ;;  %885 = vmatprep.subr.mxu0 %v278_v56 }
  0x1f   :  { %v274_v60 = vld [vmem:[%s7916_s1 + $0x8] sm:$0xff]  ;;  %1142 = vmatprep.subr.mxu1 %v406_v57  ;;  %v273_v62 = vld [vmem:[%s7916_s1] sm:$0xff]  ;;  %886 = vmatpush1.msra.mxu0 %v277_v58 }
  0x20   :  { %v402_v61 = vld [vmem:[%s7916_s1 + $0x408] sm:$0xff]  ;;  %v401_v63 = vld [vmem:[%s7916_s1 + $0x400] sm:$0xff]  ;;  %1143 = vmatpush1.msra.mxu1 %v405_v59  ;;  %887 = vmatprep.subr.mxu0 %v274_v60 }
  0x21   :  { %v398_v0 = vld [vmem:[%s7916_s1 + $0x3e8] sm:$0xff]  ;;  %1144 = vmatprep.subr.mxu1 %v402_v61  ;;  %v397_v2 = vld [vmem:[%s7916_s1 + $0x3e0] sm:$0xff]  ;;  %888 = vmatpush1.msra.mxu0 %v273_v62 }
  0x22   :  { %v526_v1 = vld [vmem:[%s7916_s1 + $0x7e8] sm:$0xff]  ;;  %v525_v3 = vld [vmem:[%s7916_s1 + $0x7e0] sm:$0xff]  ;;  %1145 = vmatpush1.msra.mxu1 %v401_v63  ;;  %889 = vmatprep.subr.mxu0 %v398_v0 }
  0x23   :  { %v394_v4 = vld [vmem:[%s7916_s1 + $0x3c8] sm:$0xff]  ;;  %1146 = vmatprep.subr.mxu1 %v526_v1  ;;  %v393_v6 = vld [vmem:[%s7916_s1 + $0x3c0] sm:$0xff]  ;;  %890 = vmatpush2.msra.mxu0 %v397_v2  ;;  %v20_v2 = vld [vmem:[%s7917_s0 + $0x18] sm:$0xff] }
  0x24   :  { %v522_v5 = vld [vmem:[%s7916_s1 + $0x7c8] sm:$0xff]  ;;  %v521_v7 = vld [vmem:[%s7916_s1 + $0x7c0] sm:$0xff]  ;;  %1147 = vmatpush2.msra.mxu1 %v525_v3  ;;  %891 = vmatprep.subr.mxu0 %v394_v4  ;;  %v19_v4 = vld [vmem:[%s7917_s0 + $0x10] sm:$0xff] }
  0x25   :  { %v390_v8 = vld [vmem:[%s7916_s1 + $0x3a8] sm:$0xff]  ;;  %1148 = vmatprep.subr.mxu1 %v522_v5  ;;  %v389_v10 = vld [vmem:[%s7916_s1 + $0x3a0] sm:$0xff]  ;;  %892 = vmatpush2.msra.mxu0 %v393_v6 }
  0x26   :  { %v518_v9 = vld [vmem:[%s7916_s1 + $0x7a8] sm:$0xff]  ;;  %v517_v11 = vld [vmem:[%s7916_s1 + $0x7a0] sm:$0xff]  ;;  %1149 = vmatpush2.msra.mxu1 %v521_v7  ;;  %893 = vmatprep.subr.mxu0 %v390_v8 }
  0x27   :  { %v386_v12 = vld [vmem:[%s7916_s1 + $0x388] sm:$0xff]  ;;  %1150 = vmatprep.subr.mxu1 %v518_v9  ;;  %v385_v14 = vld [vmem:[%s7916_s1 + $0x380] sm:$0xff]  ;;  %894 = vmatpush2.msra.mxu0 %v389_v10  ;;  %v28_v10 = vld [vmem:[%s7917_s0 + $0x58] sm:$0xff] }
  0x28   :  { %v514_v13 = vld [vmem:[%s7916_s1 + $0x788] sm:$0xff]  ;;  %v513_v15 = vld [vmem:[%s7916_s1 + $0x780] sm:$0xff]  ;;  %1151 = vmatpush2.msra.mxu1 %v517_v11  ;;  %895 = vmatprep.subr.mxu0 %v386_v12  ;;  %v27_v12 = vld [vmem:[%s7917_s0 + $0x50] sm:$0xff] }
  0x29   :  { %v382_v16 = vld [vmem:[%s7916_s1 + $0x368] sm:$0xff]  ;;  %1152 = vmatprep.subr.mxu1 %v514_v13  ;;  %v381_v18 = vld [vmem:[%s7916_s1 + $0x360] sm:$0xff]  ;;  %896 = vmatpush2.msra.mxu0 %v385_v14 }
  0x2a   :  { %v510_v17 = vld [vmem:[%s7916_s1 + $0x768] sm:$0xff]  ;;  %v509_v19 = vld [vmem:[%s7916_s1 + $0x760] sm:$0xff]  ;;  %1153 = vmatpush2.msra.mxu1 %v513_v15  ;;  %897 = vmatprep.subr.mxu0 %v382_v16  ;;  %v36_v15 = vld [vmem:[%s7917_s0 + $0x98] sm:$0xff] }
  0x2b   :  { %v378_v20 = vld [vmem:[%s7916_s1 + $0x348] sm:$0xff]  ;;  %1154 = vmatprep.subr.mxu1 %v510_v17  ;;  %v377_v22 = vld [vmem:[%s7916_s1 + $0x340] sm:$0xff]  ;;  %898 = vmatpush2.msra.mxu0 %v381_v18 }
  0x2c   :  { %v506_v21 = vld [vmem:[%s7916_s1 + $0x748] sm:$0xff]  ;;  %v505_v23 = vld [vmem:[%s7916_s1 + $0x740] sm:$0xff]  ;;  %1155 = vmatpush2.msra.mxu1 %v509_v19  ;;  %899 = vmatprep.subr.mxu0 %v378_v20  ;;  %v35_v20 = vld [vmem:[%s7917_s0 + $0x90] sm:$0xff] }
  0x2d   :  { %v374_v24 = vld [vmem:[%s7916_s1 + $0x328] sm:$0xff]  ;;  %1156 = vmatprep.subr.mxu1 %v506_v21  ;;  %v373_v26 = vld [vmem:[%s7916_s1 + $0x320] sm:$0xff]  ;;  %900 = vmatpush2.msra.mxu0 %v377_v22 }
  0x2e   :  { %v502_v25 = vld [vmem:[%s7916_s1 + $0x728] sm:$0xff]  ;;  %v501_v27 = vld [vmem:[%s7916_s1 + $0x720] sm:$0xff]  ;;  %1157 = vmatpush2.msra.mxu1 %v505_v23  ;;  %901 = vmatprep.subr.mxu0 %v374_v24  ;;  %v44_v23 = vld [vmem:[%s7917_s0 + $0xd8] sm:$0xff] }
  0x2f   :  { %v370_v28 = vld [vmem:[%s7916_s1 + $0x308] sm:$0xff]  ;;  %1158 = vmatprep.subr.mxu1 %v502_v25  ;;  %v369_v30 = vld [vmem:[%s7916_s1 + $0x300] sm:$0xff]  ;;  %902 = vmatpush2.msra.mxu0 %v373_v26 }
  0x30   :  { %v498_v29 = vld [vmem:[%s7916_s1 + $0x708] sm:$0xff]  ;;  %v497_v31 = vld [vmem:[%s7916_s1 + $0x700] sm:$0xff]  ;;  %1159 = vmatpush2.msra.mxu1 %v501_v27  ;;  %903 = vmatprep.subr.mxu0 %v370_v28  ;;  %v43_v28 = vld [vmem:[%s7917_s0 + $0xd0] sm:$0xff] }
  0x31   :  { %v366_v32 = vld [vmem:[%s7916_s1 + $0x2e8] sm:$0xff]  ;;  %1160 = vmatprep.subr.mxu1 %v498_v29  ;;  %v365_v34 = vld [vmem:[%s7916_s1 + $0x2e0] sm:$0xff]  ;;  %904 = vmatpush2.msra.mxu0 %v369_v30  ;;  %v52_v30 = vld [vmem:[%s7917_s0 + $0x118] sm:$0xff] }
  0x32   :  { %v494_v33 = vld [vmem:[%s7916_s1 + $0x6e8] sm:$0xff]  ;;  %v493_v35 = vld [vmem:[%s7916_s1 + $0x6e0] sm:$0xff]  ;;  %1161 = vmatpush2.msra.mxu1 %v497_v31  ;;  %905 = vmatprep.subr.mxu0 %v366_v32 }
  0x33   :  { %v362_v36 = vld [vmem:[%s7916_s1 + $0x2c8] sm:$0xff]  ;;  %1162 = vmatprep.subr.mxu1 %v494_v33  ;;  %v361_v38 = vld [vmem:[%s7916_s1 + $0x2c0] sm:$0xff]  ;;  %906 = vmatpush2.msra.mxu0 %v365_v34 }
  0x34   :  { %v490_v37 = vld [vmem:[%s7916_s1 + $0x6c8] sm:$0xff]  ;;  %v489_v39 = vld [vmem:[%s7916_s1 + $0x6c0] sm:$0xff]  ;;  %1163 = vmatpush2.msra.mxu1 %v493_v35  ;;  %907 = vmatprep.subr.mxu0 %v362_v36  ;;  %v51_v36 = vld [vmem:[%s7917_s0 + $0x110] sm:$0xff] }
  0x35   :  { %v358_v40 = vld [vmem:[%s7916_s1 + $0x2a8] sm:$0xff]  ;;  %1164 = vmatprep.subr.mxu1 %v490_v37  ;;  %v357_v42 = vld [vmem:[%s7916_s1 + $0x2a0] sm:$0xff]  ;;  %908 = vmatpush2.msra.mxu0 %v361_v38  ;;  %v60_v38 = vld [vmem:[%s7917_s0 + $0x158] sm:$0xff] }
  0x36   :  { %v486_v41 = vld [vmem:[%s7916_s1 + $0x6a8] sm:$0xff]  ;;  %v485_v43 = vld [vmem:[%s7916_s1 + $0x6a0] sm:$0xff]  ;;  %1165 = vmatpush2.msra.mxu1 %v489_v39  ;;  %909 = vmatprep.subr.mxu0 %v358_v40 }
  0x37   :  { %v354_v44 = vld [vmem:[%s7916_s1 + $0x288] sm:$0xff]  ;;  %1166 = vmatprep.subr.mxu1 %v486_v41  ;;  %v353_v46 = vld [vmem:[%s7916_s1 + $0x280] sm:$0xff]  ;;  %910 = vmatpush2.msra.mxu0 %v357_v42 }
  0x38   :  { %v482_v45 = vld [vmem:[%s7916_s1 + $0x688] sm:$0xff]  ;;  %v481_v47 = vld [vmem:[%s7916_s1 + $0x680] sm:$0xff]  ;;  %1167 = vmatpush2.msra.mxu1 %v485_v43  ;;  %911 = vmatprep.subr.mxu0 %v354_v44  ;;  %v59_v44 = vld [vmem:[%s7917_s0 + $0x150] sm:$0xff] }
  0x39   :  { %v350_v48 = vld [vmem:[%s7916_s1 + $0x268] sm:$0xff]  ;;  %1168 = vmatprep.subr.mxu1 %v482_v45  ;;  %v349_v50 = vld [vmem:[%s7916_s1 + $0x260] sm:$0xff]  ;;  %912 = vmatpush2.msra.mxu0 %v353_v46  ;;  %v68_v46 = vld [vmem:[%s7917_s0 + $0x198] sm:$0xff] }
  0x3a   :  { %v478_v49 = vld [vmem:[%s7916_s1 + $0x668] sm:$0xff]  ;;  %v477_v51 = vld [vmem:[%s7916_s1 + $0x660] sm:$0xff]  ;;  %1169 = vmatpush2.msra.mxu1 %v481_v47  ;;  %913 = vmatprep.subr.mxu0 %v350_v48 }
  0x3b   :  { %v346_v52 = vld [vmem:[%s7916_s1 + $0x248] sm:$0xff]  ;;  %1170 = vmatprep.subr.mxu1 %v478_v49  ;;  %v345_v54 = vld [vmem:[%s7916_s1 + $0x240] sm:$0xff]  ;;  %914 = vmatpush2.msra.mxu0 %v349_v50 }
  0x3c   :  { %v474_v53 = vld [vmem:[%s7916_s1 + $0x648] sm:$0xff]  ;;  %v473_v55 = vld [vmem:[%s7916_s1 + $0x640] sm:$0xff]  ;;  %1171 = vmatpush2.msra.mxu1 %v477_v51  ;;  %915 = vmatprep.subr.mxu0 %v346_v52  ;;  %v67_v52 = vld [vmem:[%s7917_s0 + $0x190] sm:$0xff] }
  0x3d   :  { %v342_v56 = vld [vmem:[%s7916_s1 + $0x228] sm:$0xff]  ;;  %1172 = vmatprep.subr.mxu1 %v474_v53  ;;  %v341_v58 = vld [vmem:[%s7916_s1 + $0x220] sm:$0xff]  ;;  %916 = vmatpush2.msra.mxu0 %v345_v54  ;;  %v76_v54 = vld [vmem:[%s7917_s0 + $0x1d8] sm:$0xff] }
  0x3e   :  { %v470_v57 = vld [vmem:[%s7916_s1 + $0x628] sm:$0xff]  ;;  %v469_v59 = vld [vmem:[%s7916_s1 + $0x620] sm:$0xff]  ;;  %1173 = vmatpush2.msra.mxu1 %v473_v55  ;;  %917 = vmatprep.subr.mxu0 %v342_v56 }
  0x3f   :  { %v338_v60 = vld [vmem:[%s7916_s1 + $0x208] sm:$0xff]  ;;  %1174 = vmatprep.subr.mxu1 %v470_v57  ;;  %v337_v62 = vld [vmem:[%s7916_s1 + $0x200] sm:$0xff]  ;;  %918 = vmatpush2.msra.mxu0 %v341_v58 }
  0x40   :  { %v18_v61 = vld [vmem:[%s7917_s0 + $0x8] sm:$0xff]  ;;  %1175 = vmatpush2.msra.mxu1 %v469_v59  ;;  %v17_v0 = vld [vmem:[%s7917_s0] sm:$0xff]  ;;  %919 = vmatprep.subr.mxu0 %v338_v60  ;;  %v75_v60 = vld [vmem:[%s7917_s0 + $0x1d0] sm:$0xff] }
  0x41   :  { %v466_v63 = vld [vmem:[%s7916_s1 + $0x608] sm:$0xff]  ;;  %v465_v1 = vld [vmem:[%s7916_s1 + $0x600] sm:$0xff]  ;;  %921 = vmatprep.mubr.f32.mxu0 %v18_v61  ;;  %920 = vmatpush2.msra.mxu0 %v337_v62  ;;  %v84_v62 = vld [vmem:[%s7917_s0 + $0x218] sm:$0xff] }
  0x42   :  { %v590_v3 = vld [vmem:[%s7916_s1 + $0x9e8] sm:$0xff]  ;;  %1176 = vmatprep.subr.mxu1 %v466_v63  ;;  %v589_v5 = vld [vmem:[%s7916_s1 + $0x9e0] sm:$0xff]  ;;  %922 = vmatmul.mubr.f32.vlgmr.msra.gmra.mxu0 %v17_v0 }
  0x43   :  { %1177 = vmatpush2.msra.mxu1 %v465_v1  ;;  %v718_v6 = vld [vmem:[%s7916_s1 + $0xde8] sm:$0xff]  ;;  %1178 = vmatprep.mubr.f32.mxu1 %v20_v2  ;;  %v717_v8 = vld [vmem:[%s7916_s1 + $0xde0] sm:$0xff] }
  0x44   :  { %v26_v7 = vld [vmem:[%s7917_s0 + $0x48] sm:$0xff]  ;;  %1371 = vmatprep.subr.mxu0 %v590_v3  ;;  %v25_v9 = vld [vmem:[%s7917_s0 + $0x40] sm:$0xff]  ;;  %1179 = vmatmul.mubr.f32.vlgmr.msra.gmra.mxu1 %v19_v4  ;;  %v83_v4 = vld [vmem:[%s7917_s0 + $0x210] sm:$0xff] }
  0x45   :  { %1372 = vmatpush1.msra.mxu0 %v589_v5  ;;  %v586_v11 = vld [vmem:[%s7916_s1 + $0x9c8] sm:$0xff]  ;;  %1628 = vmatprep.subr.mxu1 %v718_v6  ;;  %v585_v13 = vld [vmem:[%s7916_s1 + $0x9c0] sm:$0xff]  ;;  %v92_v6 = vld [vmem:[%s7917_s0 + $0x258] sm:$0xff] }
  0x46   :  { %927 = vmatprep.mubr.f32.mxu0 %v26_v7  ;;  %1629 = vmatpush1.msra.mxu1 %v717_v8  ;;  %v34_v14 = vld [vmem:[%s7917_s0 + $0x88] sm:$0xff]  ;;  %v33_v16 = vld [vmem:[%s7917_s0 + $0x80] sm:$0xff] }
  0x47   :  { %928 = vmatmul.mubr.f32.gmra.mxu0 %v25_v9  ;;  %1184 = vmatprep.mubr.f32.mxu1 %v28_v10  ;;  %v582_v17 = vld [vmem:[%s7916_s1 + $0x9a8] sm:$0xff]  ;;  %v581_v18 = vld [vmem:[%s7916_s1 + $0x9a0] sm:$0xff] }
  0x48   :  { %1373 = vmatprep.subr.mxu0 %v586_v11  ;;  %1185 = vmatmul.mubr.f32.gmra.mxu1 %v27_v12  ;;  %v714_v19 = vld [vmem:[%s7916_s1 + $0xdc8] sm:$0xff]  ;;  %v713_v22 = vld [vmem:[%s7916_s1 + $0xdc0] sm:$0xff]  ;;  %v91_v12 = vld [vmem:[%s7917_s0 + $0x250] sm:$0xff] }
  0x49   :  { %1374 = vmatpush1.msra.mxu0 %v585_v13  ;;  %933 = vmatprep.mubr.f32.mxu0 %v34_v14  ;;  %v42_v21 = vld [vmem:[%s7917_s0 + $0xc8] sm:$0xff]  ;;  %v41_v24 = vld [vmem:[%s7917_s0 + $0xc0] sm:$0xff]  ;;  %v100_v14 = vld [vmem:[%s7917_s0 + $0x298] sm:$0xff] }
  0x4a   :  { %1190 = vmatprep.mubr.f32.mxu1 %v36_v15  ;;  %1375 = vmatprep.subr.mxu0 %v582_v17  ;;  %v578_v25 = vld [vmem:[%s7916_s1 + $0x988] sm:$0xff]  ;;  %v577_v26 = vld [vmem:[%s7916_s1 + $0x980] sm:$0xff] }
  0x4b   :  { %934 = vmatmul.mubr.f32.gmra.mxu0 %v33_v16  ;;  %1630 = vmatprep.subr.mxu1 %v714_v19  ;;  %v50_v27 = vld [vmem:[%s7917_s0 + $0x108] sm:$0xff]  ;;  %v573_v31 = vld [vmem:[%s7916_s1 + $0x960] sm:$0xff] }
  0x4c   :  { %1376 = vmatpush1.msra.mxu0 %v581_v18  ;;  %1191 = vmatmul.mubr.f32.gmra.mxu1 %v35_v20  ;;  %v574_v29 = vld [vmem:[%s7916_s1 + $0x968] sm:$0xff]  ;;  %v49_v32 = vld [vmem:[%s7917_s0 + $0x100] sm:$0xff]  ;;  %v99_v20 = vld [vmem:[%s7917_s0 + $0x290] sm:$0xff] }
  0x4d   :  { %939 = vmatprep.mubr.f32.mxu0 %v42_v21  ;;  %1631 = vmatpush1.msra.mxu1 %v713_v22  ;;  %v710_v33 = vld [vmem:[%s7916_s1 + $0xda8] sm:$0xff]  ;;  %v709_v35 = vld [vmem:[%s7916_s1 + $0xda0] sm:$0xff]  ;;  %v108_v22 = vld [vmem:[%s7917_s0 + $0x2d8] sm:$0xff] }
  0x4e   :  { %1196 = vmatprep.mubr.f32.mxu1 %v44_v23  ;;  %1377 = vmatprep.subr.mxu0 %v578_v25  ;;  %v58_v34 = vld [vmem:[%s7917_s0 + $0x148] sm:$0xff]  ;;  %v569_v39 = vld [vmem:[%s7916_s1 + $0x940] sm:$0xff] }
  0x4f   :  { %940 = vmatmul.mubr.f32.gmra.mxu0 %v41_v24  ;;  %v570_v37 = vld [vmem:[%s7916_s1 + $0x948] sm:$0xff]  ;;  %1632 = vmatprep.subr.mxu1 %v710_v33  ;;  %v57_v40 = vld [vmem:[%s7917_s0 + $0x140] sm:$0xff] }
  0x50   :  { %1378 = vmatpush1.msra.mxu0 %v577_v26  ;;  %945 = vmatprep.mubr.f32.mxu0 %v50_v27  ;;  %v566_v41 = vld [vmem:[%s7916_s1 + $0x928] sm:$0xff]  ;;  %v565_v43 = vld [vmem:[%s7916_s1 + $0x920] sm:$0xff] }
  0x51   :  { %1197 = vmatmul.mubr.f32.gmra.mxu1 %v43_v28  ;;  %1379 = vmatprep.subr.mxu0 %v574_v29  ;;  %v66_v42 = vld [vmem:[%s7917_s0 + $0x188] sm:$0xff]  ;;  %v705_v47 = vld [vmem:[%s7916_s1 + $0xd80] sm:$0xff]  ;;  %v107_v28 = vld [vmem:[%s7917_s0 + $0x2d0] sm:$0xff] }
  0x52   :  { %1202 = vmatprep.mubr.f32.mxu1 %v52_v30  ;;  %1380 = vmatpush1.msra.mxu0 %v573_v31  ;;  %v706_v45 = vld [vmem:[%s7916_s1 + $0xd88] sm:$0xff]  ;;  %v65_v48 = vld [vmem:[%s7917_s0 + $0x180] sm:$0xff]  ;;  %v116_v30 = vld [vmem:[%s7917_s0 + $0x318] sm:$0xff] }
  0x53   :  { %946 = vmatmul.mubr.f32.gmra.mxu0 %v49_v32  ;;  %1633 = vmatpush1.msra.mxu1 %v709_v35  ;;  %v562_v49 = vld [vmem:[%s7916_s1 + $0x908] sm:$0xff]  ;;  %v561_v51 = vld [vmem:[%s7916_s1 + $0x900] sm:$0xff] }
  0x54   :  { %951 = vmatprep.mubr.f32.mxu0 %v58_v34  ;;  %1381 = vmatprep.subr.mxu0 %v570_v37  ;;  %v74_v50 = vld [vmem:[%s7917_s0 + $0x1c8] sm:$0xff]  ;;  %v557_v55 = vld [vmem:[%s7916_s1 + $0x8e0] sm:$0xff] }
  0x55   :  { %1203 = vmatmul.mubr.f32.gmra.mxu1 %v51_v36  ;;  %1382 = vmatpush1.msra.mxu0 %v569_v39  ;;  %v558_v53 = vld [vmem:[%s7916_s1 + $0x8e8] sm:$0xff]  ;;  %v73_v56 = vld [vmem:[%s7917_s0 + $0x1c0] sm:$0xff]  ;;  %v115_v36 = vld [vmem:[%s7917_s0 + $0x310] sm:$0xff] }
  0x56   :  { %1208 = vmatprep.mubr.f32.mxu1 %v60_v38  ;;  %1383 = vmatprep.subr.mxu0 %v566_v41  ;;  %v702_v57 = vld [vmem:[%s7916_s1 + $0xd68] sm:$0xff]  ;;  %v701_v59 = vld [vmem:[%s7916_s1 + $0xd60] sm:$0xff]  ;;  %v124_v38 = vld [vmem:[%s7917_s0 + $0x358] sm:$0xff] }
  0x57   :  { %952 = vmatmul.mubr.f32.gmra.mxu0 %v57_v40  ;;  %1634 = vmatprep.subr.mxu1 %v706_v45  ;;  %v82_v58 = vld [vmem:[%s7917_s0 + $0x208] sm:$0xff]  ;;  %v553_v63 = vld [vmem:[%s7916_s1 + $0x8c0] sm:$0xff] }
  0x58   :  { %957 = vmatprep.mubr.f32.mxu0 %v66_v42  ;;  %1384 = vmatpush1.msra.mxu0 %v565_v43  ;;  %v554_v61 = vld [vmem:[%s7916_s1 + $0x8c8] sm:$0xff]  ;;  %v81_v0 = vld [vmem:[%s7917_s0 + $0x200] sm:$0xff] }
  0x59   :  { %1209 = vmatmul.mubr.f32.gmra.mxu1 %v59_v44  ;;  %1385 = vmatprep.subr.mxu0 %v562_v49  ;;  %v550_v1 = vld [vmem:[%s7916_s1 + $0x8a8] sm:$0xff]  ;;  %v549_v5 = vld [vmem:[%s7916_s1 + $0x8a0] sm:$0xff]  ;;  %v123_v44 = vld [vmem:[%s7917_s0 + $0x350] sm:$0xff] }
  0x5a   :  { %1214 = vmatprep.mubr.f32.mxu1 %v68_v46  ;;  %1635 = vmatpush1.msra.mxu1 %v705_v47  ;;  %v90_v2 = vld [vmem:[%s7917_s0 + $0x248] sm:$0xff]  ;;  %v697_v7 = vld [vmem:[%s7916_s1 + $0xd40] sm:$0xff]  ;;  %v132_v46 = vld [vmem:[%s7917_s0 + $0x398] sm:$0xff] }
  0x5b   :  { %958 = vmatmul.mubr.f32.gmra.mxu0 %v65_v48  ;;  %1636 = vmatprep.subr.mxu1 %v702_v57  ;;  %v698_v3 = vld [vmem:[%s7916_s1 + $0xd48] sm:$0xff]  ;;  %v89_v8 = vld [vmem:[%s7917_s0 + $0x240] sm:$0xff] }
  0x5c   :  { %963 = vmatprep.mubr.f32.mxu0 %v74_v50  ;;  %1386 = vmatpush1.msra.mxu0 %v561_v51  ;;  %v546_v9 = vld [vmem:[%s7916_s1 + $0x888] sm:$0xff]  ;;  %v545_v11 = vld [vmem:[%s7916_s1 + $0x880] sm:$0xff] }
  0x5d   :  { %1215 = vmatmul.mubr.f32.gmra.mxu1 %v67_v52  ;;  %1387 = vmatprep.subr.mxu0 %v558_v53  ;;  %v98_v10 = vld [vmem:[%s7917_s0 + $0x288] sm:$0xff]  ;;  %v97_v16 = vld [vmem:[%s7917_s0 + $0x280] sm:$0xff]  ;;  %v131_v52 = vld [vmem:[%s7917_s0 + $0x390] sm:$0xff] }
  0x5e   :  { %1220 = vmatprep.mubr.f32.mxu1 %v76_v54  ;;  %1388 = vmatpush1.msra.mxu0 %v557_v55  ;;  %v542_v13 = vld [vmem:[%s7916_s1 + $0x868] sm:$0xff]  ;;  %v693_v17 = vld [vmem:[%s7916_s1 + $0xd20] sm:$0xff]  ;;  %v140_v54 = vld [vmem:[%s7917_s0 + $0x3d8] sm:$0xff] }
  0x5f   :  { %964 = vmatmul.mubr.f32.gmra.mxu0 %v73_v56  ;;  %1637 = vmatpush1.msra.mxu1 %v701_v59  ;;  %v694_v15 = vld [vmem:[%s7916_s1 + $0xd28] sm:$0xff]  ;;  %v541_v19 = vld [vmem:[%s7916_s1 + $0x860] sm:$0xff] }
  0x60   :  { %969 = vmatprep.mubr.f32.mxu0 %v82_v58  ;;  %1389 = vmatprep.subr.mxu0 %v554_v61  ;;  %v106_v18 = vld [vmem:[%s7917_s0 + $0x2c8] sm:$0xff]  ;;  %v537_v23 = vld [vmem:[%s7916_s1 + $0x840] sm:$0xff] }
  0x61   :  { %1221 = vmatmul.mubr.f32.gmra.mxu1 %v75_v60  ;;  %1390 = vmatpush1.msra.mxu0 %v553_v63  ;;  %v538_v21 = vld [vmem:[%s7916_s1 + $0x848] sm:$0xff]  ;;  %v105_v24 = vld [vmem:[%s7917_s0 + $0x2c0] sm:$0xff]  ;;  %v139_v60 = vld [vmem:[%s7917_s0 + $0x3d0] sm:$0xff] }
  0x62   :  { %1226 = vmatprep.mubr.f32.mxu1 %v84_v62  ;;  %1391 = vmatprep.subr.mxu0 %v550_v1  ;;  %v690_v25 = vld [vmem:[%s7916_s1 + $0xd08] sm:$0xff]  ;;  %v533_v29 = vld [vmem:[%s7916_s1 + $0x820] sm:$0xff]  ;;  %v148_v62 = vld [vmem:[%s7917_s0 + $0x418] sm:$0xff] }
  0x63   :  { %970 = vmatmul.mubr.f32.gmra.mxu0 %v81_v0  ;;  %1638 = vmatprep.subr.mxu1 %v698_v3  ;;  %v114_v26 = vld [vmem:[%s7917_s0 + $0x308] sm:$0xff]  ;;  %v689_v31 = vld [vmem:[%s7916_s1 + $0xd00] sm:$0xff] }
  0x64   :  { %975 = vmatprep.mubr.f32.mxu0 %v90_v2  ;;  %1392 = vmatpush1.msra.mxu0 %v549_v5  ;;  %v534_v27 = vld [vmem:[%s7916_s1 + $0x828] sm:$0xff]  ;;  %v113_v32 = vld [vmem:[%s7917_s0 + $0x300] sm:$0xff] }
  0x65   :  { %1227 = vmatmul.mubr.f32.gmra.mxu1 %v83_v4  ;;  %1393 = vmatprep.subr.mxu0 %v546_v9  ;;  %v530_v33 = vld [vmem:[%s7916_s1 + $0x808] sm:$0xff]  ;;  %v529_v35 = vld [vmem:[%s7916_s1 + $0x800] sm:$0xff]  ;;  %v147_v4 = vld [vmem:[%s7917_s0 + $0x410] sm:$0xff] }
  0x66   :  { %1232 = vmatprep.mubr.f32.mxu1 %v92_v6  ;;  %1639 = vmatpush1.msra.mxu1 %v697_v7  ;;  %v122_v34 = vld [vmem:[%s7917_s0 + $0x348] sm:$0xff]  ;;  %v121_v40 = vld [vmem:[%s7917_s0 + $0x340] sm:$0xff]  ;;  %v156_v6 = vld [vmem:[%s7917_s0 + $0x458] sm:$0xff] }
  0x67   :  { %976 = vmatmul.mubr.f32.gmra.mxu0 %v89_v8  ;;  %1640 = vmatprep.subr.mxu1 %v694_v15  ;;  %v686_v37 = vld [vmem:[%s7916_s1 + $0xce8] sm:$0xff]  ;;  %v685_v41 = vld [vmem:[%s7916_s1 + $0xce0] sm:$0xff] }
  0x68   :  { %981 = vmatprep.mubr.f32.mxu0 %v98_v10  ;;  %1394 = vmatpush1.msra.mxu0 %v545_v11  ;;  %v654_v39 = vld [vmem:[%s7916_s1 + $0xbe8] sm:$0xff]  ;;  %v653_v43 = vld [vmem:[%s7916_s1 + $0xbe0] sm:$0xff] }
  0x69   :  { %1233 = vmatmul.mubr.f32.gmra.mxu1 %v91_v12  ;;  %1395 = vmatprep.subr.mxu0 %v542_v13  ;;  %v130_v42 = vld [vmem:[%s7917_s0 + $0x388] sm:$0xff]  ;;  %v649_v47 = vld [vmem:[%s7916_s1 + $0xbc0] sm:$0xff]  ;;  %v155_v12 = vld [vmem:[%s7917_s0 + $0x450] sm:$0xff] }
  0x6a   :  { %1238 = vmatprep.mubr.f32.mxu1 %v100_v14  ;;  %1641 = vmatpush1.msra.mxu1 %v693_v17  ;;  %v650_v45 = vld [vmem:[%s7916_s1 + $0xbc8] sm:$0xff]  ;;  %v129_v48 = vld [vmem:[%s7917_s0 + $0x380] sm:$0xff]  ;;  %v164_v14 = vld [vmem:[%s7917_s0 + $0x498] sm:$0xff] }
  0x6b   :  { %982 = vmatmul.mubr.f32.gmra.mxu0 %v97_v16  ;;  %1642 = vmatprep.subr.mxu1 %v690_v25  ;;  %v682_v49 = vld [vmem:[%s7916_s1 + $0xcc8] sm:$0xff]  ;;  %v681_v51 = vld [vmem:[%s7916_s1 + $0xcc0] sm:$0xff] }
  0x6c   :  { %987 = vmatprep.mubr.f32.mxu0 %v106_v18  ;;  %1396 = vmatpush1.msra.mxu0 %v541_v19  ;;  %v138_v50 = vld [vmem:[%s7917_s0 + $0x3c8] sm:$0xff]  ;;  %v645_v55 = vld [vmem:[%s7916_s1 + $0xba0] sm:$0xff] }
  0x6d   :  { %1239 = vmatmul.mubr.f32.gmra.mxu1 %v99_v20  ;;  %1397 = vmatprep.subr.mxu0 %v538_v21  ;;  %v646_v53 = vld [vmem:[%s7916_s1 + $0xba8] sm:$0xff]  ;;  %v137_v56 = vld [vmem:[%s7917_s0 + $0x3c0] sm:$0xff]  ;;  %v163_v20 = vld [vmem:[%s7917_s0 + $0x490] sm:$0xff] }
  0x6e   :  { %1244 = vmatprep.mubr.f32.mxu1 %v108_v22  ;;  %1398 = vmatpush1.msra.mxu0 %v537_v23  ;;  %v642_v57 = vld [vmem:[%s7916_s1 + $0xb88] sm:$0xff]  ;;  %v641_v59 = vld [vmem:[%s7916_s1 + $0xb80] sm:$0xff]  ;;  %v172_v22 = vld [vmem:[%s7917_s0 + $0x4d8] sm:$0xff] }
  0x6f   :  { %988 = vmatmul.mubr.f32.gmra.mxu0 %v105_v24  ;;  %1399 = vmatprep.subr.mxu0 %v534_v27  ;;  %v146_v58 = vld [vmem:[%s7917_s0 + $0x408] sm:$0xff]  ;;  %v677_v63 = vld [vmem:[%s7916_s1 + $0xca0] sm:$0xff] }
  0x70   :  { %993 = vmatprep.mubr.f32.mxu0 %v114_v26  ;;  %1400 = vmatpush1.msra.mxu0 %v533_v29  ;;  %v678_v61 = vld [vmem:[%s7916_s1 + $0xca8] sm:$0xff]  ;;  %v145_v0 = vld [vmem:[%s7917_s0 + $0x400] sm:$0xff] }
  0x71   :  { %1245 = vmatmul.mubr.f32.gmra.mxu1 %v107_v28  ;;  %1401 = vmatprep.subr.mxu0 %v530_v33  ;;  %v638_v1 = vld [vmem:[%s7916_s1 + $0xb68] sm:$0xff]  ;;  %v637_v3 = vld [vmem:[%s7916_s1 + $0xb60] sm:$0xff]  ;;  %v171_v28 = vld [vmem:[%s7917_s0 + $0x4d0] sm:$0xff] }
  0x72   :  { %1250 = vmatprep.mubr.f32.mxu1 %v116_v30  ;;  %1643 = vmatpush1.msra.mxu1 %v689_v31  ;;  %v154_v2 = vld [vmem:[%s7917_s0 + $0x448] sm:$0xff]  ;;  %v633_v7 = vld [vmem:[%s7916_s1 + $0xb40] sm:$0xff]  ;;  %v180_v30 = vld [vmem:[%s7917_s0 + $0x518] sm:$0xff] }
  0x73   :  { %994 = vmatmul.mubr.f32.gmra.mxu0 %v113_v32  ;;  %1644 = vmatprep.subr.mxu1 %v686_v37  ;;  %v634_v5 = vld [vmem:[%s7916_s1 + $0xb48] sm:$0xff]  ;;  %v153_v8 = vld [vmem:[%s7917_s0 + $0x440] sm:$0xff] }
  0x74   :  { %999 = vmatprep.mubr.f32.mxu0 %v122_v34  ;;  %1402 = vmatpush1.msra.mxu0 %v529_v35  ;;  %v674_v9 = vld [vmem:[%s7916_s1 + $0xc88] sm:$0xff]  ;;  %v673_v11 = vld [vmem:[%s7916_s1 + $0xc80] sm:$0xff] }
  0x75   :  { %1251 = vmatmul.mubr.f32.gmra.mxu1 %v115_v36  ;;  %1403 = vmatprep.subr.mxu0 %v654_v39  ;;  %v162_v10 = vld [vmem:[%s7917_s0 + $0x488] sm:$0xff]  ;;  %v629_v15 = vld [vmem:[%s7916_s1 + $0xb20] sm:$0xff]  ;;  %v179_v36 = vld [vmem:[%s7917_s0 + $0x510] sm:$0xff] }
  0x76   :  { %1256 = vmatprep.mubr.f32.mxu1 %v124_v38  ;;  %1645 = vmatpush1.msra.mxu1 %v685_v41  ;;  %v630_v13 = vld [vmem:[%s7916_s1 + $0xb28] sm:$0xff]  ;;  %v161_v16 = vld [vmem:[%s7917_s0 + $0x480] sm:$0xff]  ;;  %v188_v38 = vld [vmem:[%s7917_s0 + $0x558] sm:$0xff] }
  0x77   :  { %1000 = vmatmul.mubr.f32.gmra.mxu0 %v121_v40  ;;  %1646 = vmatprep.subr.mxu1 %v682_v49  ;;  %v626_v17 = vld [vmem:[%s7916_s1 + $0xb08] sm:$0xff]  ;;  %v625_v19 = vld [vmem:[%s7916_s1 + $0xb00] sm:$0xff] }
  0x78   :  { %1005 = vmatprep.mubr.f32.mxu0 %v130_v42  ;;  %1404 = vmatpush2.msra.mxu0 %v653_v43  ;;  %v170_v18 = vld [vmem:[%s7917_s0 + $0x4c8] sm:$0xff]  ;;  %v669_v23 = vld [vmem:[%s7916_s1 + $0xc60] sm:$0xff] }
  0x79   :  { %1257 = vmatmul.mubr.f32.gmra.mxu1 %v123_v44  ;;  %1405 = vmatprep.subr.mxu0 %v650_v45  ;;  %v670_v21 = vld [vmem:[%s7916_s1 + $0xc68] sm:$0xff]  ;;  %v169_v24 = vld [vmem:[%s7917_s0 + $0x4c0] sm:$0xff]  ;;  %v187_v44 = vld [vmem:[%s7917_s0 + $0x550] sm:$0xff] }
  0x7a   :  { %1262 = vmatprep.mubr.f32.mxu1 %v132_v46  ;;  %1406 = vmatpush2.msra.mxu0 %v649_v47  ;;  %v622_v25 = vld [vmem:[%s7916_s1 + $0xae8] sm:$0xff]  ;;  %v621_v27 = vld [vmem:[%s7916_s1 + $0xae0] sm:$0xff]  ;;  %v196_v46 = vld [vmem:[%s7917_s0 + $0x598] sm:$0xff] }
  0x7b   :  { %1006 = vmatmul.mubr.f32.gmra.mxu0 %v129_v48  ;;  %1647 = vmatpush1.msra.mxu1 %v681_v51  ;;  %v178_v26 = vld [vmem:[%s7917_s0 + $0x508] sm:$0xff]  ;;  %v177_v32 = vld [vmem:[%s7917_s0 + $0x500] sm:$0xff] }
  0x7c   :  { %1011 = vmatprep.mubr.f32.mxu0 %v138_v50  ;;  %1407 = vmatprep.subr.mxu0 %v646_v53  ;;  %v618_v29 = vld [vmem:[%s7916_s1 + $0xac8] sm:$0xff]  ;;  %v665_v33 = vld [vmem:[%s7916_s1 + $0xc40] sm:$0xff] }
  0x7d   :  { %1263 = vmatmul.mubr.f32.gmra.mxu1 %v131_v52  ;;  %1408 = vmatpush2.msra.mxu0 %v645_v55  ;;  %v666_v31 = vld [vmem:[%s7916_s1 + $0xc48] sm:$0xff]  ;;  %v617_v35 = vld [vmem:[%s7916_s1 + $0xac0] sm:$0xff]  ;;  %v195_v52 = vld [vmem:[%s7917_s0 + $0x590] sm:$0xff] }
  0x7e   :  { %1268 = vmatprep.mubr.f32.mxu1 %v140_v54  ;;  %1409 = vmatprep.subr.mxu0 %v642_v57  ;;  %v186_v34 = vld [vmem:[%s7917_s0 + $0x548] sm:$0xff]  ;;  %v613_v39 = vld [vmem:[%s7916_s1 + $0xaa0] sm:$0xff]  ;;  %v204_v54 = vld [vmem:[%s7917_s0 + $0x5d8] sm:$0xff] }
  0x7f   :  { %1012 = vmatmul.mubr.f32.gmra.mxu0 %v137_v56  ;;  %1648 = vmatprep.subr.mxu1 %v678_v61  ;;  %v614_v37 = vld [vmem:[%s7916_s1 + $0xaa8] sm:$0xff]  ;;  %v185_v40 = vld [vmem:[%s7917_s0 + $0x540] sm:$0xff] }
  0x80   :  { %1017 = vmatprep.mubr.f32.mxu0 %v146_v58  ;;  %1410 = vmatpush2.msra.mxu0 %v641_v59  ;;  %v610_v41 = vld [vmem:[%s7916_s1 + $0xa88] sm:$0xff]  ;;  %v609_v45 = vld [vmem:[%s7916_s1 + $0xa80] sm:$0xff] }
  0x81   :  { %1269 = vmatmul.mubr.f32.gmra.mxu1 %v139_v60  ;;  %1411 = vmatprep.subr.mxu0 %v638_v1  ;;  %v194_v42 = vld [vmem:[%s7917_s0 + $0x588] sm:$0xff]  ;;  %v661_v47 = vld [vmem:[%s7916_s1 + $0xc20] sm:$0xff]  ;;  %v203_v60 = vld [vmem:[%s7917_s0 + $0x5d0] sm:$0xff] }
  0x82   :  { %1274 = vmatprep.mubr.f32.mxu1 %v148_v62  ;;  %1649 = vmatpush1.msra.mxu1 %v677_v63  ;;  %v662_v43 = vld [vmem:[%s7916_s1 + $0xc28] sm:$0xff]  ;;  %v193_v48 = vld [vmem:[%s7917_s0 + $0x580] sm:$0xff]  ;;  %v212_v62 = vld [vmem:[%s7917_s0 + $0x618] sm:$0xff] }
  0x83   :  { %1018 = vmatmul.mubr.f32.gmra.mxu0 %v145_v0  ;;  %1650 = vmatprep.subr.mxu1 %v674_v9  ;;  %v606_v49 = vld [vmem:[%s7916_s1 + $0xa68] sm:$0xff]  ;;  %v605_v51 = vld [vmem:[%s7916_s1 + $0xa60] sm:$0xff]  ;;  %v336_v9 = vld [vmem:[%s7916_s1 + $0x1f8] sm:$0xff] }
  0x84   :  { %1023 = vmatprep.mubr.f32.mxu0 %v154_v2  ;;  %1412 = vmatpush2.msra.mxu0 %v637_v3  ;;  %v202_v50 = vld [vmem:[%s7917_s0 + $0x5c8] sm:$0xff]  ;;  %v201_v56 = vld [vmem:[%s7917_s0 + $0x5c0] sm:$0xff] }
  0x85   :  { %1275 = vmatmul.mubr.f32.gmra.mxu1 %v147_v4  ;;  %1413 = vmatprep.subr.mxu0 %v634_v5  ;;  %v658_v53 = vld [vmem:[%s7916_s1 + $0xc08] sm:$0xff]  ;;  %v657_v57 = vld [vmem:[%s7916_s1 + $0xc00] sm:$0xff]  ;;  %v211_v4 = vld [vmem:[%s7917_s0 + $0x610] sm:$0xff] }
  0x86   :  { %1280 = vmatprep.mubr.f32.mxu1 %v156_v6  ;;  %1414 = vmatpush2.msra.mxu0 %v633_v7  ;;  %v602_v55 = vld [vmem:[%s7916_s1 + $0xa48] sm:$0xff]  ;;  %v601_v59 = vld [vmem:[%s7916_s1 + $0xa40] sm:$0xff]  ;;  %v220_v6 = vld [vmem:[%s7917_s0 + $0x658] sm:$0xff] }
  0x87   :  { %1024 = vmatmul.mubr.f32.gmra.mxu0 %v153_v8  ;;  %1651 = vmatpush1.msra.mxu1 %v673_v11  ;;  %v210_v58 = vld [vmem:[%s7917_s0 + $0x608] sm:$0xff]  ;;  %v597_v63 = vld [vmem:[%s7916_s1 + $0xa20] sm:$0xff]  ;;  %v464_v11 = vld [vmem:[%s7916_s1 + $0x5f8] sm:$0xff] }
  0x88   :  { %1029 = vmatprep.mubr.f32.mxu0 %v162_v10  ;;  %1415 = vmatprep.subr.mxu0 %v630_v13  ;;  %v598_v61 = vld [vmem:[%s7916_s1 + $0xa28] sm:$0xff]  ;;  %v209_v0 = vld [vmem:[%s7917_s0 + $0x600] sm:$0xff]  ;;  %v228_v13 = vld [vmem:[%s7917_s0 + $0x698] sm:$0xff] }
  0x89   :  { %1281 = vmatmul.mubr.f32.gmra.mxu1 %v155_v12  ;;  %1416 = vmatpush2.msra.mxu0 %v629_v15  ;;  %v722_v1 = vld [vmem:[%s7916_s1 + $0xe08] sm:$0xf]  ;;  %v593_v5 = vld [vmem:[%s7916_s1 + $0xa00] sm:$0xff]  ;;  %v219_v12 = vld [vmem:[%s7917_s0 + $0x650] sm:$0xff] }
  0x8a   :  { %1286 = vmatprep.mubr.f32.mxu1 %v164_v14  ;;  %1417 = vmatprep.subr.mxu0 %v626_v17  ;;  %v218_v2 = vld [vmem:[%s7917_s0 + $0x648] sm:$0xff]  ;;  %v721_v7 = vld [vmem:[%s7916_s1 + $0xe00] sm:$0xf] }
  0x8b   :  { %1030 = vmatmul.mubr.f32.gmra.mxu0 %v161_v16  ;;  %1652 = vmatprep.subr.mxu1 %v670_v21  ;;  %v594_v3 = vld [vmem:[%s7916_s1 + $0xa08] sm:$0xff]  ;;  %v217_v8 = vld [vmem:[%s7917_s0 + $0x640] sm:$0xff]  ;;  %v3694_v16 = vmov 0  }
  0x8c   :  { %1035 = vmatprep.mubr.f32.mxu0 %v170_v18  ;;  %1418 = vmatpush2.msra.mxu0 %v625_v19  ;;  %v226_v10 = vld [vmem:[%s7917_s0 + $0x688] sm:$0xff]  ;;  %v225_v14 = vld [vmem:[%s7917_s0 + $0x680] sm:$0xff]  ;;  %v227_v18 = vld [vmem:[%s7917_s0 + $0x690] sm:$0xff] }
  0x8d   :  { %1287 = vmatmul.mubr.f32.gmra.mxu1 %v163_v20  ;;  %1419 = vmatprep.subr.mxu0 %v622_v25  ;;  %v234_v15 = vld [vmem:[%s7917_s0 + $0x6c8] sm:$0xff]  ;;  %v2913_v17 = vld [vmem:[%s7918_s3] sm:$0xff]  ;;  %v236_v19 = vld [vmem:[%s7917_s0 + $0x6d8] sm:$0xff] }
  0x8e   :  { %1292 = vmatprep.mubr.f32.mxu1 %v172_v22  ;;  %1653 = vmatpush1.msra.mxu1 %v669_v23  ;;  %v233_v20 = vld [vmem:[%s7917_s0 + $0x6c0] sm:$0xff]  ;;  %v2914_v21 = vld [vmem:[%s7918_s3 + $0x8] sm:$0xff]  ;;  %v235_v23 = vld [vmem:[%s7917_s0 + $0x6d0] sm:$0xff] }
  0x8f   :  { %1036 = vmatmul.mubr.f32.gmra.mxu0 %v169_v24  ;;  %1654 = vmatprep.subr.mxu1 %v666_v31  ;;  %v242_v22 = vld [vmem:[%s7917_s0 + $0x708] sm:$0xff]  ;;  %v244_v24 = vld [vmem:[%s7917_s0 + $0x718] sm:$0xff]  ;;  %v2915_v25 = vld [vmem:[%s7918_s3 + $0x10] sm:$0xff] }
  0x90   :  { %1041 = vmatprep.mubr.f32.mxu0 %v178_v26  ;;  %1420 = vmatpush2.msra.mxu0 %v621_v27  ;;  %v241_v26 = vld [vmem:[%s7917_s0 + $0x700] sm:$0xff]  ;;  %v250_v27 = vld [vmem:[%s7917_s0 + $0x748] sm:$0xff] }
  0x91   :  { %1293 = vmatmul.mubr.f32.gmra.mxu1 %v171_v28  ;;  %1421 = vmatprep.subr.mxu0 %v618_v29  ;;  %v243_v28 = vld [vmem:[%s7917_s0 + $0x710] sm:$0xff]  ;;  %v2916_v29 = vld [vmem:[%s7918_s3 + $0x18] sm:$0xff]  ;;  %v249_v31 = vld [vmem:[%s7917_s0 + $0x740] sm:$0xff] }
  0x92   :  { %1298 = vmatprep.mubr.f32.mxu1 %v180_v30  ;;  %1655 = vmatpush1.msra.mxu1 %v665_v33  ;;  %v252_v30 = vld [vmem:[%s7917_s0 + $0x758] sm:$0xff]  ;;  %v2917_v33 = vld [vmem:[%s7918_s3 + $0x20] sm:$0xff] }
  0x93   :  { %1042 = vmatmul.mubr.f32.gmra.mxu0 %v177_v32  ;;  %1656 = vmatprep.subr.mxu1 %v662_v43  ;;  %v258_v32 = vld [vmem:[%s7917_s0 + $0x788] sm:$0xff] }
  0x94   :  { %1047 = vmatprep.mubr.f32.mxu0 %v186_v34  ;;  %1422 = vmatpush2.msra.mxu0 %v617_v35  ;;  %v251_v34 = vld [vmem:[%s7917_s0 + $0x750] sm:$0xff]  ;;  %v260_v35 = vld [vmem:[%s7917_s0 + $0x798] sm:$0xff]  ;;  %v22_v43 = vld [vmem:[%s7917_s0 + $0x28] sm:$0xff] }
  0x95   :  { %1299 = vmatmul.mubr.f32.gmra.mxu1 %v179_v36  ;;  %1423 = vmatprep.subr.mxu0 %v614_v37  ;;  %v257_v36 = vld [vmem:[%s7917_s0 + $0x780] sm:$0xff]  ;;  %v2918_v37 = vld [vmem:[%s7918_s3 + $0x28] sm:$0xff] }
  0x96   :  { %1304 = vmatprep.mubr.f32.mxu1 %v188_v38  ;;  %1424 = vmatpush2.msra.mxu0 %v613_v39  ;;  %v266_v38 = vld [vmem:[%s7917_s0 + $0x7c8] sm:$0xff]  ;;  %v259_v39 = vld [vmem:[%s7917_s0 + $0x790] sm:$0xff] }
  0x97   :  { %1048 = vmatmul.mubr.f32.gmra.mxu0 %v185_v40  ;;  %1425 = vmatprep.subr.mxu0 %v610_v41  ;;  %v268_v40 = vld [vmem:[%s7917_s0 + $0x7d8] sm:$0xff]  ;;  %v2919_v41 = vld [vmem:[%s7918_s3 + $0x30] sm:$0xff] }
  0x98   :  { %1053 = vmatprep.mubr.f32.mxu0 %v194_v42  ;;  %1426 = vmatpush2.msra.mxu0 %v609_v45  ;;  %v265_v42 = vld [vmem:[%s7917_s0 + $0x7c0] sm:$0xff]  ;;  %v2920_v45 = vld [vmem:[%s7918_s3 + $0x38] sm:$0xff] }
  0x99   :  { %1305 = vmatmul.mubr.f32.gmra.mxu1 %v187_v44  ;;  %1427 = vmatprep.subr.mxu0 %v606_v49  ;;  %v267_v44 = vld [vmem:[%s7917_s0 + $0x7d0] sm:$0xff]  ;;  %v30_v49 = vld [vmem:[%s7917_s0 + $0x68] sm:$0xff] }
  0x9a   :  { %1310 = vmatprep.mubr.f32.mxu1 %v196_v46  ;;  %1657 = vmatpush1.msra.mxu1 %v661_v47  ;;  %v24_v46 = vld [vmem:[%s7917_s0 + $0x38] sm:$0xff]  ;;  %v21_v47 = vld [vmem:[%s7917_s0 + $0x20] sm:$0xff] }
  0x9b   :  { %1054 = vmatmul.mubr.f32.gmra.mxu0 %v193_v48  ;;  %1658 = vmatprep.subr.mxu1 %v658_v53  ;;  %v335_v48 = vld [vmem:[%s7916_s1 + $0x1f0] sm:$0xff] }
  0x9c   :  { %1059 = vmatprep.mubr.f32.mxu0 %v202_v50  ;;  %1428 = vmatpush2.msra.mxu0 %v605_v51  ;;  %v2921_v50 = vld [vmem:[%s7918_s3 + $0x40] sm:$0xff]  ;;  %v23_v51 = vld [vmem:[%s7917_s0 + $0x30] sm:$0xff] }
  0x9d   :  { %1311 = vmatmul.mubr.f32.gmra.mxu1 %v195_v52  ;;  %1429 = vmatprep.subr.mxu0 %v602_v55  ;;  %v332_v52 = vld [vmem:[%s7916_s1 + $0x1d8] sm:$0xff]  ;;  %v463_v53 = vld [vmem:[%s7916_s1 + $0x5f0] sm:$0xff]  ;;  %v29_v55 = vld [vmem:[%s7917_s0 + $0x60] sm:$0xff] }
  0x9e   :  { %1316 = vmatprep.mubr.f32.mxu1 %v204_v54  ;;  %1659 = vmatpush1.msra.mxu1 %v657_v57  ;;  %v32_v54 = vld [vmem:[%s7917_s0 + $0x78] sm:$0xff]  ;;  %v331_v57 = vld [vmem:[%s7916_s1 + $0x1d0] sm:$0xff] }
  0x9f   :  { %1060 = vmatmul.mubr.f32.gmra.mxu0 %v201_v56  ;;  %3366 = vmatprep.subr.msk.mxu1 %vm844_vm0, %v722_v1  ;;  %v460_v56 = vld [vmem:[%s7916_s1 + $0x5d8] sm:$0xff]  ;;  %v327_v1 = vld [vmem:[%s7916_s1 + $0x1b0] sm:$0xff] }
  0xa0   :  { %1065 = vmatprep.mubr.f32.mxu0 %v210_v58  ;;  %1430 = vmatpush2.msra.mxu0 %v601_v59  ;;  %v38_v58 = vld [vmem:[%s7917_s0 + $0xa8] sm:$0xff]  ;;  %v31_v59 = vld [vmem:[%s7917_s0 + $0x70] sm:$0xff] }
  0xa1   :  { %1317 = vmatmul.mubr.f32.gmra.mxu1 %v203_v60  ;;  %1431 = vmatprep.subr.mxu0 %v598_v61  ;;  %v328_v60 = vld [vmem:[%s7916_s1 + $0x1b8] sm:$0xff]  ;;  %v459_v61 = vld [vmem:[%s7916_s1 + $0x5d0] sm:$0xff] }
  0xa2   :  { %1322 = vmatprep.mubr.f32.mxu1 %v212_v62  ;;  %1432 = vmatpush2.msra.mxu0 %v597_v63  ;;  %v40_v62 = vld [vmem:[%s7917_s0 + $0xb8] sm:$0xff]  ;;  %v37_v63 = vld [vmem:[%s7917_s0 + $0xa0] sm:$0xff] }
  0xa3   :  { %1066 = vmatmul.mubr.f32.gmra.mxu0 %v209_v0  ;;  %1433 = vmatprep.subr.mxu0 %v594_v3  ;;  %v456_v0 = vld [vmem:[%s7916_s1 + $0x5b8] sm:$0xff]  ;;  %v39_v3 = vld [vmem:[%s7917_s0 + $0xb0] sm:$0xff] }
  0xa4   :  { %1071 = vmatprep.mubr.f32.mxu0 %v218_v2  ;;  %1434 = vmatpush2.msra.mxu0 %v593_v5  ;;  %v46_v2 = vld [vmem:[%s7917_s0 + $0xe8] sm:$0xff]  ;;  %v455_v5 = vld [vmem:[%s7916_s1 + $0x5b0] sm:$0xff] }
  0xa5   :  { %1323 = vmatmul.mubr.f32.gmra.mxu1 %v211_v4  ;;  %1885 = vmatprep.subr.mxu0 %v336_v9  ;;  %v324_v4 = vld [vmem:[%s7916_s1 + $0x198] sm:$0xff]  ;;  %v323_v9 = vld [vmem:[%s7916_s1 + $0x190] sm:$0xff] }
  0xa6   :  { %1328 = vmatprep.mubr.f32.mxu1 %v220_v6  ;;  %3367 = vmatpush2.msk.msra.mxu1 %vm844_vm0, %v721_v7  ;;  %v48_v6 = vld [vmem:[%s7917_s0 + $0xf8] sm:$0xff]  ;;  %v45_v7 = vld [vmem:[%s7917_s0 + $0xe0] sm:$0xff] }
  0xa7   :  { %1072 = vmatmul.mubr.f32.gmra.mxu0 %v217_v8  ;;  %2142 = vmatprep.subr.mxu1 %v464_v11  ;;  %v452_v8 = vld [vmem:[%s7916_s1 + $0x598] sm:$0xff]  ;;  %v47_v11 = vld [vmem:[%s7917_s0 + $0xf0] sm:$0xff] }
  0xa8   :  { %1077 = vmatprep.mubr.f32.mxu0 %v226_v10  ;;  %3435 = vset.pattern.permute.xlu0 %v3694_v16  ;;  %v54_v10 = vld [vmem:[%s7917_s0 + $0x128] sm:$0xff] }
  0xa9   :  { %1329 = vmatmul.mubr.f32.gmra.mxu1 %v219_v12  ;;  %2947 = vperm.xlu0 %3435, %v2913_v17   ;;  %v320_v12 = vld [vmem:[%s7916_s1 + $0x178] sm:$0xff]  ;;  %v319_v17 = vld [vmem:[%s7916_s1 + $0x170] sm:$0xff] }
  0xaa   :  { %1334 = vmatprep.mubr.f32.mxu1 %v228_v13  ;;  %3436 = vset.pattern.permute.xlu1 %v3694_v16  ;;  %v451_v13 = vld [vmem:[%s7916_s1 + $0x590] sm:$0xff]  ;;  %v448_v16 = vld [vmem:[%s7916_s1 + $0x578] sm:$0xff] }
  0xab   :  { %1078 = vmatmul.mubr.f32.gmra.mxu0 %v225_v14  ;;  %2957 = vperm.xlu1 %3436, %v2915_v25   ;;  %v56_v14 = vld [vmem:[%s7917_s0 + $0x138] sm:$0xff]  ;;  %v315_v25 = vld [vmem:[%s7916_s1 + $0x150] sm:$0xff] }
  0xac   :  { %1083 = vmatprep.mubr.f32.mxu0 %v234_v15  ;;  %v53_v15 = vld [vmem:[%s7917_s0 + $0x120] sm:$0xff] }
  0xad   :  { %1335 = vmatmul.mubr.f32.gmra.mxu1 %v227_v18  ;;  %2952 = vperm.xlu0 %3435, %v2914_v21   ;;  %v62_v18 = vld [vmem:[%s7917_s0 + $0x168] sm:$0xff]  ;;  %v447_v21 = vld [vmem:[%s7916_s1 + $0x570] sm:$0xff] }
  0xae   :  { %1340 = vmatprep.mubr.f32.mxu1 %v236_v19  ;;  %v55_v19 = vld [vmem:[%s7917_s0 + $0x130] sm:$0xff] }
  0xaf   :  { %1084 = vmatmul.mubr.f32.gmra.mxu0 %v233_v20  ;;  %2962 = vperm.xlu1 %3436, %v2916_v29   ;;  %v316_v20 = vld [vmem:[%s7916_s1 + $0x158] sm:$0xff]  ;;  %v443_v29 = vld [vmem:[%s7916_s1 + $0x550] sm:$0xff] }
  0xb0   :  { %1089 = vmatprep.mubr.f32.mxu0 %v242_v22  ;;  %v64_v22 = vld [vmem:[%s7917_s0 + $0x178] sm:$0xff] }
  0xb1   :  { %1341 = vmatmul.mubr.f32.gmra.mxu1 %v235_v23  ;;  %2967 = vperm.xlu0 %3435, %v2917_v33   ;;  %v61_v23 = vld [vmem:[%s7917_s0 + $0x160] sm:$0xff]  ;;  %v311_v33 = vld [vmem:[%s7916_s1 + $0x130] sm:$0xff] }
  0xb2   :  { %1346 = vmatprep.mubr.f32.mxu1 %v244_v24  ;;  %v444_v24 = vld [vmem:[%s7916_s1 + $0x558] sm:$0xff] }
  0xb3   :  { %1090 = vmatmul.mubr.f32.gmra.mxu0 %v241_v26  ;;  %2972 = vperm.xlu1 %3436, %v2918_v37   ;;  %v70_v26 = vld [vmem:[%s7917_s0 + $0x1a8] sm:$0xff]  ;;  %v439_v37 = vld [vmem:[%s7916_s1 + $0x530] sm:$0xff] }
  0xb4   :  { %1095 = vmatprep.mubr.f32.mxu0 %v250_v27  ;;  %v63_v27 = vld [vmem:[%s7917_s0 + $0x170] sm:$0xff] }
  0xb5   :  { %1347 = vmatmul.mubr.f32.gmra.mxu1 %v243_v28  ;;  %2977 = vperm.xlu0 %3435, %v2919_v41   ;;  %v312_v28 = vld [vmem:[%s7916_s1 + $0x138] sm:$0xff]  ;;  %v307_v41 = vld [vmem:[%s7916_s1 + $0x110] sm:$0xff] }
  0xb6   :  { %1352 = vmatprep.mubr.f32.mxu1 %v252_v30  ;;  %v72_v30 = vld [vmem:[%s7917_s0 + $0x1b8] sm:$0xff] }
  0xb7   :  { %1096 = vmatmul.mubr.f32.gmra.mxu0 %v249_v31  ;;  %2982 = vperm.xlu1 %3436, %v2920_v45   ;;  %v69_v31 = vld [vmem:[%s7917_s0 + $0x1a0] sm:$0xff]  ;;  %v435_v45 = vld [vmem:[%s7916_s1 + $0x510] sm:$0xff] }
  0xb8   :  { %1101 = vmatprep.mubr.f32.mxu0 %v258_v32  ;;  %v440_v32 = vld [vmem:[%s7916_s1 + $0x538] sm:$0xff] }
  0xb9   :  { %1353 = vmatmul.mubr.f32.gmra.mxu1 %v251_v34  ;;  %2987 = vperm.xlu0 %3435, %v2921_v50   ;;  %v78_v34 = vld [vmem:[%s7917_s0 + $0x1e8] sm:$0xff] }
  0xba   :  { %1358 = vmatprep.mubr.f32.mxu1 %v260_v35  ;;  %v71_v35 = vld [vmem:[%s7917_s0 + $0x1b0] sm:$0xff]  ;;  %v94_v50 = vld [vmem:[%s7917_s0 + $0x268] sm:$0xff] }
  0xbb   :  { %1102 = vmatmul.mubr.f32.gmra.mxu0 %v257_v36  ;;  %v308_v36 = vld [vmem:[%s7916_s1 + $0x118] sm:$0xff] }
  0xbc   :  { %1107 = vmatprep.mubr.f32.mxu0 %v266_v38  ;;  %v80_v38 = vld [vmem:[%s7917_s0 + $0x1f8] sm:$0xff] }
  0xbd   :  { %1359 = vmatmul.mubr.f32.gmra.mxu1 %v259_v39  ;;  %v77_v39 = vld [vmem:[%s7917_s0 + $0x1e0] sm:$0xff] }
  0xbe   :  { %1364 = vmatprep.mubr.f32.mxu1 %v268_v40  ;;  %v436_v40 = vld [vmem:[%s7916_s1 + $0x518] sm:$0xff] }
  0xbf   :  { %1108 = vmatmul.mubr.f32.gmra.mxu0 %v265_v42  ;;  %v86_v42 = vld [vmem:[%s7917_s0 + $0x228] sm:$0xff] }
  0xc0   :  { %1435 = vmatprep.mubr.f32.mxu0 %v22_v43  ;;  %v79_v43 = vld [vmem:[%s7917_s0 + $0x1f0] sm:$0xff] }
  0xc1   :  { %1365 = vmatmul.mubr.f32.gmra.mxu1 %v267_v44  ;;  %v304_v44 = vld [vmem:[%s7916_s1 + $0xf8] sm:$0xff] }
  0xc2   :  { %3368 = vmatprep.mubr.msk.f32.mxu1 %vm747_vm1, %v24_v46  ;;  %v88_v46 = vld [vmem:[%s7917_s0 + $0x238] sm:$0xff] }
  0xc3   :  { %1436 = vmatmul.mubr.f32.vlgmr.msra.gmra.mxu0 %v21_v47  ;;  %v85_v47 = vld [vmem:[%s7917_s0 + $0x220] sm:$0xff] }
  0xc4   :  { %1886 = vmatpush1.msra.mxu0 %v335_v48  ;;  %1441 = vmatprep.mubr.f32.mxu0 %v30_v49  ;;  %v432_v48 = vld [vmem:[%s7916_s1 + $0x4f8] sm:$0xff]  ;;  %v303_v49 = vld [vmem:[%s7916_s1 + $0xf0] sm:$0xff] }
  0xc5   :  { %1693 = vmatmul.mubr.f32.vlgmr.msra.gmra.mxu1 %v23_v51  ;;  %1887 = vmatprep.subr.mxu0 %v332_v52  ;;  %v87_v51 = vld [vmem:[%s7917_s0 + $0x230] sm:$0xff]  ;;  %v300_v52 = vld [vmem:[%s7916_s1 + $0xd8] sm:$0xff] }
  0xc6   :  { %2143 = vmatpush1.msra.mxu1 %v463_v53  ;;  %3369 = vmatprep.mubr.msk.f32.mxu1 %vm747_vm1, %v32_v54  ;;  %v431_v53 = vld [vmem:[%s7916_s1 + $0x4f0] sm:$0xff]  ;;  %v96_v54 = vld [vmem:[%s7917_s0 + $0x278] sm:$0xff] }
  0xc7   :  { %1442 = vmatmul.mubr.f32.gmra.mxu0 %v29_v55  ;;  %2144 = vmatprep.subr.mxu1 %v460_v56  ;;  %v93_v55 = vld [vmem:[%s7917_s0 + $0x260] sm:$0xff]  ;;  %v428_v56 = vld [vmem:[%s7916_s1 + $0x4d8] sm:$0xff] }
  0xc8   :  { %1888 = vmatpush1.msra.mxu0 %v331_v57  ;;  %1447 = vmatprep.mubr.f32.mxu0 %v38_v58  ;;  %v299_v57 = vld [vmem:[%s7916_s1 + $0xd0] sm:$0xff]  ;;  %v102_v58 = vld [vmem:[%s7917_s0 + $0x2a8] sm:$0xff] }
  0xc9   :  { %1699 = vmatmul.mubr.f32.gmra.mxu1 %v31_v59  ;;  %1889 = vmatprep.subr.mxu0 %v328_v60  ;;  %v95_v59 = vld [vmem:[%s7917_s0 + $0x270] sm:$0xff]  ;;  %v296_v60 = vld [vmem:[%s7916_s1 + $0xb8] sm:$0xff] }
  0xca   :  { %2145 = vmatpush1.msra.mxu1 %v459_v61  ;;  %3370 = vmatprep.mubr.msk.f32.mxu1 %vm747_vm1, %v40_v62  ;;  %v427_v61 = vld [vmem:[%s7916_s1 + $0x4d0] sm:$0xff]  ;;  %v104_v62 = vld [vmem:[%s7917_s0 + $0x2b8] sm:$0xff] }
  0xcb   :  { %1448 = vmatmul.mubr.f32.gmra.mxu0 %v37_v63  ;;  %2146 = vmatprep.subr.mxu1 %v456_v0  ;;  %v101_v63 = vld [vmem:[%s7917_s0 + $0x2a0] sm:$0xff]  ;;  %v424_v0 = vld [vmem:[%s7916_s1 + $0x4b8] sm:$0xff] }
  0xcc   :  { %1890 = vmatpush1.msra.mxu0 %v327_v1  ;;  %1453 = vmatprep.mubr.f32.mxu0 %v46_v2  ;;  %v295_v1 = vld [vmem:[%s7916_s1 + $0xb0] sm:$0xff]  ;;  %v110_v2 = vld [vmem:[%s7917_s0 + $0x2e8] sm:$0xff] }
  0xcd   :  { %1705 = vmatmul.mubr.f32.gmra.mxu1 %v39_v3  ;;  %1891 = vmatprep.subr.mxu0 %v324_v4  ;;  %v103_v3 = vld [vmem:[%s7917_s0 + $0x2b0] sm:$0xff]  ;;  %v292_v4 = vld [vmem:[%s7916_s1 + $0x98] sm:$0xff] }
  0xce   :  { %2147 = vmatpush1.msra.mxu1 %v455_v5  ;;  %3371 = vmatprep.mubr.msk.f32.mxu1 %vm747_vm1, %v48_v6  ;;  %v423_v5 = vld [vmem:[%s7916_s1 + $0x4b0] sm:$0xff]  ;;  %v112_v6 = vld [vmem:[%s7917_s0 + $0x2f8] sm:$0xff] }
  0xcf   :  { %1454 = vmatmul.mubr.f32.gmra.mxu0 %v45_v7  ;;  %2148 = vmatprep.subr.mxu1 %v452_v8  ;;  %v109_v7 = vld [vmem:[%s7917_s0 + $0x2e0] sm:$0xff]  ;;  %v420_v8 = vld [vmem:[%s7916_s1 + $0x498] sm:$0xff] }
  0xd0   :  { %1892 = vmatpush1.msra.mxu0 %v323_v9  ;;  %1459 = vmatprep.mubr.f32.mxu0 %v54_v10  ;;  %v291_v9 = vld [vmem:[%s7916_s1 + $0x90] sm:$0xff]  ;;  %v118_v10 = vld [vmem:[%s7917_s0 + $0x328] sm:$0xff] }
  0xd1   :  { %1711 = vmatmul.mubr.f32.gmra.mxu1 %v47_v11  ;;  %1893 = vmatprep.subr.mxu0 %v320_v12  ;;  %v111_v11 = vld [vmem:[%s7917_s0 + $0x2f0] sm:$0xff]  ;;  %v288_v12 = vld [vmem:[%s7916_s1 + $0x78] sm:$0xff] }
  0xd2   :  { %2149 = vmatpush1.msra.mxu1 %v451_v13  ;;  %3372 = vmatprep.mubr.msk.f32.mxu1 %vm747_vm1, %v56_v14  ;;  %v419_v13 = vld [vmem:[%s7916_s1 + $0x490] sm:$0xff]  ;;  %v120_v14 = vld [vmem:[%s7917_s0 + $0x338] sm:$0xff] }
  0xd3   :  { %1460 = vmatmul.mubr.f32.gmra.mxu0 %v53_v15  ;;  %2150 = vmatprep.subr.mxu1 %v448_v16  ;;  %v117_v15 = vld [vmem:[%s7917_s0 + $0x320] sm:$0xff]  ;;  %v416_v16 = vld [vmem:[%s7916_s1 + $0x478] sm:$0xff] }
  0xd4   :  { %1894 = vmatpush1.msra.mxu0 %v319_v17  ;;  %1465 = vmatprep.mubr.f32.mxu0 %v62_v18  ;;  %v287_v17 = vld [vmem:[%s7916_s1 + $0x70] sm:$0xff]  ;;  %v126_v18 = vld [vmem:[%s7917_s0 + $0x368] sm:$0xff] }
  0xd5   :  { %1717 = vmatmul.mubr.f32.gmra.mxu1 %v55_v19  ;;  %1895 = vmatprep.subr.mxu0 %v316_v20  ;;  %v119_v19 = vld [vmem:[%s7917_s0 + $0x330] sm:$0xff]  ;;  %v284_v20 = vld [vmem:[%s7916_s1 + $0x58] sm:$0xff] }
  0xd6   :  { %2151 = vmatpush1.msra.mxu1 %v447_v21  ;;  %3373 = vmatprep.mubr.msk.f32.mxu1 %vm747_vm1, %v64_v22  ;;  %v415_v21 = vld [vmem:[%s7916_s1 + $0x470] sm:$0xff]  ;;  %v128_v22 = vld [vmem:[%s7917_s0 + $0x378] sm:$0xff] }
  0xd7   :  { %1466 = vmatmul.mubr.f32.gmra.mxu0 %v61_v23  ;;  %2152 = vmatprep.subr.mxu1 %v444_v24  ;;  %v125_v23 = vld [vmem:[%s7917_s0 + $0x360] sm:$0xff]  ;;  %v412_v24 = vld [vmem:[%s7916_s1 + $0x458] sm:$0xff] }
  0xd8   :  { %1896 = vmatpush1.msra.mxu0 %v315_v25  ;;  %1471 = vmatprep.mubr.f32.mxu0 %v70_v26  ;;  %v727_v25 = vlaneseq  ;;  %v283_v26 = vld [vmem:[%s7916_s1 + $0x50] sm:$0xff] }
  0xd9   :  { %1723 = vmatmul.mubr.f32.gmra.mxu1 %v63_v27  ;;  %1897 = vmatprep.subr.mxu0 %v312_v28  ;;  %v134_v27 = vld [vmem:[%s7917_s0 + $0x3a8] sm:$0xff]  ;;  %v127_v28 = vld [vmem:[%s7917_s0 + $0x370] sm:$0xff] }
  0xda   :  { %2153 = vmatpush1.msra.mxu1 %v443_v29  ;;  %3374 = vmatprep.mubr.msk.f32.mxu1 %vm747_vm1, %v72_v30  ;;  %v280_v29 = vld [vmem:[%s7916_s1 + $0x38] sm:$0xff]  ;;  %v411_v30 = vld [vmem:[%s7916_s1 + $0x450] sm:$0xff] }
  0xdb   :  { %1472 = vmatmul.mubr.f32.gmra.mxu0 %v69_v31  ;;  %2154 = vmatprep.subr.mxu1 %v440_v32  ;;  %v136_v31 = vld [vmem:[%s7917_s0 + $0x3b8] sm:$0xff]  ;;  %v133_v32 = vld [vmem:[%s7917_s0 + $0x3a0] sm:$0xff] }
  0xdc   :  { %1898 = vmatpush1.msra.mxu0 %v311_v33  ;;  %1477 = vmatprep.mubr.f32.mxu0 %v78_v34  ;;  %v408_v33 = vld [vmem:[%s7916_s1 + $0x438] sm:$0xff]  ;;  %v5176_v34 = vshrl.u32 %v727_v25, 7 }
  0xdd   :  { %1729 = vmatmul.mubr.f32.gmra.mxu1 %v71_v35  ;;  %1899 = vmatprep.subr.mxu0 %v308_v36  ;;  %v279_v35 = vld [vmem:[%s7916_s1 + $0x30] sm:$0xff]  ;;  %v142_v36 = vld [vmem:[%s7917_s0 + $0x3e8] sm:$0xff]  ;;  %v388_v25 = vld [vmem:[%s7916_s1 + $0x398] sm:$0xff] }
  0xde   :  { %2155 = vmatpush1.msra.mxu1 %v439_v37  ;;  %3375 = vmatprep.mubr.msk.f32.mxu1 %vm747_vm1, %v80_v38  ;;  %7959 = vst [vmem:[#allocation2_spill] sm:$0xff] %v5176_v34  ;;  %v135_v37 = vld [vmem:[%s7917_s0 + $0x3b0] sm:$0xff]  ;;  %v276_v38 = vld [vmem:[%s7916_s1 + $0x18] sm:$0xff] }
  0xdf   :  { %1478 = vmatmul.mubr.f32.gmra.mxu0 %v77_v39  ;;  %2156 = vmatprep.subr.mxu1 %v436_v40  ;;  %v407_v39 = vld [vmem:[%s7916_s1 + $0x430] sm:$0xff]  ;;  %v144_v40 = vld [vmem:[%s7917_s0 + $0x3f8] sm:$0xff] }
  0xe0   :  { %1900 = vmatpush1.msra.mxu0 %v307_v41  ;;  %1483 = vmatprep.mubr.f32.mxu0 %v86_v42  ;;  %v141_v41 = vld [vmem:[%s7917_s0 + $0x3e0] sm:$0xff]  ;;  %v404_v42 = vld [vmem:[%s7916_s1 + $0x418] sm:$0xff] }
  0xe1   :  { %1735 = vmatmul.mubr.f32.gmra.mxu1 %v79_v43  ;;  %1901 = vmatprep.subr.mxu0 %v304_v44  ;;  %v729_v43 = vsub.s32 0, %v5176_v34  ;;  %v275_v44 = vld [vmem:[%s7916_s1 + $0x10] sm:$0xff] }
  0xe2   :  { %2157 = vmatpush1.msra.mxu1 %v435_v45  ;;  %3376 = vmatprep.mubr.msk.f32.mxu1 %vm747_vm1, %v88_v46  ;;  %v150_v45 = vld [vmem:[%s7917_s0 + $0x428] sm:$0xff]  ;;  %v725_v46 = vld [vmem:[%s7919_s2] sm:$0xf] }
  0xe3   :  { %1484 = vmatmul.mubr.f32.gmra.mxu0 %v85_v47  ;;  %2158 = vmatprep.subr.mxu1 %v432_v48  ;;  %v143_v47 = vld [vmem:[%s7917_s0 + $0x3f0] sm:$0xff]  ;;  %v400_v48 = vld [vmem:[%s7916_s1 + $0x3f8] sm:$0xff] }
  0xe4   :  { %1902 = vmatpush1.msra.mxu0 %v303_v49  ;;  %1489 = vmatprep.mubr.f32.mxu0 %v94_v50  ;;  %v733_v49 = vsub.s32 1, %v5176_v34  ;;  %v403_v50 = vld [vmem:[%s7916_s1 + $0x410] sm:$0xff] }
  0xe5   :  { %1741 = vmatmul.mubr.f32.gmra.mxu1 %v87_v51  ;;  %1903 = vmatprep.subr.mxu0 %v300_v52  ;;  %v152_v51 = vld [vmem:[%s7917_s0 + $0x438] sm:$0xff]  ;;  %v5227_v52 = vrot.slane %v725_v46, %v729_v43 }
  0xe6   :  { %2159 = vmatpush1.msra.mxu1 %v431_v53  ;;  %3377 = vmatprep.mubr.msk.f32.mxu1 %vm747_vm1, %v96_v54  ;;  %v149_v53 = vld [vmem:[%s7917_s0 + $0x420] sm:$0xff]  ;;  %v528_v54 = vld [vmem:[%s7916_s1 + $0x7f8] sm:$0xff] }
  0xe7   :  { %1490 = vmatmul.mubr.f32.gmra.mxu0 %v93_v55  ;;  %2160 = vmatprep.subr.mxu1 %v428_v56  ;;  %v399_v55 = vld [vmem:[%s7916_s1 + $0x3f0] sm:$0xff]  ;;  %v158_v56 = vld [vmem:[%s7917_s0 + $0x468] sm:$0xff] }
  0xe8   :  { %1904 = vmatpush1.msra.mxu0 %v299_v57  ;;  %1495 = vmatprep.mubr.f32.mxu0 %v102_v58  ;;  %v151_v57 = vld [vmem:[%s7917_s0 + $0x430] sm:$0xff]  ;;  %v5245_v58 = vrot.slane %v725_v46, %v733_v49  ;;  %v184_v46 = vld [vmem:[%s7917_s0 + $0x538] sm:$0xff]  ;;  %v181_v49 = vld [vmem:[%s7917_s0 + $0x520] sm:$0xff] }
  0xe9   :  { %1747 = vmatmul.mubr.f32.gmra.mxu1 %v95_v59  ;;  %1905 = vmatprep.subr.mxu0 %v296_v60  ;;  %v396_v59 = vld [vmem:[%s7916_s1 + $0x3d8] sm:$0xff] }
  0xea   :  { %2161 = vmatpush1.msra.mxu1 %v427_v61  ;;  %3378 = vmatprep.mubr.msk.f32.mxu1 %vm747_vm1, %v104_v62  ;;  %v527_v61 = vld [vmem:[%s7916_s1 + $0x7f0] sm:$0xff]  ;;  %v160_v62 = vld [vmem:[%s7917_s0 + $0x478] sm:$0xff] }
  0xeb   :  { %1496 = vmatmul.mubr.f32.gmra.mxu0 %v101_v63  ;;  %2162 = vmatprep.subr.mxu1 %v424_v0  ;;  %v157_v0 = vld [vmem:[%s7917_s0 + $0x460] sm:$0xff] }
  0xec   :  { %1906 = vmatpush1.msra.mxu0 %v295_v1  ;;  %1501 = vmatprep.mubr.f32.mxu0 %v110_v2  ;;  %v524_v1 = vld [vmem:[%s7916_s1 + $0x7d8] sm:$0xff] }
  0xed   :  { %1753 = vmatmul.mubr.f32.gmra.mxu1 %v103_v3  ;;  %1907 = vmatprep.subr.mxu0 %v292_v4  ;;  %v395_v4 = vld [vmem:[%s7916_s1 + $0x3d0] sm:$0xff] }
  0xee   :  { %2163 = vmatpush1.msra.mxu1 %v423_v5  ;;  %3379 = vmatprep.mubr.msk.f32.mxu1 %vm747_vm1, %v112_v6  ;;  %v166_v5 = vld [vmem:[%s7917_s0 + $0x4a8] sm:$0xff] }
  0xef   :  { %1502 = vmatmul.mubr.f32.gmra.mxu0 %v109_v7  ;;  %2164 = vmatprep.subr.mxu1 %v420_v8  ;;  %v159_v8 = vld [vmem:[%s7917_s0 + $0x470] sm:$0xff] }
  0xf0   :  { %1908 = vmatpush1.msra.mxu0 %v291_v9  ;;  %1507 = vmatprep.mubr.f32.mxu0 %v118_v10  ;;  %v392_v9 = vld [vmem:[%s7916_s1 + $0x3b8] sm:$0xff] }
  0xf1   :  { %1759 = vmatmul.mubr.f32.gmra.mxu1 %v111_v11  ;;  %1909 = vmatprep.subr.mxu0 %v288_v12  ;;  %v523_v12 = vld [vmem:[%s7916_s1 + $0x7d0] sm:$0xff] }
  0xf2   :  { %2165 = vmatpush1.msra.mxu1 %v419_v13  ;;  %3380 = vmatprep.mubr.msk.f32.mxu1 %vm747_vm1, %v120_v14  ;;  %v168_v13 = vld [vmem:[%s7917_s0 + $0x4b8] sm:$0xff] }
  0xf3   :  { %1508 = vmatmul.mubr.f32.gmra.mxu0 %v117_v15  ;;  %2166 = vmatprep.subr.mxu1 %v416_v16  ;;  %v165_v16 = vld [vmem:[%s7917_s0 + $0x4a0] sm:$0xff] }
  0xf4   :  { %1910 = vmatpush1.msra.mxu0 %v287_v17  ;;  %1513 = vmatprep.mubr.f32.mxu0 %v126_v18  ;;  %v520_v17 = vld [vmem:[%s7916_s1 + $0x7b8] sm:$0xff] }
  0xf5   :  { %1765 = vmatmul.mubr.f32.gmra.mxu1 %v119_v19  ;;  %1911 = vmatprep.subr.mxu0 %v284_v20  ;;  %v391_v20 = vld [vmem:[%s7916_s1 + $0x3b0] sm:$0xff] }
  0xf6   :  { %2167 = vmatpush1.msra.mxu1 %v415_v21  ;;  %3381 = vmatprep.mubr.msk.f32.mxu1 %vm747_vm1, %v128_v22  ;;  %v174_v21 = vld [vmem:[%s7917_s0 + $0x4e8] sm:$0xff] }
  0xf7   :  { %1514 = vmatmul.mubr.f32.gmra.mxu0 %v125_v23  ;;  %2168 = vmatprep.subr.mxu1 %v412_v24  ;;  %v167_v24 = vld [vmem:[%s7917_s0 + $0x4b0] sm:$0xff] }
  0xf8   :  { %1912 = vmatpush1.msra.mxu0 %v283_v26  ;;  %1519 = vmatprep.mubr.f32.mxu0 %v134_v27 }
  0xf9   :  { %1771 = vmatmul.mubr.f32.gmra.mxu1 %v127_v28  ;;  %1913 = vmatprep.subr.mxu0 %v280_v29  ;;  %v519_v28 = vld [vmem:[%s7916_s1 + $0x7b0] sm:$0xff]  ;;  %v176_v29 = vld [vmem:[%s7917_s0 + $0x4f8] sm:$0xff] }
  0xfa   :  { %2169 = vmatpush1.msra.mxu1 %v411_v30  ;;  %3382 = vmatprep.mubr.msk.f32.mxu1 %vm747_vm1, %v136_v31 }
  0xfb   :  { %1520 = vmatmul.mubr.f32.gmra.mxu0 %v133_v32  ;;  %2170 = vmatprep.subr.mxu1 %v408_v33  ;;  %v173_v32 = vld [vmem:[%s7917_s0 + $0x4e0] sm:$0xff]  ;;  %v516_v33 = vld [vmem:[%s7916_s1 + $0x798] sm:$0xff] }
  0xfc   :  { %1914 = vmatpush1.msra.mxu0 %v279_v35  ;;  %1525 = vmatprep.mubr.f32.mxu0 %v142_v36 }
  0xfd   :  { %1777 = vmatmul.mubr.f32.gmra.mxu1 %v135_v37  ;;  %1915 = vmatprep.subr.mxu0 %v276_v38  ;;  %v387_v37 = vld [vmem:[%s7916_s1 + $0x390] sm:$0xff]  ;;  %v182_v38 = vld [vmem:[%s7917_s0 + $0x528] sm:$0xff] }
  0xfe   :  { %2171 = vmatpush1.msra.mxu1 %v407_v39  ;;  %3383 = vmatprep.mubr.msk.f32.mxu1 %vm747_vm1, %v144_v40 }
  0xff   :  { %1526 = vmatmul.mubr.f32.gmra.mxu0 %v141_v41  ;;  %2172 = vmatprep.subr.mxu1 %v404_v42  ;;  %v175_v41 = vld [vmem:[%s7917_s0 + $0x4f0] sm:$0xff]  ;;  %v384_v42 = vld [vmem:[%s7916_s1 + $0x378] sm:$0xff] }
 0x100   :  { %1916 = vmatpush1.msra.mxu0 %v275_v44  ;;  %1531 = vmatprep.mubr.f32.mxu0 %v150_v45  ;;  %v515_v45 = vld [vmem:[%s7916_s1 + $0x790] sm:$0xff] }
 0x101   :  { %1783 = vmatmul.mubr.f32.gmra.mxu1 %v143_v47  ;;  %1917 = vmatprep.subr.mxu0 %v400_v48 }
 0x102   :  { %2173 = vmatpush1.msra.mxu1 %v403_v50  ;;  %3384 = vmatprep.mubr.msk.f32.mxu1 %vm747_vm1, %v152_v51  ;;  %v923_v60 = vpop.f32.mrf.mxu0  ;;  %v512_v50 = vld [vmem:[%s7916_s1 + $0x778] sm:$0xff] }
 0x103   :  { %1532 = vmatmul.mubr.f32.gmra.mxu0 %v149_v53  ;;  %2174 = vmatprep.subr.mxu1 %v528_v54  ;;  %v924_v63 = vadd.f32 %v923_v60, %v5227_v52  ;;  %v383_v54 = vld [vmem:[%s7916_s1 + $0x370] sm:$0xff]  ;;  %v380_v60 = vld [vmem:[%s7916_s1 + $0x358] sm:$0xff] }
 0x104   :  { %1918 = vmatpush2.msra.mxu0 %v399_v55  ;;  %1537 = vmatprep.mubr.f32.mxu0 %v158_v56  ;;  %v1180_v2 = vpop.f32.mrf.mxu1  ;;  %v925_v3 = vpop.f32.mrf.mxu0  ;;  %v190_v55 = vld [vmem:[%s7917_s0 + $0x568] sm:$0xff] }
 0x105   :  { %1789 = vmatmul.mubr.f32.gmra.mxu1 %v151_v57  ;;  %1919 = vmatprep.subr.mxu0 %v396_v59  ;;  %v5269_v6 = vadd.f32 %v1180_v2, %v924_v63  ;;  %v926_v7 = vadd.f32 %v925_v3, %v5245_v58  ;;  %v183_v59 = vld [vmem:[%s7917_s0 + $0x530] sm:$0xff]  ;;  %v189_v3 = vld [vmem:[%s7917_s0 + $0x560] sm:$0xff] }
 0x106   :  { %2175 = vmatpush2.msra.mxu1 %v527_v61  ;;  %3385 = vmatprep.mubr.msk.f32.mxu1 %vm747_vm1, %v160_v62  ;;  %v1182_v10 = vpop.f32.mrf.mxu1  ;;  %v511_v63 = vld [vmem:[%s7916_s1 + $0x770] sm:$0xff] }
 0x107   :  { %v929_v11 = vpop.f32.mrf.mxu0  ;;  %1538 = vmatmul.mubr.f32.gmra.mxu0 %v157_v0  ;;  %2176 = vmatprep.subr.mxu1 %v524_v1  ;;  %v5285_v14 = vadd.f32 %v1182_v10, %v926_v7  ;;  %v192_v0 = vld [vmem:[%s7917_s0 + $0x578] sm:$0xff] }
 0x108   :  { %v930_v15 = vadd.f32 %v929_v11, %v5227_v52  ;;  %1920 = vmatpush2.msra.mxu0 %v395_v4  ;;  %1543 = vmatprep.mubr.f32.mxu0 %v166_v5  ;;  %v1186_v18 = vpop.f32.mrf.mxu1  ;;  %v508_v4 = vld [vmem:[%s7916_s1 + $0x758] sm:$0xff] }
 0x109   :  { %1795 = vmatmul.mubr.f32.gmra.mxu1 %v159_v8  ;;  %v931_v19 = vpop.f32.mrf.mxu0  ;;  %1921 = vmatprep.subr.mxu0 %v392_v9  ;;  %v379_v8 = vld [vmem:[%s7916_s1 + $0x350] sm:$0xff]  ;;  %v198_v9 = vld [vmem:[%s7917_s0 + $0x5a8] sm:$0xff] }
 0x10a   :  { %v5300_v22 = vadd.f32 %v1186_v18, %v930_v15  ;;  %v932_v23 = vadd.f32 %v931_v19, %v5245_v58  ;;  %2177 = vmatpush2.msra.mxu1 %v523_v12  ;;  %3386 = vmatprep.mubr.msk.f32.mxu1 %vm747_vm1, %v168_v13  ;;  %v1188_v26 = vpop.f32.mrf.mxu1  ;;  %v191_v12 = vld [vmem:[%s7917_s0 + $0x570] sm:$0xff]  ;;  %v376_v13 = vld [vmem:[%s7916_s1 + $0x338] sm:$0xff] }
 0x10b   :  { %v935_v27 = vpop.f32.mrf.mxu0  ;;  %1544 = vmatmul.mubr.f32.gmra.mxu0 %v165_v16  ;;  %2178 = vmatprep.subr.mxu1 %v520_v17  ;;  %v507_v17 = vld [vmem:[%s7916_s1 + $0x750] sm:$0xff]  ;;  %v200_v18 = vld [vmem:[%s7917_s0 + $0x5b8] sm:$0xff] }
 0x10c   :  { %v5316_v30 = vadd.f32 %v1188_v26, %v932_v23  ;;  %v936_v31 = vadd.f32 %v935_v27, %v5227_v52  ;;  %1922 = vmatpush2.msra.mxu0 %v391_v20  ;;  %1549 = vmatprep.mubr.f32.mxu0 %v174_v21  ;;  %v1192_v35 = vpop.f32.mrf.mxu1  ;;  %v197_v21 = vld [vmem:[%s7917_s0 + $0x5a0] sm:$0xff]  ;;  %v504_v23 = vld [vmem:[%s7916_s1 + $0x738] sm:$0xff]  ;;  %v375_v26 = vld [vmem:[%s7916_s1 + $0x330] sm:$0xff] }
 0x10d   :  { %1801 = vmatmul.mubr.f32.gmra.mxu1 %v167_v24  ;;  %v937_v36 = vpop.f32.mrf.mxu0  ;;  %1923 = vmatprep.subr.mxu0 %v388_v25  ;;  %v206_v27 = vld [vmem:[%s7917_s0 + $0x5e8] sm:$0xff] }
 0x10e   :  { %v5331_v39 = vadd.f32 %v1192_v35, %v936_v31  ;;  %v938_v40 = vadd.f32 %v937_v36, %v5245_v58  ;;  %2179 = vmatpush2.msra.mxu1 %v519_v28  ;;  %3387 = vmatprep.mubr.msk.f32.mxu1 %vm747_vm1, %v176_v29  ;;  %v1194_v43 = vpop.f32.mrf.mxu1  ;;  %v199_v31 = vld [vmem:[%s7917_s0 + $0x5b0] sm:$0xff] }
 0x10f   :  { %v941_v44 = vpop.f32.mrf.mxu0  ;;  %1550 = vmatmul.mubr.f32.gmra.mxu0 %v173_v32  ;;  %2180 = vmatprep.subr.mxu1 %v516_v33  ;;  %v372_v32 = vld [vmem:[%s7916_s1 + $0x318] sm:$0xff]  ;;  %v503_v36 = vld [vmem:[%s7916_s1 + $0x730] sm:$0xff] }
 0x110   :  { %v5347_v47 = vadd.f32 %v1194_v43, %v938_v40  ;;  %v942_v48 = vadd.f32 %v941_v44, %v5227_v52  ;;  %1924 = vmatpush2.msra.mxu0 %v387_v37  ;;  %1555 = vmatprep.mubr.f32.mxu0 %v182_v38  ;;  %v208_v37 = vld [vmem:[%s7917_s0 + $0x5f8] sm:$0xff] }
 0x111   :  { %v1198_v51 = vpop.f32.mrf.mxu1  ;;  %1807 = vmatmul.mubr.f32.gmra.mxu1 %v175_v41  ;;  %v943_v53 = vpop.f32.mrf.mxu0  ;;  %1925 = vmatprep.subr.mxu0 %v384_v42  ;;  %v205_v41 = vld [vmem:[%s7917_s0 + $0x5e0] sm:$0xff]  ;;  %v500_v42 = vld [vmem:[%s7916_s1 + $0x718] sm:$0xff] }
 0x112   :  { %v5362_v56 = vadd.f32 %v1198_v51, %v942_v48  ;;  %v944_v57 = vadd.f32 %v943_v53, %v5245_v58  ;;  %2181 = vmatpush2.msra.mxu1 %v515_v45  ;;  %3388 = vmatprep.mubr.msk.f32.mxu1 %vm747_vm1, %v184_v46  ;;  %v371_v45 = vld [vmem:[%s7916_s1 + $0x310] sm:$0xff]  ;;  %v214_v46 = vld [vmem:[%s7917_s0 + $0x628] sm:$0xff]  ;;  %v368_v51 = vld [vmem:[%s7916_s1 + $0x2f8] sm:$0xff] }
 0x113   :  { %v1200_v61 = vpop.f32.mrf.mxu1  ;;  %v947_v62 = vpop.f32.mrf.mxu0  ;;  %1556 = vmatmul.mubr.f32.gmra.mxu0 %v181_v49  ;;  %2182 = vmatprep.subr.mxu1 %v512_v50  ;;  %v207_v50 = vld [vmem:[%s7917_s0 + $0x5f0] sm:$0xff] }
 0x114   :  { %v5378_v1 = vadd.f32 %v1200_v61, %v944_v57  ;;  %v948_v2 = vadd.f32 %v947_v62, %v5227_v52  ;;  %1926 = vmatpush2.msra.mxu0 %v383_v54  ;;  %1561 = vmatprep.mubr.f32.mxu0 %v190_v55  ;;  %v499_v55 = vld [vmem:[%s7916_s1 + $0x710] sm:$0xff]  ;;  %v216_v57 = vld [vmem:[%s7917_s0 + $0x638] sm:$0xff]  ;;  %v213_v61 = vld [vmem:[%s7917_s0 + $0x620] sm:$0xff] }
 0x115   :  { %v1204_v5 = vpop.f32.mrf.mxu1  ;;  %1813 = vmatmul.mubr.f32.gmra.mxu1 %v183_v59  ;;  %v949_v7 = vpop.f32.mrf.mxu0  ;;  %1927 = vmatprep.subr.mxu0 %v380_v60  ;;  %v496_v62 = vld [vmem:[%s7916_s1 + $0x6f8] sm:$0xff] }
 0x116   :  { %v5393_v10 = vadd.f32 %v1204_v5, %v948_v2  ;;  %v950_v11 = vadd.f32 %v949_v7, %v5245_v58  ;;  %2183 = vmatpush2.msra.mxu1 %v511_v63  ;;  %3389 = vmatprep.mubr.msk.f32.mxu1 %vm747_vm1, %v192_v0  ;;  %v367_v2 = vld [vmem:[%s7916_s1 + $0x2f0] sm:$0xff] }
 0x117   :  { %v1206_v15 = vpop.f32.mrf.mxu1  ;;  %v953_v16 = vpop.f32.mrf.mxu0  ;;  %1562 = vmatmul.mubr.f32.gmra.mxu0 %v189_v3  ;;  %2184 = vmatprep.subr.mxu1 %v508_v4  ;;  %v222_v3 = vld [vmem:[%s7917_s0 + $0x668] sm:$0xff]  ;;  %v215_v7 = vld [vmem:[%s7917_s0 + $0x630] sm:$0xff] }
 0x118   :  { %v5409_v19 = vadd.f32 %v1206_v15, %v950_v11  ;;  %v954_v20 = vadd.f32 %v953_v16, %v5227_v52  ;;  %1928 = vmatpush2.msra.mxu0 %v379_v8  ;;  %1567 = vmatprep.mubr.f32.mxu0 %v198_v9  ;;  %v364_v8 = vld [vmem:[%s7916_s1 + $0x2d8] sm:$0xff] }
 0x119   :  { %v1210_v24 = vpop.f32.mrf.mxu1  ;;  %1819 = vmatmul.mubr.f32.gmra.mxu1 %v191_v12  ;;  %v955_v25 = vpop.f32.mrf.mxu0  ;;  %1929 = vmatprep.subr.mxu0 %v376_v13  ;;  %v495_v12 = vld [vmem:[%s7916_s1 + $0x6f0] sm:$0xff]  ;;  %v224_v13 = vld [vmem:[%s7917_s0 + $0x678] sm:$0xff] }
 0x11a   :  { %v5424_v28 = vadd.f32 %v1210_v24, %v954_v20  ;;  %v956_v29 = vadd.f32 %v955_v25, %v5245_v58  ;;  %2185 = vmatpush2.msra.mxu1 %v507_v17  ;;  %3390 = vmatprep.mubr.msk.f32.mxu1 %vm747_vm1, %v200_v18  ;;  %v221_v17 = vld [vmem:[%s7917_s0 + $0x660] sm:$0xff]  ;;  %v492_v18 = vld [vmem:[%s7916_s1 + $0x6d8] sm:$0xff]  ;;  %v230_v24 = vld [vmem:[%s7917_s0 + $0x6a8] sm:$0xff] }
 0x11b   :  { %v1212_v33 = vpop.f32.mrf.mxu1  ;;  %v959_v35 = vpop.f32.mrf.mxu0  ;;  %1568 = vmatmul.mubr.f32.gmra.mxu0 %v197_v21  ;;  %2186 = vmatprep.subr.mxu1 %v504_v23  ;;  %v363_v23 = vld [vmem:[%s7916_s1 + $0x2d0] sm:$0xff] }
 0x11c   :  { %v5440_v38 = vadd.f32 %v1212_v33, %v956_v29  ;;  %v960_v40 = vadd.f32 %v959_v35, %v5227_v52  ;;  %1930 = vmatpush2.msra.mxu0 %v375_v26  ;;  %1573 = vmatprep.mubr.f32.mxu0 %v206_v27  ;;  %v223_v27 = vld [vmem:[%s7917_s0 + $0x670] sm:$0xff]  ;;  %v360_v29 = vld [vmem:[%s7916_s1 + $0x2b8] sm:$0xff] }
 0x11d   :  { %v1216_v43 = vpop.f32.mrf.mxu1  ;;  %1825 = vmatmul.mubr.f32.gmra.mxu1 %v199_v31  ;;  %v961_v44 = vpop.f32.mrf.mxu0  ;;  %1931 = vmatprep.subr.mxu0 %v372_v32  ;;  %v491_v33 = vld [vmem:[%s7916_s1 + $0x6d0] sm:$0xff]  ;;  %v232_v35 = vld [vmem:[%s7917_s0 + $0x6b8] sm:$0xff] }
 0x11e   :  { %v5455_v48 = vadd.f32 %v1216_v43, %v960_v40  ;;  %v962_v49 = vadd.f32 %v961_v44, %v5245_v58  ;;  %2187 = vmatpush2.msra.mxu1 %v503_v36  ;;  %3391 = vmatprep.mubr.msk.f32.mxu1 %vm747_vm1, %v208_v37  ;;  %v229_v40 = vld [vmem:[%s7917_s0 + $0x6a0] sm:$0xff]  ;;  %v359_v44 = vld [vmem:[%s7916_s1 + $0x2b0] sm:$0xff] }
 0x11f   :  { %v1218_v53 = vpop.f32.mrf.mxu1  ;;  %v965_v54 = vpop.f32.mrf.mxu0  ;;  %1574 = vmatmul.mubr.f32.gmra.mxu0 %v205_v41  ;;  %2188 = vmatprep.subr.mxu1 %v500_v42  ;;  %v488_v41 = vld [vmem:[%s7916_s1 + $0x6b8] sm:$0xff] }
 0x120   :  { %v5471_v59 = vadd.f32 %v1218_v53, %v962_v49  ;;  %v966_v60 = vadd.f32 %v965_v54, %v5227_v52  ;;  %1932 = vmatpush2.msra.mxu0 %v371_v45  ;;  %1579 = vmatprep.mubr.f32.mxu0 %v214_v46  ;;  %v238_v45 = vld [vmem:[%s7917_s0 + $0x6e8] sm:$0xff] }
 0x121   :  { %v1222_v63 = vpop.f32.mrf.mxu1  ;;  %1831 = vmatmul.mubr.f32.gmra.mxu1 %v207_v50  ;;  %v967_v0 = vpop.f32.mrf.mxu0  ;;  %1933 = vmatprep.subr.mxu0 %v368_v51  ;;  %v231_v50 = vld [vmem:[%s7917_s0 + $0x6b0] sm:$0xff]  ;;  %v356_v51 = vld [vmem:[%s7916_s1 + $0x298] sm:$0xff] }
 0x122   :  { %v5486_v4 = vadd.f32 %v1222_v63, %v966_v60  ;;  %v968_v5 = vadd.f32 %v967_v0, %v5245_v58  ;;  %2189 = vmatpush2.msra.mxu1 %v499_v55  ;;  %3392 = vmatprep.mubr.msk.f32.mxu1 %vm747_vm1, %v216_v57  ;;  %v487_v55 = vld [vmem:[%s7916_s1 + $0x6b0] sm:$0xff]  ;;  %v240_v57 = vld [vmem:[%s7917_s0 + $0x6f8] sm:$0xff]  ;;  %v2922_v63 = vld [vmem:[%s7918_s3 + $0x48] sm:$0xff] }
 0x123   :  { %v1224_v9 = vpop.f32.mrf.mxu1  ;;  %v971_v11 = vpop.f32.mrf.mxu0  ;;  %1580 = vmatmul.mubr.f32.gmra.mxu0 %v213_v61  ;;  %2190 = vmatprep.subr.mxu1 %v496_v62  ;;  %v237_v62 = vld [vmem:[%s7917_s0 + $0x6e0] sm:$0xff] }
 0x124   :  { %v5502_v15 = vadd.f32 %v1224_v9, %v968_v5  ;;  %v972_v16 = vadd.f32 %v971_v11, %v5227_v52  ;;  %1934 = vmatpush2.msra.mxu0 %v367_v2  ;;  %1585 = vmatprep.mubr.f32.mxu0 %v222_v3  ;;  %v355_v3 = vld [vmem:[%s7916_s1 + $0x290] sm:$0xff]  ;;  %v484_v5 = vld [vmem:[%s7916_s1 + $0x698] sm:$0xff]  ;;  %v246_v11 = vld [vmem:[%s7917_s0 + $0x728] sm:$0xff] }
 0x125   :  { %v1228_v20 = vpop.f32.mrf.mxu1  ;;  %1837 = vmatmul.mubr.f32.gmra.mxu1 %v215_v7  ;;  %v973_v21 = vpop.f32.mrf.mxu0  ;;  %1935 = vmatprep.subr.mxu0 %v364_v8  ;;  %v239_v9 = vld [vmem:[%s7917_s0 + $0x6f0] sm:$0xff] }
 0x126   :  { %v5517_v25 = vadd.f32 %v1228_v20, %v972_v16  ;;  %v974_v26 = vadd.f32 %v973_v21, %v5245_v58  ;;  %2191 = vmatpush2.msra.mxu1 %v495_v12  ;;  %3393 = vmatprep.mubr.msk.f32.mxu1 %vm747_vm1, %v224_v13  ;;  %v483_v16 = vld [vmem:[%s7916_s1 + $0x690] sm:$0xff]  ;;  %v245_v21 = vld [vmem:[%s7917_s0 + $0x720] sm:$0xff] }
 0x127   :  { %v1230_v31 = vpop.f32.mrf.mxu1  ;;  %v977_v32 = vpop.f32.mrf.mxu0  ;;  %1586 = vmatmul.mubr.f32.gmra.mxu0 %v221_v17  ;;  %2192 = vmatprep.subr.mxu1 %v492_v18  ;;  %v248_v17 = vld [vmem:[%s7917_s0 + $0x738] sm:$0xff] }
 0x128   :  { %v5533_v36 = vadd.f32 %v1230_v31, %v974_v26  ;;  %v978_v37 = vadd.f32 %v977_v32, %v5227_v52  ;;  %1936 = vmatpush2.msra.mxu0 %v363_v23  ;;  %1591 = vmatprep.mubr.f32.mxu0 %v230_v24  ;;  %v352_v23 = vld [vmem:[%s7916_s1 + $0x278] sm:$0xff] }
 0x129   :  { %v1234_v42 = vpop.f32.mrf.mxu1  ;;  %1843 = vmatmul.mubr.f32.gmra.mxu1 %v223_v27  ;;  %v979_v43 = vpop.f32.mrf.mxu0  ;;  %1937 = vmatprep.subr.mxu0 %v360_v29  ;;  %v2923_v27 = vld [vmem:[%s7918_s3 + $0x50] sm:$0xff] }
 0x12a   :  { %v5548_v46 = vadd.f32 %v1234_v42, %v978_v37  ;;  %v980_v49 = vadd.f32 %v979_v43, %v5245_v58  ;;  %2193 = vmatpush2.msra.mxu1 %v491_v33  ;;  %3394 = vmatprep.mubr.msk.f32.mxu1 %vm747_vm1, %v232_v35  ;;  %v351_v29 = vld [vmem:[%s7916_s1 + $0x270] sm:$0xff]  ;;  %v480_v35 = vld [vmem:[%s7916_s1 + $0x678] sm:$0xff] }
 0x12b   :  { %v1236_v53 = vpop.f32.mrf.mxu1  ;;  %v983_v54 = vpop.f32.mrf.mxu0  ;;  %1592 = vmatmul.mubr.f32.gmra.mxu0 %v229_v40  ;;  %2194 = vmatprep.subr.mxu1 %v488_v41  ;;  %v247_v33 = vld [vmem:[%s7917_s0 + $0x730] sm:$0xff]  ;;  %v254_v41 = vld [vmem:[%s7917_s0 + $0x768] sm:$0xff] }
 0x12c   :  { %v5564_v60 = vadd.f32 %v1236_v53, %v980_v49  ;;  %v984_v61 = vadd.f32 %v983_v54, %v5227_v52  ;;  %1938 = vmatpush2.msra.mxu0 %v359_v44  ;;  %1597 = vmatprep.mubr.f32.mxu0 %v238_v45  ;;  %v479_v42 = vld [vmem:[%s7916_s1 + $0x670] sm:$0xff]  ;;  %v253_v45 = vld [vmem:[%s7917_s0 + $0x760] sm:$0xff]  ;;  %v256_v49 = vld [vmem:[%s7917_s0 + $0x778] sm:$0xff] }
 0x12d   :  { %v1240_v0 = vpop.f32.mrf.mxu1  ;;  %1849 = vmatmul.mubr.f32.gmra.mxu1 %v231_v50  ;;  %v985_v2 = vpop.f32.mrf.mxu0  ;;  %1939 = vmatprep.subr.mxu0 %v356_v51  ;;  %v348_v53 = vld [vmem:[%s7916_s1 + $0x258] sm:$0xff] }
 0x12e   :  { %v5579_v7 = vadd.f32 %v1240_v0, %v984_v61  ;;  %v986_v8 = vadd.f32 %v985_v2, %v5245_v58  ;;  %2195 = vmatpush2.msra.mxu1 %v487_v55  ;;  %3395 = vmatprep.mubr.msk.f32.mxu1 %vm747_vm1, %v240_v57  ;;  %v2924_v54 = vld [vmem:[%s7918_s3 + $0x58] sm:$0xff]  ;;  %v255_v61 = vld [vmem:[%s7917_s0 + $0x770] sm:$0xff] }
 0x12f   :  { %v1242_v12 = vpop.f32.mrf.mxu1  ;;  %v989_v13 = vpop.f32.mrf.mxu0  ;;  %1598 = vmatmul.mubr.f32.gmra.mxu0 %v237_v62  ;;  %2992 = vperm.xlu1 %3436, %v2922_v63   ;;  %v347_v62 = vld [vmem:[%s7916_s1 + $0x250] sm:$0xff]  ;;  %v476_v2 = vld [vmem:[%s7916_s1 + $0x658] sm:$0xff] }
 0x130   :  { %v5595_v18 = vadd.f32 %v1242_v12, %v986_v8  ;;  %v990_v20 = vadd.f32 %v989_v13, %v5227_v52  ;;  %1940 = vmatpush2.msra.mxu0 %v355_v3  ;;  %2196 = vmatprep.subr.mxu1 %v484_v5  ;;  %v262_v3 = vld [vmem:[%s7917_s0 + $0x7a8] sm:$0xff] }
 0x131   :  { %v1246_v24 = vpop.f32.mrf.mxu1  ;;  %1855 = vmatmul.mubr.f32.gmra.mxu1 %v239_v9  ;;  %v991_v26 = vpop.f32.mrf.mxu0  ;;  %1603 = vmatprep.mubr.f32.mxu0 %v246_v11  ;;  %v475_v9 = vld [vmem:[%s7916_s1 + $0x650] sm:$0xff]  ;;  %v261_v11 = vld [vmem:[%s7917_s0 + $0x7a0] sm:$0xff] }
 0x132   :  { %v5610_v31 = vadd.f32 %v1246_v24, %v990_v20  ;;  %v992_v32 = vadd.f32 %v991_v26, %v5245_v58  ;;  %2197 = vmatpush2.msra.mxu1 %v483_v16  ;;  %3396 = vmatprep.mubr.msk.f32.mxu1 %vm747_vm1, %v248_v17  ;;  %v264_v16 = vld [vmem:[%s7917_s0 + $0x7b8] sm:$0xff]  ;;  %v263_v24 = vld [vmem:[%s7917_s0 + $0x7b0] sm:$0xff] }
 0x133   :  { %v1248_v37 = vpop.f32.mrf.mxu1  ;;  %v995_v40 = vpop.f32.mrf.mxu0  ;;  %1604 = vmatmul.mubr.f32.gmra.mxu0 %v245_v21  ;;  %1941 = vmatprep.subr.mxu0 %v352_v23  ;;  %v344_v17 = vld [vmem:[%s7916_s1 + $0x238] sm:$0xff]  ;;  %v2925_v23 = vld [vmem:[%s7918_s3 + $0x60] sm:$0xff] }
 0x134   :  { %v5626_v43 = vadd.f32 %v1248_v37, %v992_v32  ;;  %v996_v44 = vadd.f32 %v995_v40, %v5227_v52  ;;  %2997 = vperm.xlu0 %3435, %v2923_v27   ;;  %1942 = vmatpush2.msra.mxu0 %v351_v29  ;;  %v343_v29 = vld [vmem:[%s7916_s1 + $0x230] sm:$0xff]  ;;  %v472_v32 = vld [vmem:[%s7916_s1 + $0x638] sm:$0xff]  ;;  %v270_v37 = vld [vmem:[%s7917_s0 + $0x7e8] sm:$0xff] }
 0x135   :  { %v1252_v50 = vpop.f32.mrf.mxu1  ;;  %1861 = vmatmul.mubr.f32.gmra.mxu1 %v247_v33  ;;  %v997_v51 = vpop.f32.mrf.mxu0  ;;  %2198 = vmatprep.subr.mxu1 %v480_v35  ;;  %v471_v40 = vld [vmem:[%s7916_s1 + $0x630] sm:$0xff] }
 0x136   :  { %v5641_v55 = vadd.f32 %v1252_v50, %v996_v44  ;;  %v998_v57 = vadd.f32 %v997_v51, %v5245_v58  ;;  %1609 = vmatprep.mubr.f32.mxu0 %v254_v41  ;;  %2199 = vmatpush2.msra.mxu1 %v479_v42  ;;  %v269_v44 = vld [vmem:[%s7917_s0 + $0x7e0] sm:$0xff]  ;;  %v340_v51 = vld [vmem:[%s7916_s1 + $0x218] sm:$0xff] }
 0x137   :  { %v1254_v63 = vpop.f32.mrf.mxu1  ;;  %v1001_v0 = vpop.f32.mrf.mxu0  ;;  %1610 = vmatmul.mubr.f32.gmra.mxu0 %v253_v45  ;;  %3397 = vmatprep.mubr.msk.f32.mxu1 %vm747_vm1, %v256_v49  ;;  %v272_v45 = vld [vmem:[%s7917_s0 + $0x7f8] sm:$0xff] }
 0x138   :  { %v5657_v5 = vadd.f32 %v1254_v63, %v998_v57  ;;  %v1002_v8 = vadd.f32 %v1001_v0, %v5227_v52  ;;  %1943 = vmatprep.subr.mxu0 %v348_v53  ;;  %3002 = vperm.xlu1 %3436, %v2924_v54   ;;  %v2926_v53 = vld [vmem:[%s7918_s3 + $0x68] sm:$0xff] }
 0x139   :  { %v1258_v12 = vpop.f32.mrf.mxu1  ;;  %1867 = vmatmul.mubr.f32.gmra.mxu1 %v255_v61  ;;  %1944 = vmatpush2.msra.mxu0 %v347_v62  ;;  %v1003_v13 = vpop.f32.mrf.mxu0  ;;  %v271_v61 = vld [vmem:[%s7917_s0 + $0x7f0] sm:$0xff] }
 0x13a   :  { %v5672_v20 = vadd.f32 %v1258_v12, %v1002_v8  ;;  %v1004_v21 = vadd.f32 %v1003_v13, %v5245_v58  ;;  %2200 = vmatprep.subr.mxu1 %v476_v2  ;;  %1615 = vmatprep.mubr.f32.mxu0 %v262_v3  ;;  %v339_v62 = vld [vmem:[%s7916_s1 + $0x210] sm:$0xff]  ;;  %v468_v2 = vld [vmem:[%s7916_s1 + $0x618] sm:$0xff] }
 0x13b   :  { %v1260_v26 = vpop.f32.mrf.mxu1  ;;  %2201 = vmatpush2.msra.mxu1 %v475_v9  ;;  %v1007_v27 = vpop.f32.mrf.mxu0  ;;  %1616 = vmatmul.mubr.f32.gmra.mxu0 %v261_v11  ;;  %v467_v9 = vld [vmem:[%s7916_s1 + $0x610] sm:$0xff]  ;;  %v592_v13 = vld [vmem:[%s7916_s1 + $0x9f8] sm:$0xff] }
 0x13c   :  { %v5687_v33 = vadd.f32 %v1260_v26, %v1004_v21  ;;  %v1008_v35 = vadd.f32 %v1007_v27, %v5227_v52  ;;  %3398 = vmatprep.mubr.msk.f32.mxu1 %vm747_vm1, %v264_v16  ;;  %1945 = vmatprep.subr.mxu0 %v344_v17  ;;  %v3437_v17 = vld [vmem:[%s7917_s0 + $0x8] sm:$0xff]  ;;  %v3438_v27 = vld [vmem:[%s7917_s0] sm:$0xff] }
 0x13d   :  { %3007 = vperm.xlu0 %3435, %v2925_v23   ;;  %v1264_v41 = vpop.f32.mrf.mxu1  ;;  %1873 = vmatmul.mubr.f32.gmra.mxu1 %v263_v24  ;;  %v1009_v42 = vpop.f32.mrf.mxu0  ;;  %v2927_v23 = vld [vmem:[%s7918_s3 + $0x70] sm:$0xff] }
 0x13e   :  { %v5703_v49 = vadd.f32 %v1264_v41, %v1008_v35  ;;  %1946 = vmatpush2.msra.mxu0 %v343_v29  ;;  %v1010_v50 = vadd.f32 %v1009_v42, %v5245_v58  ;;  %2202 = vmatprep.subr.mxu1 %v472_v32  ;;  %v591_v29 = vld [vmem:[%s7916_s1 + $0x9f0] sm:$0xff]  ;;  %v720_v32 = vld [vmem:[%s7916_s1 + $0xdf8] sm:$0xff] }
 0x13f   :  { %v1266_v54 = vpop.f32.mrf.mxu1  ;;  %1621 = vmatprep.mubr.f32.mxu0 %v270_v37  ;;  %2203 = vmatpush2.msra.mxu1 %v471_v40  ;;  %v1013_v57 = vpop.f32.mrf.mxu0  ;;  %v3439_v35 = vld [vmem:[%s7917_s0 + $0x18] sm:$0xff]  ;;  %v719_v41 = vld [vmem:[%s7916_s1 + $0xdf0] sm:$0xff] }
 0x140   :  { %v5718_v63 = vadd.f32 %v1266_v54, %v1010_v50  ;;  %v1014_v0 = vadd.f32 %v1013_v57, %v5227_v52  ;;  %1622 = vmatmul.mubr.f32.gmra.mxu0 %v269_v44  ;;  %3399 = vmatprep.mubr.msk.f32.mxu1 %vm747_vm1, %v272_v45  ;;  %v3440_v44 = vld [vmem:[%s7917_s0 + $0x10] sm:$0xff]  ;;  %v2928_v54 = vld [vmem:[%s7918_s3 + $0x78] sm:$0xff] }
 0x141   :  { %1947 = vmatprep.subr.mxu0 %v340_v51  ;;  %3012 = vperm.xlu1 %3436, %v2926_v53   ;;  %v1270_v3 = vpop.f32.mrf.mxu1  ;;  %v1015_v8 = vpop.f32.mrf.mxu0  ;;  %v588_v53 = vld [vmem:[%s7916_s1 + $0x9d8] sm:$0xff] }
 0x142   :  { %v5728_v11 = vadd.f32 %v1270_v3, %v1014_v0  ;;  %1879 = vmatmul.mubr.f32.gmra.mxu1 %v271_v61  ;;  %1948 = vmatpush2.msra.mxu0 %v339_v62  ;;  %v1016_v12 = vadd.f32 %v1015_v8, %v5245_v58  ;;  %v3441_v61 = vld [vmem:[%s7917_s0 + $0x48] sm:$0xff]  ;;  %v587_v0 = vld [vmem:[%s7916_s1 + $0x9d0] sm:$0xff]  ;;  %v3443_v3 = vld [vmem:[%s7917_s0 + $0x58] sm:$0xff] }
 0x143   :  { %2204 = vmatprep.subr.mxu1 %v468_v2  ;;  %v1272_v16 = vpop.f32.mrf.mxu1  ;;  %1949 = vmatprep.mubr.f32.mxu0 %v3437_v17  ;;  %v1019_v21 = vpop.f32.mrf.mxu0  ;;  %v3442_v2 = vld [vmem:[%s7917_s0 + $0x40] sm:$0xff]  ;;  %v3444_v17 = vld [vmem:[%s7917_s0 + $0x50] sm:$0xff] }
 0x144   :  { %v5740_v24 = vadd.f32 %v1272_v16, %v1016_v12  ;;  %2205 = vmatpush2.msra.mxu1 %v467_v9  ;;  %v1020_v26 = vadd.f32 %v1019_v21, %v5227_v52  ;;  %1950 = vmatmul.mubr.f32.vlgmr.msra.gmra.mxu0 %v3438_v27  ;;  %v584_v16 = vld [vmem:[%s7916_s1 + $0x9b8] sm:$0xff]  ;;  %v583_v27 = vld [vmem:[%s7916_s1 + $0x9b0] sm:$0xff] }
 0x145   :  { %2206 = vmatprep.mubr.f32.mxu1 %v3439_v35  ;;  %2399 = vmatprep.subr.mxu0 %v592_v13  ;;  %v1276_v37 = vpop.f32.mrf.mxu1  ;;  %v1021_v40 = vpop.f32.mrf.mxu0 }
 0x146   :  { %3017 = vperm.xlu0 %3435, %v2927_v23   ;;  %v5758_v42 = vadd.f32 %v1276_v37, %v1020_v26  ;;  %2207 = vmatmul.mubr.f32.vlgmr.msra.gmra.mxu1 %v3440_v44  ;;  %v1022_v45 = vadd.f32 %v1021_v40, %v5245_v58  ;;  %v2929_v26 = vld [vmem:[%s7918_s3 + $0x80] sm:$0xff]  ;;  %v3446_v37 = vld [vmem:[%s7917_s0 + $0x98] sm:$0xff] }
 0x147   :  { %2400 = vmatpush1.msra.mxu0 %v591_v29  ;;  %2656 = vmatprep.subr.mxu1 %v720_v32  ;;  %v1278_v50 = vpop.f32.mrf.mxu1  ;;  %v1025_v51 = vpop.f32.mrf.mxu0  ;;  %v3445_v32 = vld [vmem:[%s7917_s0 + $0x88] sm:$0xff]  ;;  %v716_v40 = vld [vmem:[%s7916_s1 + $0xdd8] sm:$0xff] }
 0x148   :  { %v5770_v57 = vadd.f32 %v1278_v50, %v1022_v45  ;;  %1955 = vmatprep.mubr.f32.mxu0 %v3441_v61  ;;  %2657 = vmatpush1.msra.mxu1 %v719_v41  ;;  %v1026_v62 = vadd.f32 %v1025_v51, %v5227_v52  ;;  %v3447_v41 = vld [vmem:[%s7917_s0 + $0x80] sm:$0xff]  ;;  %v715_v50 = vld [vmem:[%s7916_s1 + $0xdd0] sm:$0xff] }
 0x149   :  { %1956 = vmatmul.mubr.f32.gmra.mxu0 %v3442_v2  ;;  %2212 = vmatprep.mubr.f32.mxu1 %v3443_v3  ;;  %v1282_v8 = vpop.f32.mrf.mxu1  ;;  %v1027_v9 = vpop.f32.mrf.mxu0  ;;  %v2930_v2 = vld [vmem:[%s7918_s3 + $0x88] sm:$0xff] }
 0x14a   :  { %2401 = vmatprep.subr.mxu0 %v588_v53  ;;  %3022 = vperm.xlu1 %3436, %v2928_v54   ;;  %v5785_v12 = vadd.f32 %v1282_v8, %v1026_v62  ;;  %v1028_v13 = vadd.f32 %v1027_v9, %v5245_v58  ;;  %v3448_v54 = vld [vmem:[%s7917_s0 + $0x90] sm:$0xff]  ;;  %v3449_v8 = vld [vmem:[%s7917_s0 + $0xc8] sm:$0xff] }
 0x14b   :  { %2213 = vmatmul.mubr.f32.gmra.mxu1 %v3444_v17  ;;  %2402 = vmatpush1.msra.mxu0 %v587_v0  ;;  %v1284_v21 = vpop.f32.mrf.mxu1  ;;  %v1031_v23 = vpop.f32.mrf.mxu0  ;;  %v580_v0 = vld [vmem:[%s7916_s1 + $0x998] sm:$0xff] }
 0x14c   :  { %v5800_v29 = vadd.f32 %v1284_v21, %v1028_v13  ;;  %1961 = vmatprep.mubr.f32.mxu0 %v3445_v32  ;;  %v1032_v35 = vadd.f32 %v1031_v23, %v5227_v52  ;;  %2218 = vmatprep.mubr.f32.mxu1 %v3446_v37  ;;  %v579_v13 = vld [vmem:[%s7916_s1 + $0x990] sm:$0xff]  ;;  %v3451_v17 = vld [vmem:[%s7917_s0 + $0xd8] sm:$0xff] }
 0x14d   :  { %1962 = vmatmul.mubr.f32.gmra.mxu0 %v3447_v41  ;;  %2403 = vmatprep.subr.mxu0 %v584_v16  ;;  %v1288_v44 = vpop.f32.mrf.mxu1  ;;  %v1033_v45 = vpop.f32.mrf.mxu0  ;;  %v3450_v16 = vld [vmem:[%s7917_s0 + $0xc0] sm:$0xff]  ;;  %v576_v32 = vld [vmem:[%s7916_s1 + $0x978] sm:$0xff]  ;;  %v2931_v41 = vld [vmem:[%s7918_s3 + $0x90] sm:$0xff] }
 0x14e   :  { %3027 = vperm.xlu0 %3435, %v2929_v26   ;;  %v5818_v51 = vadd.f32 %v1288_v44, %v1032_v35  ;;  %2404 = vmatpush1.msra.mxu0 %v583_v27  ;;  %v1034_v53 = vadd.f32 %v1033_v45, %v5245_v58  ;;  %v3452_v35 = vld [vmem:[%s7917_s0 + $0xd0] sm:$0xff] }
 0x14f   :  { %2219 = vmatmul.mubr.f32.gmra.mxu1 %v3448_v54  ;;  %2658 = vmatprep.subr.mxu1 %v716_v40  ;;  %v1290_v61 = vpop.f32.mrf.mxu1  ;;  %v1037_v62 = vpop.f32.mrf.mxu0  ;;  %v575_v44 = vld [vmem:[%s7916_s1 + $0x970] sm:$0xff]  ;;  %v3454_v54 = vld [vmem:[%s7917_s0 + $0x118] sm:$0xff] }
 0x150   :  { %v5830_v3 = vadd.f32 %v1290_v61, %v1034_v53  ;;  %1967 = vmatprep.mubr.f32.mxu0 %v3449_v8  ;;  %2659 = vmatpush1.msra.mxu1 %v715_v50  ;;  %v1038_v9 = vadd.f32 %v1037_v62, %v5227_v52  ;;  %v3453_v50 = vld [vmem:[%s7917_s0 + $0x108] sm:$0xff]  ;;  %v712_v61 = vld [vmem:[%s7916_s1 + $0xdb8] sm:$0xff]  ;;  %v3455_v62 = vld [vmem:[%s7917_s0 + $0x100] sm:$0xff] }
 0x151   :  { %1968 = vmatmul.mubr.f32.gmra.mxu0 %v3450_v16  ;;  %2224 = vmatprep.mubr.f32.mxu1 %v3451_v17  ;;  %v1294_v21 = vpop.f32.mrf.mxu1  ;;  %v1039_v23 = vpop.f32.mrf.mxu0  ;;  %v711_v8 = vld [vmem:[%s7916_s1 + $0xdb0] sm:$0xff] }
 0x152   :  { %2405 = vmatprep.subr.mxu0 %v580_v0  ;;  %3032 = vperm.xlu1 %3436, %v2930_v2   ;;  %v5845_v26 = vadd.f32 %v1294_v21, %v1038_v9  ;;  %v1040_v27 = vadd.f32 %v1039_v23, %v5245_v58  ;;  %v3456_v16 = vld [vmem:[%s7917_s0 + $0x110] sm:$0xff]  ;;  %v572_v23 = vld [vmem:[%s7916_s1 + $0x958] sm:$0xff] }
 0x153   :  { %2225 = vmatmul.mubr.f32.gmra.mxu1 %v3452_v35  ;;  %2406 = vmatpush1.msra.mxu0 %v579_v13  ;;  %v1296_v37 = vpop.f32.mrf.mxu1  ;;  %v1043_v40 = vpop.f32.mrf.mxu0  ;;  %v3457_v35 = vld [vmem:[%s7917_s0 + $0x148] sm:$0xff] }
 0x154   :  { %v5860_v45 = vadd.f32 %v1296_v37, %v1040_v27  ;;  %1973 = vmatprep.mubr.f32.mxu0 %v3453_v50  ;;  %v1044_v53 = vadd.f32 %v1043_v40, %v5227_v52  ;;  %2230 = vmatprep.mubr.f32.mxu1 %v3454_v54  ;;  %v2932_v27 = vld [vmem:[%s7918_s3 + $0x98] sm:$0xff]  ;;  %v571_v40 = vld [vmem:[%s7916_s1 + $0x950] sm:$0xff] }
 0x155   :  { %1974 = vmatmul.mubr.f32.gmra.mxu0 %v3455_v62  ;;  %2407 = vmatprep.subr.mxu0 %v576_v32  ;;  %v1300_v0 = vpop.f32.mrf.mxu1  ;;  %v1045_v2 = vpop.f32.mrf.mxu0  ;;  %v568_v62 = vld [vmem:[%s7916_s1 + $0x938] sm:$0xff] }
 0x156   :  { %3037 = vperm.xlu0 %3435, %v2931_v41   ;;  %v5878_v9 = vadd.f32 %v1300_v0, %v1044_v53  ;;  %2408 = vmatpush1.msra.mxu0 %v575_v44  ;;  %v1046_v13 = vadd.f32 %v1045_v2, %v5245_v58  ;;  %v3458_v41 = vld [vmem:[%s7917_s0 + $0x140] sm:$0xff]  ;;  %v3459_v44 = vld [vmem:[%s7917_s0 + $0x158] sm:$0xff]  ;;  %v3460_v0 = vld [vmem:[%s7917_s0 + $0x150] sm:$0xff] }
 0x157   :  { %2231 = vmatmul.mubr.f32.gmra.mxu1 %v3456_v16  ;;  %2660 = vmatprep.subr.mxu1 %v712_v61  ;;  %v1302_v17 = vpop.f32.mrf.mxu1  ;;  %v1049_v21 = vpop.f32.mrf.mxu0  ;;  %v567_v16 = vld [vmem:[%s7916_s1 + $0x930] sm:$0xff] }
 0x158   :  { %v5890_v32 = vadd.f32 %v1302_v17, %v1046_v13  ;;  %1979 = vmatprep.mubr.f32.mxu0 %v3457_v35  ;;  %2661 = vmatpush1.msra.mxu1 %v711_v8  ;;  %v1050_v37 = vadd.f32 %v1049_v21, %v5227_v52  ;;  %v2933_v13 = vld [vmem:[%s7918_s3 + $0xa0] sm:$0xff]  ;;  %v3461_v21 = vld [vmem:[%s7917_s0 + $0x188] sm:$0xff]  ;;  %v708_v35 = vld [vmem:[%s7916_s1 + $0xd98] sm:$0xff] }
 0x159   :  { %1980 = vmatmul.mubr.f32.gmra.mxu0 %v3458_v41  ;;  %2236 = vmatprep.mubr.f32.mxu1 %v3459_v44  ;;  %v1306_v50 = vpop.f32.mrf.mxu1  ;;  %v1051_v53 = vpop.f32.mrf.mxu0  ;;  %v707_v44 = vld [vmem:[%s7916_s1 + $0xd90] sm:$0xff] }
 0x15a   :  { %2409 = vmatprep.subr.mxu0 %v572_v23  ;;  %3042 = vperm.xlu1 %3436, %v2932_v27   ;;  %v5905_v54 = vadd.f32 %v1306_v50, %v1050_v37  ;;  %v1052_v61 = vadd.f32 %v1051_v53, %v5245_v58  ;;  %v3462_v27 = vld [vmem:[%s7917_s0 + $0x198] sm:$0xff]  ;;  %v3463_v37 = vld [vmem:[%s7917_s0 + $0x180] sm:$0xff] }
 0x15b   :  { %2237 = vmatmul.mubr.f32.gmra.mxu1 %v3460_v0  ;;  %2410 = vmatpush1.msra.mxu0 %v571_v40  ;;  %v1308_v2 = vpop.f32.mrf.mxu1  ;;  %v1055_v8 = vpop.f32.mrf.mxu0 }
 0x15c   :  { %v5920_v17 = vadd.f32 %v1308_v2, %v1052_v61  ;;  %1985 = vmatprep.mubr.f32.mxu0 %v3461_v21  ;;  %v1056_v23 = vadd.f32 %v1055_v8, %v5227_v52  ;;  %2242 = vmatprep.mubr.f32.mxu1 %v3462_v27  ;;  %v3464_v61 = vld [vmem:[%s7917_s0 + $0x190] sm:$0xff]  ;;  %v564_v2 = vld [vmem:[%s7916_s1 + $0x918] sm:$0xff]  ;;  %v2934_v8 = vld [vmem:[%s7918_s3 + $0xa8] sm:$0xff] }
 0x15d   :  { %1986 = vmatmul.mubr.f32.gmra.mxu0 %v3463_v37  ;;  %2411 = vmatprep.subr.mxu0 %v568_v62  ;;  %v1312_v40 = vpop.f32.mrf.mxu1  ;;  %v1057_v41 = vpop.f32.mrf.mxu0  ;;  %v3466_v27 = vld [vmem:[%s7917_s0 + $0x1c0] sm:$0xff] }
 0x15e   :  { %3047 = vperm.xlu0 %3435, %v2933_v13   ;;  %v5938_v50 = vadd.f32 %v1312_v40, %v1056_v23  ;;  %2412 = vmatpush1.msra.mxu0 %v567_v16  ;;  %v1058_v53 = vadd.f32 %v1057_v41, %v5245_v58  ;;  %v3465_v16 = vld [vmem:[%s7917_s0 + $0x1c8] sm:$0xff]  ;;  %v563_v23 = vld [vmem:[%s7916_s1 + $0x910] sm:$0xff] }
 0x15f   :  { %2243 = vmatmul.mubr.f32.gmra.mxu1 %v3464_v61  ;;  %2662 = vmatprep.subr.mxu1 %v708_v35  ;;  %v1314_v0 = vpop.f32.mrf.mxu1  ;;  %v1061_v62 = vpop.f32.mrf.mxu0  ;;  %v3467_v35 = vld [vmem:[%s7917_s0 + $0x1d8] sm:$0xff]  ;;  %v3468_v61 = vld [vmem:[%s7917_s0 + $0x1d0] sm:$0xff] }
 0x160   :  { %2663 = vmatpush1.msra.mxu1 %v707_v44  ;;  %v5950_v13 = vadd.f32 %v1314_v0, %v1058_v53  ;;  %1991 = vmatprep.mubr.f32.mxu0 %v3465_v16  ;;  %v1062_v21 = vadd.f32 %v1061_v62, %v5227_v52  ;;  %v560_v53 = vld [vmem:[%s7916_s1 + $0x8f8] sm:$0xff] }
 0x161   :  { %1992 = vmatmul.mubr.f32.gmra.mxu0 %v3466_v27  ;;  %2248 = vmatprep.mubr.f32.mxu1 %v3467_v35  ;;  %v1318_v37 = vpop.f32.mrf.mxu1  ;;  %v1063_v40 = vpop.f32.mrf.mxu0  ;;  %v704_v35 = vld [vmem:[%s7916_s1 + $0xd78] sm:$0xff] }
 0x162   :  { %2413 = vmatprep.subr.mxu0 %v564_v2  ;;  %3052 = vperm.xlu1 %3436, %v2934_v8   ;;  %v5965_v41 = vadd.f32 %v1318_v37, %v1062_v21  ;;  %v1064_v44 = vadd.f32 %v1063_v40, %v5245_v58  ;;  %v2935_v2 = vld [vmem:[%s7918_s3 + $0xb0] sm:$0xff]  ;;  %v3469_v21 = vld [vmem:[%s7917_s0 + $0x208] sm:$0xff]  ;;  %v3471_v37 = vld [vmem:[%s7917_s0 + $0x200] sm:$0xff] }
 0x163   :  { %2249 = vmatmul.mubr.f32.gmra.mxu1 %v3468_v61  ;;  %2414 = vmatpush1.msra.mxu0 %v563_v23  ;;  %v1320_v0 = vpop.f32.mrf.mxu1  ;;  %v1067_v62 = vpop.f32.mrf.mxu0  ;;  %v559_v8 = vld [vmem:[%s7916_s1 + $0x8f0] sm:$0xff]  ;;  %v3470_v23 = vld [vmem:[%s7917_s0 + $0x218] sm:$0xff] }
 0x164   :  { %v5980_v16 = vadd.f32 %v1320_v0, %v1064_v44  ;;  %1997 = vmatprep.mubr.f32.mxu0 %v3469_v21  ;;  %v1068_v27 = vadd.f32 %v1067_v62, %v5227_v52  ;;  %2254 = vmatprep.mubr.f32.mxu1 %v3470_v23  ;;  %v703_v61 = vld [vmem:[%s7916_s1 + $0xd70] sm:$0xff] }
 0x165   :  { %1998 = vmatmul.mubr.f32.gmra.mxu0 %v3471_v37  ;;  %2415 = vmatprep.subr.mxu0 %v560_v53  ;;  %v1324_v40 = vpop.f32.mrf.mxu1  ;;  %v1069_v44 = vpop.f32.mrf.mxu0  ;;  %v3472_v21 = vld [vmem:[%s7917_s0 + $0x210] sm:$0xff]  ;;  %v556_v37 = vld [vmem:[%s7916_s1 + $0x8d8] sm:$0xff] }
 0x166   :  { %3057 = vperm.xlu0 %3435, %v2935_v2   ;;  %v5998_v0 = vadd.f32 %v1324_v40, %v1068_v27  ;;  %2416 = vmatpush1.msra.mxu0 %v559_v8  ;;  %v1070_v62 = vadd.f32 %v1069_v44, %v5245_v58  ;;  %v2936_v2 = vld [vmem:[%s7918_s3 + $0xb8] sm:$0xff]  ;;  %v3473_v27 = vld [vmem:[%s7917_s0 + $0x248] sm:$0xff]  ;;  %v555_v40 = vld [vmem:[%s7916_s1 + $0x8d0] sm:$0xff] }
 0x167   :  { %2255 = vmatmul.mubr.f32.gmra.mxu1 %v3472_v21  ;;  %2664 = vmatprep.subr.mxu1 %v704_v35  ;;  %v1326_v23 = vpop.f32.mrf.mxu1  ;;  %v1073_v53 = vpop.f32.mrf.mxu0  ;;  %v3474_v44 = vld [vmem:[%s7917_s0 + $0x240] sm:$0xff] }
 0x168   :  { %2665 = vmatpush1.msra.mxu1 %v703_v61  ;;  %v6010_v8 = vadd.f32 %v1326_v23, %v1070_v62  ;;  %2003 = vmatprep.mubr.f32.mxu0 %v3473_v27  ;;  %v1074_v35 = vadd.f32 %v1073_v53, %v5227_v52  ;;  %v3475_v61 = vld [vmem:[%s7917_s0 + $0x258] sm:$0xff] }
 0x169   :  { %2004 = vmatmul.mubr.f32.gmra.mxu0 %v3474_v44  ;;  %2260 = vmatprep.mubr.f32.mxu1 %v3475_v61  ;;  %v1330_v62 = vpop.f32.mrf.mxu1  ;;  %v1075_v21 = vpop.f32.mrf.mxu0  ;;  %v552_v27 = vld [vmem:[%s7916_s1 + $0x8b8] sm:$0xff]  ;;  %v3476_v44 = vld [vmem:[%s7917_s0 + $0x250] sm:$0xff] }
 0x16a   :  { %7960 = vst [vmem:[#allocation3_spill] sm:$0xff] %v6010_v8  ;;  %2417 = vmatprep.subr.mxu0 %v556_v37  ;;  %3062 = vperm.xlu1 %3436, %v2936_v2   ;;  %v6025_v23 = vadd.f32 %v1330_v62, %v1074_v35  ;;  %v1076_v53 = vadd.f32 %v1075_v21, %v5245_v58  ;;  %v700_v37 = vld [vmem:[%s7916_s1 + $0xd58] sm:$0xff]  ;;  %v2937_v2 = vld [vmem:[%s7918_s3 + $0xc0] sm:$0xff]  ;;  %v3477_v62 = vld [vmem:[%s7917_s0 + $0x288] sm:$0xff] }
 0x16b   :  { %2261 = vmatmul.mubr.f32.gmra.mxu1 %v3476_v44  ;;  %2418 = vmatpush1.msra.mxu0 %v555_v40  ;;  %v1332_v34 = vpop.f32.mrf.mxu1  ;;  %v1079_v61 = vpop.f32.mrf.mxu0  ;;  %v3478_v40 = vld [vmem:[%s7917_s0 + $0x298] sm:$0xff]  ;;  %v551_v44 = vld [vmem:[%s7916_s1 + $0x8b0] sm:$0xff] }
 0x16c   :  { %7961 = vst [vmem:[#allocation4_spill] sm:$0xff] %v6025_v23  ;;  %v6040_v35 = vadd.f32 %v1332_v34, %v1076_v53  ;;  %2009 = vmatprep.mubr.f32.mxu0 %v3477_v62  ;;  %v1080_v21 = vadd.f32 %v1079_v61, %v5227_v52  ;;  %2266 = vmatprep.mubr.f32.mxu1 %v3478_v40  ;;  %v3479_v34 = vld [vmem:[%s7917_s0 + $0x280] sm:$0xff]  ;;  %v699_v61 = vld [vmem:[%s7916_s1 + $0xd50] sm:$0xff]  ;;  %v548_v8 = vld [vmem:[%s7916_s1 + $0x898] sm:$0xff] }
 0x16d   :  { %2010 = vmatmul.mubr.f32.gmra.mxu0 %v3479_v34  ;;  %2419 = vmatprep.subr.mxu0 %v552_v27  ;;  %v1336_v53 = vpop.f32.mrf.mxu1  ;;  %v1081_v62 = vpop.f32.mrf.mxu0  ;;  %v3480_v23 = vld [vmem:[%s7917_s0 + $0x290] sm:$0xff] }
 0x16e   :  { %7962 = vst [vmem:[#allocation5_spill] sm:$0xff] %v6040_v35  ;;  %2666 = vmatprep.subr.mxu1 %v700_v37  ;;  %3067 = vperm.xlu0 %3435, %v2937_v2   ;;  %v6058_v35 = vadd.f32 %v1336_v53, %v1080_v21  ;;  %v1082_v40 = vadd.f32 %v1081_v62, %v5245_v58  ;;  %v2938_v37 = vld [vmem:[%s7918_s3 + $0xc8] sm:$0xff]  ;;  %v3482_v53 = vld [vmem:[%s7917_s0 + $0x2c0] sm:$0xff] }
 0x16f   :  { %2267 = vmatmul.mubr.f32.gmra.mxu1 %v3480_v23  ;;  %2420 = vmatpush1.msra.mxu0 %v551_v44  ;;  %v1338_v34 = vpop.f32.mrf.mxu1  ;;  %v1085_v27 = vpop.f32.mrf.mxu0  ;;  %v3481_v21 = vld [vmem:[%s7917_s0 + $0x2c8] sm:$0xff]  ;;  %v547_v44 = vld [vmem:[%s7916_s1 + $0x890] sm:$0xff] }
 0x170   :  { %7963 = vst [vmem:[#allocation6_spill] sm:$0xff] %v6058_v35  ;;  %2667 = vmatpush1.msra.mxu1 %v699_v61  ;;  %v6070_v2 = vadd.f32 %v1338_v34, %v1082_v40  ;;  %2015 = vmatprep.mubr.f32.mxu0 %v3481_v21  ;;  %v1086_v23 = vadd.f32 %v1085_v27, %v5227_v52  ;;  %v3483_v61 = vld [vmem:[%s7917_s0 + $0x2d8] sm:$0xff] }
 0x171   :  { %2016 = vmatmul.mubr.f32.gmra.mxu0 %v3482_v53  ;;  %2272 = vmatprep.mubr.f32.mxu1 %v3483_v61  ;;  %v1342_v62 = vpop.f32.mrf.mxu1  ;;  %v1087_v40 = vpop.f32.mrf.mxu0  ;;  %v544_v21 = vld [vmem:[%s7916_s1 + $0x878] sm:$0xff]  ;;  %v3484_v53 = vld [vmem:[%s7917_s0 + $0x2d0] sm:$0xff] }
 0x172   :  { %7964 = vst [vmem:[#allocation7_spill] sm:$0xff] %v6070_v2  ;;  %2421 = vmatprep.subr.mxu0 %v548_v8  ;;  %3072 = vperm.xlu1 %3436, %v2938_v37   ;;  %v6085_v34 = vadd.f32 %v1342_v62, %v1086_v23  ;;  %v1088_v27 = vadd.f32 %v1087_v40, %v5245_v58  ;;  %v696_v8 = vld [vmem:[%s7916_s1 + $0xd38] sm:$0xff]  ;;  %v2939_v37 = vld [vmem:[%s7918_s3 + $0xd0] sm:$0xff]  ;;  %v3485_v62 = vld [vmem:[%s7917_s0 + $0x308] sm:$0xff] }
 0x173   :  { %2273 = vmatmul.mubr.f32.gmra.mxu1 %v3484_v53  ;;  %2422 = vmatpush1.msra.mxu0 %v547_v44  ;;  %v1344_v2 = vpop.f32.mrf.mxu1  ;;  %v1091_v61 = vpop.f32.mrf.mxu0  ;;  %v3486_v44 = vld [vmem:[%s7917_s0 + $0x318] sm:$0xff]  ;;  %v543_v53 = vld [vmem:[%s7916_s1 + $0x870] sm:$0xff] }
 0x174   :  { %7965 = vst [vmem:[#allocation8_spill] sm:$0xff] %v6085_v34  ;;  %v6100_v23 = vadd.f32 %v1344_v2, %v1088_v27  ;;  %2021 = vmatprep.mubr.f32.mxu0 %v3485_v62  ;;  %v1092_v40 = vadd.f32 %v1091_v61, %v5227_v52  ;;  %2278 = vmatprep.mubr.f32.mxu1 %v3486_v44  ;;  %v3487_v2 = vld [vmem:[%s7917_s0 + $0x300] sm:$0xff]  ;;  %v695_v61 = vld [vmem:[%s7916_s1 + $0xd30] sm:$0xff]  ;;  %v540_v35 = vld [vmem:[%s7916_s1 + $0x858] sm:$0xff] }
 0x175   :  { %2022 = vmatmul.mubr.f32.gmra.mxu0 %v3487_v2  ;;  %2423 = vmatprep.subr.mxu0 %v544_v21  ;;  %v1348_v27 = vpop.f32.mrf.mxu1  ;;  %v1093_v62 = vpop.f32.mrf.mxu0  ;;  %v3488_v34 = vld [vmem:[%s7917_s0 + $0x310] sm:$0xff] }
 0x176   :  { %7966 = vst [vmem:[#allocation9_spill] sm:$0xff] %v6100_v23  ;;  %2668 = vmatprep.subr.mxu1 %v696_v8  ;;  %3077 = vperm.xlu0 %3435, %v2939_v37   ;;  %v6118_v23 = vadd.f32 %v1348_v27, %v1092_v40  ;;  %v1094_v44 = vadd.f32 %v1093_v62, %v5245_v58  ;;  %v2940_v8 = vld [vmem:[%s7918_s3 + $0xd8] sm:$0xff]  ;;  %v3489_v40 = vld [vmem:[%s7917_s0 + $0x348] sm:$0xff]  ;;  %v3490_v27 = vld [vmem:[%s7917_s0 + $0x340] sm:$0xff] }
 0x177   :  { %2279 = vmatmul.mubr.f32.gmra.mxu1 %v3488_v34  ;;  %2424 = vmatpush1.msra.mxu0 %v543_v53  ;;  %v1350_v2 = vpop.f32.mrf.mxu1  ;;  %v1097_v21 = vpop.f32.mrf.mxu0  ;;  %v539_v53 = vld [vmem:[%s7916_s1 + $0x850] sm:$0xff] }
 0x178   :  { %7967 = vst [vmem:[#allocation10_spill] sm:$0xff] %v6118_v23  ;;  %2669 = vmatpush1.msra.mxu1 %v695_v61  ;;  %v6130_v37 = vadd.f32 %v1350_v2, %v1094_v44  ;;  %2027 = vmatprep.mubr.f32.mxu0 %v3489_v40  ;;  %v1098_v34 = vadd.f32 %v1097_v21, %v5227_v52  ;;  %v3491_v61 = vld [vmem:[%s7917_s0 + $0x358] sm:$0xff] }
 0x179   :  { %2028 = vmatmul.mubr.f32.gmra.mxu0 %v3490_v27  ;;  %2284 = vmatprep.mubr.f32.mxu1 %v3491_v61  ;;  %v1354_v62 = vpop.f32.mrf.mxu1  ;;  %v1099_v44 = vpop.f32.mrf.mxu0  ;;  %v692_v2 = vld [vmem:[%s7916_s1 + $0xd18] sm:$0xff]  ;;  %v3492_v27 = vld [vmem:[%s7917_s0 + $0x350] sm:$0xff] }
 0x17a   :  { %7968 = vst [vmem:[#allocation11_spill] sm:$0xff] %v6130_v37  ;;  %2425 = vmatprep.subr.mxu0 %v540_v35  ;;  %3082 = vperm.xlu1 %3436, %v2940_v8   ;;  %v6148_v21 = vadd.f32 %v1354_v62, %v1098_v34  ;;  %v1100_v40 = vadd.f32 %v1099_v44, %v5245_v58  ;;  %v536_v23 = vld [vmem:[%s7916_s1 + $0x838] sm:$0xff]  ;;  %v691_v35 = vld [vmem:[%s7916_s1 + $0xd10] sm:$0xff]  ;;  %v3493_v34 = vld [vmem:[%s7917_s0 + $0x388] sm:$0xff] }
 0x17b   :  { %2285 = vmatmul.mubr.f32.gmra.mxu1 %v3492_v27  ;;  %2426 = vmatpush1.msra.mxu0 %v539_v53  ;;  %v1356_v37 = vpop.f32.mrf.mxu1  ;;  %v1103_v61 = vpop.f32.mrf.mxu0  ;;  %v2941_v62 = vld [vmem:[%s7918_s3 + $0xe0] sm:$0xff] }
 0x17c   :  { %7969 = vst [vmem:[#allocation12_spill] sm:$0xff] %v6148_v21  ;;  %v6160_v8 = vadd.f32 %v1356_v37, %v1100_v40  ;;  %2033 = vmatprep.mubr.f32.mxu0 %v3493_v34  ;;  %2670 = vmatprep.subr.mxu1 %v692_v2  ;;  %v1104_v53 = vadd.f32 %v1103_v61, %v5227_v52  ;;  %v3494_v44 = vld [vmem:[%s7917_s0 + $0x380] sm:$0xff]  ;;  %v3495_v37 = vld [vmem:[%s7917_s0 + $0x398] sm:$0xff]  ;;  %v535_v2 = vld [vmem:[%s7916_s1 + $0x830] sm:$0xff] }
 0x17d   :  { %2034 = vmatmul.mubr.f32.gmra.mxu0 %v3494_v44  ;;  %2290 = vmatprep.mubr.f32.mxu1 %v3495_v37  ;;  %v1360_v40 = vpop.f32.mrf.mxu1  ;;  %v1105_v27 = vpop.f32.mrf.mxu0  ;;  %v3496_v44 = vld [vmem:[%s7917_s0 + $0x390] sm:$0xff]  ;;  %v532_v21 = vld [vmem:[%s7916_s1 + $0x818] sm:$0xff] }
 0x17e   :  { %7970 = vst [vmem:[#allocation13_spill] sm:$0xff] %v6160_v8  ;;  %2427 = vmatprep.subr.mxu0 %v536_v23  ;;  %2671 = vmatpush1.msra.mxu1 %v691_v35  ;;  %v6178_v61 = vadd.f32 %v1360_v40, %v1104_v53  ;;  %v1106_v34 = vadd.f32 %v1105_v27, %v5245_v58  ;;  %v2942_v23 = vld [vmem:[%s7918_s3 + $0xe8] sm:$0xff]  ;;  %v531_v40 = vld [vmem:[%s7916_s1 + $0x810] sm:$0xff]  ;;  %v3498_v27 = vld [vmem:[%s7917_s0 + $0x3c0] sm:$0xff] }
 0x17f   :  { %3087 = vperm.xlu0 %3435, %v2941_v62   ;;  %2291 = vmatmul.mubr.f32.gmra.mxu1 %v3496_v44  ;;  %v1362_v8 = vpop.f32.mrf.mxu1  ;;  %v1109_v37 = vpop.f32.mrf.mxu0  ;;  %v3497_v53 = vld [vmem:[%s7917_s0 + $0x3c8] sm:$0xff] }
 0x180   :  { %7971 = vst [vmem:[#allocation14_spill] sm:$0xff] %v6178_v61  ;;  %2428 = vmatpush1.msra.mxu0 %v535_v2  ;;  %v6190_v35 = vadd.f32 %v1362_v8, %v1106_v34  ;;  %2039 = vmatprep.mubr.f32.mxu0 %v3497_v53  ;;  %v1110_v62 = vadd.f32 %v1109_v37, %v5227_v52  ;;  %v3499_v8 = vld [vmem:[%s7917_s0 + $0x3d8] sm:$0xff]  ;;  %v6211_v53 = vpop.permute.xlu0 %2947 }
 0x181   :  { %2040 = vmatmul.mubr.f32.gmra.mxu0 %v3498_v27  ;;  %2296 = vmatprep.mubr.f32.mxu1 %v3499_v8  ;;  %v1366_v2 = vpop.f32.mrf.mxu1  ;;  %v1111_v34 = vpop.f32.mrf.mxu0  ;;  %v688_v52 = vld [vmem:[%s7916_s1 + $0xcf8] sm:$0xff]  ;;  %7973 = vst [vmem:[#allocation16_spill] sm:$0xff] %v6211_v53  ;;  %v3500_v27 = vld [vmem:[%s7917_s0 + $0x3d0] sm:$0xff] }
 0x182   :  { %7972 = vst [vmem:[#allocation15_spill] sm:$0xff] %v6190_v35  ;;  %2429 = vmatprep.subr.mxu0 %v532_v21  ;;  %3092 = vperm.xlu1 %3436, %v2942_v23   ;;  %v6208_v44 = vadd.f32 %v1366_v2, %v1110_v62  ;;  %v1112_v37 = vadd.f32 %v1111_v34, %v5245_v58  ;;  %v656_v61 = vld [vmem:[%s7916_s1 + $0xbf8] sm:$0xff]  ;;  %v687_v21 = vld [vmem:[%s7916_s1 + $0xcf0] sm:$0xff]  ;;  %v3501_v58 = vld [vmem:[%s7917_s0 + $0x408] sm:$0xff] }
 0x183   :  { %2297 = vmatmul.mubr.f32.gmra.mxu1 %v3500_v27  ;;  %2430 = vmatpush1.msra.mxu0 %v531_v40  ;;  %v1368_v8 = vpop.f32.mrf.mxu1  ;;  %v1437_v35 = vpop.f32.mrf.mxu0  ;;  %v2943_v40 = vld [vmem:[%s7918_s3 + $0xf0] sm:$0xff]  ;;  %v3502_v2 = vld [vmem:[%s7917_s0 + $0x400] sm:$0xff]  ;;  %v3503_v34 = vld [vmem:[%s7917_s0 + $0x418] sm:$0xff] }
 0x184   :  { %v6222_v23 = vadd.f32 %v1368_v8, %v1112_v37  ;;  %2045 = vmatprep.mubr.f32.mxu0 %v3501_v58  ;;  %2672 = vmatprep.subr.mxu1 %v688_v52  ;;  %v1438_v62 = vadd.f32 %v1437_v35, %v5269_v6  ;;  %v655_v52 = vld [vmem:[%s7916_s1 + $0xbf0] sm:$0xff] }
 0x185   :  { %2046 = vmatmul.mubr.f32.gmra.mxu0 %v3502_v2  ;;  %2302 = vmatprep.mubr.f32.mxu1 %v3503_v34  ;;  %v1694_v37 = vpop.f32.mrf.mxu1  ;;  %v1439_v6 = vpop.f32.mrf.mxu0  ;;  %v3504_v8 = vld [vmem:[%s7917_s0 + $0x410] sm:$0xff]  ;;  %v652_v34 = vld [vmem:[%s7916_s1 + $0xbd8] sm:$0xff] }
 0x186   :  { %7974 = vst [vmem:[#allocation17_spill] sm:$0xff] %v6222_v23  ;;  %2431 = vmatprep.subr.mxu0 %v656_v61  ;;  %2673 = vmatpush1.msra.mxu1 %v687_v21  ;;  %v1695_v35 = vadd.f32 %v1694_v37, %v1438_v62  ;;  %v1440_v27 = vadd.f32 %v1439_v6, %v5285_v14  ;;  %v2944_v61 = vld [vmem:[%s7918_s3 + $0xf8] sm:$0xff]  ;;  %v3505_v14 = vld [vmem:[%s7917_s0 + $0x448] sm:$0xff]  ;;  %v651_v37 = vld [vmem:[%s7916_s1 + $0xbd0] sm:$0xff]  ;;  %v6258_v6 = vpop.permute.xlu0 %2952 }
 0x187   :  { %3097 = vperm.xlu0 %3435, %v2943_v40   ;;  %2303 = vmatmul.mubr.f32.gmra.mxu1 %v3504_v8  ;;  %v1696_v58 = vpop.f32.mrf.mxu1  ;;  %v1443_v2 = vpop.f32.mrf.mxu0  ;;  %v3508_v23 = vld [vmem:[%s7917_s0 + $0x450] sm:$0xff] }
 0x188   :  { %2432 = vmatpush2.msra.mxu0 %v655_v52  ;;  %v1697_v21 = vadd.f32 %v1696_v58, %v1440_v27  ;;  %2051 = vmatprep.mubr.f32.mxu0 %v3505_v14  ;;  %v3105_v62 = vmul.f32 %v6211_v53, %v1695_v35  ;;  %v1444_v40 = vadd.f32 %v1443_v2, %v5300_v22  ;;  %v3506_v52 = vld [vmem:[%s7917_s0 + $0x440] sm:$0xff]  ;;  %v3507_v27 = vld [vmem:[%s7917_s0 + $0x458] sm:$0xff] }
 0x189   :  { %2052 = vmatmul.mubr.f32.gmra.mxu0 %v3506_v52  ;;  %2308 = vmatprep.mubr.f32.mxu1 %v3507_v27  ;;  %v1700_v8 = vpop.f32.mrf.mxu1  ;;  %v1445_v35 = vpop.f32.mrf.mxu0  ;;  %v684_v22 = vld [vmem:[%s7916_s1 + $0xcd8] sm:$0xff]  ;;  %v683_v52 = vld [vmem:[%s7916_s1 + $0xcd0] sm:$0xff] }
 0x18a   :  { %v3106_v58 = vmul.f32 %v6211_v53, %v1697_v21  ;;  %3233 = vst [vmem:[%s7920_s4] sm:$0xff] %v3105_v62  ;;  %2433 = vmatprep.subr.mxu0 %v652_v34  ;;  %3102 = vperm.xlu1 %3436, %v2944_v61   ;;  %v1701_v2 = vadd.f32 %v1700_v8, %v1444_v40  ;;  %v6277_v27 = vpop.permute.xlu1 %2957  ;;  %v648_v34 = vld [vmem:[%s7916_s1 + $0xbb8] sm:$0xff]  ;;  %v3509_v61 = vld [vmem:[%s7917_s0 + $0x488] sm:$0xff]  ;;  %v647_v40 = vld [vmem:[%s7916_s1 + $0xbb0] sm:$0xff] }
 0x18b   :  { %v1446_v14 = vadd.f32 %v1445_v35, %v5316_v30  ;;  %2309 = vmatmul.mubr.f32.gmra.mxu1 %v3508_v23  ;;  %2434 = vmatpush2.msra.mxu0 %v651_v37  ;;  %v1702_v21 = vpop.f32.mrf.mxu1  ;;  %v1449_v53 = vpop.f32.mrf.mxu0  ;;  %v3510_v37 = vld [vmem:[%s7917_s0 + $0x480] sm:$0xff] }
 0x18c   :  { %3234 = vst [vmem:[%s7920_s4 + $0x8] sm:$0xff] %v3106_v58  ;;  %2674 = vmatprep.subr.mxu1 %v684_v22  ;;  %2057 = vmatprep.mubr.f32.mxu0 %v3509_v61  ;;  %v3109_v23 = vmul.f32 %v6258_v6, %v1701_v2  ;;  %v1450_v62 = vadd.f32 %v1449_v53, %v5331_v39  ;;  %v3511_v39 = vld [vmem:[%s7917_s0 + $0x498] sm:$0xff]  ;;  %v3513_v61 = vld [vmem:[%s7917_s0 + $0x4c8] sm:$0xff] }
 0x18d   :  { %v1703_v30 = vadd.f32 %v1702_v21, %v1446_v14  ;;  %2675 = vmatpush1.msra.mxu1 %v683_v52  ;;  %2058 = vmatmul.mubr.f32.gmra.mxu0 %v3510_v37  ;;  %v1706_v8 = vpop.f32.mrf.mxu1  ;;  %v1451_v35 = vpop.f32.mrf.mxu0  ;;  %v644_v2 = vld [vmem:[%s7916_s1 + $0xb98] sm:$0xff]  ;;  %v3512_v14 = vld [vmem:[%s7917_s0 + $0x490] sm:$0xff] }
 0x18e   :  { %3238 = vst [vmem:[%s7920_s4 + $0x20] sm:$0xff] %v3109_v23  ;;  %2314 = vmatprep.mubr.f32.mxu1 %v3511_v39  ;;  %2435 = vmatprep.subr.mxu0 %v648_v34  ;;  %v1707_v53 = vadd.f32 %v1706_v8, %v1450_v62  ;;  %v1452_v58 = vadd.f32 %v1451_v35, %v5347_v47  ;;  %v680_v47 = vld [vmem:[%s7916_s1 + $0xcb8] sm:$0xff]  ;;  %v6330_v37 = vpop.permute.xlu1 %2962  ;;  %v3515_v8 = vld [vmem:[%s7917_s0 + $0x4c0] sm:$0xff]  ;;  %v679_v39 = vld [vmem:[%s7916_s1 + $0xcb0] sm:$0xff] }
 0x18f   :  { %v3110_v22 = vmul.f32 %v6258_v6, %v1703_v30  ;;  %2315 = vmatmul.mubr.f32.gmra.mxu1 %v3512_v14  ;;  %2436 = vmatpush2.msra.mxu0 %v647_v40  ;;  %v1708_v52 = vpop.f32.mrf.mxu1  ;;  %v1455_v21 = vpop.f32.mrf.mxu0  ;;  %v643_v30 = vld [vmem:[%s7916_s1 + $0xb90] sm:$0xff]  ;;  %v3514_v40 = vld [vmem:[%s7917_s0 + $0x4d8] sm:$0xff] }
 0x190   :  { %v1709_v34 = vadd.f32 %v1708_v52, %v1452_v58  ;;  %2063 = vmatprep.mubr.f32.mxu0 %v3513_v61  ;;  %v3113_v23 = vmul.f32 %v6277_v27, %v1707_v53  ;;  %v1456_v62 = vadd.f32 %v1455_v21, %v5362_v56  ;;  %2320 = vmatprep.mubr.f32.mxu1 %v3514_v40  ;;  %v3516_v14 = vld [vmem:[%s7917_s0 + $0x4d0] sm:$0xff]  ;;  %v3517_v21 = vld [vmem:[%s7917_s0 + $0x508] sm:$0xff]  ;;  %v636_v40 = vld [vmem:[%s7916_s1 + $0xb58] sm:$0xff] }
 0x191   :  { %3239 = vst [vmem:[%s7920_s4 + $0x28] sm:$0xff] %v3110_v22  ;;  %2064 = vmatmul.mubr.f32.gmra.mxu0 %v3515_v8  ;;  %2437 = vmatprep.subr.mxu0 %v644_v2  ;;  %v1712_v35 = vpop.f32.mrf.mxu1  ;;  %v1457_v22 = vpop.f32.mrf.mxu0  ;;  %v640_v2 = vld [vmem:[%s7916_s1 + $0xb78] sm:$0xff]  ;;  %v3519_v8 = vld [vmem:[%s7917_s0 + $0x500] sm:$0xff] }
 0x192   :  { %v3114_v56 = vmul.f32 %v6277_v27, %v1709_v34  ;;  %3242 = vst [vmem:[%s7920_s4 + $0x40] sm:$0xff] %v3113_v23  ;;  %v1713_v53 = vadd.f32 %v1712_v35, %v1456_v62  ;;  %2438 = vmatpush2.msra.mxu0 %v643_v30  ;;  %v1458_v58 = vadd.f32 %v1457_v22, %v5378_v1  ;;  %v639_v1 = vld [vmem:[%s7916_s1 + $0xb70] sm:$0xff]  ;;  %v3518_v23 = vld [vmem:[%s7917_s0 + $0x518] sm:$0xff]  ;;  %v6363_v62 = vpop.permute.xlu0 %2967 }
 0x193   :  { %2676 = vmatprep.subr.mxu1 %v680_v47  ;;  %2321 = vmatmul.mubr.f32.gmra.mxu1 %v3516_v14  ;;  %v1714_v52 = vpop.f32.mrf.mxu1  ;;  %v1461_v34 = vpop.f32.mrf.mxu0  ;;  %v3521_v14 = vld [vmem:[%s7917_s0 + $0x510] sm:$0xff] }
 0x194   :  { %2069 = vmatprep.mubr.f32.mxu0 %v3517_v21  ;;  %3243 = vst [vmem:[%s7920_s4 + $0x48] sm:$0xff] %v3114_v56  ;;  %v1715_v30 = vadd.f32 %v1714_v52, %v1458_v58  ;;  %2677 = vmatpush1.msra.mxu1 %v679_v39  ;;  %v3117_v47 = vmul.f32 %v6330_v37, %v1713_v53  ;;  %v3520_v58 = vld [vmem:[%s7917_s0 + $0x548] sm:$0xff] }
 0x195   :  { %v1462_v61 = vadd.f32 %v1461_v34, %v5393_v10  ;;  %2326 = vmatprep.mubr.f32.mxu1 %v3518_v23  ;;  %2070 = vmatmul.mubr.f32.gmra.mxu0 %v3519_v8  ;;  %v1718_v35 = vpop.f32.mrf.mxu1  ;;  %v1463_v22 = vpop.f32.mrf.mxu0  ;;  %v635_v10 = vld [vmem:[%s7916_s1 + $0xb50] sm:$0xff]  ;;  %v632_v23 = vld [vmem:[%s7916_s1 + $0xb38] sm:$0xff] }
 0x196   :  { %2439 = vmatprep.subr.mxu0 %v640_v2  ;;  %v3118_v39 = vmul.f32 %v6330_v37, %v1715_v30  ;;  %3246 = vst [vmem:[%s7920_s4 + $0x60] sm:$0xff] %v3117_v47  ;;  %v1464_v53 = vadd.f32 %v1463_v22, %v5409_v19  ;;  %2075 = vmatprep.mubr.f32.mxu0 %v3520_v58  ;;  %v676_v2 = vld [vmem:[%s7916_s1 + $0xc98] sm:$0xff]  ;;  %v675_v19 = vld [vmem:[%s7916_s1 + $0xc90] sm:$0xff] }
 0x197   :  { %v1719_v56 = vadd.f32 %v1718_v35, %v1462_v61  ;;  %2440 = vmatpush2.msra.mxu0 %v639_v1  ;;  %2327 = vmatmul.mubr.f32.gmra.mxu1 %v3521_v14  ;;  %v1720_v52 = vpop.f32.mrf.mxu1  ;;  %v1467_v21 = vpop.f32.mrf.mxu0  ;;  %v3522_v47 = vld [vmem:[%s7917_s0 + $0x558] sm:$0xff]  ;;  %v631_v35 = vld [vmem:[%s7916_s1 + $0xb30] sm:$0xff] }
 0x198   :  { %2441 = vmatprep.subr.mxu0 %v636_v40  ;;  %3247 = vst [vmem:[%s7920_s4 + $0x68] sm:$0xff] %v3118_v39  ;;  %v1721_v34 = vadd.f32 %v1720_v52, %v1464_v53  ;;  %v1468_v30 = vadd.f32 %v1467_v21, %v5424_v28  ;;  %2332 = vmatprep.mubr.f32.mxu1 %v3522_v47  ;;  %v6399_v61 = vpop.permute.xlu1 %2972  ;;  %v3523_v40 = vld [vmem:[%s7917_s0 + $0x540] sm:$0xff]  ;;  %v628_v53 = vld [vmem:[%s7916_s1 + $0xb18] sm:$0xff]  ;;  %v3525_v58 = vld [vmem:[%s7917_s0 + $0x550] sm:$0xff] }
 0x199   :  { %v3121_v1 = vmul.f32 %v6363_v62, %v1719_v56  ;;  %2442 = vmatpush2.msra.mxu0 %v635_v10  ;;  %v1724_v8 = vpop.f32.mrf.mxu1  ;;  %2678 = vmatprep.subr.mxu1 %v676_v2  ;;  %v1469_v28 = vpop.f32.mrf.mxu0  ;;  %v3524_v56 = vld [vmem:[%s7917_s0 + $0x588] sm:$0xff]  ;;  %v3527_v47 = vld [vmem:[%s7917_s0 + $0x580] sm:$0xff] }
 0x19a   :  { %2076 = vmatmul.mubr.f32.gmra.mxu0 %v3523_v40  ;;  %v3122_v22 = vmul.f32 %v6363_v62, %v1721_v34  ;;  %v1725_v10 = vadd.f32 %v1724_v8, %v1468_v30  ;;  %v1470_v39 = vadd.f32 %v1469_v28, %v5440_v38  ;;  %2679 = vmatpush1.msra.mxu1 %v675_v19  ;;  %v627_v38 = vld [vmem:[%s7916_s1 + $0xb10] sm:$0xff]  ;;  %v3526_v34 = vld [vmem:[%s7917_s0 + $0x598] sm:$0xff] }
 0x19b   :  { %3250 = vst [vmem:[%s7920_s4 + $0x80] sm:$0xff] %v3121_v1  ;;  %2081 = vmatprep.mubr.f32.mxu0 %v3524_v56  ;;  %2333 = vmatmul.mubr.f32.gmra.mxu1 %v3525_v58  ;;  %v1726_v2 = vpop.f32.mrf.mxu1  ;;  %v1473_v14 = vpop.f32.mrf.mxu0  ;;  %v672_v30 = vld [vmem:[%s7916_s1 + $0xc78] sm:$0xff] }
 0x19c   :  { %2443 = vmatprep.subr.mxu0 %v632_v23  ;;  %3251 = vst [vmem:[%s7920_s4 + $0x88] sm:$0xff] %v3122_v22  ;;  %v1727_v52 = vadd.f32 %v1726_v2, %v1470_v39  ;;  %v3125_v21 = vmul.f32 %v6399_v61, %v1725_v10  ;;  %v1474_v19 = vadd.f32 %v1473_v14, %v5455_v48  ;;  %v6435_v1 = vpop.permute.xlu0 %2977  ;;  %v671_v48 = vld [vmem:[%s7916_s1 + $0xc70] sm:$0xff]  ;;  %v3528_v22 = vld [vmem:[%s7917_s0 + $0x5c8] sm:$0xff]  ;;  %v624_v10 = vld [vmem:[%s7916_s1 + $0xaf8] sm:$0xff] }
 0x19d   :  { %2338 = vmatprep.mubr.f32.mxu1 %v3526_v34  ;;  %2444 = vmatpush2.msra.mxu0 %v631_v35  ;;  %v1730_v23 = vpop.f32.mrf.mxu1  ;;  %v1475_v40 = vpop.f32.mrf.mxu0  ;;  %v3529_v39 = vld [vmem:[%s7917_s0 + $0x590] sm:$0xff] }
 0x19e   :  { %2082 = vmatmul.mubr.f32.gmra.mxu0 %v3527_v47  ;;  %2445 = vmatprep.subr.mxu0 %v628_v53  ;;  %v3126_v8 = vmul.f32 %v6399_v61, %v1727_v52  ;;  %3254 = vst [vmem:[%s7920_s4 + $0xa0] sm:$0xff] %v3125_v21  ;;  %v1731_v28 = vadd.f32 %v1730_v23, %v1474_v19  ;;  %v6471_v52 = vpop.permute.xlu1 %2982  ;;  %v620_v21 = vld [vmem:[%s7916_s1 + $0xad8] sm:$0xff]  ;;  %v3531_v19 = vld [vmem:[%s7917_s0 + $0x5c0] sm:$0xff] }
 0x19f   :  { %v1476_v35 = vadd.f32 %v1475_v40, %v5471_v59  ;;  %2087 = vmatprep.mubr.f32.mxu0 %v3528_v22  ;;  %2446 = vmatpush2.msra.mxu0 %v627_v38  ;;  %v1732_v56 = vpop.f32.mrf.mxu1  ;;  %v1479_v53 = vpop.f32.mrf.mxu0  ;;  %v623_v59 = vld [vmem:[%s7916_s1 + $0xaf0] sm:$0xff]  ;;  %v3530_v38 = vld [vmem:[%s7917_s0 + $0x5d8] sm:$0xff] }
 0x1a0   :  { %2339 = vmatmul.mubr.f32.gmra.mxu1 %v3529_v39  ;;  %2680 = vmatprep.subr.mxu1 %v672_v30  ;;  %3255 = vst [vmem:[%s7920_s4 + $0xa8] sm:$0xff] %v3126_v8  ;;  %v3129_v2 = vmul.f32 %v6435_v1, %v1731_v28  ;;  %v1480_v14 = vadd.f32 %v1479_v53, %v5486_v4  ;;  %v668_v4 = vld [vmem:[%s7916_s1 + $0xc58] sm:$0xff]  ;;  %v667_v8 = vld [vmem:[%s7916_s1 + $0xc50] sm:$0xff] }
 0x1a1   :  { %v1733_v58 = vadd.f32 %v1732_v56, %v1476_v35  ;;  %2344 = vmatprep.mubr.f32.mxu1 %v3530_v38  ;;  %2681 = vmatpush1.msra.mxu1 %v671_v48  ;;  %v1736_v34 = vpop.f32.mrf.mxu1  ;;  %v1481_v30 = vpop.f32.mrf.mxu0  ;;  %v3532_v48 = vld [vmem:[%s7917_s0 + $0x608] sm:$0xff]  ;;  %v3533_v28 = vld [vmem:[%s7917_s0 + $0x5d0] sm:$0xff]  ;;  %v3534_v53 = vld [vmem:[%s7917_s0 + $0x618] sm:$0xff] }
 0x1a2   :  { %2088 = vmatmul.mubr.f32.gmra.mxu0 %v3531_v19  ;;  %2447 = vmatprep.subr.mxu0 %v624_v10  ;;  %3258 = vst [vmem:[%s7920_s4 + $0xc0] sm:$0xff] %v3129_v2  ;;  %v1737_v23 = vadd.f32 %v1736_v34, %v1480_v14  ;;  %v1482_v40 = vadd.f32 %v1481_v30, %v5502_v15  ;;  %v619_v15 = vld [vmem:[%s7916_s1 + $0xad0] sm:$0xff]  ;;  %v3535_v2 = vld [vmem:[%s7917_s0 + $0x600] sm:$0xff]  ;;  %v3536_v30 = vld [vmem:[%s7917_s0 + $0x648] sm:$0xff] }
 0x1a3   :  { %v3130_v47 = vmul.f32 %v6435_v1, %v1733_v58  ;;  %2093 = vmatprep.mubr.f32.mxu0 %v3532_v48  ;;  %2448 = vmatpush2.msra.mxu0 %v623_v59  ;;  %v1738_v35 = vpop.f32.mrf.mxu1  ;;  %v1485_v22 = vpop.f32.mrf.mxu0  ;;  %v616_v58 = vld [vmem:[%s7916_s1 + $0xab8] sm:$0xff] }
 0x1a4   :  { %2345 = vmatmul.mubr.f32.gmra.mxu1 %v3533_v28  ;;  %2449 = vmatprep.subr.mxu0 %v620_v21  ;;  %v1739_v10 = vadd.f32 %v1738_v35, %v1482_v40  ;;  %v3133_v39 = vmul.f32 %v6471_v52, %v1737_v23  ;;  %v1486_v56 = vadd.f32 %v1485_v22, %v5517_v25  ;;  %v6507_v59 = vpop.permute.xlu0 %2987  ;;  %v615_v25 = vld [vmem:[%s7916_s1 + $0xab0] sm:$0xff]  ;;  %v3538_v35 = vld [vmem:[%s7917_s0 + $0x658] sm:$0xff] }
 0x1a5   :  { %3259 = vst [vmem:[%s7920_s4 + $0xc8] sm:$0xff] %v3130_v47  ;;  %2350 = vmatprep.mubr.f32.mxu1 %v3534_v53  ;;  %2682 = vmatprep.subr.mxu1 %v668_v4  ;;  %v1742_v14 = vpop.f32.mrf.mxu1  ;;  %v1487_v38 = vpop.f32.mrf.mxu0  ;;  %v612_v4 = vld [vmem:[%s7916_s1 + $0xa98] sm:$0xff]  ;;  %v3537_v47 = vld [vmem:[%s7917_s0 + $0x610] sm:$0xff] }
 0x1a6   :  { %2094 = vmatmul.mubr.f32.gmra.mxu0 %v3535_v2  ;;  %2683 = vmatpush1.msra.mxu1 %v667_v8  ;;  %v3134_v21 = vmul.f32 %v6471_v52, %v1739_v10  ;;  %3262 = vst [vmem:[%s7920_s4 + $0xe0] sm:$0xff] %v3133_v39  ;;  %v1743_v19 = vadd.f32 %v1742_v14, %v1486_v56  ;;  %v611_v22 = vld [vmem:[%s7916_s1 + $0xa90] sm:$0xff]  ;;  %v3540_v2 = vld [vmem:[%s7917_s0 + $0x688] sm:$0xff] }
 0x1a7   :  { %v1488_v34 = vadd.f32 %v1487_v38, %v5533_v36  ;;  %2099 = vmatprep.mubr.f32.mxu0 %v3536_v30  ;;  %2450 = vmatpush2.msra.mxu0 %v619_v15  ;;  %v1744_v23 = vpop.f32.mrf.mxu1  ;;  %v1491_v40 = vpop.f32.mrf.mxu0  ;;  %v664_v36 = vld [vmem:[%s7916_s1 + $0xc38] sm:$0xff]  ;;  %v3539_v15 = vld [vmem:[%s7917_s0 + $0x640] sm:$0xff] }
 0x1a8   :  { %2351 = vmatmul.mubr.f32.gmra.mxu1 %v3537_v47  ;;  %2451 = vmatprep.subr.mxu0 %v616_v58  ;;  %3263 = vst [vmem:[%s7920_s4 + $0xe8] sm:$0xff] %v3134_v21  ;;  %v3137_v8 = vmul.f32 %v6507_v59, %v1743_v19  ;;  %v1492_v28 = vadd.f32 %v1491_v40, %v5548_v46  ;;  %v663_v46 = vld [vmem:[%s7916_s1 + $0xc30] sm:$0xff]  ;;  %v608_v38 = vld [vmem:[%s7916_s1 + $0xa78] sm:$0xff]  ;;  %v3543_v40 = vld [vmem:[%s7917_s0 + $0x680] sm:$0xff] }
 0x1a9   :  { %v1745_v48 = vadd.f32 %v1744_v23, %v1488_v34  ;;  %2356 = vmatprep.mubr.f32.mxu1 %v3538_v35  ;;  %2452 = vmatpush2.msra.mxu0 %v615_v25  ;;  %v1748_v10 = vpop.f32.mrf.mxu1  ;;  %v1493_v39 = vpop.f32.mrf.mxu0  ;;  %v3541_v25 = vld [vmem:[%s7917_s0 + $0x650] sm:$0xff]  ;;  %v3542_v47 = vld [vmem:[%s7917_s0 + $0x698] sm:$0xff] }
 0x1aa   :  { %2100 = vmatmul.mubr.f32.gmra.mxu0 %v3539_v15  ;;  %2453 = vmatprep.subr.mxu0 %v612_v4  ;;  %3266 = vst [vmem:[%s7920_s4 + $0x100] sm:$0xff] %v3137_v8  ;;  %v1749_v53 = vadd.f32 %v1748_v10, %v1492_v28  ;;  %v1494_v58 = vadd.f32 %v1493_v39, %v5564_v60  ;;  %v6560_v14 = vpop.permute.xlu1 %2992  ;;  %v607_v60 = vld [vmem:[%s7916_s1 + $0xa70] sm:$0xff]  ;;  %v660_v23 = vld [vmem:[%s7916_s1 + $0xc18] sm:$0xff] }
 0x1ab   :  { %v3138_v56 = vmul.f32 %v6507_v59, %v1745_v48  ;;  %2105 = vmatprep.mubr.f32.mxu0 %v3540_v2  ;;  %2684 = vmatprep.subr.mxu1 %v664_v36  ;;  %v1750_v21 = vpop.f32.mrf.mxu1  ;;  %v1497_v19 = vpop.f32.mrf.mxu0  ;;  %v659_v15 = vld [vmem:[%s7916_s1 + $0xc10] sm:$0xff]  ;;  %v3546_v2 = vld [vmem:[%s7917_s0 + $0x6d8] sm:$0xff] }
 0x1ac   :  { %2357 = vmatmul.mubr.f32.gmra.mxu1 %v3541_v25  ;;  %2454 = vmatpush2.msra.mxu0 %v611_v22  ;;  %v1751_v34 = vadd.f32 %v1750_v21, %v1494_v58  ;;  %v3141_v30 = vmul.f32 %v6560_v14, %v1749_v53  ;;  %v1498_v4 = vadd.f32 %v1497_v19, %v5579_v7  ;;  %v604_v7 = vld [vmem:[%s7916_s1 + $0xa58] sm:$0xff]  ;;  %v3544_v22 = vld [vmem:[%s7917_s0 + $0x6c8] sm:$0xff]  ;;  %v3545_v10 = vld [vmem:[%s7917_s0 + $0x690] sm:$0xff] }
 0x1ad   :  { %3267 = vst [vmem:[%s7920_s4 + $0x108] sm:$0xff] %v3138_v56  ;;  %2362 = vmatprep.mubr.f32.mxu1 %v3542_v47  ;;  %2685 = vmatpush1.msra.mxu1 %v663_v46  ;;  %v1754_v36 = vpop.f32.mrf.mxu1  ;;  %v1499_v48 = vpop.f32.mrf.mxu0  ;;  %v3547_v21 = vld [vmem:[%s7917_s0 + $0x6c0] sm:$0xff] }
 0x1ae   :  { %2106 = vmatmul.mubr.f32.gmra.mxu0 %v3543_v40  ;;  %2455 = vmatprep.subr.mxu0 %v608_v38  ;;  %v3142_v8 = vmul.f32 %v6560_v14, %v1751_v34  ;;  %3270 = vst [vmem:[%s7920_s4 + $0x120] sm:$0xff] %v3141_v30  ;;  %v1755_v28 = vadd.f32 %v1754_v36, %v1498_v4  ;;  %v600_v38 = vld [vmem:[%s7916_s1 + $0xa38] sm:$0xff] }
 0x1af   :  { %v1500_v35 = vadd.f32 %v1499_v48, %v5595_v18  ;;  %2111 = vmatprep.mubr.f32.mxu0 %v3544_v22  ;;  %2456 = vmatpush2.msra.mxu0 %v607_v60  ;;  %v1756_v39 = vpop.f32.mrf.mxu1  ;;  %v6602_v46 = vpop.permute.xlu0 %2997  ;;  %v603_v18 = vld [vmem:[%s7916_s1 + $0xa50] sm:$0xff]  ;;  %v724_v4 = vld [vmem:[%s7916_s1 + $0xe18] sm:$0xf] }
 0x1b0   :  { %2363 = vmatmul.mubr.f32.gmra.mxu1 %v3545_v10  ;;  %2686 = vmatprep.subr.mxu1 %v660_v23  ;;  %3271 = vst [vmem:[%s7920_s4 + $0x128] sm:$0xff] %v3142_v8  ;;  %v3145_v53 = vmul.f32 %v6602_v46, %v1755_v28  ;;  %v1503_v58 = vpop.f32.mrf.mxu0  ;;  %v599_v60 = vld [vmem:[%s7916_s1 + $0xa30] sm:$0xff]  ;;  %v3550_v28 = vld [vmem:[%s7917_s0 + $0x718] sm:$0xff]  ;;  %v3551_v10 = vld [vmem:[%s7917_s0 + $0x700] sm:$0xff] }
 0x1b1   :  { %v1757_v56 = vadd.f32 %v1756_v39, %v1500_v35  ;;  %2368 = vmatprep.mubr.f32.mxu1 %v3546_v2  ;;  %2457 = vmatprep.subr.mxu0 %v604_v7  ;;  %v1504_v25 = vadd.f32 %v1503_v58, %v5610_v31  ;;  %v1760_v19 = vpop.f32.mrf.mxu1  ;;  %v3548_v31 = vld [vmem:[%s7917_s0 + $0x708] sm:$0xff]  ;;  %v3549_v23 = vld [vmem:[%s7917_s0 + $0x6d0] sm:$0xff]  ;;  %v596_v7 = vld [vmem:[%s7916_s1 + $0xa18] sm:$0xff] }
 0x1b2   :  { %2112 = vmatmul.mubr.f32.gmra.mxu0 %v3547_v21  ;;  %2687 = vmatpush1.msra.mxu1 %v659_v15  ;;  %3274 = vst [vmem:[%s7920_s4 + $0x140] sm:$0xff] %v3145_v53  ;;  %v1505_v30 = vpop.f32.mrf.mxu0  ;;  %v3552_v53 = vld [vmem:[%s7917_s0 + $0x748] sm:$0xff]  ;;  %v3553_v2 = vld [vmem:[%s7917_s0 + $0x710] sm:$0xff] }
 0x1b3   :  { %v3146_v34 = vmul.f32 %v6602_v46, %v1757_v56  ;;  %2117 = vmatprep.mubr.f32.mxu0 %v3548_v31  ;;  %2458 = vmatpush2.msra.mxu0 %v603_v18  ;;  %v1761_v47 = vadd.f32 %v1760_v19, %v1504_v25  ;;  %v1506_v40 = vadd.f32 %v1505_v30, %v5626_v43  ;;  %v1762_v36 = vpop.f32.mrf.mxu1  ;;  %v6638_v48 = vpop.permute.xlu1 %3002  ;;  %v595_v43 = vld [vmem:[%s7916_s1 + $0xa10] sm:$0xff]  ;;  %v3555_v31 = vld [vmem:[%s7917_s0 + $0x740] sm:$0xff] }
 0x1b4   :  { %2369 = vmatmul.mubr.f32.gmra.mxu1 %v3549_v23  ;;  %2459 = vmatprep.subr.mxu0 %v600_v38  ;;  %v1509_v8 = vpop.f32.mrf.mxu0  ;;  %v723_v18 = vld [vmem:[%s7916_s1 + $0xe10] sm:$0xf]  ;;  %v3556_v23 = vld [vmem:[%s7917_s0 + $0x788] sm:$0xff] }
 0x1b5   :  { %3275 = vst [vmem:[%s7920_s4 + $0x148] sm:$0xff] %v3146_v34  ;;  %2374 = vmatprep.mubr.f32.mxu1 %v3550_v28  ;;  %2460 = vmatpush2.msra.mxu0 %v599_v60  ;;  %v1763_v35 = vadd.f32 %v1762_v36, %v1506_v40  ;;  %v3149_v22 = vmul.f32 %v6638_v48, %v1761_v47  ;;  %v1766_v39 = vpop.f32.mrf.mxu1  ;;  %v3554_v60 = vld [vmem:[%s7917_s0 + $0x758] sm:$0xff] }
 0x1b6   :  { %v1510_v15 = vadd.f32 %v1509_v8, %v5641_v55  ;;  %2118 = vmatmul.mubr.f32.gmra.mxu0 %v3551_v10  ;;  %3400 = vmatprep.subr.msk.mxu1 %vm844_vm0, %v724_v4  ;;  %v1511_v56 = vpop.f32.mrf.mxu0 }
 0x1b7   :  { %2123 = vmatprep.mubr.f32.mxu0 %v3552_v53  ;;  %2461 = vmatprep.subr.mxu0 %v596_v7  ;;  %v3150_v55 = vmul.f32 %v6638_v48, %v1763_v35  ;;  %3278 = vst [vmem:[%s7920_s4 + $0x160] sm:$0xff] %v3149_v22  ;;  %v1512_v38 = vadd.f32 %v1511_v56, %v5657_v5  ;;  %v1768_v25 = vpop.f32.mrf.mxu1  ;;  %v3558_v35 = vld [vmem:[%s7917_s0 + $0x798] sm:$0xff]  ;;  %v3560_v56 = vld [vmem:[%s7917_s0 + $0x7c8] sm:$0xff] }
 0x1b8   :  { %v1767_v58 = vadd.f32 %v1766_v39, %v1510_v15  ;;  %2375 = vmatmul.mubr.f32.gmra.mxu1 %v3553_v2  ;;  %2462 = vmatpush2.msra.mxu0 %v595_v43  ;;  %v6672_v21 = vpop.permute.xlu0 %3007  ;;  %v1515_v19 = vpop.f32.mrf.mxu0 }
 0x1b9   :  { %2380 = vmatprep.mubr.f32.mxu1 %v3554_v60  ;;  %3401 = vmatpush2.msk.msra.mxu1 %vm844_vm0, %v723_v18  ;;  %3279 = vst [vmem:[%s7920_s4 + $0x168] sm:$0xff] %v3150_v55  ;;  %v1769_v34 = vadd.f32 %v1768_v25, %v1512_v38  ;;  %v1516_v5 = vadd.f32 %v1515_v19, %v5672_v20  ;;  %v1772_v4 = vpop.f32.mrf.mxu1  ;;  %v3557_v20 = vld [vmem:[%s7917_s0 + $0x750] sm:$0xff]  ;;  %v3562_v25 = vld [vmem:[%s7917_s0 + $0x7d8] sm:$0xff] }
 0x1ba   :  { %v3153_v30 = vmul.f32 %v6672_v21, %v1767_v58  ;;  %2124 = vmatmul.mubr.f32.gmra.mxu0 %v3555_v31  ;;  %v1517_v47 = vpop.f32.mrf.mxu0 }
 0x1bb   :  { %2129 = vmatprep.mubr.f32.mxu0 %v3556_v23  ;;  %v3154_v40 = vmul.f32 %v6672_v21, %v1769_v34  ;;  %v1773_v36 = vadd.f32 %v1772_v4, %v1516_v5  ;;  %v1518_v7 = vadd.f32 %v1517_v47, %v5687_v33  ;;  %v1774_v8 = vpop.f32.mrf.mxu1  ;;  %v3559_v33 = vld [vmem:[%s7917_s0 + $0x780] sm:$0xff]  ;;  %v3564_v4 = vld [vmem:[%s7917_s0 + $0x28] sm:$0xff] }
 0x1bc   :  { %3282 = vst [vmem:[%s7920_s4 + $0x180] sm:$0xff] %v3153_v30  ;;  %2381 = vmatmul.mubr.f32.gmra.mxu1 %v3557_v20  ;;  %v6697_v28 = vpop.permute.xlu1 %3012  ;;  %v1521_v43 = vpop.f32.mrf.mxu0 }
 0x1bd   :  { %2386 = vmatprep.mubr.f32.mxu1 %v3558_v35  ;;  %3283 = vst [vmem:[%s7920_s4 + $0x188] sm:$0xff] %v3154_v40  ;;  %v1775_v22 = vadd.f32 %v1774_v8, %v1518_v7  ;;  %v3157_v15 = vmul.f32 %v6697_v28, %v1773_v36  ;;  %v1522_v10 = vadd.f32 %v1521_v43, %v5703_v49  ;;  %v1778_v39 = vpop.f32.mrf.mxu1  ;;  %v3561_v49 = vld [vmem:[%s7917_s0 + $0x790] sm:$0xff]  ;;  %v3566_v7 = vld [vmem:[%s7917_s0 + $0x38] sm:$0xff]  ;;  %v3567_v35 = vld [vmem:[%s7917_s0 + $0x20] sm:$0xff] }
 0x1be   :  { %2130 = vmatmul.mubr.f32.gmra.mxu0 %v3559_v33  ;;  %v1523_v18 = vpop.f32.mrf.mxu0  ;;  %v3568_v33 = vld [vmem:[%s7917_s0 + $0x68] sm:$0xff] }
 0x1bf   :  { %2135 = vmatprep.mubr.f32.mxu0 %v3560_v56  ;;  %v3158_v53 = vmul.f32 %v6697_v28, %v1775_v22  ;;  %3286 = vst [vmem:[%s7920_s4 + $0x1a0] sm:$0xff] %v3157_v15  ;;  %v1779_v55 = vadd.f32 %v1778_v39, %v1522_v10  ;;  %v1524_v58 = vadd.f32 %v1523_v18, %v5718_v63  ;;  %v1780_v2 = vpop.f32.mrf.mxu1  ;;  %v3563_v63 = vld [vmem:[%s7917_s0 + $0x7c0] sm:$0xff] }
 0x1c0   :  { %2387 = vmatmul.mubr.f32.gmra.mxu1 %v3561_v49  ;;  %v1527_v38 = vpop.f32.mrf.mxu0  ;;  %v3570_v49 = vld [vmem:[%s7917_s0 + $0x78] sm:$0xff] }
 0x1c1   :  { %2392 = vmatprep.mubr.f32.mxu1 %v3562_v25  ;;  %3287 = vst [vmem:[%s7920_s4 + $0x1a8] sm:$0xff] %v3158_v53  ;;  %v1781_v19 = vadd.f32 %v1780_v2, %v1524_v58  ;;  %v6727_v60 = vpop.permute.xlu0 %3017  ;;  %v1528_v34 = vadd.f32 %v1527_v38, %v5728_v11  ;;  %v1784_v30 = vpop.f32.mrf.mxu1  ;;  %v3565_v11 = vld [vmem:[%s7917_s0 + $0x7d0] sm:$0xff]  ;;  %v3571_v38 = vld [vmem:[%s7917_s0 + $0x60] sm:$0xff] }
 0x1c2   :  { %2136 = vmatmul.mubr.f32.gmra.mxu0 %v3563_v63  ;;  %v3161_v5 = vmul.f32 %v6727_v60, %v1779_v55  ;;  %v1529_v31 = vpop.f32.mrf.mxu0  ;;  %v3572_v63 = vld [vmem:[%s7917_s0 + $0xa8] sm:$0xff] }
 0x1c3   :  { %2463 = vmatprep.mubr.f32.mxu0 %v3564_v4  ;;  %v3162_v47 = vmul.f32 %v6727_v60, %v1781_v19  ;;  %v1785_v23 = vadd.f32 %v1784_v30, %v1528_v34  ;;  %v1530_v40 = vadd.f32 %v1529_v31, %v5740_v24  ;;  %v1786_v36 = vpop.f32.mrf.mxu1 }
 0x1c4   :  { %2393 = vmatmul.mubr.f32.gmra.mxu1 %v3565_v11  ;;  %3290 = vst [vmem:[%s7920_s4 + $0x1c0] sm:$0xff] %v3161_v5  ;;  %v1533_v20 = vpop.f32.mrf.mxu0 }
 0x1c5   :  { %3402 = vmatprep.mubr.msk.f32.mxu1 %vm747_vm1, %v3566_v7  ;;  %3291 = vst [vmem:[%s7920_s4 + $0x1c8] sm:$0xff] %v3162_v47  ;;  %v1787_v8 = vadd.f32 %v1786_v36, %v1530_v40  ;;  %v6752_v43 = vpop.permute.xlu1 %3022  ;;  %v1534_v24 = vadd.f32 %v1533_v20, %v5758_v42  ;;  %v1790_v22 = vpop.f32.mrf.mxu1  ;;  %v3569_v42 = vld [vmem:[%s7917_s0 + $0x30] sm:$0xff]  ;;  %v3575_v36 = vld [vmem:[%s7917_s0 + $0xa0] sm:$0xff] }
 0x1c6   :  { %7975 = vst [vmem:[#allocation18_spill] sm:$0xff] %v6752_v43  ;;  %2464 = vmatmul.mubr.f32.vlgmr.msra.gmra.mxu0 %v3567_v35  ;;  %v3165_v15 = vmul.f32 %v6752_v43, %v1785_v23  ;;  %v1535_v10 = vpop.f32.mrf.mxu0  ;;  %v3574_v23 = vld [vmem:[%s7917_s0 + $0xb8] sm:$0xff] }
 0x1c7   :  { %2469 = vmatprep.mubr.f32.mxu0 %v3568_v33  ;;  %v3166_v39 = vmul.f32 %v6752_v43, %v1787_v8  ;;  %v1791_v18 = vadd.f32 %v1790_v22, %v1534_v24  ;;  %v1536_v56 = vadd.f32 %v1535_v10, %v5770_v57  ;;  %v1792_v53 = vpop.f32.mrf.mxu1  ;;  %v3576_v24 = vld [vmem:[%s7917_s0 + $0xe8] sm:$0xff] }
 0x1c8   :  { %2721 = vmatmul.mubr.f32.vlgmr.msra.gmra.mxu1 %v3569_v42  ;;  %3294 = vst [vmem:[%s7920_s4 + $0x1e0] sm:$0xff] %v3165_v15  ;;  %v1539_v55 = vpop.f32.mrf.mxu0 }
 0x1c9   :  { %3403 = vmatprep.mubr.msk.f32.mxu1 %vm747_vm1, %v3570_v49  ;;  %3295 = vst [vmem:[%s7920_s4 + $0x1e8] sm:$0xff] %v3166_v39  ;;  %v1793_v58 = vadd.f32 %v1792_v53, %v1536_v56  ;;  %v6777_v2 = vpop.permute.xlu0 %3027  ;;  %v1540_v57 = vadd.f32 %v1539_v55, %v5785_v12  ;;  %v1796_v25 = vpop.f32.mrf.mxu1  ;;  %v3573_v12 = vld [vmem:[%s7917_s0 + $0x70] sm:$0xff]  ;;  %v3578_v39 = vld [vmem:[%s7917_s0 + $0xf8] sm:$0xff]  ;;  %v3579_v56 = vld [vmem:[%s7917_s0 + $0xe0] sm:$0xff] }
 0x1ca   :  { %7976 = vst [vmem:[#allocation19_spill] sm:$0xff] %v6777_v2  ;;  %2470 = vmatmul.mubr.f32.gmra.mxu0 %v3571_v38  ;;  %v3169_v19 = vmul.f32 %v6777_v2, %v1791_v18  ;;  %v1541_v34 = vpop.f32.mrf.mxu0 }
 0x1cb   :  { %2475 = vmatprep.mubr.f32.mxu0 %v3572_v63  ;;  %v3170_v30 = vmul.f32 %v6777_v2, %v1793_v58  ;;  %v1797_v5 = vadd.f32 %v1796_v25, %v1540_v57  ;;  %v1542_v31 = vadd.f32 %v1541_v34, %v5800_v29  ;;  %v1798_v4 = vpop.f32.mrf.mxu1  ;;  %v3580_v58 = vld [vmem:[%s7917_s0 + $0x128] sm:$0xff]  ;;  %v3582_v63 = vld [vmem:[%s7917_s0 + $0x138] sm:$0xff] }
 0x1cc   :  { %2727 = vmatmul.mubr.f32.gmra.mxu1 %v3573_v12  ;;  %3298 = vst [vmem:[%s7920_s4 + $0x200] sm:$0xff] %v3169_v19  ;;  %v1545_v47 = vpop.f32.mrf.mxu0  ;;  %v3583_v12 = vld [vmem:[%s7917_s0 + $0x120] sm:$0xff] }
 0x1cd   :  { %3404 = vmatprep.mubr.msk.f32.mxu1 %vm747_vm1, %v3574_v23  ;;  %3299 = vst [vmem:[%s7920_s4 + $0x208] sm:$0xff] %v3170_v30  ;;  %v1799_v11 = vadd.f32 %v1798_v4, %v1542_v31  ;;  %v6802_v40 = vpop.permute.xlu1 %3032  ;;  %v1546_v29 = vadd.f32 %v1545_v47, %v5818_v51  ;;  %v1802_v20 = vpop.f32.mrf.mxu1  ;;  %v3577_v51 = vld [vmem:[%s7917_s0 + $0xb0] sm:$0xff]  ;;  %v3584_v23 = vld [vmem:[%s7917_s0 + $0x168] sm:$0xff] }
 0x1ce   :  { %7977 = vst [vmem:[#allocation20_spill] sm:$0xff] %v6802_v40  ;;  %2476 = vmatmul.mubr.f32.gmra.mxu0 %v3575_v36  ;;  %v3173_v7 = vmul.f32 %v6802_v40, %v1797_v5  ;;  %v1547_v8 = vpop.f32.mrf.mxu0 }
 0x1cf   :  { %2481 = vmatprep.mubr.f32.mxu0 %v3576_v24  ;;  %v3174_v35 = vmul.f32 %v6802_v40, %v1799_v11  ;;  %v1803_v22 = vadd.f32 %v1802_v20, %v1546_v29  ;;  %v1548_v15 = vadd.f32 %v1547_v8, %v5830_v3  ;;  %v1804_v10 = vpop.f32.mrf.mxu1  ;;  %v3586_v8 = vld [vmem:[%s7917_s0 + $0x178] sm:$0xff] }
 0x1d0   :  { %2733 = vmatmul.mubr.f32.gmra.mxu1 %v3577_v51  ;;  %3302 = vst [vmem:[%s7920_s4 + $0x220] sm:$0xff] %v3173_v7  ;;  %v1551_v33 = vpop.f32.mrf.mxu0 }
 0x1d1   :  { %3405 = vmatprep.mubr.msk.f32.mxu1 %vm747_vm1, %v3578_v39  ;;  %3303 = vst [vmem:[%s7920_s4 + $0x228] sm:$0xff] %v3174_v35  ;;  %v1805_v18 = vadd.f32 %v1804_v10, %v1548_v15  ;;  %v6827_v42 = vpop.permute.xlu0 %3037  ;;  %v1552_v3 = vadd.f32 %v1551_v33, %v5845_v26  ;;  %v1808_v53 = vpop.f32.mrf.mxu1  ;;  %v3581_v26 = vld [vmem:[%s7917_s0 + $0xf0] sm:$0xff]  ;;  %v3588_v33 = vld [vmem:[%s7917_s0 + $0x1a8] sm:$0xff] }
 0x1d2   :  { %7978 = vst [vmem:[#allocation21_spill] sm:$0xff] %v6827_v42  ;;  %2482 = vmatmul.mubr.f32.gmra.mxu0 %v3579_v56  ;;  %v3177_v55 = vmul.f32 %v6827_v42, %v1803_v22  ;;  %v1553_v49 = vpop.f32.mrf.mxu0  ;;  %v3587_v22 = vld [vmem:[%s7917_s0 + $0x160] sm:$0xff] }
 0x1d3   :  { %2487 = vmatprep.mubr.f32.mxu0 %v3580_v58  ;;  %v3178_v57 = vmul.f32 %v6827_v42, %v1805_v18  ;;  %v1809_v38 = vadd.f32 %v1808_v53, %v1552_v3  ;;  %v1554_v25 = vadd.f32 %v1553_v49, %v5860_v45  ;;  %v1810_v19 = vpop.f32.mrf.mxu1 }
 0x1d4   :  { %2739 = vmatmul.mubr.f32.gmra.mxu1 %v3581_v26  ;;  %3306 = vst [vmem:[%s7920_s4 + $0x240] sm:$0xff] %v3177_v55  ;;  %v1557_v34 = vpop.f32.mrf.mxu0  ;;  %v3590_v55 = vld [vmem:[%s7917_s0 + $0x1b8] sm:$0xff] }
 0x1d5   :  { %3406 = vmatprep.mubr.msk.f32.mxu1 %vm747_vm1, %v3582_v63  ;;  %3307 = vst [vmem:[%s7920_s4 + $0x248] sm:$0xff] %v3178_v57  ;;  %v1811_v30 = vadd.f32 %v1810_v19, %v1554_v25  ;;  %v6852_v5 = vpop.permute.xlu1 %3042  ;;  %v1558_v45 = vadd.f32 %v1557_v34, %v5878_v9  ;;  %v1814_v31 = vpop.f32.mrf.mxu1  ;;  %v3585_v9 = vld [vmem:[%s7917_s0 + $0x130] sm:$0xff]  ;;  %v3591_v57 = vld [vmem:[%s7917_s0 + $0x1a0] sm:$0xff]  ;;  %v3592_v19 = vld [vmem:[%s7917_s0 + $0x1e8] sm:$0xff] }
 0x1d6   :  { %7979 = vst [vmem:[#allocation22_spill] sm:$0xff] %v6852_v5  ;;  %2488 = vmatmul.mubr.f32.gmra.mxu0 %v3583_v12  ;;  %v3181_v4 = vmul.f32 %v6852_v5, %v1809_v38  ;;  %v1559_v47 = vpop.f32.mrf.mxu0 }
 0x1d7   :  { %2493 = vmatprep.mubr.f32.mxu0 %v3584_v23  ;;  %v3182_v11 = vmul.f32 %v6852_v5, %v1811_v30  ;;  %v1815_v29 = vadd.f32 %v1814_v31, %v1558_v45  ;;  %v1560_v36 = vadd.f32 %v1559_v47, %v5890_v32  ;;  %v1816_v20 = vpop.f32.mrf.mxu1  ;;  %v3594_v31 = vld [vmem:[%s7917_s0 + $0x1f8] sm:$0xff]  ;;  %v3595_v23 = vld [vmem:[%s7917_s0 + $0x1e0] sm:$0xff] }
 0x1d8   :  { %2745 = vmatmul.mubr.f32.gmra.mxu1 %v3585_v9  ;;  %3310 = vst [vmem:[%s7920_s4 + $0x260] sm:$0xff] %v3181_v4  ;;  %v1563_v7 = vpop.f32.mrf.mxu0 }
 0x1d9   :  { %3407 = vmatprep.mubr.msk.f32.mxu1 %vm747_vm1, %v3586_v8  ;;  %3311 = vst [vmem:[%s7920_s4 + $0x268] sm:$0xff] %v3182_v11  ;;  %v1817_v24 = vadd.f32 %v1816_v20, %v1560_v36  ;;  %v6877_v35 = vpop.permute.xlu0 %3047  ;;  %v1564_v32 = vadd.f32 %v1563_v7, %v5905_v54  ;;  %v1820_v51 = vpop.f32.mrf.mxu1  ;;  %v3589_v54 = vld [vmem:[%s7917_s0 + $0x170] sm:$0xff]  ;;  %v3596_v36 = vld [vmem:[%s7917_s0 + $0x228] sm:$0xff] }
 0x1da   :  { %7980 = vst [vmem:[#allocation23_spill] sm:$0xff] %v6877_v35  ;;  %2494 = vmatmul.mubr.f32.gmra.mxu0 %v3587_v22  ;;  %v3185_v15 = vmul.f32 %v6877_v35, %v1815_v29  ;;  %v1565_v10 = vpop.f32.mrf.mxu0  ;;  %v3598_v22 = vld [vmem:[%s7917_s0 + $0x238] sm:$0xff] }
 0x1db   :  { %2499 = vmatprep.mubr.f32.mxu0 %v3588_v33  ;;  %v3186_v39 = vmul.f32 %v6877_v35, %v1817_v24  ;;  %v1821_v18 = vadd.f32 %v1820_v51, %v1564_v32  ;;  %v1566_v3 = vadd.f32 %v1565_v10, %v5920_v17  ;;  %v1822_v56 = vpop.f32.mrf.mxu1  ;;  %v3599_v10 = vld [vmem:[%s7917_s0 + $0x220] sm:$0xff] }
 0x1dc   :  { %2751 = vmatmul.mubr.f32.gmra.mxu1 %v3589_v54  ;;  %3314 = vst [vmem:[%s7920_s4 + $0x280] sm:$0xff] %v3185_v15  ;;  %v1569_v53 = vpop.f32.mrf.mxu0  ;;  %v3600_v54 = vld [vmem:[%s7917_s0 + $0x268] sm:$0xff] }
 0x1dd   :  { %3408 = vmatprep.mubr.msk.f32.mxu1 %vm747_vm1, %v3590_v55  ;;  %3315 = vst [vmem:[%s7920_s4 + $0x288] sm:$0xff] %v3186_v39  ;;  %v1823_v49 = vadd.f32 %v1822_v56, %v1566_v3  ;;  %v6902_v58 = vpop.permute.xlu1 %3052  ;;  %v1570_v17 = vadd.f32 %v1569_v53, %v5938_v50  ;;  %v1826_v38 = vpop.f32.mrf.mxu1  ;;  %v3593_v50 = vld [vmem:[%s7917_s0 + $0x1b0] sm:$0xff]  ;;  %v7984_v53 = vld [vmem:[#allocation3_spill] sm:$0xff] }
 0x1de   :  { %7981 = vst [vmem:[#allocation24_spill] sm:$0xff] %v6902_v58  ;;  %2500 = vmatmul.mubr.f32.gmra.mxu0 %v3591_v57  ;;  %v3189_v26 = vmul.f32 %v6902_v58, %v1821_v18  ;;  %v1571_v25 = vpop.f32.mrf.mxu0  ;;  %v3602_v57 = vld [vmem:[%s7917_s0 + $0x278] sm:$0xff] }
 0x1df   :  { %2505 = vmatprep.mubr.f32.mxu0 %v3592_v19  ;;  %v3190_v34 = vmul.f32 %v6902_v58, %v1823_v49  ;;  %v1827_v63 = vadd.f32 %v1826_v38, %v1570_v17  ;;  %v1572_v30 = vadd.f32 %v1571_v25, %v5950_v13  ;;  %v1828_v45 = vpop.f32.mrf.mxu1  ;;  %v7986_v25 = vld [vmem:[#allocation4_spill] sm:$0xff] }
 0x1e0   :  { %2757 = vmatmul.mubr.f32.gmra.mxu1 %v3593_v50  ;;  %3318 = vst [vmem:[%s7920_s4 + $0x2a0] sm:$0xff] %v3189_v26  ;;  %v1575_v12 = vpop.f32.mrf.mxu0 }
 0x1e1   :  { %3409 = vmatprep.mubr.msk.f32.mxu1 %vm747_vm1, %v3594_v31  ;;  %3319 = vst [vmem:[%s7920_s4 + $0x2a8] sm:$0xff] %v3190_v34  ;;  %v1829_v4 = vadd.f32 %v1828_v45, %v1572_v30  ;;  %v6927_v47 = vpop.permute.xlu0 %3057  ;;  %v1576_v13 = vadd.f32 %v1575_v12, %v5965_v41  ;;  %v1832_v11 = vpop.f32.mrf.mxu1  ;;  %v3597_v41 = vld [vmem:[%s7917_s0 + $0x1f0] sm:$0xff]  ;;  %v3603_v34 = vld [vmem:[%s7917_s0 + $0x260] sm:$0xff]  ;;  %v3604_v45 = vld [vmem:[%s7917_s0 + $0x2a8] sm:$0xff] }
 0x1e2   :  { %7982 = vst [vmem:[#allocation25_spill] sm:$0xff] %v6927_v47  ;;  %2506 = vmatmul.mubr.f32.gmra.mxu0 %v3595_v23  ;;  %v3193_v29 = vmul.f32 %v6927_v47, %v1827_v63  ;;  %v1577_v9 = vpop.f32.mrf.mxu0 }
 0x1e3   :  { %2511 = vmatprep.mubr.f32.mxu0 %v3596_v36  ;;  %v3194_v20 = vmul.f32 %v6927_v47, %v1829_v4  ;;  %v1833_v7 = vadd.f32 %v1832_v11, %v1576_v13  ;;  %v1578_v8 = vadd.f32 %v1577_v9, %v5980_v16  ;;  %v1834_v24 = vpop.f32.mrf.mxu1  ;;  %v3605_v4 = vld [vmem:[%s7917_s0 + $0x270] sm:$0xff]  ;;  %v7987_v13 = vld [vmem:[#allocation5_spill] sm:$0xff] }
 0x1e4   :  { %2763 = vmatmul.mubr.f32.gmra.mxu1 %v3597_v41  ;;  %3322 = vst [vmem:[%s7920_s4 + $0x2c0] sm:$0xff] %v3193_v29  ;;  %v1581_v32 = vpop.f32.mrf.mxu0  ;;  %v3606_v9 = vld [vmem:[%s7917_s0 + $0x2b8] sm:$0xff] }
 0x1e5   :  { %3410 = vmatprep.mubr.msk.f32.mxu1 %vm747_vm1, %v3598_v22  ;;  %3323 = vst [vmem:[%s7920_s4 + $0x2c8] sm:$0xff] %v3194_v20  ;;  %v1835_v51 = vadd.f32 %v1834_v24, %v1578_v8  ;;  %v6952_v15 = vpop.permute.xlu1 %3062  ;;  %v1582_v16 = vadd.f32 %v1581_v32, %v5998_v0  ;;  %v1838_v33 = vpop.f32.mrf.mxu1  ;;  %v3601_v0 = vld [vmem:[%s7917_s0 + $0x230] sm:$0xff]  ;;  %v3607_v8 = vld [vmem:[%s7917_s0 + $0x2a0] sm:$0xff] }
 0x1e6   :  { %7983 = vst [vmem:[#allocation26_spill] sm:$0xff] %v6952_v15  ;;  %2512 = vmatmul.mubr.f32.gmra.mxu0 %v3599_v10  ;;  %v3197_v39 = vmul.f32 %v6952_v15, %v1833_v7  ;;  %v1583_v18 = vpop.f32.mrf.mxu0  ;;  %v7989_v7 = vld [vmem:[#allocation6_spill] sm:$0xff] }
 0x1e7   :  { %2517 = vmatprep.mubr.f32.mxu0 %v3600_v54  ;;  %v3198_v3 = vmul.f32 %v6952_v15, %v1835_v51  ;;  %v1839_v56 = vadd.f32 %v1838_v33, %v1582_v16  ;;  %v1584_v55 = vadd.f32 %v1583_v18, %v7984_v53  ;;  %v1840_v49 = vpop.f32.mrf.mxu1  ;;  %v3608_v51 = vld [vmem:[%s7917_s0 + $0x2e8] sm:$0xff]  ;;  %v3609_v33 = vld [vmem:[%s7917_s0 + $0x2b0] sm:$0xff] }
 0x1e8   :  { %2769 = vmatmul.mubr.f32.gmra.mxu1 %v3601_v0  ;;  %3326 = vst [vmem:[%s7920_s4 + $0x2e0] sm:$0xff] %v3197_v39  ;;  %v1587_v17 = vpop.f32.mrf.mxu0  ;;  %v7990_v39 = vld [vmem:[#allocation7_spill] sm:$0xff] }
 0x1e9   :  { %3411 = vmatprep.mubr.msk.f32.mxu1 %vm747_vm1, %v3602_v57  ;;  %3327 = vst [vmem:[%s7920_s4 + $0x2e8] sm:$0xff] %v3198_v3  ;;  %v1841_v38 = vadd.f32 %v1840_v49, %v1584_v55  ;;  %v6977_v26 = vpop.permute.xlu0 %3067  ;;  %v1588_v19 = vadd.f32 %v1587_v17, %v7986_v25  ;;  %v1844_v63 = vpop.f32.mrf.mxu1  ;;  %v7992_v55 = vld [vmem:[#allocation8_spill] sm:$0xff]  ;;  %v3611_v17 = vld [vmem:[%s7917_s0 + $0x2e0] sm:$0xff] }
 0x1ea   :  { %7985 = vst [vmem:[#allocation3_spill] sm:$0xff] %v6977_v26  ;;  %2518 = vmatmul.mubr.f32.gmra.mxu0 %v3603_v34  ;;  %v3201_v50 = vmul.f32 %v6977_v26, %v1839_v56  ;;  %v1589_v30 = vpop.f32.mrf.mxu0  ;;  %v3610_v56 = vld [vmem:[%s7917_s0 + $0x2f8] sm:$0xff] }
 0x1eb   :  { %2523 = vmatprep.mubr.f32.mxu0 %v3604_v45  ;;  %v3202_v12 = vmul.f32 %v6977_v26, %v1841_v38  ;;  %v1845_v31 = vadd.f32 %v1844_v63, %v1588_v19  ;;  %v1590_v23 = vadd.f32 %v1589_v30, %v7987_v13  ;;  %v1846_v11 = vpop.f32.mrf.mxu1  ;;  %v3612_v19 = vld [vmem:[%s7917_s0 + $0x328] sm:$0xff]  ;;  %v7993_v30 = vld [vmem:[#allocation9_spill] sm:$0xff] }
 0x1ec   :  { %2775 = vmatmul.mubr.f32.gmra.mxu1 %v3605_v4  ;;  %3330 = vst [vmem:[%s7920_s4 + $0x300] sm:$0xff] %v3201_v50  ;;  %v1593_v29 = vpop.f32.mrf.mxu0  ;;  %v3613_v50 = vld [vmem:[%s7917_s0 + $0x2f0] sm:$0xff]  ;;  %v3614_v4 = vld [vmem:[%s7917_s0 + $0x338] sm:$0xff] }
 0x1ed   :  { %3412 = vmatprep.mubr.msk.f32.mxu1 %vm747_vm1, %v3606_v9  ;;  %3331 = vst [vmem:[%s7920_s4 + $0x308] sm:$0xff] %v3202_v12  ;;  %v1847_v36 = vadd.f32 %v1846_v11, %v1590_v23  ;;  %v7002_v20 = vpop.permute.xlu1 %3072  ;;  %v1594_v41 = vadd.f32 %v1593_v29, %v7989_v7  ;;  %v1850_v24 = vpop.f32.mrf.mxu1  ;;  %v7995_v11 = vld [vmem:[#allocation10_spill] sm:$0xff] }
 0x1ee   :  { %7988 = vst [vmem:[#allocation4_spill] sm:$0xff] %v7002_v20  ;;  %2524 = vmatmul.mubr.f32.gmra.mxu0 %v3607_v8  ;;  %v3205_v32 = vmul.f32 %v7002_v20, %v1845_v31  ;;  %v1595_v22 = vpop.f32.mrf.mxu0  ;;  %v3615_v9 = vld [vmem:[%s7917_s0 + $0x320] sm:$0xff]  ;;  %v3616_v8 = vld [vmem:[%s7917_s0 + $0x368] sm:$0xff] }
 0x1ef   :  { %2529 = vmatprep.mubr.f32.mxu0 %v3608_v51  ;;  %v3206_v16 = vmul.f32 %v7002_v20, %v1847_v36  ;;  %v1851_v10 = vadd.f32 %v1850_v24, %v1594_v41  ;;  %v1596_v18 = vadd.f32 %v1595_v22, %v7990_v39  ;;  %v1852_v54 = vpop.f32.mrf.mxu1  ;;  %v3617_v22 = vld [vmem:[%s7917_s0 + $0x330] sm:$0xff]  ;;  %v7996_v51 = vld [vmem:[#allocation11_spill] sm:$0xff]  ;;  %v3618_v39 = vld [vmem:[%s7917_s0 + $0x378] sm:$0xff] }
 0x1f0   :  { %2781 = vmatmul.mubr.f32.gmra.mxu1 %v3609_v33  ;;  %3334 = vst [vmem:[%s7920_s4 + $0x320] sm:$0xff] %v3205_v32  ;;  %v1599_v3 = vpop.f32.mrf.mxu0 }
 0x1f1   :  { %3413 = vmatprep.mubr.msk.f32.mxu1 %vm747_vm1, %v3610_v56  ;;  %3335 = vst [vmem:[%s7920_s4 + $0x328] sm:$0xff] %v3206_v16  ;;  %v1853_v0 = vadd.f32 %v1852_v54, %v1596_v18  ;;  %v7027_v53 = vpop.permute.xlu0 %3077  ;;  %v1600_v49 = vadd.f32 %v1599_v3, %v7992_v55  ;;  %v1856_v57 = vpop.f32.mrf.mxu1  ;;  %v7997_v54 = vld [vmem:[#allocation12_spill] sm:$0xff]  ;;  %v3619_v56 = vld [vmem:[%s7917_s0 + $0x360] sm:$0xff] }
 0x1f2   :  { %7991 = vst [vmem:[#allocation5_spill] sm:$0xff] %v7027_v53  ;;  %2530 = vmatmul.mubr.f32.gmra.mxu0 %v3611_v17  ;;  %v3209_v38 = vmul.f32 %v7027_v53, %v1851_v10  ;;  %v1601_v25 = vpop.f32.mrf.mxu0  ;;  %v3620_v17 = vld [vmem:[%s7917_s0 + $0x3a8] sm:$0xff] }
 0x1f3   :  { %2535 = vmatprep.mubr.f32.mxu0 %v3612_v19  ;;  %v3210_v34 = vmul.f32 %v7027_v53, %v1853_v0  ;;  %v1857_v63 = vadd.f32 %v1856_v57, %v1600_v49  ;;  %v1602_v45 = vadd.f32 %v1601_v25, %v7993_v30  ;;  %v1858_v12 = vpop.f32.mrf.mxu1  ;;  %v3621_v19 = vld [vmem:[%s7917_s0 + $0x370] sm:$0xff] }
 0x1f4   :  { %2787 = vmatmul.mubr.f32.gmra.mxu1 %v3613_v50  ;;  %3338 = vst [vmem:[%s7920_s4 + $0x340] sm:$0xff] %v3209_v38  ;;  %v1605_v31 = vpop.f32.mrf.mxu0 }
 0x1f5   :  { %3414 = vmatprep.mubr.msk.f32.mxu1 %vm747_vm1, %v3614_v4  ;;  %3339 = vst [vmem:[%s7920_s4 + $0x348] sm:$0xff] %v3210_v34  ;;  %v1859_v13 = vadd.f32 %v1858_v12, %v1602_v45  ;;  %v7052_v23 = vpop.permute.xlu1 %3082  ;;  %v1606_v29 = vadd.f32 %v1605_v31, %v7995_v11  ;;  %v1862_v36 = vpop.f32.mrf.mxu1  ;;  %v7999_v34 = vld [vmem:[#allocation13_spill] sm:$0xff]  ;;  %v8001_v4 = vld [vmem:[#allocation14_spill] sm:$0xff] }
 0x1f6   :  { %7994 = vst [vmem:[#allocation6_spill] sm:$0xff] %v7052_v23  ;;  %2536 = vmatmul.mubr.f32.gmra.mxu0 %v3615_v9  ;;  %v3213_v7 = vmul.f32 %v7052_v23, %v1857_v63  ;;  %v1607_v41 = vpop.f32.mrf.mxu0  ;;  %v3622_v45 = vld [vmem:[%s7917_s0 + $0x3b8] sm:$0xff]  ;;  %v3623_v11 = vld [vmem:[%s7917_s0 + $0x3a0] sm:$0xff] }
 0x1f7   :  { %2541 = vmatprep.mubr.f32.mxu0 %v3616_v8  ;;  %v3214_v24 = vmul.f32 %v7052_v23, %v1859_v13  ;;  %v1863_v32 = vadd.f32 %v1862_v36, %v1606_v29  ;;  %v1608_v16 = vadd.f32 %v1607_v41, %v7996_v51  ;;  %v1864_v10 = vpop.f32.mrf.mxu1  ;;  %v8002_v41 = vld [vmem:[#allocation2_spill] sm:$0xff]  ;;  %v8003_v51 = vld [vmem:[#allocation15_spill] sm:$0xff] }
 0x1f8   :  { %2793 = vmatmul.mubr.f32.gmra.mxu1 %v3617_v22  ;;  %3342 = vst [vmem:[%s7920_s4 + $0x360] sm:$0xff] %v3213_v7  ;;  %v1611_v33 = vpop.f32.mrf.mxu0  ;;  %v3624_v7 = vld [vmem:[%s7917_s0 + $0x3e8] sm:$0xff]  ;;  %v737_v8 = vsub.s32 2, %v8002_v41  ;;  %v3625_v22 = vld [vmem:[%s7917_s0 + $0x3b0] sm:$0xff] }
 0x1f9   :  { %3415 = vmatprep.mubr.msk.f32.mxu1 %vm747_vm1, %v3618_v39  ;;  %3343 = vst [vmem:[%s7920_s4 + $0x368] sm:$0xff] %v3214_v24  ;;  %v1865_v18 = vadd.f32 %v1864_v10, %v1608_v16  ;;  %v1612_v3 = vadd.f32 %v1611_v33, %v7997_v54  ;;  %v1868_v0 = vpop.f32.mrf.mxu1  ;;  %v3626_v39 = vld [vmem:[%s7917_s0 + $0x3f8] sm:$0xff] }
 0x1fa   :  { %2542 = vmatmul.mubr.f32.gmra.mxu0 %v3619_v56  ;;  %v7081_v55 = vpop.permute.xlu0 %3087  ;;  %v1613_v49 = vpop.f32.mrf.mxu0  ;;  %v3627_v56 = vld [vmem:[%s7917_s0 + $0x3e0] sm:$0xff] }
 0x1fb   :  { %7998 = vst [vmem:[#allocation7_spill] sm:$0xff] %v7081_v55  ;;  %2547 = vmatprep.mubr.f32.mxu0 %v3620_v17  ;;  %v3217_v57 = vmul.f32 %v7081_v55, %v1863_v32  ;;  %v3218_v38 = vmul.f32 %v7081_v55, %v1865_v18  ;;  %v1869_v25 = vadd.f32 %v1868_v0, %v1612_v3  ;;  %v1870_v50 = vpop.f32.mrf.mxu1  ;;  %v741_v18 = vsub.s32 3, %v8002_v41  ;;  %v3628_v17 = vld [vmem:[%s7917_s0 + $0x428] sm:$0xff] }
 0x1fc   :  { %2799 = vmatmul.mubr.f32.gmra.mxu1 %v3621_v19  ;;  %v1614_v63 = vadd.f32 %v1613_v49, %v7999_v34  ;;  %v1617_v30 = vpop.f32.mrf.mxu0  ;;  %v3630_v34 = vld [vmem:[%s7917_s0 + $0x3f0] sm:$0xff] }
 0x1fd   :  { %3416 = vmatprep.mubr.msk.f32.mxu1 %vm747_vm1, %v3622_v45  ;;  %3346 = vst [vmem:[%s7920_s4 + $0x380] sm:$0xff] %v3217_v57  ;;  %3347 = vst [vmem:[%s7920_s4 + $0x388] sm:$0xff] %v3218_v38  ;;  %v7102_v31 = vpop.permute.xlu1 %3092  ;;  %v1618_v13 = vadd.f32 %v1617_v30, %v8001_v4  ;;  %v1874_v29 = vpop.f32.mrf.mxu1  ;;  %v3629_v57 = vld [vmem:[%s7919_s2] sm:$0xf] }
 0x1fe   :  { %v1871_v12 = vadd.f32 %v1870_v50, %v1614_v63  ;;  %8000 = vst [vmem:[#allocation8_spill] sm:$0xff] %v7102_v31  ;;  %2548 = vmatmul.mubr.f32.gmra.mxu0 %v3623_v11  ;;  %v3221_v9 = vmul.f32 %v7102_v31, %v1869_v25  ;;  %v1619_v36 = vpop.f32.mrf.mxu0  ;;  %v7141_v38 = vrot.slane %v3629_v57, %v737_v8  ;;  %v8005_v50 = vld [vmem:[#allocation17_spill] sm:$0xff]  ;;  %v3633_v8 = vld [vmem:[%s7917_s0 + $0x468] sm:$0xff] }
 0x1ff   :  { %2553 = vmatprep.mubr.f32.mxu0 %v3624_v7  ;;  %v1875_v32 = vadd.f32 %v1874_v29, %v1618_v13  ;;  %v1620_v16 = vadd.f32 %v1619_v36, %v8003_v51  ;;  %v1876_v10 = vpop.f32.mrf.mxu1  ;;  %v7153_v4 = vrot.slane %v3629_v57, %v741_v18  ;;  %v3632_v29 = vld [vmem:[%s7917_s0 + $0x420] sm:$0xff] }
 0x200   :  { %v3222_v24 = vmul.f32 %v7102_v31, %v1871_v12  ;;  %2805 = vmatmul.mubr.f32.gmra.mxu1 %v3625_v22  ;;  %3350 = vst [vmem:[%s7920_s4 + $0x3a0] sm:$0xff] %v3221_v9  ;;  %v1623_v33 = vpop.f32.mrf.mxu0  ;;  %v3631_v12 = vld [vmem:[%s7917_s0 + $0x438] sm:$0xff]  ;;  %v3636_v18 = vld [vmem:[%s7917_s0 + $0x460] sm:$0xff] }
 0x201   :  { %3417 = vmatprep.mubr.msk.f32.mxu1 %vm747_vm1, %v3626_v39  ;;  %v1877_v54 = vadd.f32 %v1876_v10, %v1620_v16  ;;  %v1624_v3 = vadd.f32 %v1623_v33, %v6208_v44  ;;  %v3635_v33 = vld [vmem:[%s7917_s0 + $0x478] sm:$0xff] }
 0x202   :  { %3351 = vst [vmem:[%s7920_s4 + $0x3a8] sm:$0xff] %v3222_v24  ;;  %2554 = vmatmul.mubr.f32.gmra.mxu0 %v3627_v56  ;;  %v7133_v0 = vpop.permute.xlu0 %3097  ;;  %v1880_v49 = vpop.f32.mrf.mxu1  ;;  %v3634_v24 = vld [vmem:[%s7917_s0 + $0x430] sm:$0xff]  ;;  %v3637_v56 = vld [vmem:[%s7917_s0 + $0x4a8] sm:$0xff] }
 0x203   :  { %8004 = vst [vmem:[#allocation9_spill] sm:$0xff] %v7133_v0  ;;  %2559 = vmatprep.mubr.f32.mxu0 %v3628_v17  ;;  %v3225_v44 = vmul.f32 %v7133_v0, %v1875_v32  ;;  %v3226_v25 = vmul.f32 %v7133_v0, %v1877_v54  ;;  %v1881_v19 = vadd.f32 %v1880_v49, %v1624_v3  ;;  %v1625_v63 = vpop.f32.mrf.mxu0  ;;  %v3638_v17 = vld [vmem:[%s7917_s0 + $0x470] sm:$0xff] }
 0x204   :  { %2811 = vmatmul.mubr.f32.gmra.mxu1 %v3630_v34  ;;  %v1626_v30 = vadd.f32 %v1625_v63, %v8005_v50  ;;  %v1882_v45 = vpop.f32.mrf.mxu1  ;;  %v3640_v50 = vld [vmem:[%s7917_s0 + $0x4a0] sm:$0xff] }
 0x205   :  { %3418 = vmatprep.mubr.msk.f32.mxu1 %vm747_vm1, %v3631_v12  ;;  %3354 = vst [vmem:[%s7920_s4 + $0x3c0] sm:$0xff] %v3225_v44  ;;  %3355 = vst [vmem:[%s7920_s4 + $0x3c8] sm:$0xff] %v3226_v25  ;;  %v7161_v13 = vpop.permute.xlu1 %3102  ;;  %v1951_v11 = vpop.f32.mrf.mxu0  ;;  %v3641_v12 = vld [vmem:[%s7917_s0 + $0x4e8] sm:$0xff] }
 0x206   :  { %8006 = vst [vmem:[#allocation10_spill] sm:$0xff] %v7161_v13  ;;  %2560 = vmatmul.mubr.f32.gmra.mxu0 %v3632_v29  ;;  %v1883_v9 = vadd.f32 %v1882_v45, %v1626_v30  ;;  %v3229_v36 = vmul.f32 %v7161_v13, %v1881_v19  ;;  %v1952_v7 = vadd.f32 %v1951_v11, %v7141_v38  ;;  %v2208_v41 = vpop.f32.mrf.mxu1  ;;  %v3639_v19 = vld [vmem:[%s7917_s0 + $0x4b8] sm:$0xff]  ;;  %v3642_v29 = vld [vmem:[%s7917_s0 + $0x4b0] sm:$0xff] }
 0x207   :  { %2565 = vmatprep.mubr.f32.mxu0 %v3633_v8  ;;  %v1953_v32 = vpop.f32.mrf.mxu0 }
 0x208   :  { %2817 = vmatmul.mubr.f32.gmra.mxu1 %v3634_v24  ;;  %v3230_v22 = vmul.f32 %v7161_v13, %v1883_v9  ;;  %3358 = vst [vmem:[%s7920_s4 + $0x3e0] sm:$0xff] %v3229_v36  ;;  %v7178_v51 = vadd.f32 %v2208_v41, %v1952_v7  ;;  %v1954_v16 = vadd.f32 %v1953_v32, %v7153_v4  ;;  %v2210_v10 = vpop.f32.mrf.mxu1  ;;  %v3643_v41 = vld [vmem:[%s7917_s0 + $0x4f8] sm:$0xff]  ;;  %v3644_v32 = vld [vmem:[%s7917_s0 + $0x4e0] sm:$0xff] }
 0x209   :  { %3419 = vmatprep.mubr.msk.f32.mxu1 %vm747_vm1, %v3635_v33  ;;  %v1957_v39 = vpop.f32.mrf.mxu0 }
 0x20a   :  { %2566 = vmatmul.mubr.f32.gmra.mxu0 %v3636_v18  ;;  %3359 = vst [vmem:[%s7920_s4 + $0x3e8] sm:$0xff] %v3230_v22  ;;  %v7191_v54 = vadd.f32 %v2210_v10, %v1954_v16  ;;  %v1958_v3 = vadd.f32 %v1957_v39, %v7141_v38  ;;  %v3645_v10 = vld [vmem:[%s7917_s0 + $0x528] sm:$0xff]  ;;  %v3646_v39 = vld [vmem:[%s7917_s0 + $0x4f0] sm:$0xff] }
 0x20b   :  { %2571 = vmatprep.mubr.f32.mxu0 %v3637_v56  ;;  %v2214_v49 = vpop.f32.mrf.mxu1  ;;  %v1959_v57 = vpop.f32.mrf.mxu0 }
 0x20c   :  { %2823 = vmatmul.mubr.f32.gmra.mxu1 %v3638_v17  ;;  %v7200_v44 = vadd.f32 %v2214_v49, %v1958_v3  ;;  %v1960_v25 = vadd.f32 %v1959_v57, %v7153_v4  ;;  %v3647_v49 = vld [vmem:[%s7917_s0 + $0x538] sm:$0xff] }
 0x20d   :  { %3420 = vmatprep.mubr.msk.f32.mxu1 %vm747_vm1, %v3639_v19  ;;  %v2216_v34 = vpop.f32.mrf.mxu1  ;;  %v1963_v63 = vpop.f32.mrf.mxu0 }
 0x20e   :  { %2572 = vmatmul.mubr.f32.gmra.mxu0 %v3640_v50  ;;  %v7210_v30 = vadd.f32 %v2216_v34, %v1960_v25  ;;  %v1964_v45 = vadd.f32 %v1963_v63, %v7141_v38  ;;  %v3648_v25 = vld [vmem:[%s7917_s0 + $0x520] sm:$0xff]  ;;  %v3649_v63 = vld [vmem:[%s7917_s0 + $0x568] sm:$0xff] }
 0x20f   :  { %2577 = vmatprep.mubr.f32.mxu0 %v3641_v12  ;;  %v2220_v11 = vpop.f32.mrf.mxu1  ;;  %v1965_v9 = vpop.f32.mrf.mxu0 }
 0x210   :  { %2829 = vmatmul.mubr.f32.gmra.mxu1 %v3642_v29  ;;  %v7219_v36 = vadd.f32 %v2220_v11, %v1964_v45  ;;  %v1966_v7 = vadd.f32 %v1965_v9, %v7153_v4  ;;  %v3650_v45 = vld [vmem:[%s7917_s0 + $0x530] sm:$0xff]  ;;  %v3651_v9 = vld [vmem:[%s7917_s0 + $0x578] sm:$0xff] }
 0x211   :  { %3421 = vmatprep.mubr.msk.f32.mxu1 %vm747_vm1, %v3643_v41  ;;  %v2222_v8 = vpop.f32.mrf.mxu1  ;;  %v1969_v24 = vpop.f32.mrf.mxu0 }
 0x212   :  { %2578 = vmatmul.mubr.f32.gmra.mxu0 %v3644_v32  ;;  %v7229_v22 = vadd.f32 %v2222_v8, %v1966_v7  ;;  %v1970_v16 = vadd.f32 %v1969_v24, %v7141_v38  ;;  %v3652_v8 = vld [vmem:[%s7917_s0 + $0x560] sm:$0xff] }
 0x213   :  { %2583 = vmatprep.mubr.f32.mxu0 %v3645_v10  ;;  %v2226_v33 = vpop.f32.mrf.mxu1  ;;  %v1971_v18 = vpop.f32.mrf.mxu0 }
 0x214   :  { %2835 = vmatmul.mubr.f32.gmra.mxu1 %v3646_v39  ;;  %v7238_v3 = vadd.f32 %v2226_v33, %v1970_v16  ;;  %v1972_v56 = vadd.f32 %v1971_v18, %v7153_v4  ;;  %v3653_v16 = vld [vmem:[%s7917_s0 + $0x5a8] sm:$0xff]  ;;  %v3654_v33 = vld [vmem:[%s7917_s0 + $0x570] sm:$0xff] }
 0x215   :  { %3422 = vmatprep.mubr.msk.f32.mxu1 %vm747_vm1, %v3647_v49  ;;  %v2228_v17 = vpop.f32.mrf.mxu1  ;;  %v1975_v57 = vpop.f32.mrf.mxu0  ;;  %v3655_v49 = vld [vmem:[%s7917_s0 + $0x5b8] sm:$0xff] }
 0x216   :  { %2584 = vmatmul.mubr.f32.gmra.mxu0 %v3648_v25  ;;  %v7248_v19 = vadd.f32 %v2228_v17, %v1972_v56  ;;  %v1976_v34 = vadd.f32 %v1975_v57, %v7141_v38  ;;  %v3656_v25 = vld [vmem:[%s7917_s0 + $0x5a0] sm:$0xff] }
 0x217   :  { %2589 = vmatprep.mubr.f32.mxu0 %v3649_v63  ;;  %v2232_v50 = vpop.f32.mrf.mxu1  ;;  %v1977_v12 = vpop.f32.mrf.mxu0 }
 0x218   :  { %2841 = vmatmul.mubr.f32.gmra.mxu1 %v3650_v45  ;;  %v7257_v11 = vadd.f32 %v2232_v50, %v1976_v34  ;;  %v1978_v29 = vadd.f32 %v1977_v12, %v7153_v4  ;;  %v3657_v50 = vld [vmem:[%s7917_s0 + $0x5e8] sm:$0xff]  ;;  %v3658_v12 = vld [vmem:[%s7917_s0 + $0x5b0] sm:$0xff] }
 0x219   :  { %3423 = vmatprep.mubr.msk.f32.mxu1 %vm747_vm1, %v3651_v9  ;;  %v2234_v7 = vpop.f32.mrf.mxu1  ;;  %v1981_v41 = vpop.f32.mrf.mxu0 }
 0x21a   :  { %2590 = vmatmul.mubr.f32.gmra.mxu0 %v3652_v8  ;;  %v7267_v24 = vadd.f32 %v2234_v7, %v1978_v29  ;;  %v1982_v32 = vadd.f32 %v1981_v41, %v7141_v38  ;;  %v3659_v41 = vld [vmem:[%s7917_s0 + $0x5f8] sm:$0xff] }
 0x21b   :  { %2595 = vmatprep.mubr.f32.mxu0 %v3653_v16  ;;  %v2238_v10 = vpop.f32.mrf.mxu1  ;;  %v1983_v39 = vpop.f32.mrf.mxu0  ;;  %v3660_v16 = vld [vmem:[%s7917_s0 + $0x5e0] sm:$0xff] }
 0x21c   :  { %2847 = vmatmul.mubr.f32.gmra.mxu1 %v3654_v33  ;;  %v7276_v18 = vadd.f32 %v2238_v10, %v1982_v32  ;;  %v1984_v56 = vadd.f32 %v1983_v39, %v7153_v4  ;;  %v3661_v39 = vld [vmem:[%s7917_s0 + $0x628] sm:$0xff] }
 0x21d   :  { %3424 = vmatprep.mubr.msk.f32.mxu1 %vm747_vm1, %v3655_v49  ;;  %v2240_v17 = vpop.f32.mrf.mxu1  ;;  %v1987_v57 = vpop.f32.mrf.mxu0  ;;  %v3662_v49 = vld [vmem:[%s7917_s0 + $0x5f0] sm:$0xff] }
 0x21e   :  { %2596 = vmatmul.mubr.f32.gmra.mxu0 %v3656_v25  ;;  %v7286_v34 = vadd.f32 %v2240_v17, %v1984_v56  ;;  %v1988_v63 = vadd.f32 %v1987_v57, %v7141_v38 }
 0x21f   :  { %2601 = vmatprep.mubr.f32.mxu0 %v3657_v50  ;;  %v2244_v45 = vpop.f32.mrf.mxu1  ;;  %v1989_v29 = vpop.f32.mrf.mxu0 }
 0x220   :  { %2853 = vmatmul.mubr.f32.gmra.mxu1 %v3658_v12  ;;  %v7295_v9 = vadd.f32 %v2244_v45, %v1988_v63  ;;  %v1990_v7 = vadd.f32 %v1989_v29, %v7153_v4  ;;  %v3663_v63 = vld [vmem:[%s7917_s0 + $0x638] sm:$0xff]  ;;  %v3664_v12 = vld [vmem:[%s7917_s0 + $0x620] sm:$0xff] }
 0x221   :  { %3425 = vmatprep.mubr.msk.f32.mxu1 %vm747_vm1, %v3659_v41  ;;  %v2246_v8 = vpop.f32.mrf.mxu1  ;;  %v1993_v32 = vpop.f32.mrf.mxu0  ;;  %v3665_v41 = vld [vmem:[%s7917_s0 + $0x668] sm:$0xff] }
 0x222   :  { %2602 = vmatmul.mubr.f32.gmra.mxu0 %v3660_v16  ;;  %v7305_v10 = vadd.f32 %v2246_v8, %v1990_v7  ;;  %v1994_v33 = vadd.f32 %v1993_v32, %v7141_v38  ;;  %v3666_v32 = vld [vmem:[%s7917_s0 + $0x630] sm:$0xff] }
 0x223   :  { %2607 = vmatprep.mubr.f32.mxu0 %v3661_v39  ;;  %v2250_v56 = vpop.f32.mrf.mxu1  ;;  %v1995_v17 = vpop.f32.mrf.mxu0 }
 0x224   :  { %2859 = vmatmul.mubr.f32.gmra.mxu1 %v3662_v49  ;;  %v7314_v57 = vadd.f32 %v2250_v56, %v1994_v33  ;;  %v1996_v25 = vadd.f32 %v1995_v17, %v7153_v4  ;;  %v3667_v56 = vld [vmem:[%s7917_s0 + $0x678] sm:$0xff] }
 0x225   :  { %3426 = vmatprep.mubr.msk.f32.mxu1 %vm747_vm1, %v3663_v63  ;;  %v2252_v50 = vpop.f32.mrf.mxu1  ;;  %v1999_v45 = vpop.f32.mrf.mxu0 }
 0x226   :  { %2608 = vmatmul.mubr.f32.gmra.mxu0 %v3664_v12  ;;  %v7324_v29 = vadd.f32 %v2252_v50, %v1996_v25  ;;  %v2000_v7 = vadd.f32 %v1999_v45, %v7141_v38  ;;  %v3668_v25 = vld [vmem:[%s7917_s0 + $0x660] sm:$0xff]  ;;  %v3669_v45 = vld [vmem:[%s7917_s0 + $0x6a8] sm:$0xff] }
 0x227   :  { %2613 = vmatprep.mubr.f32.mxu0 %v3665_v41  ;;  %v2256_v8 = vpop.f32.mrf.mxu1  ;;  %v2001_v16 = vpop.f32.mrf.mxu0 }
 0x228   :  { %2865 = vmatmul.mubr.f32.gmra.mxu1 %v3666_v32  ;;  %v7333_v33 = vadd.f32 %v2256_v8, %v2000_v7  ;;  %v2002_v39 = vadd.f32 %v2001_v16, %v7153_v4  ;;  %v3670_v7 = vld [vmem:[%s7917_s0 + $0x670] sm:$0xff]  ;;  %v3671_v16 = vld [vmem:[%s7917_s0 + $0x6b8] sm:$0xff] }
 0x229   :  { %3427 = vmatprep.mubr.msk.f32.mxu1 %vm747_vm1, %v3667_v56  ;;  %v2258_v49 = vpop.f32.mrf.mxu1  ;;  %v2005_v17 = vpop.f32.mrf.mxu0 }
 0x22a   :  { %2614 = vmatmul.mubr.f32.gmra.mxu0 %v3668_v25  ;;  %v7343_v63 = vadd.f32 %v2258_v49, %v2002_v39  ;;  %v2006_v50 = vadd.f32 %v2005_v17, %v7141_v38  ;;  %v3672_v49 = vld [vmem:[%s7917_s0 + $0x6a0] sm:$0xff] }
 0x22b   :  { %2619 = vmatprep.mubr.f32.mxu0 %v3669_v45  ;;  %v2262_v12 = vpop.f32.mrf.mxu1  ;;  %v2007_v41 = vpop.f32.mrf.mxu0 }
 0x22c   :  { %2871 = vmatmul.mubr.f32.gmra.mxu1 %v3670_v7  ;;  %v7352_v8 = vadd.f32 %v2262_v12, %v2006_v50  ;;  %v2008_v32 = vadd.f32 %v2007_v41, %v7153_v4  ;;  %v3673_v50 = vld [vmem:[%s7917_s0 + $0x6e8] sm:$0xff]  ;;  %v3674_v12 = vld [vmem:[%s7917_s0 + $0x6b0] sm:$0xff] }
 0x22d   :  { %3428 = vmatprep.mubr.msk.f32.mxu1 %vm747_vm1, %v3671_v16  ;;  %v2264_v39 = vpop.f32.mrf.mxu1  ;;  %v2011_v56 = vpop.f32.mrf.mxu0 }
 0x22e   :  { %2620 = vmatmul.mubr.f32.gmra.mxu0 %v3672_v49  ;;  %v7362_v17 = vadd.f32 %v2264_v39, %v2008_v32  ;;  %v2012_v25 = vadd.f32 %v2011_v56, %v7141_v38  ;;  %v3675_v32 = vld [vmem:[%s7917_s0 + $0x6f8] sm:$0xff]  ;;  %v3676_v49 = vld [vmem:[%s7917_s0 + $0x6e0] sm:$0xff] }
 0x22f   :  { %2625 = vmatprep.mubr.f32.mxu0 %v3673_v50  ;;  %v2268_v45 = vpop.f32.mrf.mxu1  ;;  %v2013_v7 = vpop.f32.mrf.mxu0 }
 0x230   :  { %2877 = vmatmul.mubr.f32.gmra.mxu1 %v3674_v12  ;;  %v7371_v41 = vadd.f32 %v2268_v45, %v2012_v25  ;;  %v2014_v16 = vadd.f32 %v2013_v7, %v7153_v4  ;;  %v3677_v45 = vld [vmem:[%s7917_s0 + $0x728] sm:$0xff]  ;;  %v3678_v7 = vld [vmem:[%s7917_s0 + $0x6f0] sm:$0xff] }
 0x231   :  { %3429 = vmatprep.mubr.msk.f32.mxu1 %vm747_vm1, %v3675_v32  ;;  %v2270_v39 = vpop.f32.mrf.mxu1  ;;  %v2017_v56 = vpop.f32.mrf.mxu0 }
 0x232   :  { %2626 = vmatmul.mubr.f32.gmra.mxu0 %v3676_v49  ;;  %v7381_v50 = vadd.f32 %v2270_v39, %v2014_v16  ;;  %v2018_v25 = vadd.f32 %v2017_v56, %v7141_v38  ;;  %v3679_v16 = vld [vmem:[%s7917_s0 + $0x738] sm:$0xff] }
 0x233   :  { %2631 = vmatprep.mubr.f32.mxu0 %v3677_v45  ;;  %v2274_v12 = vpop.f32.mrf.mxu1  ;;  %v2019_v32 = vpop.f32.mrf.mxu0  ;;  %v3680_v45 = vld [vmem:[%s7917_s0 + $0x720] sm:$0xff] }
 0x234   :  { %2883 = vmatmul.mubr.f32.gmra.mxu1 %v3678_v7  ;;  %v7390_v13 = vadd.f32 %v2274_v12, %v2018_v25  ;;  %v2020_v49 = vadd.f32 %v2019_v32, %v7153_v4  ;;  %v3681_v12 = vld [vmem:[%s7917_s0 + $0x768] sm:$0xff]  ;;  %v3682_v32 = vld [vmem:[%s7917_s0 + $0x730] sm:$0xff] }
 0x235   :  { %3430 = vmatprep.mubr.msk.f32.mxu1 %vm747_vm1, %v3679_v16  ;;  %v2276_v39 = vpop.f32.mrf.mxu1  ;;  %v2023_v56 = vpop.f32.mrf.mxu0 }
 0x236   :  { %2632 = vmatmul.mubr.f32.gmra.mxu0 %v3680_v45  ;;  %v7400_v0 = vadd.f32 %v2276_v39, %v2020_v49  ;;  %v2024_v25 = vadd.f32 %v2023_v56, %v7141_v38  ;;  %v3683_v49 = vld [vmem:[%s7917_s0 + $0x778] sm:$0xff] }
 0x237   :  { %2637 = vmatprep.mubr.f32.mxu0 %v3681_v12  ;;  %v2280_v7 = vpop.f32.mrf.mxu1  ;;  %v2025_v16 = vpop.f32.mrf.mxu0  ;;  %v3684_v12 = vld [vmem:[%s7917_s0 + $0x760] sm:$0xff] }
 0x238   :  { %2889 = vmatmul.mubr.f32.gmra.mxu1 %v3682_v32  ;;  %v7409_v31 = vadd.f32 %v2280_v7, %v2024_v25  ;;  %v2026_v45 = vadd.f32 %v2025_v16, %v7153_v4  ;;  %v3685_v7 = vld [vmem:[%s7917_s0 + $0x7a8] sm:$0xff]  ;;  %v3686_v16 = vld [vmem:[%s7917_s0 + $0x770] sm:$0xff] }
 0x239   :  { %3431 = vmatprep.mubr.msk.f32.mxu1 %vm747_vm1, %v3683_v49  ;;  %v2282_v39 = vpop.f32.mrf.mxu1  ;;  %v2029_v56 = vpop.f32.mrf.mxu0 }
 0x23a   :  { %2638 = vmatmul.mubr.f32.gmra.mxu0 %v3684_v12  ;;  %v7419_v55 = vadd.f32 %v2282_v39, %v2026_v45  ;;  %v2030_v25 = vadd.f32 %v2029_v56, %v7141_v38  ;;  %v3687_v45 = vld [vmem:[%s7917_s0 + $0x7b8] sm:$0xff] }
 0x23b   :  { %2643 = vmatprep.mubr.f32.mxu0 %v3685_v7  ;;  %v2286_v32 = vpop.f32.mrf.mxu1  ;;  %v2031_v49 = vpop.f32.mrf.mxu0  ;;  %v3688_v7 = vld [vmem:[%s7917_s0 + $0x7a0] sm:$0xff] }
 0x23c   :  { %2895 = vmatmul.mubr.f32.gmra.mxu1 %v3686_v16  ;;  %v7428_v23 = vadd.f32 %v2286_v32, %v2030_v25  ;;  %v2032_v12 = vadd.f32 %v2031_v49, %v7153_v4  ;;  %v3689_v32 = vld [vmem:[%s7917_s0 + $0x7e8] sm:$0xff]  ;;  %v3690_v49 = vld [vmem:[%s7917_s0 + $0x7b0] sm:$0xff] }
 0x23d   :  { %3432 = vmatprep.mubr.msk.f32.mxu1 %vm747_vm1, %v3687_v45  ;;  %v2288_v39 = vpop.f32.mrf.mxu1  ;;  %v2035_v56 = vpop.f32.mrf.mxu0 }
 0x23e   :  { %2644 = vmatmul.mubr.f32.gmra.mxu0 %v3688_v7  ;;  %v7438_v53 = vadd.f32 %v2288_v39, %v2032_v12  ;;  %v2036_v25 = vadd.f32 %v2035_v56, %v7141_v38  ;;  %v3691_v12 = vld [vmem:[%s7917_s0 + $0x7f8] sm:$0xff] }
 0x23f   :  { %2649 = vmatprep.mubr.f32.mxu0 %v3689_v32  ;;  %v2292_v16 = vpop.f32.mrf.mxu1  ;;  %v2037_v45 = vpop.f32.mrf.mxu0  ;;  %v3692_v32 = vld [vmem:[%s7917_s0 + $0x7e0] sm:$0xff] }
 0x240   :  { %2901 = vmatmul.mubr.f32.gmra.mxu1 %v3690_v49  ;;  %v7447_v20 = vadd.f32 %v2292_v16, %v2036_v25  ;;  %v2038_v7 = vadd.f32 %v2037_v45, %v7153_v4  ;;  %v3693_v49 = vld [vmem:[%s7917_s0 + $0x7f0] sm:$0xff] }
 0x241   :  { %3433 = vmatprep.mubr.msk.f32.mxu1 %vm747_vm1, %v3691_v12  ;;  %v2294_v39 = vpop.f32.mrf.mxu1  ;;  %v2041_v56 = vpop.f32.mrf.mxu0 }
 0x242   :  { %2650 = vmatmul.mubr.f32.gmra.mxu0 %v3692_v32  ;;  %v7457_v26 = vadd.f32 %v2294_v39, %v2038_v7  ;;  %v2042_v25 = vadd.f32 %v2041_v56, %v7141_v38 }
 0x243   :  { %v2298_v16 = vpop.f32.mrf.mxu1  ;;  %v2043_v45 = vpop.f32.mrf.mxu0 }
 0x244   :  { %2907 = vmatmul.mubr.f32.gmra.mxu1 %v3693_v49  ;;  %v7463_v15 = vadd.f32 %v2298_v16, %v2042_v25  ;;  %v2044_v12 = vadd.f32 %v2043_v45, %v7153_v4 }
 0x245   :  { %v2300_v47 = vpop.f32.mrf.mxu1  ;;  %v2047_v58 = vpop.f32.mrf.mxu0 }
 0x246   :  { %v7466_v35 = vadd.f32 %v2300_v47, %v2044_v12  ;;  %v2048_v7 = vadd.f32 %v2047_v58, %v7141_v38 }
 0x247   :  { %v2304_v39 = vpop.f32.mrf.mxu1  ;;  %v2049_v32 = vpop.f32.mrf.mxu0 }
 0x248   :  { %8007 = vst [vmem:[#allocation11_spill] sm:$0xff] %v7466_v35  ;;  %v7469_v56 = vadd.f32 %v2304_v39, %v2048_v7  ;;  %v2050_v5 = vadd.f32 %v2049_v32, %v7153_v4 }
 0x249   :  { %v2306_v42 = vpop.f32.mrf.mxu1  ;;  %v2053_v40 = vpop.f32.mrf.mxu0 }
 0x24a   :  { %8008 = vst [vmem:[#allocation12_spill] sm:$0xff] %v7469_v56  ;;  %v7472_v49 = vadd.f32 %v2306_v42, %v2050_v5  ;;  %v2054_v25 = vadd.f32 %v2053_v40, %v7141_v38 }
 0x24b   :  { %v2310_v16 = vpop.f32.mrf.mxu1  ;;  %v2055_v45 = vpop.f32.mrf.mxu0 }
 0x24c   :  { %8009 = vst [vmem:[#allocation13_spill] sm:$0xff] %v7472_v49  ;;  %v7475_v2 = vadd.f32 %v2310_v16, %v2054_v25  ;;  %v2056_v47 = vadd.f32 %v2055_v45, %v7153_v4 }
 0x24d   :  { %v2312_v12 = vpop.f32.mrf.mxu1  ;;  %v2059_v58 = vpop.f32.mrf.mxu0 }
 0x24e   :  { %8010 = vst [vmem:[#allocation14_spill] sm:$0xff] %v7475_v2  ;;  %v7478_v43 = vadd.f32 %v2312_v12, %v2056_v47  ;;  %v2060_v7 = vadd.f32 %v2059_v58, %v7141_v38 }
 0x24f   :  { %v2316_v39 = vpop.f32.mrf.mxu1  ;;  %v2061_v32 = vpop.f32.mrf.mxu0 }
 0x250   :  { %8011 = vst [vmem:[#allocation2_spill] sm:$0xff] %v7478_v43  ;;  %v7481_v56 = vadd.f32 %v2316_v39, %v2060_v7  ;;  %v2062_v42 = vadd.f32 %v2061_v32, %v7153_v4 }
 0x251   :  { %v2318_v5 = vpop.f32.mrf.mxu1  ;;  %v2065_v40 = vpop.f32.mrf.mxu0 }
 0x252   :  { %8012 = vst [vmem:[#allocation15_spill] sm:$0xff] %v7481_v56  ;;  %v7484_v49 = vadd.f32 %v2318_v5, %v2062_v42  ;;  %v2066_v25 = vadd.f32 %v2065_v40, %v7141_v38 }
 0x253   :  { %v2322_v16 = vpop.f32.mrf.mxu1  ;;  %v2067_v45 = vpop.f32.mrf.mxu0 }
 0x254   :  { %8013 = vst [vmem:[#allocation17_spill] sm:$0xff] %v7484_v49  ;;  %v7487_v2 = vadd.f32 %v2322_v16, %v2066_v25  ;;  %v2068_v47 = vadd.f32 %v2067_v45, %v7153_v4 }
 0x255   :  { %v2324_v12 = vpop.f32.mrf.mxu1  ;;  %v2071_v58 = vpop.f32.mrf.mxu0 }
 0x256   :  { %8014 = vst [vmem:[#allocation27_spill] sm:$0xff] %v7487_v2  ;;  %v7490_v43 = vadd.f32 %v2324_v12, %v2068_v47  ;;  %v2072_v7 = vadd.f32 %v2071_v58, %v7141_v38 }
 0x257   :  { %v2328_v39 = vpop.f32.mrf.mxu1  ;;  %v2073_v32 = vpop.f32.mrf.mxu0 }
 0x258   :  { %8015 = vst [vmem:[#allocation28_spill] sm:$0xff] %v7490_v43  ;;  %v7493_v56 = vadd.f32 %v2328_v39, %v2072_v7  ;;  %v2074_v42 = vadd.f32 %v2073_v32, %v7153_v4 }
 0x259   :  { %v2330_v5 = vpop.f32.mrf.mxu1 }
 0x25a   :  { %8016 = vst [vmem:[#allocation29_spill] sm:$0xff] %v7493_v56  ;;  %v2077_v40 = vpop.f32.mrf.mxu0  ;;  %v7496_v49 = vadd.f32 %v2330_v5, %v2074_v42 }
 0x25b   :  { %v2078_v25 = vadd.f32 %v2077_v40, %v7141_v38  ;;  %v2334_v16 = vpop.f32.mrf.mxu1 }
 0x25c   :  { %8017 = vst [vmem:[#allocation30_spill] sm:$0xff] %v7496_v49  ;;  %v2079_v45 = vpop.f32.mrf.mxu0 }
 0x25d   :  { %v7499_v2 = vadd.f32 %v2334_v16, %v2078_v25  ;;  %v2080_v47 = vadd.f32 %v2079_v45, %v7153_v4  ;;  %v2336_v12 = vpop.f32.mrf.mxu1 }
 0x25e   :  { %v2083_v58 = vpop.f32.mrf.mxu0 }
 0x25f   :  { %8018 = vst [vmem:[#allocation31_spill] sm:$0xff] %v7499_v2  ;;  %v7502_v43 = vadd.f32 %v2336_v12, %v2080_v47  ;;  %v2084_v7 = vadd.f32 %v2083_v58, %v7141_v38 }
 0x260   :  { %v2340_v39 = vpop.f32.mrf.mxu1  ;;  %v2085_v32 = vpop.f32.mrf.mxu0 }
 0x261   :  { %8019 = vst [vmem:[#allocation32_spill] sm:$0xff] %v7502_v43  ;;  %v7505_v56 = vadd.f32 %v2340_v39, %v2084_v7  ;;  %v2086_v42 = vadd.f32 %v2085_v32, %v7153_v4 }
 0x262   :  { %v2342_v5 = vpop.f32.mrf.mxu1  ;;  %v2089_v40 = vpop.f32.mrf.mxu0 }
 0x263   :  { %8020 = vst [vmem:[#allocation33_spill] sm:$0xff] %v7505_v56  ;;  %v7508_v49 = vadd.f32 %v2342_v5, %v2086_v42  ;;  %v2090_v25 = vadd.f32 %v2089_v40, %v7141_v38 }
 0x264   :  { %v2346_v16 = vpop.f32.mrf.mxu1  ;;  %v2091_v45 = vpop.f32.mrf.mxu0 }
 0x265   :  { %8021 = vst [vmem:[#allocation34_spill] sm:$0xff] %v7508_v49  ;;  %v7511_v2 = vadd.f32 %v2346_v16, %v2090_v25  ;;  %v2092_v47 = vadd.f32 %v2091_v45, %v7153_v4 }
 0x266   :  { %v2348_v12 = vpop.f32.mrf.mxu1  ;;  %v2095_v58 = vpop.f32.mrf.mxu0 }
 0x267   :  { %8022 = vst [vmem:[#allocation35_spill] sm:$0xff] %v7511_v2  ;;  %v7514_v43 = vadd.f32 %v2348_v12, %v2092_v47  ;;  %v2096_v7 = vadd.f32 %v2095_v58, %v7141_v38 }
 0x268   :  { %v2352_v39 = vpop.f32.mrf.mxu1  ;;  %v2097_v32 = vpop.f32.mrf.mxu0 }
 0x269   :  { %8023 = vst [vmem:[#allocation36_spill] sm:$0xff] %v7514_v43  ;;  %v7517_v56 = vadd.f32 %v2352_v39, %v2096_v7  ;;  %v2098_v42 = vadd.f32 %v2097_v32, %v7153_v4 }
 0x26a   :  { %v2354_v5 = vpop.f32.mrf.mxu1  ;;  %v2101_v40 = vpop.f32.mrf.mxu0 }
 0x26b   :  { %8024 = vst [vmem:[#allocation37_spill] sm:$0xff] %v7517_v56  ;;  %v7520_v49 = vadd.f32 %v2354_v5, %v2098_v42  ;;  %v2102_v25 = vadd.f32 %v2101_v40, %v7141_v38 }
 0x26c   :  { %v2358_v16 = vpop.f32.mrf.mxu1  ;;  %v2103_v45 = vpop.f32.mrf.mxu0 }
 0x26d   :  { %8025 = vst [vmem:[#allocation38_spill] sm:$0xff] %v7520_v49  ;;  %v7523_v2 = vadd.f32 %v2358_v16, %v2102_v25  ;;  %v2104_v47 = vadd.f32 %v2103_v45, %v7153_v4 }
 0x26e   :  { %v2360_v12 = vpop.f32.mrf.mxu1  ;;  %v2107_v58 = vpop.f32.mrf.mxu0 }
 0x26f   :  { %8026 = vst [vmem:[#allocation39_spill] sm:$0xff] %v7523_v2  ;;  %v7526_v43 = vadd.f32 %v2360_v12, %v2104_v47  ;;  %v2108_v7 = vadd.f32 %v2107_v58, %v7141_v38 }
 0x270   :  { %v2364_v39 = vpop.f32.mrf.mxu1  ;;  %v2109_v32 = vpop.f32.mrf.mxu0 }
 0x271   :  { %8027 = vst [vmem:[#allocation40_spill] sm:$0xff] %v7526_v43  ;;  %v7529_v56 = vadd.f32 %v2364_v39, %v2108_v7  ;;  %v2110_v42 = vadd.f32 %v2109_v32, %v7153_v4 }
 0x272   :  { %v2366_v5 = vpop.f32.mrf.mxu1  ;;  %v2113_v40 = vpop.f32.mrf.mxu0 }
 0x273   :  { %8028 = vst [vmem:[#allocation41_spill] sm:$0xff] %v7529_v56  ;;  %v7532_v49 = vadd.f32 %v2366_v5, %v2110_v42  ;;  %v2114_v25 = vadd.f32 %v2113_v40, %v7141_v38 }
 0x274   :  { %v2370_v16 = vpop.f32.mrf.mxu1  ;;  %v2115_v45 = vpop.f32.mrf.mxu0 }
 0x275   :  { %8029 = vst [vmem:[#allocation42_spill] sm:$0xff] %v7532_v49  ;;  %v7535_v2 = vadd.f32 %v2370_v16, %v2114_v25  ;;  %v2116_v47 = vadd.f32 %v2115_v45, %v7153_v4 }
 0x276   :  { %v2372_v12 = vpop.f32.mrf.mxu1  ;;  %v2119_v58 = vpop.f32.mrf.mxu0 }
 0x277   :  { %8030 = vst [vmem:[#allocation43_spill] sm:$0xff] %v7535_v2  ;;  %v7538_v43 = vadd.f32 %v2372_v12, %v2116_v47  ;;  %v2120_v7 = vadd.f32 %v2119_v58, %v7141_v38 }
 0x278   :  { %v2376_v39 = vpop.f32.mrf.mxu1  ;;  %v2121_v32 = vpop.f32.mrf.mxu0 }
 0x279   :  { %8031 = vst [vmem:[#allocation44_spill] sm:$0xff] %v7538_v43  ;;  %v7541_v56 = vadd.f32 %v2376_v39, %v2120_v7  ;;  %v2122_v42 = vadd.f32 %v2121_v32, %v7153_v4 }
 0x27a   :  { %v2378_v5 = vpop.f32.mrf.mxu1  ;;  %v2125_v40 = vpop.f32.mrf.mxu0 }
 0x27b   :  { %8032 = vst [vmem:[#allocation45_spill] sm:$0xff] %v7541_v56  ;;  %v7544_v49 = vadd.f32 %v2378_v5, %v2122_v42  ;;  %v2126_v25 = vadd.f32 %v2125_v40, %v7141_v38 }
 0x27c   :  { %v2382_v16 = vpop.f32.mrf.mxu1  ;;  %v2127_v45 = vpop.f32.mrf.mxu0 }
 0x27d   :  { %8033 = vst [vmem:[#allocation46_spill] sm:$0xff] %v7544_v49  ;;  %v7547_v2 = vadd.f32 %v2382_v16, %v2126_v25  ;;  %v2128_v47 = vadd.f32 %v2127_v45, %v7153_v4 }
 0x27e   :  { %v2384_v12 = vpop.f32.mrf.mxu1  ;;  %v2131_v58 = vpop.f32.mrf.mxu0 }
 0x27f   :  { %8034 = vst [vmem:[#allocation47_spill] sm:$0xff] %v7547_v2  ;;  %v7550_v43 = vadd.f32 %v2384_v12, %v2128_v47  ;;  %v2132_v7 = vadd.f32 %v2131_v58, %v7141_v38 }
 0x280   :  { %v2388_v39 = vpop.f32.mrf.mxu1  ;;  %v2133_v32 = vpop.f32.mrf.mxu0 }
 0x281   :  { %8035 = vst [vmem:[#allocation48_spill] sm:$0xff] %v7550_v43  ;;  %v7553_v56 = vadd.f32 %v2388_v39, %v2132_v7  ;;  %v2134_v42 = vadd.f32 %v2133_v32, %v7153_v4 }
 0x282   :  { %v2390_v5 = vpop.f32.mrf.mxu1  ;;  %v2137_v40 = vpop.f32.mrf.mxu0 }
 0x283   :  { %8036 = vst [vmem:[#allocation49_spill] sm:$0xff] %v7553_v56  ;;  %v7556_v49 = vadd.f32 %v2390_v5, %v2134_v42  ;;  %v2138_v25 = vadd.f32 %v2137_v40, %v7141_v38  ;;  %v8038_v38 = vld [vmem:[#allocation16_spill] sm:$0xff] }
 0x284   :  { %v2394_v16 = vpop.f32.mrf.mxu1  ;;  %v2139_v45 = vpop.f32.mrf.mxu0 }
 0x285   :  { %8037 = vst [vmem:[#allocation50_spill] sm:$0xff] %v7556_v49  ;;  %v7559_v2 = vadd.f32 %v2394_v16, %v2138_v25  ;;  %v2140_v47 = vadd.f32 %v2139_v45, %v7153_v4 }
 0x286   :  { %v2396_v12 = vpop.f32.mrf.mxu1  ;;  %v2465_v58 = vpop.f32.mrf.mxu0 }
 0x287   :  { %v7562_v43 = vadd.f32 %v2396_v12, %v2140_v47  ;;  %v2466_v7 = vadd.f32 %v2465_v58, %v7178_v51 }
 0x288   :  { %v2722_v39 = vpop.f32.mrf.mxu1  ;;  %v2467_v32 = vpop.f32.mrf.mxu0 }
 0x289   :  { %v2723_v56 = vadd.f32 %v2722_v39, %v2466_v7  ;;  %v2468_v42 = vadd.f32 %v2467_v32, %v7191_v54 }
 0x28a   :  { %v2724_v5 = vpop.f32.mrf.mxu1  ;;  %v2471_v49 = vpop.f32.mrf.mxu0 }
 0x28b   :  { %v3107_v40 = vmul.f32 %v8038_v38, %v2723_v56  ;;  %v2725_v35 = vadd.f32 %v2724_v5, %v2468_v42  ;;  %v2472_v25 = vadd.f32 %v2471_v49, %v7200_v44 }
 0x28c   :  { %v2728_v4 = vpop.f32.mrf.mxu1  ;;  %v2473_v16 = vpop.f32.mrf.mxu0 }
 0x28d   :  { %3235 = vst [vmem:[%s7920_s4 + $0x10] sm:$0xff] %v3107_v40  ;;  %v3108_v51 = vmul.f32 %v8038_v38, %v2725_v35  ;;  %v2729_v45 = vadd.f32 %v2728_v4, %v2472_v25  ;;  %v2474_v47 = vadd.f32 %v2473_v16, %v7210_v30 }
 0x28e   :  { %v2730_v54 = vpop.f32.mrf.mxu1  ;;  %v2477_v12 = vpop.f32.mrf.mxu0 }
 0x28f   :  { %3237 = vst.msk [vmem:[%s7920_s4 + $0x18] sm:$0xff] %vm3236_vm2, %v3108_v51  ;;  %v3111_v44 = vmul.f32 %v6258_v6, %v2729_v45  ;;  %v2731_v56 = vadd.f32 %v2730_v54, %v2474_v47  ;;  %v2478_v49 = vadd.f32 %v2477_v12, %v7219_v36 }
 0x290   :  { %v2734_v58 = vpop.f32.mrf.mxu1  ;;  %v2479_v7 = vpop.f32.mrf.mxu0 }
 0x291   :  { %3240 = vst [vmem:[%s7920_s4 + $0x30] sm:$0xff] %v3111_v44  ;;  %v3112_v35 = vmul.f32 %v6258_v6, %v2731_v56  ;;  %v2735_v30 = vadd.f32 %v2734_v58, %v2478_v49  ;;  %v2480_v39 = vadd.f32 %v2479_v7, %v7229_v22 }
 0x292   :  { %v2736_v32 = vpop.f32.mrf.mxu1  ;;  %v2483_v42 = vpop.f32.mrf.mxu0 }
 0x293   :  { %3241 = vst.msk [vmem:[%s7920_s4 + $0x38] sm:$0xff] %vm3236_vm2, %v3112_v35  ;;  %v3115_v36 = vmul.f32 %v6277_v27, %v2735_v30  ;;  %v2737_v5 = vadd.f32 %v2736_v32, %v2480_v39  ;;  %v2484_v38 = vadd.f32 %v2483_v42, %v7238_v3 }
 0x294   :  { %v2740_v40 = vpop.f32.mrf.mxu1  ;;  %v2485_v25 = vpop.f32.mrf.mxu0 }
 0x295   :  { %3244 = vst [vmem:[%s7920_s4 + $0x50] sm:$0xff] %v3115_v36  ;;  %v3116_v6 = vmul.f32 %v6277_v27, %v2737_v5  ;;  %v2741_v22 = vadd.f32 %v2740_v40, %v2484_v38  ;;  %v2486_v4 = vadd.f32 %v2485_v25, %v7248_v19 }
 0x296   :  { %v2742_v16 = vpop.f32.mrf.mxu1  ;;  %v2489_v51 = vpop.f32.mrf.mxu0 }
 0x297   :  { %3245 = vst.msk [vmem:[%s7920_s4 + $0x58] sm:$0xff] %vm3236_vm2, %v3116_v6  ;;  %v3119_v3 = vmul.f32 %v6330_v37, %v2741_v22  ;;  %v2743_v45 = vadd.f32 %v2742_v16, %v2486_v4  ;;  %v2490_v47 = vadd.f32 %v2489_v51, %v7257_v11 }
 0x298   :  { %v2746_v54 = vpop.f32.mrf.mxu1  ;;  %v2491_v12 = vpop.f32.mrf.mxu0 }
 0x299   :  { %3248 = vst [vmem:[%s7920_s4 + $0x70] sm:$0xff] %v3119_v3  ;;  %v3120_v27 = vmul.f32 %v6330_v37, %v2743_v45  ;;  %v2747_v19 = vadd.f32 %v2746_v54, %v2490_v47  ;;  %v2492_v44 = vadd.f32 %v2491_v12, %v7267_v24 }
 0x29a   :  { %v2748_v56 = vpop.f32.mrf.mxu1  ;;  %v2495_v49 = vpop.f32.mrf.mxu0 }
 0x29b   :  { %3249 = vst.msk [vmem:[%s7920_s4 + $0x78] sm:$0xff] %vm3236_vm2, %v3120_v27  ;;  %v3123_v11 = vmul.f32 %v6363_v62, %v2747_v19  ;;  %v2749_v58 = vadd.f32 %v2748_v56, %v2492_v44  ;;  %v2496_v7 = vadd.f32 %v2495_v49, %v7276_v18 }
 0x29c   :  { %v2752_v35 = vpop.f32.mrf.mxu1  ;;  %v2497_v30 = vpop.f32.mrf.mxu0 }
 0x29d   :  { %3252 = vst [vmem:[%s7920_s4 + $0x90] sm:$0xff] %v3123_v11  ;;  %v3124_v37 = vmul.f32 %v6363_v62, %v2749_v58  ;;  %v2753_v24 = vadd.f32 %v2752_v35, %v2496_v7  ;;  %v2498_v39 = vadd.f32 %v2497_v30, %v7286_v34 }
 0x29e   :  { %v2754_v32 = vpop.f32.mrf.mxu1  ;;  %v2501_v42 = vpop.f32.mrf.mxu0 }
 0x29f   :  { %3253 = vst.msk [vmem:[%s7920_s4 + $0x98] sm:$0xff] %vm3236_vm2, %v3124_v37  ;;  %v3127_v18 = vmul.f32 %v6399_v61, %v2753_v24  ;;  %v2755_v36 = vadd.f32 %v2754_v32, %v2498_v39  ;;  %v2502_v5 = vadd.f32 %v2501_v42, %v7295_v9 }
 0x2a0   :  { %v2758_v38 = vpop.f32.mrf.mxu1  ;;  %v2503_v40 = vpop.f32.mrf.mxu0 }
 0x2a1   :  { %3256 = vst [vmem:[%s7920_s4 + $0xb0] sm:$0xff] %v3127_v18  ;;  %v3128_v62 = vmul.f32 %v6399_v61, %v2755_v36  ;;  %v2759_v34 = vadd.f32 %v2758_v38, %v2502_v5  ;;  %v2504_v25 = vadd.f32 %v2503_v40, %v7305_v10 }
 0x2a2   :  { %v2760_v6 = vpop.f32.mrf.mxu1  ;;  %v2507_v22 = vpop.f32.mrf.mxu0 }
 0x2a3   :  { %3257 = vst.msk [vmem:[%s7920_s4 + $0xb8] sm:$0xff] %vm3236_vm2, %v3128_v62  ;;  %v3131_v9 = vmul.f32 %v6435_v1, %v2759_v34  ;;  %v2761_v4 = vadd.f32 %v2760_v6, %v2504_v25  ;;  %v2508_v16 = vadd.f32 %v2507_v22, %v7314_v57 }
 0x2a4   :  { %v2764_v51 = vpop.f32.mrf.mxu1  ;;  %v2509_v3 = vpop.f32.mrf.mxu0 }
 0x2a5   :  { %3260 = vst [vmem:[%s7920_s4 + $0xd0] sm:$0xff] %v3131_v9  ;;  %v3132_v61 = vmul.f32 %v6435_v1, %v2761_v4  ;;  %v2765_v10 = vadd.f32 %v2764_v51, %v2508_v16  ;;  %v2510_v45 = vadd.f32 %v2509_v3, %v7324_v29 }
 0x2a6   :  { %v2766_v47 = vpop.f32.mrf.mxu1  ;;  %v2513_v54 = vpop.f32.mrf.mxu0 }
 0x2a7   :  { %3261 = vst.msk [vmem:[%s7920_s4 + $0xd8] sm:$0xff] %vm3236_vm2, %v3132_v61  ;;  %v3135_v57 = vmul.f32 %v6471_v52, %v2765_v10  ;;  %v2767_v12 = vadd.f32 %v2766_v47, %v2510_v45  ;;  %v2514_v27 = vadd.f32 %v2513_v54, %v7333_v33 }
 0x2a8   :  { %v2770_v19 = vpop.f32.mrf.mxu1  ;;  %v2515_v44 = vpop.f32.mrf.mxu0 }
 0x2a9   :  { %3264 = vst [vmem:[%s7920_s4 + $0xf0] sm:$0xff] %v3135_v57  ;;  %v3136_v1 = vmul.f32 %v6471_v52, %v2767_v12  ;;  %v2771_v29 = vadd.f32 %v2770_v19, %v2514_v27  ;;  %v2516_v56 = vadd.f32 %v2515_v44, %v7343_v63 }
 0x2aa   :  { %v2772_v49 = vpop.f32.mrf.mxu1  ;;  %v2519_v11 = vpop.f32.mrf.mxu0 }
 0x2ab   :  { %3265 = vst.msk [vmem:[%s7920_s4 + $0xf8] sm:$0xff] %vm3236_vm2, %v3136_v1  ;;  %v3139_v33 = vmul.f32 %v6507_v59, %v2771_v29  ;;  %v2773_v58 = vadd.f32 %v2772_v49, %v2516_v56  ;;  %v2520_v7 = vadd.f32 %v2519_v11, %v7352_v8 }
 0x2ac   :  { %v2776_v35 = vpop.f32.mrf.mxu1  ;;  %v2521_v30 = vpop.f32.mrf.mxu0 }
 0x2ad   :  { %3268 = vst [vmem:[%s7920_s4 + $0x110] sm:$0xff] %v3139_v33  ;;  %v3140_v52 = vmul.f32 %v6507_v59, %v2773_v58  ;;  %v2777_v63 = vadd.f32 %v2776_v35, %v2520_v7  ;;  %v2522_v37 = vadd.f32 %v2521_v30, %v7362_v17 }
 0x2ae   :  { %v2778_v24 = vpop.f32.mrf.mxu1  ;;  %v2525_v39 = vpop.f32.mrf.mxu0 }
 0x2af   :  { %3269 = vst.msk [vmem:[%s7920_s4 + $0x118] sm:$0xff] %vm3236_vm2, %v3140_v52  ;;  %v3143_v8 = vmul.f32 %v6560_v14, %v2777_v63  ;;  %v2779_v32 = vadd.f32 %v2778_v24, %v2522_v37  ;;  %v2526_v42 = vadd.f32 %v2525_v39, %v7371_v41  ;;  %v8039_v37 = vld [vmem:[#allocation11_spill] sm:$0xff] }
 0x2b0   :  { %v2782_v18 = vpop.f32.mrf.mxu1  ;;  %v2527_v36 = vpop.f32.mrf.mxu0 }
 0x2b1   :  { %3272 = vst [vmem:[%s7920_s4 + $0x130] sm:$0xff] %v3143_v8  ;;  %v3144_v59 = vmul.f32 %v6560_v14, %v2779_v32  ;;  %v2783_v17 = vadd.f32 %v2782_v18, %v2526_v42  ;;  %v2528_v5 = vadd.f32 %v2527_v36, %v7381_v50  ;;  %v8040_v32 = vld [vmem:[#allocation18_spill] sm:$0xff]  ;;  %v8041_v18 = vld [vmem:[#allocation12_spill] sm:$0xff] }
 0x2b2   :  { %v2784_v38 = vpop.f32.mrf.mxu1  ;;  %v2531_v40 = vpop.f32.mrf.mxu0 }
 0x2b3   :  { %3273 = vst.msk [vmem:[%s7920_s4 + $0x138] sm:$0xff] %vm3236_vm2, %v3144_v59  ;;  %v3147_v41 = vmul.f32 %v6602_v46, %v2783_v17  ;;  %v2785_v62 = vadd.f32 %v2784_v38, %v2528_v5  ;;  %v2532_v34 = vadd.f32 %v2531_v40, %v7390_v13  ;;  %v8042_v38 = vld [vmem:[#allocation13_spill] sm:$0xff] }
 0x2b4   :  { %v2788_v25 = vpop.f32.mrf.mxu1  ;;  %v2533_v6 = vpop.f32.mrf.mxu0 }
 0x2b5   :  { %3276 = vst [vmem:[%s7920_s4 + $0x150] sm:$0xff] %v3147_v41  ;;  %v3148_v14 = vmul.f32 %v6602_v46, %v2785_v62  ;;  %v2789_v50 = vadd.f32 %v2788_v25, %v2532_v34  ;;  %v2534_v22 = vadd.f32 %v2533_v6, %v7400_v0  ;;  %v8043_v34 = vld [vmem:[#allocation19_spill] sm:$0xff] }
 0x2b6   :  { %v2790_v9 = vpop.f32.mrf.mxu1  ;;  %v2537_v4 = vpop.f32.mrf.mxu0 }
 0x2b7   :  { %3277 = vst.msk [vmem:[%s7920_s4 + $0x158] sm:$0xff] %vm3236_vm2, %v3148_v14  ;;  %v3151_v13 = vmul.f32 %v6638_v48, %v2789_v50  ;;  %v2791_v16 = vadd.f32 %v2790_v9, %v2534_v22  ;;  %v2538_v51 = vadd.f32 %v2537_v4, %v7409_v31  ;;  %v8044_v14 = vld [vmem:[#allocation14_spill] sm:$0xff] }
 0x2b8   :  { %v2794_v3 = vpop.f32.mrf.mxu1  ;;  %v2539_v61 = vpop.f32.mrf.mxu0 }
 0x2b9   :  { %3280 = vst [vmem:[%s7920_s4 + $0x170] sm:$0xff] %v3151_v13  ;;  %v3152_v46 = vmul.f32 %v6638_v48, %v2791_v16  ;;  %v2795_v0 = vadd.f32 %v2794_v3, %v2538_v51  ;;  %v2540_v10 = vadd.f32 %v2539_v61, %v7419_v55  ;;  %v8045_v16 = vld [vmem:[#allocation2_spill] sm:$0xff] }
 0x2ba   :  { %v2796_v45 = vpop.f32.mrf.mxu1  ;;  %v2543_v47 = vpop.f32.mrf.mxu0 }
 0x2bb   :  { %3281 = vst.msk [vmem:[%s7920_s4 + $0x178] sm:$0xff] %vm3236_vm2, %v3152_v46  ;;  %v3155_v31 = vmul.f32 %v6672_v21, %v2795_v0  ;;  %v2797_v54 = vadd.f32 %v2796_v45, %v2540_v10  ;;  %v2544_v57 = vadd.f32 %v2543_v47, %v7428_v23  ;;  %v8046_v46 = vld [vmem:[#allocation20_spill] sm:$0xff]  ;;  %v8047_v45 = vld [vmem:[#allocation15_spill] sm:$0xff] }
 0x2bc   :  { %v2800_v12 = vpop.f32.mrf.mxu1  ;;  %v2545_v27 = vpop.f32.mrf.mxu0 }
 0x2bd   :  { %3284 = vst [vmem:[%s7920_s4 + $0x190] sm:$0xff] %v3155_v31  ;;  %v3156_v48 = vmul.f32 %v6672_v21, %v2797_v54  ;;  %v2801_v55 = vadd.f32 %v2800_v12, %v2544_v57  ;;  %v2546_v19 = vadd.f32 %v2545_v27, %v7438_v53  ;;  %v8048_v27 = vld [vmem:[#allocation17_spill] sm:$0xff] }
 0x2be   :  { %v2802_v44 = vpop.f32.mrf.mxu1  ;;  %v2549_v1 = vpop.f32.mrf.mxu0 }
 0x2bf   :  { %3285 = vst.msk [vmem:[%s7920_s4 + $0x198] sm:$0xff] %vm3236_vm2, %v3156_v48  ;;  %v3159_v23 = vmul.f32 %v6697_v28, %v2801_v55  ;;  %v2803_v29 = vadd.f32 %v2802_v44, %v2546_v19  ;;  %v2550_v56 = vadd.f32 %v2549_v1, %v7447_v20  ;;  %v8049_v44 = vld [vmem:[#allocation21_spill] sm:$0xff] }
 0x2c0   :  { %v2806_v49 = vpop.f32.mrf.mxu1  ;;  %v2551_v11 = vpop.f32.mrf.mxu0 }
 0x2c1   :  { %3288 = vst [vmem:[%s7920_s4 + $0x1b0] sm:$0xff] %v3159_v23  ;;  %v3160_v21 = vmul.f32 %v6697_v28, %v2803_v29  ;;  %v2807_v53 = vadd.f32 %v2806_v49, %v2550_v56  ;;  %v2552_v33 = vadd.f32 %v2551_v11, %v7457_v26  ;;  %v8050_v29 = vld [vmem:[#allocation27_spill] sm:$0xff] }
 0x2c2   :  { %v2808_v58 = vpop.f32.mrf.mxu1  ;;  %v2555_v7 = vpop.f32.mrf.mxu0 }
 0x2c3   :  { %3289 = vst.msk [vmem:[%s7920_s4 + $0x1b8] sm:$0xff] %vm3236_vm2, %v3160_v21  ;;  %v3163_v20 = vmul.f32 %v6727_v60, %v2807_v53  ;;  %v2809_v35 = vadd.f32 %v2808_v58, %v2552_v33  ;;  %v2556_v30 = vadd.f32 %v2555_v7, %v7463_v15  ;;  %v8051_v33 = vld [vmem:[#allocation28_spill] sm:$0xff] }
 0x2c4   :  { %v2812_v52 = vpop.f32.mrf.mxu1  ;;  %v2557_v63 = vpop.f32.mrf.mxu0 }
 0x2c5   :  { %3292 = vst [vmem:[%s7920_s4 + $0x1d0] sm:$0xff] %v3163_v20  ;;  %v3164_v28 = vmul.f32 %v6727_v60, %v2809_v35  ;;  %v2813_v26 = vadd.f32 %v2812_v52, %v2556_v30  ;;  %v2558_v24 = vadd.f32 %v2557_v63, %v8039_v37  ;;  %v8052_v35 = vld [vmem:[#allocation22_spill] sm:$0xff]  ;;  %v8053_v63 = vld [vmem:[#allocation29_spill] sm:$0xff] }
 0x2c6   :  { %v2814_v39 = vpop.f32.mrf.mxu1  ;;  %v2561_v8 = vpop.f32.mrf.mxu0 }
 0x2c7   :  { %3293 = vst.msk [vmem:[%s7920_s4 + $0x1d8] sm:$0xff] %vm3236_vm2, %v3164_v28  ;;  %v3167_v15 = vmul.f32 %v8040_v32, %v2813_v26  ;;  %v2815_v42 = vadd.f32 %v2814_v39, %v2558_v24  ;;  %v2562_v36 = vadd.f32 %v2561_v8, %v8041_v18  ;;  %v8054_v8 = vld [vmem:[#allocation30_spill] sm:$0xff]  ;;  %v8055_v18 = vld [vmem:[#allocation23_spill] sm:$0xff] }
 0x2c8   :  { %v2818_v59 = vpop.f32.mrf.mxu1  ;;  %v2563_v17 = vpop.f32.mrf.mxu0 }
 0x2c9   :  { %3296 = vst [vmem:[%s7920_s4 + $0x1f0] sm:$0xff] %v3167_v15  ;;  %v3168_v60 = vmul.f32 %v8040_v32, %v2815_v42  ;;  %v2819_v5 = vadd.f32 %v2818_v59, %v2562_v36  ;;  %v2564_v40 = vadd.f32 %v2563_v17, %v8042_v38  ;;  %v8056_v17 = vld [vmem:[#allocation31_spill] sm:$0xff] }
 0x2ca   :  { %v2820_v41 = vpop.f32.mrf.mxu1  ;;  %v2567_v62 = vpop.f32.mrf.mxu0 }
 0x2cb   :  { %3297 = vst.msk [vmem:[%s7920_s4 + $0x1f8] sm:$0xff] %vm3236_vm2, %v3168_v60  ;;  %v3171_v25 = vmul.f32 %v8043_v34, %v2819_v5  ;;  %v2821_v6 = vadd.f32 %v2820_v41, %v2564_v40  ;;  %v2568_v50 = vadd.f32 %v2567_v62, %v8044_v14  ;;  %v8057_v62 = vld [vmem:[#allocation32_spill] sm:$0xff] }
 0x2cc   :  { %v2824_v22 = vpop.f32.mrf.mxu1  ;;  %v2569_v9 = vpop.f32.mrf.mxu0  ;;  %v8058_v14 = vld [vmem:[#allocation24_spill] sm:$0xff] }
 0x2cd   :  { %3300 = vst [vmem:[%s7920_s4 + $0x210] sm:$0xff] %v3171_v25  ;;  %v3172_v4 = vmul.f32 %v8043_v34, %v2821_v6  ;;  %v2825_v13 = vadd.f32 %v2824_v22, %v2568_v50  ;;  %v2570_v51 = vadd.f32 %v2569_v9, %v8045_v16  ;;  %v8059_v9 = vld [vmem:[#allocation33_spill] sm:$0xff] }
 0x2ce   :  { %v2826_v3 = vpop.f32.mrf.mxu1  ;;  %v2573_v61 = vpop.f32.mrf.mxu0 }
 0x2cf   :  { %3301 = vst.msk [vmem:[%s7920_s4 + $0x218] sm:$0xff] %vm3236_vm2, %v3172_v4  ;;  %v3175_v0 = vmul.f32 %v8046_v46, %v2825_v13  ;;  %v2827_v10 = vadd.f32 %v2826_v3, %v2570_v51  ;;  %v2574_v47 = vadd.f32 %v2573_v61, %v8047_v45  ;;  %v8060_v61 = vld [vmem:[#allocation34_spill] sm:$0xff]  ;;  %v8061_v45 = vld [vmem:[#allocation25_spill] sm:$0xff] }
 0x2d0   :  { %v2830_v31 = vpop.f32.mrf.mxu1  ;;  %v2575_v54 = vpop.f32.mrf.mxu0 }
 0x2d1   :  { %3304 = vst [vmem:[%s7920_s4 + $0x230] sm:$0xff] %v3175_v0  ;;  %v3176_v57 = vmul.f32 %v8046_v46, %v2827_v10  ;;  %v2831_v12 = vadd.f32 %v2830_v31, %v2574_v47  ;;  %v2576_v48 = vadd.f32 %v2575_v54, %v8048_v27  ;;  %v8062_v54 = vld [vmem:[#allocation35_spill] sm:$0xff] }
 0x2d2   :  { %v2832_v55 = vpop.f32.mrf.mxu1  ;;  %v2579_v19 = vpop.f32.mrf.mxu0 }
 0x2d3   :  { %3305 = vst.msk [vmem:[%s7920_s4 + $0x238] sm:$0xff] %vm3236_vm2, %v3176_v57  ;;  %v3179_v1 = vmul.f32 %v8049_v44, %v2831_v12  ;;  %v2833_v23 = vadd.f32 %v2832_v55, %v2576_v48  ;;  %v2580_v56 = vadd.f32 %v2579_v19, %v8050_v29  ;;  %v8063_v19 = vld [vmem:[#allocation36_spill] sm:$0xff]  ;;  %v8064_v29 = vld [vmem:[#allocation26_spill] sm:$0xff] }
 0x2d4   :  { %v2836_v49 = vpop.f32.mrf.mxu1  ;;  %v2581_v11 = vpop.f32.mrf.mxu0 }
 0x2d5   :  { %3308 = vst [vmem:[%s7920_s4 + $0x250] sm:$0xff] %v3179_v1  ;;  %v3180_v21 = vmul.f32 %v8049_v44, %v2833_v23  ;;  %v2837_v53 = vadd.f32 %v2836_v49, %v2580_v56  ;;  %v2582_v58 = vadd.f32 %v2581_v11, %v8051_v33  ;;  %v8065_v11 = vld [vmem:[#allocation37_spill] sm:$0xff] }
 0x2d6   :  { %v2838_v7 = vpop.f32.mrf.mxu1  ;;  %v2585_v20 = vpop.f32.mrf.mxu0 }
 0x2d7   :  { %3309 = vst.msk [vmem:[%s7920_s4 + $0x258] sm:$0xff] %vm3236_vm2, %v3180_v21  ;;  %v3183_v30 = vmul.f32 %v8052_v35, %v2837_v53  ;;  %v2839_v52 = vadd.f32 %v2838_v7, %v2582_v58  ;;  %v2586_v28 = vadd.f32 %v2585_v20, %v8053_v63  ;;  %v8066_v20 = vld [vmem:[#allocation38_spill] sm:$0xff]  ;;  %v8067_v63 = vld [vmem:[#allocation3_spill] sm:$0xff] }
 0x2d8   :  { %v2842_v26 = vpop.f32.mrf.mxu1  ;;  %v2587_v37 = vpop.f32.mrf.mxu0 }
 0x2d9   :  { %3312 = vst [vmem:[%s7920_s4 + $0x270] sm:$0xff] %v3183_v30  ;;  %v3184_v24 = vmul.f32 %v8052_v35, %v2839_v52  ;;  %v2843_v39 = vadd.f32 %v2842_v26, %v2586_v28  ;;  %v2588_v32 = vadd.f32 %v2587_v37, %v8054_v8  ;;  %v8068_v37 = vld [vmem:[#allocation39_spill] sm:$0xff] }
 0x2da   :  { %v2844_v15 = vpop.f32.mrf.mxu1  ;;  %v2591_v42 = vpop.f32.mrf.mxu0 }
 0x2db   :  { %3313 = vst.msk [vmem:[%s7920_s4 + $0x278] sm:$0xff] %vm3236_vm2, %v3184_v24  ;;  %v3187_v36 = vmul.f32 %v8055_v18, %v2843_v39  ;;  %v2845_v59 = vadd.f32 %v2844_v15, %v2588_v32  ;;  %v2592_v60 = vadd.f32 %v2591_v42, %v8056_v17  ;;  %v8069_v42 = vld [vmem:[#allocation40_spill] sm:$0xff] }
 0x2dc   :  { %v2848_v5 = vpop.f32.mrf.mxu1  ;;  %v2593_v38 = vpop.f32.mrf.mxu0  ;;  %v8070_v17 = vld [vmem:[#allocation4_spill] sm:$0xff] }
 0x2dd   :  { %3316 = vst [vmem:[%s7920_s4 + $0x290] sm:$0xff] %v3187_v36  ;;  %v3188_v40 = vmul.f32 %v8055_v18, %v2845_v59  ;;  %v2849_v41 = vadd.f32 %v2848_v5, %v2592_v60  ;;  %v2594_v34 = vadd.f32 %v2593_v38, %v8057_v62  ;;  %v8071_v38 = vld [vmem:[#allocation41_spill] sm:$0xff] }
 0x2de   :  { %v2850_v25 = vpop.f32.mrf.mxu1  ;;  %v2597_v6 = vpop.f32.mrf.mxu0 }
 0x2df   :  { %3317 = vst.msk [vmem:[%s7920_s4 + $0x298] sm:$0xff] %vm3236_vm2, %v3188_v40  ;;  %v3191_v50 = vmul.f32 %v8058_v14, %v2849_v41  ;;  %v2851_v22 = vadd.f32 %v2850_v25, %v2594_v34  ;;  %v2598_v4 = vadd.f32 %v2597_v6, %v8059_v9  ;;  %v8072_v6 = vld [vmem:[#allocation42_spill] sm:$0xff]  ;;  %v8073_v9 = vld [vmem:[#allocation5_spill] sm:$0xff] }
 0x2e0   :  { %v2854_v13 = vpop.f32.mrf.mxu1  ;;  %v2599_v16 = vpop.f32.mrf.mxu0 }
 0x2e1   :  { %3320 = vst [vmem:[%s7920_s4 + $0x2b0] sm:$0xff] %v3191_v50  ;;  %v3192_v51 = vmul.f32 %v8058_v14, %v2851_v22  ;;  %v2855_v3 = vadd.f32 %v2854_v13, %v2598_v4  ;;  %v2600_v46 = vadd.f32 %v2599_v16, %v8060_v61  ;;  %v8074_v16 = vld [vmem:[#allocation43_spill] sm:$0xff] }
 0x2e2   :  { %v2856_v0 = vpop.f32.mrf.mxu1  ;;  %v2603_v10 = vpop.f32.mrf.mxu0 }
 0x2e3   :  { %3321 = vst.msk [vmem:[%s7920_s4 + $0x2b8] sm:$0xff] %vm3236_vm2, %v3192_v51  ;;  %v3195_v47 = vmul.f32 %v8061_v45, %v2855_v3  ;;  %v2857_v31 = vadd.f32 %v2856_v0, %v2600_v46  ;;  %v2604_v57 = vadd.f32 %v2603_v10, %v8062_v54  ;;  %v8075_v10 = vld [vmem:[#allocation44_spill] sm:$0xff]  ;;  %v8076_v54 = vld [vmem:[#allocation6_spill] sm:$0xff] }
 0x2e4   :  { %v2860_v12 = vpop.f32.mrf.mxu1  ;;  %v2605_v27 = vpop.f32.mrf.mxu0 }
 0x2e5   :  { %3324 = vst [vmem:[%s7920_s4 + $0x2d0] sm:$0xff] %v3195_v47  ;;  %v3196_v48 = vmul.f32 %v8061_v45, %v2857_v31  ;;  %v2861_v55 = vadd.f32 %v2860_v12, %v2604_v57  ;;  %v2606_v44 = vadd.f32 %v2605_v27, %v8063_v19  ;;  %v8077_v27 = vld [vmem:[#allocation45_spill] sm:$0xff] }
 0x2e6   :  { %v2862_v1 = vpop.f32.mrf.mxu1  ;;  %v2609_v23 = vpop.f32.mrf.mxu0 }
 0x2e7   :  { %3325 = vst.msk [vmem:[%s7920_s4 + $0x2d8] sm:$0xff] %vm3236_vm2, %v3196_v48  ;;  %v3199_v56 = vmul.f32 %v8064_v29, %v2861_v55  ;;  %v2863_v49 = vadd.f32 %v2862_v1, %v2606_v44  ;;  %v2610_v21 = vadd.f32 %v2609_v23, %v8065_v11  ;;  %v8078_v23 = vld [vmem:[#allocation46_spill] sm:$0xff]  ;;  %v8079_v11 = vld [vmem:[#allocation7_spill] sm:$0xff] }
 0x2e8   :  { %v2866_v53 = vpop.f32.mrf.mxu1  ;;  %v2611_v33 = vpop.f32.mrf.mxu0 }
 0x2e9   :  { %3328 = vst [vmem:[%s7920_s4 + $0x2f0] sm:$0xff] %v3199_v56  ;;  %v3200_v58 = vmul.f32 %v8064_v29, %v2863_v49  ;;  %v2867_v7 = vadd.f32 %v2866_v53, %v2610_v21  ;;  %v2612_v35 = vadd.f32 %v2611_v33, %v8066_v20  ;;  %v8080_v33 = vld [vmem:[#allocation47_spill] sm:$0xff] }
 0x2ea   :  { %v2868_v30 = vpop.f32.mrf.mxu1  ;;  %v2615_v52 = vpop.f32.mrf.mxu0 }
 0x2eb   :  { %3329 = vst.msk [vmem:[%s7920_s4 + $0x2f8] sm:$0xff] %vm3236_vm2, %v3200_v58  ;;  %v3203_v28 = vmul.f32 %v8067_v63, %v2867_v7  ;;  %v2869_v26 = vadd.f32 %v2868_v30, %v2612_v35  ;;  %v2616_v24 = vadd.f32 %v2615_v52, %v8068_v37  ;;  %v8081_v52 = vld [vmem:[#allocation48_spill] sm:$0xff] }
 0x2ec   :  { %v2872_v39 = vpop.f32.mrf.mxu1  ;;  %v2617_v8 = vpop.f32.mrf.mxu0  ;;  %v8082_v37 = vld [vmem:[#allocation8_spill] sm:$0xff] }
 0x2ed   :  { %3332 = vst [vmem:[%s7920_s4 + $0x310] sm:$0xff] %v3203_v28  ;;  %v3204_v32 = vmul.f32 %v8067_v63, %v2869_v26  ;;  %v2873_v15 = vadd.f32 %v2872_v39, %v2616_v24  ;;  %v2618_v18 = vadd.f32 %v2617_v8, %v8069_v42  ;;  %v8083_v8 = vld [vmem:[#allocation49_spill] sm:$0xff] }
 0x2ee   :  { %v2874_v36 = vpop.f32.mrf.mxu1  ;;  %v2621_v59 = vpop.f32.mrf.mxu0 }
 0x2ef   :  { %3333 = vst.msk [vmem:[%s7920_s4 + $0x318] sm:$0xff] %vm3236_vm2, %v3204_v32  ;;  %v3207_v60 = vmul.f32 %v8070_v17, %v2873_v15  ;;  %v2875_v5 = vadd.f32 %v2874_v36, %v2618_v18  ;;  %v2622_v40 = vadd.f32 %v2621_v59, %v8071_v38  ;;  %v8084_v59 = vld [vmem:[#allocation50_spill] sm:$0xff]  ;;  %v8085_v38 = vld [vmem:[#allocation9_spill] sm:$0xff] }
 0x2f0   :  { %v2878_v41 = vpop.f32.mrf.mxu1  ;;  %v2623_v62 = vpop.f32.mrf.mxu0 }
 0x2f1   :  { %3336 = vst [vmem:[%s7920_s4 + $0x330] sm:$0xff] %v3207_v60  ;;  %v3208_v34 = vmul.f32 %v8070_v17, %v2875_v5  ;;  %v2879_v25 = vadd.f32 %v2878_v41, %v2622_v40  ;;  %v2624_v14 = vadd.f32 %v2623_v62, %v8072_v6 }
 0x2f2   :  { %v2880_v50 = vpop.f32.mrf.mxu1  ;;  %v2627_v22 = vpop.f32.mrf.mxu0 }
 0x2f3   :  { %3337 = vst.msk [vmem:[%s7920_s4 + $0x338] sm:$0xff] %vm3236_vm2, %v3208_v34  ;;  %v3211_v4 = vmul.f32 %v8073_v9, %v2879_v25  ;;  %v2881_v13 = vadd.f32 %v2880_v50, %v2624_v14  ;;  %v2628_v51 = vadd.f32 %v2627_v22, %v8074_v16 }
 0x2f4   :  { %v2884_v3 = vpop.f32.mrf.mxu1  ;;  %v2629_v61 = vpop.f32.mrf.mxu0 }
 0x2f5   :  { %3340 = vst [vmem:[%s7920_s4 + $0x350] sm:$0xff] %v3211_v4  ;;  %v3212_v46 = vmul.f32 %v8073_v9, %v2881_v13  ;;  %v2885_v0 = vadd.f32 %v2884_v3, %v2628_v51  ;;  %v2630_v45 = vadd.f32 %v2629_v61, %v8075_v10  ;;  %v8086_v9 = vld [vmem:[#allocation10_spill] sm:$0xff] }
 0x2f6   :  { %v2886_v47 = vpop.f32.mrf.mxu1  ;;  %v2633_v31 = vpop.f32.mrf.mxu0 }
 0x2f7   :  { %3341 = vst.msk [vmem:[%s7920_s4 + $0x358] sm:$0xff] %vm3236_vm2, %v3212_v46  ;;  %v3215_v57 = vmul.f32 %v8076_v54, %v2885_v0  ;;  %v2887_v12 = vadd.f32 %v2886_v47, %v2630_v45  ;;  %v2634_v48 = vadd.f32 %v2633_v31, %v8077_v27 }
 0x2f8   :  { %v2890_v55 = vpop.f32.mrf.mxu1  ;;  %v2635_v19 = vpop.f32.mrf.mxu0 }
 0x2f9   :  { %3344 = vst [vmem:[%s7920_s4 + $0x370] sm:$0xff] %v3215_v57  ;;  %v3216_v44 = vmul.f32 %v8076_v54, %v2887_v12  ;;  %v2891_v1 = vadd.f32 %v2890_v55, %v2634_v48  ;;  %v2636_v29 = vadd.f32 %v2635_v19, %v8078_v23 }
 0x2fa   :  { %v2892_v56 = vpop.f32.mrf.mxu1  ;;  %v2639_v49 = vpop.f32.mrf.mxu0 }
 0x2fb   :  { %3345 = vst.msk [vmem:[%s7920_s4 + $0x378] sm:$0xff] %vm3236_vm2, %v3216_v44  ;;  %v3219_v21 = vmul.f32 %v8079_v11, %v2891_v1  ;;  %v2893_v53 = vadd.f32 %v2892_v56, %v2636_v29  ;;  %v2640_v58 = vadd.f32 %v2639_v49, %v8080_v33 }
 0x2fc   :  { %v2896_v7 = vpop.f32.mrf.mxu1  ;;  %v2641_v20 = vpop.f32.mrf.mxu0 }
 0x2fd   :  { %3348 = vst [vmem:[%s7920_s4 + $0x390] sm:$0xff] %v3219_v21  ;;  %v3220_v35 = vmul.f32 %v8079_v11, %v2893_v53  ;;  %v2897_v30 = vadd.f32 %v2896_v7, %v2640_v58  ;;  %v2642_v63 = vadd.f32 %v2641_v20, %v8081_v52 }
 0x2fe   :  { %v2898_v28 = vpop.f32.mrf.mxu1  ;;  %v2645_v26 = vpop.f32.mrf.mxu0 }
 0x2ff   :  { %3349 = vst.msk [vmem:[%s7920_s4 + $0x398] sm:$0xff] %vm3236_vm2, %v3220_v35  ;;  %v3223_v24 = vmul.f32 %v8082_v37, %v2897_v30  ;;  %v2899_v39 = vadd.f32 %v2898_v28, %v2642_v63  ;;  %v2646_v32 = vadd.f32 %v2645_v26, %v8083_v8 }
 0x300   :  { %v2902_v15 = vpop.f32.mrf.mxu1  ;;  %v2647_v42 = vpop.f32.mrf.mxu0 }
 0x301   :  { %3352 = vst [vmem:[%s7920_s4 + $0x3b0] sm:$0xff] %v3223_v24  ;;  %v3224_v18 = vmul.f32 %v8082_v37, %v2899_v39  ;;  %v2903_v36 = vadd.f32 %v2902_v15, %v2646_v32  ;;  %v2648_v17 = vadd.f32 %v2647_v42, %v8084_v59 }
 0x302   :  { %v2904_v60 = vpop.f32.mrf.mxu1  ;;  %v2651_v5 = vpop.f32.mrf.mxu0 }
 0x303   :  { %3353 = vst.msk [vmem:[%s7920_s4 + $0x3b8] sm:$0xff] %vm3236_vm2, %v3224_v18  ;;  %v3227_v40 = vmul.f32 %v8085_v38, %v2903_v36  ;;  %v2905_v41 = vadd.f32 %v2904_v60, %v2648_v17  ;;  %v2652_v62 = vadd.f32 %v2651_v5, %v7559_v2 }
 0x304   :  { %v2908_v34 = vpop.f32.mrf.mxu1  ;;  %v2653_v25 = vpop.f32.mrf.mxu0 }
 0x305   :  { %3356 = vst [vmem:[%s7920_s4 + $0x3d0] sm:$0xff] %v3227_v40  ;;  %v3228_v6 = vmul.f32 %v8085_v38, %v2905_v41  ;;  %v2909_v14 = vadd.f32 %v2908_v34, %v2652_v62  ;;  %v2654_v50 = vadd.f32 %v2653_v25, %v7562_v43 }
 0x306   :  { %v2910_v22 = vpop.f32.mrf.mxu1 }
 0x307   :  { %3357 = vst.msk [vmem:[%s7920_s4 + $0x3d8] sm:$0xff] %vm3236_vm2, %v3228_v6  ;;  %v3231_v4 = vmul.f32 %v8086_v9, %v2909_v14  ;;  %v2911_v2 = vadd.f32 %v2910_v22, %v2654_v50 }
 0x309   :  { %3360 = vst [vmem:[%s7920_s4 + $0x3f0] sm:$0xff] %v3231_v4  ;;  %v3232_v13 = vmul.f32 %v8086_v9, %v2911_v2 }
 0x30b   :  { %3361 = vst.msk [vmem:[%s7920_s4 + $0x3f8] sm:$0xff] %vm3236_vm2, %v3232_v13 }

// kernel: forward.4
= control target key start
LH: loop header
LB: loop body
LE: loop exit
PB: predicated region body
PF: predicated region fallthrough
CT: control target
= control target key end

     0   :  { %vm264_vm0 = vcmask 130048   ;;  %vm1015_vm1 = vcmask 588800   ;;  %vm2346_vm2 = vcmask 1041409   ;;  %vm2348_vm3 = vcmask 1042434   ;;  %s4653_s2 = inlined_call_operand.vmem [shape: f32[400,200], index: 2, kind: input, shape index: {}]   ;;  %s4654_s0 = inlined_call_operand.vmem [shape: f32[256,400], index: 0, kind: input, shape index: {}]   ;;  %s4655_s3 = inlined_call_operand.vmem [shape: f32[1,200], index: 3, kind: input, shape index: {}]   ;;  %s4656_s4 = inlined_call_operand.vmem [shape: f32[1,200], index: 4, kind: input, shape index: {}]   ;;  %s4657_s5 = inlined_call_operand.<no memory space> [shape: f32[1,1], index: 5, kind: input, shape index: {}]   ;;  %s4658_s1 = inlined_call_operand.vmem [shape: f32[16,16,400], index: 1, kind: input, shape index: {}]   ;;  %s4659_s6 = inlined_call_operand.vmem [shape: f32[16,400], index: 6, kind: output, shape index: {}]  }
   0x1   :  { %v183_v0 = vld [vmem:[%s4653_s2 + $0xf8] sm:$0xff]  ;;  %v182_v1 = vld [vmem:[%s4653_s2 + $0xf0] sm:$0xff]  ;;  %v181_v2 = vld [vmem:[%s4653_s2 + $0xe8] sm:$0xff]  ;;  %vm2350_vm4 = vcmask 1043459   ;;  %vm2352_vm5 = vcmask 1044484   ;;  %vm2354_vm6 = vcmask 1045509  }
   0x2   :  { %361 = vmatprep.subr.mxu0 %v183_v0  ;;  %v180_v3 = vld [vmem:[%s4653_s2 + $0xe0] sm:$0xff]  ;;  %v179_v4 = vld [vmem:[%s4653_s2 + $0xd8] sm:$0xff]  ;;  %v178_v5 = vld [vmem:[%s4653_s2 + $0xd0] sm:$0xff]  ;;  %vm2356_vm7 = vcmask 1046534   ;;  %vm2358_vm8 = vcmask 1047559  }
   0x3   :  { %362 = vmatpush1.msra.mxu0 %v182_v1  ;;  %v177_v6 = vld [vmem:[%s4653_s2 + $0xc8] sm:$0xff]  ;;  %v176_v7 = vld [vmem:[%s4653_s2 + $0xc0] sm:$0xff]  ;;  %v175_v8 = vld [vmem:[%s4653_s2 + $0xb8] sm:$0xff] }
   0x4   :  { %363 = vmatprep.subr.mxu0 %v181_v2  ;;  %v174_v9 = vld [vmem:[%s4653_s2 + $0xb0] sm:$0xff]  ;;  %v173_v10 = vld [vmem:[%s4653_s2 + $0xa8] sm:$0xff]  ;;  %v172_v11 = vld [vmem:[%s4653_s2 + $0xa0] sm:$0xff] }
   0x5   :  { %364 = vmatpush1.msra.mxu0 %v180_v3  ;;  %v247_v12 = vld [vmem:[%s4653_s2 + $0x2f8] sm:$0xff]  ;;  %v246_v14 = vld [vmem:[%s4653_s2 + $0x2f0] sm:$0xff]  ;;  %v245_v16 = vld [vmem:[%s4653_s2 + $0x2e8] sm:$0xff] }
   0x6   :  { %365 = vmatprep.subr.mxu0 %v179_v4  ;;  %v171_v13 = vld [vmem:[%s4653_s2 + $0x98] sm:$0xff]  ;;  %618 = vmatprep.subr.mxu1 %v247_v12  ;;  %v170_v15 = vld [vmem:[%s4653_s2 + $0x90] sm:$0xff]  ;;  %v244_v17 = vld [vmem:[%s4653_s2 + $0x2e0] sm:$0xff] }
   0x7   :  { %366 = vmatpush1.msra.mxu0 %v178_v5  ;;  %619 = vmatpush1.msra.mxu1 %v246_v14  ;;  %v169_v18 = vld [vmem:[%s4653_s2 + $0x88] sm:$0xff]  ;;  %v243_v19 = vld [vmem:[%s4653_s2 + $0x2d8] sm:$0xff]  ;;  %v168_v20 = vld [vmem:[%s4653_s2 + $0x80] sm:$0xff] }
   0x8   :  { %367 = vmatprep.subr.mxu0 %v177_v6  ;;  %620 = vmatprep.subr.mxu1 %v245_v16  ;;  %v242_v21 = vld [vmem:[%s4653_s2 + $0x2d0] sm:$0xff]  ;;  %v241_v22 = vld [vmem:[%s4653_s2 + $0x2c8] sm:$0xff]  ;;  %v167_v23 = vld [vmem:[%s4653_s2 + $0x78] sm:$0xff] }
   0x9   :  { %368 = vmatpush1.msra.mxu0 %v176_v7  ;;  %621 = vmatpush1.msra.mxu1 %v244_v17  ;;  %v240_v24 = vld [vmem:[%s4653_s2 + $0x2c0] sm:$0xff]  ;;  %v166_v25 = vld [vmem:[%s4653_s2 + $0x70] sm:$0xff]  ;;  %v239_v26 = vld [vmem:[%s4653_s2 + $0x2b8] sm:$0xff] }
   0xa   :  { %369 = vmatprep.subr.mxu0 %v175_v8  ;;  %622 = vmatprep.subr.mxu1 %v243_v19  ;;  %v165_v27 = vld [vmem:[%s4653_s2 + $0x68] sm:$0xff]  ;;  %v238_v28 = vld [vmem:[%s4653_s2 + $0x2b0] sm:$0xff]  ;;  %v164_v29 = vld [vmem:[%s4653_s2 + $0x60] sm:$0xff] }
   0xb   :  { %370 = vmatpush1.msra.mxu0 %v174_v9  ;;  %623 = vmatpush1.msra.mxu1 %v242_v21  ;;  %v237_v30 = vld [vmem:[%s4653_s2 + $0x2a8] sm:$0xff]  ;;  %v163_v31 = vld [vmem:[%s4653_s2 + $0x58] sm:$0xff]  ;;  %v236_v32 = vld [vmem:[%s4653_s2 + $0x2a0] sm:$0xff] }
   0xc   :  { %371 = vmatprep.subr.mxu0 %v173_v10  ;;  %624 = vmatprep.subr.mxu1 %v241_v22  ;;  %v162_v33 = vld [vmem:[%s4653_s2 + $0x50] sm:$0xff]  ;;  %v235_v34 = vld [vmem:[%s4653_s2 + $0x298] sm:$0xff]  ;;  %v161_v35 = vld [vmem:[%s4653_s2 + $0x48] sm:$0xff] }
   0xd   :  { %372 = vmatpush1.msra.mxu0 %v172_v11  ;;  %625 = vmatpush1.msra.mxu1 %v240_v24  ;;  %v234_v36 = vld [vmem:[%s4653_s2 + $0x290] sm:$0xff]  ;;  %v160_v37 = vld [vmem:[%s4653_s2 + $0x40] sm:$0xff]  ;;  %v233_v38 = vld [vmem:[%s4653_s2 + $0x288] sm:$0xff] }
   0xe   :  { %373 = vmatprep.subr.mxu0 %v171_v13  ;;  %626 = vmatprep.subr.mxu1 %v239_v26  ;;  %v159_v39 = vld [vmem:[%s4653_s2 + $0x38] sm:$0xff]  ;;  %v232_v40 = vld [vmem:[%s4653_s2 + $0x280] sm:$0xff]  ;;  %v158_v41 = vld [vmem:[%s4653_s2 + $0x30] sm:$0xff] }
   0xf   :  { %374 = vmatpush1.msra.mxu0 %v170_v15  ;;  %627 = vmatpush1.msra.mxu1 %v238_v28  ;;  %v231_v42 = vld [vmem:[%s4653_s2 + $0x278] sm:$0xff]  ;;  %v157_v43 = vld [vmem:[%s4653_s2 + $0x28] sm:$0xff]  ;;  %v230_v44 = vld [vmem:[%s4653_s2 + $0x270] sm:$0xff] }
  0x10   :  { %375 = vmatprep.subr.mxu0 %v169_v18  ;;  %628 = vmatprep.subr.mxu1 %v237_v30  ;;  %v156_v45 = vld [vmem:[%s4653_s2 + $0x20] sm:$0xff]  ;;  %v229_v46 = vld [vmem:[%s4653_s2 + $0x268] sm:$0xff]  ;;  %v155_v47 = vld [vmem:[%s4653_s2 + $0x18] sm:$0xff] }
  0x11   :  { %376 = vmatpush1.msra.mxu0 %v168_v20  ;;  %629 = vmatpush1.msra.mxu1 %v236_v32  ;;  %v228_v48 = vld [vmem:[%s4653_s2 + $0x260] sm:$0xff]  ;;  %v154_v49 = vld [vmem:[%s4653_s2 + $0x10] sm:$0xff]  ;;  %v227_v50 = vld [vmem:[%s4653_s2 + $0x258] sm:$0xff] }
  0x12   :  { %377 = vmatprep.subr.mxu0 %v167_v23  ;;  %630 = vmatprep.subr.mxu1 %v235_v34  ;;  %v153_v51 = vld [vmem:[%s4653_s2 + $0x8] sm:$0xff]  ;;  %v226_v52 = vld [vmem:[%s4653_s2 + $0x250] sm:$0xff]  ;;  %v152_v53 = vld [vmem:[%s4653_s2] sm:$0xff] }
  0x13   :  { %378 = vmatpush1.msra.mxu0 %v166_v25  ;;  %631 = vmatpush1.msra.mxu1 %v234_v36  ;;  %v225_v54 = vld [vmem:[%s4653_s2 + $0x248] sm:$0xff]  ;;  %v215_v55 = vld [vmem:[%s4653_s2 + $0x1f8] sm:$0xff]  ;;  %v224_v56 = vld [vmem:[%s4653_s2 + $0x240] sm:$0xff] }
  0x14   :  { %379 = vmatprep.subr.mxu0 %v165_v27  ;;  %632 = vmatprep.subr.mxu1 %v233_v38  ;;  %v214_v57 = vld [vmem:[%s4653_s2 + $0x1f0] sm:$0xff]  ;;  %v223_v58 = vld [vmem:[%s4653_s2 + $0x238] sm:$0xff]  ;;  %v213_v59 = vld [vmem:[%s4653_s2 + $0x1e8] sm:$0xff] }
  0x15   :  { %380 = vmatpush1.msra.mxu0 %v164_v29  ;;  %633 = vmatpush1.msra.mxu1 %v232_v40  ;;  %v222_v60 = vld [vmem:[%s4653_s2 + $0x230] sm:$0xff]  ;;  %v212_v61 = vld [vmem:[%s4653_s2 + $0x1e0] sm:$0xff]  ;;  %v221_v62 = vld [vmem:[%s4653_s2 + $0x228] sm:$0xff] }
  0x16   :  { %381 = vmatprep.subr.mxu0 %v163_v31  ;;  %634 = vmatprep.subr.mxu1 %v231_v42  ;;  %v211_v63 = vld [vmem:[%s4653_s2 + $0x1d8] sm:$0xff]  ;;  %v220_v0 = vld [vmem:[%s4653_s2 + $0x220] sm:$0xff]  ;;  %v210_v1 = vld [vmem:[%s4653_s2 + $0x1d0] sm:$0xff] }
  0x17   :  { %382 = vmatpush1.msra.mxu0 %v162_v33  ;;  %635 = vmatpush1.msra.mxu1 %v230_v44  ;;  %v219_v2 = vld [vmem:[%s4653_s2 + $0x218] sm:$0xff]  ;;  %v209_v3 = vld [vmem:[%s4653_s2 + $0x1c8] sm:$0xff]  ;;  %v218_v4 = vld [vmem:[%s4653_s2 + $0x210] sm:$0xff] }
  0x18   :  { %383 = vmatprep.subr.mxu0 %v161_v35  ;;  %636 = vmatprep.subr.mxu1 %v229_v46  ;;  %v208_v5 = vld [vmem:[%s4653_s2 + $0x1c0] sm:$0xff]  ;;  %v217_v6 = vld [vmem:[%s4653_s2 + $0x208] sm:$0xff]  ;;  %v207_v7 = vld [vmem:[%s4653_s2 + $0x1b8] sm:$0xff] }
  0x19   :  { %384 = vmatpush1.msra.mxu0 %v160_v37  ;;  %637 = vmatpush1.msra.mxu1 %v228_v48  ;;  %v216_v8 = vld [vmem:[%s4653_s2 + $0x200] sm:$0xff]  ;;  %v206_v9 = vld [vmem:[%s4653_s2 + $0x1b0] sm:$0xff]  ;;  %v251_v10 = vld [vmem:[%s4653_s2 + $0x318] sm:$0xff] }
  0x1a   :  { %385 = vmatprep.subr.mxu0 %v159_v39  ;;  %638 = vmatprep.subr.mxu1 %v227_v50  ;;  %v205_v11 = vld [vmem:[%s4653_s2 + $0x1a8] sm:$0xff]  ;;  %v250_v12 = vld [vmem:[%s4653_s2 + $0x310] sm:$0xff]  ;;  %v204_v13 = vld [vmem:[%s4653_s2 + $0x1a0] sm:$0xff] }
  0x1b   :  { %386 = vmatpush1.msra.mxu0 %v158_v41  ;;  %639 = vmatpush1.msra.mxu1 %v226_v52  ;;  %v249_v14 = vld [vmem:[%s4653_s2 + $0x308] sm:$0xff]  ;;  %v203_v15 = vld [vmem:[%s4653_s2 + $0x198] sm:$0xff]  ;;  %v202_v17 = vld [vmem:[%s4653_s2 + $0x190] sm:$0xff] }
  0x1c   :  { %387 = vmatprep.subr.mxu0 %v157_v43  ;;  %640 = vmatprep.subr.mxu1 %v225_v54  ;;  %v25_v16 = vld [vmem:[%s4654_s0 + $0x8] sm:$0xff]  ;;  %v248_v18 = vld [vmem:[%s4653_s2 + $0x300] sm:$0xff]  ;;  %v27_v20 = vld [vmem:[%s4654_s0 + $0x18] sm:$0xff] }
  0x1d   :  { %388 = vmatpush1.msra.mxu0 %v156_v45  ;;  %641 = vmatpush1.msra.mxu1 %v224_v56  ;;  %v201_v19 = vld [vmem:[%s4653_s2 + $0x188] sm:$0xff]  ;;  %v200_v21 = vld [vmem:[%s4653_s2 + $0x180] sm:$0xff]  ;;  %v26_v22 = vld [vmem:[%s4654_s0 + $0x10] sm:$0xff] }
  0x1e   :  { %389 = vmatprep.subr.mxu0 %v155_v47  ;;  %642 = vmatprep.subr.mxu1 %v223_v58  ;;  %v199_v23 = vld [vmem:[%s4653_s2 + $0x178] sm:$0xff]  ;;  %v198_v25 = vld [vmem:[%s4653_s2 + $0x170] sm:$0xff]  ;;  %v197_v26 = vld [vmem:[%s4653_s2 + $0x168] sm:$0xff] }
  0x1f   :  { %390 = vmatpush1.msra.mxu0 %v154_v49  ;;  %643 = vmatpush1.msra.mxu1 %v222_v60  ;;  %v31_v24 = vld [vmem:[%s4654_s0 + $0x38] sm:$0xff]  ;;  %v196_v27 = vld [vmem:[%s4653_s2 + $0x160] sm:$0xff]  ;;  %v30_v28 = vld [vmem:[%s4654_s0 + $0x30] sm:$0xff] }
  0x20   :  { %391 = vmatprep.subr.mxu0 %v153_v51  ;;  %644 = vmatprep.subr.mxu1 %v221_v62  ;;  %v195_v29 = vld [vmem:[%s4653_s2 + $0x158] sm:$0xff]  ;;  %v194_v31 = vld [vmem:[%s4653_s2 + $0x150] sm:$0xff]  ;;  %v193_v32 = vld [vmem:[%s4653_s2 + $0x148] sm:$0xff] }
  0x21   :  { %392 = vmatpush1.msra.mxu0 %v152_v53  ;;  %645 = vmatpush1.msra.mxu1 %v220_v0  ;;  %v35_v30 = vld [vmem:[%s4654_s0 + $0x58] sm:$0xff]  ;;  %v192_v33 = vld [vmem:[%s4653_s2 + $0x140] sm:$0xff]  ;;  %v34_v34 = vld [vmem:[%s4654_s0 + $0x50] sm:$0xff] }
  0x22   :  { %393 = vmatprep.subr.mxu0 %v215_v55  ;;  %646 = vmatprep.subr.mxu1 %v219_v2  ;;  %v191_v35 = vld [vmem:[%s4653_s2 + $0x138] sm:$0xff]  ;;  %v190_v37 = vld [vmem:[%s4653_s2 + $0x130] sm:$0xff]  ;;  %v189_v38 = vld [vmem:[%s4653_s2 + $0x128] sm:$0xff] }
  0x23   :  { %394 = vmatpush2.msra.mxu0 %v214_v57  ;;  %647 = vmatpush1.msra.mxu1 %v218_v4  ;;  %v39_v36 = vld [vmem:[%s4654_s0 + $0x78] sm:$0xff]  ;;  %v188_v39 = vld [vmem:[%s4653_s2 + $0x120] sm:$0xff]  ;;  %v38_v40 = vld [vmem:[%s4654_s0 + $0x70] sm:$0xff] }
  0x24   :  { %395 = vmatprep.subr.mxu0 %v213_v59  ;;  %648 = vmatprep.subr.mxu1 %v217_v6  ;;  %v187_v41 = vld [vmem:[%s4653_s2 + $0x118] sm:$0xff]  ;;  %v186_v43 = vld [vmem:[%s4653_s2 + $0x110] sm:$0xff]  ;;  %v185_v44 = vld [vmem:[%s4653_s2 + $0x108] sm:$0xff] }
  0x25   :  { %396 = vmatpush2.msra.mxu0 %v212_v61  ;;  %649 = vmatpush1.msra.mxu1 %v216_v8  ;;  %v43_v42 = vld [vmem:[%s4654_s0 + $0x98] sm:$0xff]  ;;  %v184_v45 = vld [vmem:[%s4653_s2 + $0x100] sm:$0xff]  ;;  %v42_v46 = vld [vmem:[%s4654_s0 + $0x90] sm:$0xff] }
  0x26   :  { %397 = vmatprep.subr.mxu0 %v211_v63  ;;  %678 = vmatprep.subr.mxu1 %v251_v10  ;;  %v24_v47 = vld [vmem:[%s4654_s0] sm:$0xff]  ;;  %v47_v48 = vld [vmem:[%s4654_s0 + $0xb8] sm:$0xff]  ;;  %v29_v49 = vld [vmem:[%s4654_s0 + $0x28] sm:$0xff] }
  0x27   :  { %398 = vmatpush2.msra.mxu0 %v210_v1  ;;  %679 = vmatpush2.msra.mxu1 %v250_v12  ;;  %v46_v50 = vld [vmem:[%s4654_s0 + $0xb0] sm:$0xff]  ;;  %v28_v51 = vld [vmem:[%s4654_s0 + $0x20] sm:$0xff]  ;;  %v51_v52 = vld [vmem:[%s4654_s0 + $0xd8] sm:$0xff] }
  0x28   :  { %399 = vmatprep.subr.mxu0 %v209_v3  ;;  %680 = vmatprep.subr.mxu1 %v249_v14  ;;  %v33_v53 = vld [vmem:[%s4654_s0 + $0x48] sm:$0xff]  ;;  %v50_v54 = vld [vmem:[%s4654_s0 + $0xd0] sm:$0xff]  ;;  %v32_v55 = vld [vmem:[%s4654_s0 + $0x40] sm:$0xff] }
  0x29   :  { %400 = vmatpush2.msra.mxu0 %v208_v5  ;;  %425 = vmatprep.mubr.f32.mxu0 %v25_v16  ;;  %v55_v56 = vld [vmem:[%s4654_s0 + $0xf8] sm:$0xff]  ;;  %v37_v57 = vld [vmem:[%s4654_s0 + $0x68] sm:$0xff]  ;;  %v54_v58 = vld [vmem:[%s4654_s0 + $0xf0] sm:$0xff] }
  0x2a   :  { %401 = vmatprep.subr.mxu0 %v207_v7  ;;  %681 = vmatpush2.msra.mxu1 %v248_v18  ;;  %v36_v59 = vld [vmem:[%s4654_s0 + $0x60] sm:$0xff]  ;;  %v59_v60 = vld [vmem:[%s4654_s0 + $0x118] sm:$0xff]  ;;  %v41_v61 = vld [vmem:[%s4654_s0 + $0x88] sm:$0xff] }
  0x2b   :  { %402 = vmatpush2.msra.mxu0 %v206_v9  ;;  %2429 = vmatprep.mubr.msk.f32.mxu1 %vm264_vm0, %v27_v20  ;;  %v58_v62 = vld [vmem:[%s4654_s0 + $0x110] sm:$0xff]  ;;  %v40_v63 = vld [vmem:[%s4654_s0 + $0x80] sm:$0xff]  ;;  %v63_v0 = vld [vmem:[%s4654_s0 + $0x138] sm:$0xff] }
  0x2c   :  { %403 = vmatprep.subr.mxu0 %v205_v11  ;;  %683 = vmatmul.mubr.f32.vlgmr.msra.gmra.mxu1 %v26_v22  ;;  %v45_v1 = vld [vmem:[%s4654_s0 + $0xa8] sm:$0xff]  ;;  %v62_v2 = vld [vmem:[%s4654_s0 + $0x130] sm:$0xff]  ;;  %v44_v3 = vld [vmem:[%s4654_s0 + $0xa0] sm:$0xff] }
  0x2d   :  { %404 = vmatpush2.msra.mxu0 %v204_v13  ;;  %2430 = vmatprep.mubr.msk.f32.mxu1 %vm264_vm0, %v31_v24  ;;  %v67_v4 = vld [vmem:[%s4654_s0 + $0x158] sm:$0xff]  ;;  %v49_v5 = vld [vmem:[%s4654_s0 + $0xc8] sm:$0xff]  ;;  %v66_v6 = vld [vmem:[%s4654_s0 + $0x150] sm:$0xff] }
  0x2e   :  { %405 = vmatprep.subr.mxu0 %v203_v15  ;;  %v48_v7 = vld [vmem:[%s4654_s0 + $0xc0] sm:$0xff]  ;;  %v71_v8 = vld [vmem:[%s4654_s0 + $0x178] sm:$0xff]  ;;  %v53_v9 = vld [vmem:[%s4654_s0 + $0xe8] sm:$0xff] }
  0x2f   :  { %406 = vmatpush2.msra.mxu0 %v202_v17  ;;  %v70_v10 = vld [vmem:[%s4654_s0 + $0x170] sm:$0xff]  ;;  %v52_v11 = vld [vmem:[%s4654_s0 + $0xe0] sm:$0xff]  ;;  %v75_v12 = vld [vmem:[%s4654_s0 + $0x198] sm:$0xff] }
  0x30   :  { %407 = vmatprep.subr.mxu0 %v201_v19  ;;  %689 = vmatmul.mubr.f32.gmra.mxu1 %v30_v28  ;;  %v57_v13 = vld [vmem:[%s4654_s0 + $0x108] sm:$0xff]  ;;  %v74_v14 = vld [vmem:[%s4654_s0 + $0x190] sm:$0xff]  ;;  %v56_v15 = vld [vmem:[%s4654_s0 + $0x100] sm:$0xff] }
  0x31   :  { %408 = vmatpush2.msra.mxu0 %v200_v21  ;;  %2431 = vmatprep.mubr.msk.f32.mxu1 %vm264_vm0, %v35_v30  ;;  %v79_v16 = vld [vmem:[%s4654_s0 + $0x1b8] sm:$0xff]  ;;  %v61_v17 = vld [vmem:[%s4654_s0 + $0x128] sm:$0xff]  ;;  %v78_v18 = vld [vmem:[%s4654_s0 + $0x1b0] sm:$0xff] }
  0x32   :  { %409 = vmatprep.subr.mxu0 %v199_v23  ;;  %v60_v19 = vld [vmem:[%s4654_s0 + $0x120] sm:$0xff]  ;;  %v83_v20 = vld [vmem:[%s4654_s0 + $0x1d8] sm:$0xff]  ;;  %v65_v21 = vld [vmem:[%s4654_s0 + $0x148] sm:$0xff] }
  0x33   :  { %410 = vmatpush2.msra.mxu0 %v198_v25  ;;  %v82_v22 = vld [vmem:[%s4654_s0 + $0x1d0] sm:$0xff]  ;;  %v64_v23 = vld [vmem:[%s4654_s0 + $0x140] sm:$0xff]  ;;  %v87_v24 = vld [vmem:[%s4654_s0 + $0x1f8] sm:$0xff] }
  0x34   :  { %411 = vmatprep.subr.mxu0 %v197_v26  ;;  %695 = vmatmul.mubr.f32.gmra.mxu1 %v34_v34  ;;  %v69_v25 = vld [vmem:[%s4654_s0 + $0x168] sm:$0xff]  ;;  %v86_v26 = vld [vmem:[%s4654_s0 + $0x1f0] sm:$0xff]  ;;  %v91_v28 = vld [vmem:[%s4654_s0 + $0x218] sm:$0xff] }
  0x35   :  { %412 = vmatpush2.msra.mxu0 %v196_v27  ;;  %2432 = vmatprep.mubr.msk.f32.mxu1 %vm264_vm0, %v39_v36  ;;  %v68_v27 = vld [vmem:[%s4654_s0 + $0x160] sm:$0xff]  ;;  %v90_v30 = vld [vmem:[%s4654_s0 + $0x210] sm:$0xff]  ;;  %v99_v36 = vld [vmem:[%s4654_s0 + $0x258] sm:$0xff] }
  0x36   :  { %413 = vmatprep.subr.mxu0 %v195_v29  ;;  %v73_v29 = vld [vmem:[%s4654_s0 + $0x188] sm:$0xff]  ;;  %v94_v34 = vld [vmem:[%s4654_s0 + $0x230] sm:$0xff] }
  0x37   :  { %414 = vmatpush2.msra.mxu0 %v194_v31  ;;  %v72_v31 = vld [vmem:[%s4654_s0 + $0x180] sm:$0xff] }
  0x38   :  { %415 = vmatprep.subr.mxu0 %v193_v32  ;;  %701 = vmatmul.mubr.f32.gmra.mxu1 %v38_v40  ;;  %v95_v32 = vld [vmem:[%s4654_s0 + $0x238] sm:$0xff] }
  0x39   :  { %416 = vmatpush2.msra.mxu0 %v192_v33  ;;  %2433 = vmatprep.mubr.msk.f32.mxu1 %vm264_vm0, %v43_v42  ;;  %v77_v33 = vld [vmem:[%s4654_s0 + $0x1a8] sm:$0xff]  ;;  %v103_v40 = vld [vmem:[%s4654_s0 + $0x278] sm:$0xff]  ;;  %v102_v42 = vld [vmem:[%s4654_s0 + $0x270] sm:$0xff] }
  0x3a   :  { %417 = vmatprep.subr.mxu0 %v191_v35  ;;  %v76_v35 = vld [vmem:[%s4654_s0 + $0x1a0] sm:$0xff] }
  0x3b   :  { %418 = vmatpush2.msra.mxu0 %v190_v37  ;;  %v81_v37 = vld [vmem:[%s4654_s0 + $0x1c8] sm:$0xff] }
  0x3c   :  { %419 = vmatprep.subr.mxu0 %v189_v38  ;;  %707 = vmatmul.mubr.f32.gmra.mxu1 %v42_v46  ;;  %v98_v38 = vld [vmem:[%s4654_s0 + $0x250] sm:$0xff] }
  0x3d   :  { %420 = vmatpush2.msra.mxu0 %v188_v39  ;;  %2434 = vmatprep.mubr.msk.f32.mxu1 %vm264_vm0, %v47_v48  ;;  %v80_v39 = vld [vmem:[%s4654_s0 + $0x1c0] sm:$0xff]  ;;  %v106_v46 = vld [vmem:[%s4654_s0 + $0x290] sm:$0xff]  ;;  %v111_v48 = vld [vmem:[%s4654_s0 + $0x2b8] sm:$0xff] }
  0x3e   :  { %421 = vmatprep.subr.mxu0 %v187_v41  ;;  %v85_v41 = vld [vmem:[%s4654_s0 + $0x1e8] sm:$0xff] }
  0x3f   :  { %422 = vmatpush2.msra.mxu0 %v186_v43  ;;  %v84_v43 = vld [vmem:[%s4654_s0 + $0x1e0] sm:$0xff] }
  0x40   :  { %423 = vmatprep.subr.mxu0 %v185_v44  ;;  %713 = vmatmul.mubr.f32.gmra.mxu1 %v46_v50  ;;  %v107_v44 = vld [vmem:[%s4654_s0 + $0x298] sm:$0xff]  ;;  %v110_v50 = vld [vmem:[%s4654_s0 + $0x2b0] sm:$0xff] }
  0x41   :  { %424 = vmatpush2.msra.mxu0 %v184_v45  ;;  %2435 = vmatprep.mubr.msk.f32.mxu1 %vm264_vm0, %v51_v52  ;;  %v89_v45 = vld [vmem:[%s4654_s0 + $0x208] sm:$0xff]  ;;  %v115_v52 = vld [vmem:[%s4654_s0 + $0x2d8] sm:$0xff] }
  0x42   :  { %426 = vmatmul.mubr.f32.vlgmr.msra.gmra.mxu0 %v24_v47  ;;  %v88_v47 = vld [vmem:[%s4654_s0 + $0x200] sm:$0xff] }
  0x43   :  { %431 = vmatprep.mubr.f32.mxu0 %v29_v49  ;;  %v93_v49 = vld [vmem:[%s4654_s0 + $0x228] sm:$0xff] }
  0x44   :  { %719 = vmatmul.mubr.f32.gmra.mxu1 %v50_v54  ;;  %v114_v54 = vld [vmem:[%s4654_s0 + $0x2d0] sm:$0xff] }
  0x45   :  { %2436 = vmatprep.mubr.msk.f32.mxu1 %vm264_vm0, %v55_v56  ;;  %v119_v56 = vld [vmem:[%s4654_s0 + $0x2f8] sm:$0xff] }
  0x46   :  { %432 = vmatmul.mubr.f32.gmra.mxu0 %v28_v51  ;;  %v92_v51 = vld [vmem:[%s4654_s0 + $0x220] sm:$0xff] }
  0x47   :  { %437 = vmatprep.mubr.f32.mxu0 %v33_v53  ;;  %v97_v53 = vld [vmem:[%s4654_s0 + $0x248] sm:$0xff] }
  0x48   :  { %725 = vmatmul.mubr.f32.gmra.mxu1 %v54_v58  ;;  %v118_v58 = vld [vmem:[%s4654_s0 + $0x2f0] sm:$0xff] }
  0x49   :  { %2437 = vmatprep.mubr.msk.f32.mxu1 %vm264_vm0, %v59_v60  ;;  %v123_v60 = vld [vmem:[%s4654_s0 + $0x318] sm:$0xff] }
  0x4a   :  { %438 = vmatmul.mubr.f32.gmra.mxu0 %v32_v55  ;;  %v96_v55 = vld [vmem:[%s4654_s0 + $0x240] sm:$0xff] }
  0x4b   :  { %443 = vmatprep.mubr.f32.mxu0 %v37_v57  ;;  %v101_v57 = vld [vmem:[%s4654_s0 + $0x268] sm:$0xff] }
  0x4c   :  { %731 = vmatmul.mubr.f32.gmra.mxu1 %v58_v62  ;;  %v122_v62 = vld [vmem:[%s4654_s0 + $0x310] sm:$0xff] }
  0x4d   :  { %2438 = vmatprep.mubr.msk.f32.mxu1 %vm264_vm0, %v63_v0  ;;  %v127_v0 = vld [vmem:[%s4654_s0 + $0x338] sm:$0xff] }
  0x4e   :  { %444 = vmatmul.mubr.f32.gmra.mxu0 %v36_v59  ;;  %v100_v59 = vld [vmem:[%s4654_s0 + $0x260] sm:$0xff] }
  0x4f   :  { %449 = vmatprep.mubr.f32.mxu0 %v41_v61  ;;  %v105_v61 = vld [vmem:[%s4654_s0 + $0x288] sm:$0xff] }
  0x50   :  { %737 = vmatmul.mubr.f32.gmra.mxu1 %v62_v2  ;;  %v126_v2 = vld [vmem:[%s4654_s0 + $0x330] sm:$0xff] }
  0x51   :  { %2439 = vmatprep.mubr.msk.f32.mxu1 %vm264_vm0, %v67_v4  ;;  %v131_v4 = vld [vmem:[%s4654_s0 + $0x358] sm:$0xff] }
  0x52   :  { %450 = vmatmul.mubr.f32.gmra.mxu0 %v40_v63  ;;  %v104_v63 = vld [vmem:[%s4654_s0 + $0x280] sm:$0xff] }
  0x53   :  { %455 = vmatprep.mubr.f32.mxu0 %v45_v1  ;;  %v109_v1 = vld [vmem:[%s4654_s0 + $0x2a8] sm:$0xff] }
  0x54   :  { %743 = vmatmul.mubr.f32.gmra.mxu1 %v66_v6  ;;  %v130_v6 = vld [vmem:[%s4654_s0 + $0x350] sm:$0xff] }
  0x55   :  { %2440 = vmatprep.mubr.msk.f32.mxu1 %vm264_vm0, %v71_v8  ;;  %v135_v8 = vld [vmem:[%s4654_s0 + $0x378] sm:$0xff] }
  0x56   :  { %456 = vmatmul.mubr.f32.gmra.mxu0 %v44_v3  ;;  %v108_v3 = vld [vmem:[%s4654_s0 + $0x2a0] sm:$0xff] }
  0x57   :  { %461 = vmatprep.mubr.f32.mxu0 %v49_v5  ;;  %v113_v5 = vld [vmem:[%s4654_s0 + $0x2c8] sm:$0xff] }
  0x58   :  { %749 = vmatmul.mubr.f32.gmra.mxu1 %v70_v10  ;;  %v134_v10 = vld [vmem:[%s4654_s0 + $0x370] sm:$0xff] }
  0x59   :  { %2441 = vmatprep.mubr.msk.f32.mxu1 %vm264_vm0, %v75_v12  ;;  %v139_v12 = vld [vmem:[%s4654_s0 + $0x398] sm:$0xff] }
  0x5a   :  { %462 = vmatmul.mubr.f32.gmra.mxu0 %v48_v7  ;;  %v112_v7 = vld [vmem:[%s4654_s0 + $0x2c0] sm:$0xff] }
  0x5b   :  { %467 = vmatprep.mubr.f32.mxu0 %v53_v9  ;;  %v117_v9 = vld [vmem:[%s4654_s0 + $0x2e8] sm:$0xff] }
  0x5c   :  { %755 = vmatmul.mubr.f32.gmra.mxu1 %v74_v14  ;;  %v138_v14 = vld [vmem:[%s4654_s0 + $0x390] sm:$0xff] }
  0x5d   :  { %2442 = vmatprep.mubr.msk.f32.mxu1 %vm264_vm0, %v79_v16  ;;  %v143_v16 = vld [vmem:[%s4654_s0 + $0x3b8] sm:$0xff] }
  0x5e   :  { %468 = vmatmul.mubr.f32.gmra.mxu0 %v52_v11  ;;  %v116_v11 = vld [vmem:[%s4654_s0 + $0x2e0] sm:$0xff] }
  0x5f   :  { %473 = vmatprep.mubr.f32.mxu0 %v57_v13  ;;  %v121_v13 = vld [vmem:[%s4654_s0 + $0x308] sm:$0xff] }
  0x60   :  { %761 = vmatmul.mubr.f32.gmra.mxu1 %v78_v18  ;;  %v142_v18 = vld [vmem:[%s4654_s0 + $0x3b0] sm:$0xff] }
  0x61   :  { %2443 = vmatprep.mubr.msk.f32.mxu1 %vm264_vm0, %v83_v20  ;;  %v147_v20 = vld [vmem:[%s4654_s0 + $0x3d8] sm:$0xff] }
  0x62   :  { %474 = vmatmul.mubr.f32.gmra.mxu0 %v56_v15  ;;  %v120_v15 = vld [vmem:[%s4654_s0 + $0x300] sm:$0xff] }
  0x63   :  { %479 = vmatprep.mubr.f32.mxu0 %v61_v17  ;;  %v125_v17 = vld [vmem:[%s4654_s0 + $0x328] sm:$0xff] }
  0x64   :  { %767 = vmatmul.mubr.f32.gmra.mxu1 %v82_v22  ;;  %v146_v22 = vld [vmem:[%s4654_s0 + $0x3d0] sm:$0xff] }
  0x65   :  { %2444 = vmatprep.mubr.msk.f32.mxu1 %vm264_vm0, %v87_v24  ;;  %v151_v24 = vld [vmem:[%s4654_s0 + $0x3f8] sm:$0xff] }
  0x66   :  { %480 = vmatmul.mubr.f32.gmra.mxu0 %v60_v19  ;;  %v124_v19 = vld [vmem:[%s4654_s0 + $0x320] sm:$0xff] }
  0x67   :  { %485 = vmatprep.mubr.f32.mxu0 %v65_v21  ;;  %v129_v21 = vld [vmem:[%s4654_s0 + $0x348] sm:$0xff] }
  0x68   :  { %773 = vmatmul.mubr.f32.gmra.mxu1 %v86_v26  ;;  %v150_v26 = vld [vmem:[%s4654_s0 + $0x3f0] sm:$0xff] }
  0x69   :  { %2445 = vmatprep.mubr.msk.f32.mxu1 %vm264_vm0, %v91_v28  ;;  %v137_v28 = vld [vmem:[%s4654_s0 + $0x388] sm:$0xff] }
  0x6a   :  { %486 = vmatmul.mubr.f32.gmra.mxu0 %v64_v23  ;;  %v128_v23 = vld [vmem:[%s4654_s0 + $0x340] sm:$0xff] }
  0x6b   :  { %491 = vmatprep.mubr.f32.mxu0 %v69_v25  ;;  %v133_v25 = vld [vmem:[%s4654_s0 + $0x368] sm:$0xff] }
  0x6c   :  { %779 = vmatmul.mubr.f32.gmra.mxu1 %v90_v30  ;;  %v141_v30 = vld [vmem:[%s4654_s0 + $0x3a8] sm:$0xff] }
  0x6d   :  { %2446 = vmatprep.mubr.msk.f32.mxu1 %vm264_vm0, %v95_v32  ;;  %v145_v32 = vld [vmem:[%s4654_s0 + $0x3c8] sm:$0xff] }
  0x6e   :  { %492 = vmatmul.mubr.f32.gmra.mxu0 %v68_v27  ;;  %v132_v27 = vld [vmem:[%s4654_s0 + $0x360] sm:$0xff] }
  0x6f   :  { %497 = vmatprep.mubr.f32.mxu0 %v73_v29  ;;  %v136_v29 = vld [vmem:[%s4654_s0 + $0x380] sm:$0xff] }
  0x70   :  { %785 = vmatmul.mubr.f32.gmra.mxu1 %v94_v34  ;;  %v149_v34 = vld [vmem:[%s4654_s0 + $0x3e8] sm:$0xff] }
  0x71   :  { %2447 = vmatprep.mubr.msk.f32.mxu1 %vm264_vm0, %v99_v36 }
  0x72   :  { %498 = vmatmul.mubr.f32.gmra.mxu0 %v72_v31  ;;  %v140_v31 = vld [vmem:[%s4654_s0 + $0x3a0] sm:$0xff] }
  0x73   :  { %503 = vmatprep.mubr.f32.mxu0 %v77_v33  ;;  %v144_v33 = vld [vmem:[%s4654_s0 + $0x3c0] sm:$0xff] }
  0x74   :  { %791 = vmatmul.mubr.f32.gmra.mxu1 %v98_v38 }
  0x75   :  { %2448 = vmatprep.mubr.msk.f32.mxu1 %vm264_vm0, %v103_v40 }
  0x76   :  { %504 = vmatmul.mubr.f32.gmra.mxu0 %v76_v35  ;;  %v148_v35 = vld [vmem:[%s4654_s0 + $0x3e0] sm:$0xff] }
  0x77   :  { %509 = vmatprep.mubr.f32.mxu0 %v81_v37  ;;  %v254_v37 = vlaneseq }
  0x78   :  { %797 = vmatmul.mubr.f32.gmra.mxu1 %v102_v42 }
  0x79   :  { %2449 = vmatprep.mubr.msk.f32.mxu1 %vm264_vm0, %v107_v44  ;;  %v255_v40 = vshrl.u32 %v254_v37, 7 }
  0x7a   :  { %510 = vmatmul.mubr.f32.gmra.mxu0 %v80_v39 }
  0x7b   :  { %515 = vmatprep.mubr.f32.mxu0 %v85_v41 }
  0x7c   :  { %803 = vmatmul.mubr.f32.gmra.mxu1 %v106_v46  ;;  %v260_v46 = vsub.s32 1, %v255_v40 }
  0x7d   :  { %2450 = vmatprep.mubr.msk.f32.mxu1 %vm264_vm0, %v111_v48 }
  0x7e   :  { %516 = vmatmul.mubr.f32.gmra.mxu0 %v84_v43  ;;  %v256_v43 = vsub.s32 0, %v255_v40 }
  0x7f   :  { %521 = vmatprep.mubr.f32.mxu0 %v89_v45  ;;  %v252_v45 = vld [vmem:[%s4655_s3] sm:$0x3] }
  0x80   :  { %809 = vmatmul.mubr.f32.gmra.mxu1 %v110_v50  ;;  %v3439_v48 = vrot.slane %v252_v45, %v256_v43  ;;  %v3441_v50 = vrot.slane %v252_v45, %v260_v46 }
  0x81   :  { %2451 = vmatprep.mubr.msk.f32.mxu1 %vm264_vm0, %v115_v52 }
  0x82   :  { %522 = vmatmul.mubr.f32.gmra.mxu0 %v88_v47 }
  0x83   :  { %527 = vmatprep.mubr.f32.mxu0 %v93_v49 }
  0x84   :  { %815 = vmatmul.mubr.f32.gmra.mxu1 %v114_v54 }
  0x85   :  { %2452 = vmatprep.mubr.msk.f32.mxu1 %vm264_vm0, %v119_v56 }
  0x86   :  { %528 = vmatmul.mubr.f32.gmra.mxu0 %v92_v51 }
  0x87   :  { %533 = vmatprep.mubr.f32.mxu0 %v97_v53 }
  0x88   :  { %821 = vmatmul.mubr.f32.gmra.mxu1 %v118_v58 }
  0x89   :  { %2453 = vmatprep.mubr.msk.f32.mxu1 %vm264_vm0, %v123_v60 }
  0x8a   :  { %534 = vmatmul.mubr.f32.gmra.mxu0 %v96_v55 }
  0x8b   :  { %539 = vmatprep.mubr.f32.mxu0 %v101_v57 }
  0x8c   :  { %827 = vmatmul.mubr.f32.gmra.mxu1 %v122_v62 }
  0x8d   :  { %2454 = vmatprep.mubr.msk.f32.mxu1 %vm264_vm0, %v127_v0 }
  0x8e   :  { %540 = vmatmul.mubr.f32.gmra.mxu0 %v100_v59 }
  0x8f   :  { %545 = vmatprep.mubr.f32.mxu0 %v105_v61 }
  0x90   :  { %833 = vmatmul.mubr.f32.gmra.mxu1 %v126_v2 }
  0x91   :  { %2455 = vmatprep.mubr.msk.f32.mxu1 %vm264_vm0, %v131_v4 }
  0x92   :  { %546 = vmatmul.mubr.f32.gmra.mxu0 %v104_v63 }
  0x93   :  { %551 = vmatprep.mubr.f32.mxu0 %v109_v1 }
  0x94   :  { %839 = vmatmul.mubr.f32.gmra.mxu1 %v130_v6 }
  0x95   :  { %2456 = vmatprep.mubr.msk.f32.mxu1 %vm264_vm0, %v135_v8 }
  0x96   :  { %552 = vmatmul.mubr.f32.gmra.mxu0 %v108_v3 }
  0x97   :  { %557 = vmatprep.mubr.f32.mxu0 %v113_v5 }
  0x98   :  { %845 = vmatmul.mubr.f32.gmra.mxu1 %v134_v10 }
  0x99   :  { %2457 = vmatprep.mubr.msk.f32.mxu1 %vm264_vm0, %v139_v12 }
  0x9a   :  { %558 = vmatmul.mubr.f32.gmra.mxu0 %v112_v7 }
  0x9b   :  { %563 = vmatprep.mubr.f32.mxu0 %v117_v9 }
  0x9c   :  { %851 = vmatmul.mubr.f32.gmra.mxu1 %v138_v14 }
  0x9d   :  { %2458 = vmatprep.mubr.msk.f32.mxu1 %vm264_vm0, %v143_v16 }
  0x9e   :  { %564 = vmatmul.mubr.f32.gmra.mxu0 %v116_v11 }
  0x9f   :  { %569 = vmatprep.mubr.f32.mxu0 %v121_v13 }
  0xa0   :  { %857 = vmatmul.mubr.f32.gmra.mxu1 %v142_v18  ;;  %v939_v18 = vld [vmem:[%s4656_s4] sm:$0x3] }
  0xa1   :  { %2459 = vmatprep.mubr.msk.f32.mxu1 %vm264_vm0, %v147_v20 }
  0xa2   :  { %570 = vmatmul.mubr.f32.gmra.mxu0 %v120_v15 }
  0xa3   :  { %575 = vmatprep.mubr.f32.mxu0 %v125_v17 }
  0xa4   :  { %863 = vmatmul.mubr.f32.gmra.mxu1 %v146_v22 }
  0xa5   :  { %2460 = vmatprep.mubr.msk.f32.mxu1 %vm264_vm0, %v151_v24 }
  0xa6   :  { %576 = vmatmul.mubr.f32.gmra.mxu0 %v124_v19 }
  0xa7   :  { %581 = vmatprep.mubr.f32.mxu0 %v129_v21 }
  0xa8   :  { %869 = vmatmul.mubr.f32.gmra.mxu1 %v150_v26  ;;  %v3469_v26 = vrot.slane %v939_v18, %v256_v43 }
  0xaa   :  { %582 = vmatmul.mubr.f32.gmra.mxu0 %v128_v23  ;;  %v3465_v23 = vrot.slane %v939_v18, %v260_v46 }
  0xab   :  { %587 = vmatprep.mubr.f32.mxu0 %v133_v25 }
  0xae   :  { %588 = vmatmul.mubr.f32.gmra.mxu0 %v132_v27 }
  0xaf   :  { %593 = vmatprep.mubr.f32.mxu0 %v137_v28 }
  0xb2   :  { %594 = vmatmul.mubr.f32.gmra.mxu0 %v136_v29 }
  0xb3   :  { %599 = vmatprep.mubr.f32.mxu0 %v141_v30 }
  0xb6   :  { %600 = vmatmul.mubr.f32.gmra.mxu0 %v140_v31 }
  0xb7   :  { %605 = vmatprep.mubr.f32.mxu0 %v145_v32 }
  0xba   :  { %606 = vmatmul.mubr.f32.gmra.mxu0 %v144_v33 }
  0xbb   :  { %611 = vmatprep.mubr.f32.mxu0 %v149_v34 }
  0xbe   :  { %612 = vmatmul.mubr.f32.gmra.mxu0 %v148_v35 }
  0xec   :  { %v684_v36 = vpop.f32.mrf.mxu1 }
  0xee   :  { %v686_v38 = vpop.f32.mrf.mxu1 }
  0xf0   :  { %v690_v39 = vpop.f32.mrf.mxu1 }
  0xf2   :  { %v692_v41 = vpop.f32.mrf.mxu1 }
  0xf4   :  { %v696_v42 = vpop.f32.mrf.mxu1 }
  0xf6   :  { %v698_v44 = vpop.f32.mrf.mxu1 }
  0xf8   :  { %v702_v47 = vpop.f32.mrf.mxu1 }
  0xfa   :  { %v704_v49 = vpop.f32.mrf.mxu1 }
  0xfc   :  { %v708_v51 = vpop.f32.mrf.mxu1 }
  0xfe   :  { %v710_v54 = vpop.f32.mrf.mxu1 }
 0x100   :  { %v714_v58 = vpop.f32.mrf.mxu1 }
 0x102   :  { %v427_v52 = vpop.f32.mrf.mxu0  ;;  %v716_v62 = vpop.f32.mrf.mxu1 }
 0x103   :  { %v428_v53 = vadd.f32 %v427_v52, %v3439_v48 }
 0x104   :  { %v429_v55 = vpop.f32.mrf.mxu0  ;;  %v3447_v2 = vpop.f32.mrf.mxu1 }
 0x105   :  { %v685_v56 = vadd.f32 %v684_v36, %v428_v53  ;;  %v430_v57 = vadd.f32 %v429_v55, %v3441_v50 }
 0x106   :  { %v433_v59 = vpop.f32.mrf.mxu0  ;;  %v3450_v6 = vpop.f32.mrf.mxu1 }
 0x107   :  { %v687_v60 = vadd.f32 %v686_v38, %v430_v57  ;;  %v434_v61 = vadd.f32 %v433_v59, %v3439_v48  ;;  %2461 = vtanh.f32 %v685_v56 }
 0x108   :  { %v435_v63 = vpop.f32.mrf.mxu0  ;;  %v3453_v10 = vpop.f32.mrf.mxu1 }
 0x109   :  { %2463 = vtanh.f32 %v687_v60  ;;  %v691_v0 = vadd.f32 %v690_v39, %v434_v61  ;;  %v436_v1 = vadd.f32 %v435_v63, %v3441_v50 }
 0x10a   :  { %v439_v3 = vpop.f32.mrf.mxu0  ;;  %v3456_v14 = vpop.f32.mrf.mxu1 }
 0x10b   :  { %v693_v4 = vadd.f32 %v692_v41, %v436_v1  ;;  %v440_v5 = vadd.f32 %v439_v3, %v3439_v48  ;;  %2465 = vtanh.f32 %v691_v0 }
 0x10c   :  { %v441_v7 = vpop.f32.mrf.mxu0  ;;  %v3462_v19 = vpop.f32.mrf.mxu1 }
 0x10d   :  { %2467 = vtanh.f32 %v693_v4  ;;  %v697_v8 = vadd.f32 %v696_v42, %v440_v5  ;;  %v442_v9 = vadd.f32 %v441_v7, %v3441_v50 }
 0x10e   :  { %v445_v11 = vpop.f32.mrf.mxu0  ;;  %v3467_v24 = vpop.f32.mrf.mxu1 }
 0x10f   :  { %v699_v12 = vadd.f32 %v698_v44, %v442_v9  ;;  %v446_v13 = vadd.f32 %v445_v11, %v3439_v48  ;;  %2469 = vtanh.f32 %v697_v8 }
 0x110   :  { %v447_v15 = vpop.f32.mrf.mxu0  ;;  %v3472_v30 = vpop.f32.mrf.mxu1 }
 0x111   :  { %2471 = vtanh.f32 %v699_v12  ;;  %v703_v16 = vadd.f32 %v702_v47, %v446_v13  ;;  %v448_v17 = vadd.f32 %v447_v15, %v3441_v50 }
 0x112   :  { %v451_v20 = vpop.f32.mrf.mxu0  ;;  %v3476_v36 = vpop.f32.mrf.mxu1 }
 0x113   :  { %v705_v21 = vadd.f32 %v704_v49, %v448_v17  ;;  %v452_v22 = vadd.f32 %v451_v20, %v3439_v48  ;;  %2473 = vtanh.f32 %v703_v16 }
 0x114   :  { %v453_v25 = vpop.f32.mrf.mxu0  ;;  %v2462_v27 = vpop.eup %2461 }
 0x115   :  { %2475 = vtanh.f32 %v705_v21  ;;  %v709_v28 = vadd.f32 %v708_v51, %v452_v22  ;;  %v454_v29 = vadd.f32 %v453_v25, %v3441_v50  ;;  %v951_v38 = vmul.f32 %v2462_v27, %v3469_v26  ;;  %v3481_v43 = vpop.f32.mrf.mxu1 }
 0x116   :  { %v2464_v31 = vpop.eup %2463  ;;  %v457_v32 = vpop.f32.mrf.mxu0 }
 0x117   :  { %v711_v33 = vadd.f32 %v710_v54, %v454_v29  ;;  %v458_v34 = vadd.f32 %v457_v32, %v3439_v48  ;;  %v952_v35 = vmul.f32 %v2464_v31, %v3465_v23  ;;  %2477 = vtanh.f32 %v709_v28  ;;  %v3485_v52 = vpop.f32.mrf.mxu1 }
 0x118   :  { %v459_v37 = vpop.f32.mrf.mxu0  ;;  %v2466_v39 = vpop.eup %2465 }
 0x119   :  { %2479 = vtanh.f32 %v711_v33  ;;  %v715_v40 = vadd.f32 %v714_v58, %v458_v34  ;;  %v460_v41 = vadd.f32 %v459_v37, %v3441_v50  ;;  %v1016_v42 = vsel %vm1015_vm1, %v952_v35, 0.0  ;;  %v3491_v59 = vpop.f32.mrf.mxu1 }
 0x11a   :  { %v2468_v44 = vpop.eup %2467  ;;  %v463_v45 = vpop.f32.mrf.mxu0  ;;  %v1017_v46 = vadd.f32 %v1016_v42, %v951_v38  ;;  %v953_v54 = vmul.f32 %v2466_v39, %v3469_v26 }
 0x11b   :  { %v717_v47 = vadd.f32 %v716_v62, %v460_v41  ;;  %v464_v49 = vadd.f32 %v463_v45, %v3439_v48  ;;  %v954_v51 = vmul.f32 %v2468_v44, %v3465_v23  ;;  %2481 = vtanh.f32 %v715_v40  ;;  %v3496_v3 = vpop.f32.mrf.mxu1 }
 0x11c   :  { %v465_v53 = vpop.f32.mrf.mxu0  ;;  %1018 = vadd.xlane.f32.xlu0 %v1017_v46  ;;  %v2470_v55 = vpop.eup %2469 }
 0x11d   :  { %2483 = vtanh.f32 %v717_v47  ;;  %v721_v56 = vadd.f32 %v3447_v2, %v464_v49  ;;  %v466_v57 = vadd.f32 %v465_v53, %v3441_v50  ;;  %v1020_v58 = vsel %vm1015_vm1, %v954_v51, 0.0 }
 0x11e   :  { %v2472_v60 = vpop.eup %2471  ;;  %v469_v61 = vpop.f32.mrf.mxu0  ;;  %v1021_v62 = vadd.f32 %v1020_v58, %v953_v54  ;;  %v955_v2 = vmul.f32 %v2470_v55, %v3469_v26 }
 0x11f   :  { %v723_v63 = vadd.f32 %v3450_v6, %v466_v57  ;;  %v470_v0 = vadd.f32 %v469_v61, %v3439_v48  ;;  %v956_v1 = vmul.f32 %v2472_v60, %v3465_v23  ;;  %2485 = vtanh.f32 %v721_v56  ;;  %v3502_v6 = vpop.f32.mrf.mxu1 }
 0x120   :  { %v471_v4 = vpop.f32.mrf.mxu0  ;;  %1022 = vadd.xlane.f32.xlu0 %v1021_v62  ;;  %v2474_v5 = vpop.eup %2473 }
 0x121   :  { %2487 = vtanh.f32 %v723_v63  ;;  %v727_v7 = vadd.f32 %v3453_v10, %v470_v0  ;;  %v472_v8 = vadd.f32 %v471_v4, %v3441_v50  ;;  %v1024_v9 = vsel %vm1015_vm1, %v956_v1, 0.0  ;;  %v3507_v18 = vpop.f32.mrf.mxu1 }
 0x122   :  { %v2476_v11 = vpop.eup %2475  ;;  %v475_v12 = vpop.f32.mrf.mxu0  ;;  %v1025_v13 = vadd.f32 %v1024_v9, %v955_v2  ;;  %v957_v10 = vmul.f32 %v2474_v5, %v3469_v26 }
 0x123   :  { %v729_v15 = vadd.f32 %v3456_v14, %v472_v8  ;;  %v476_v16 = vadd.f32 %v475_v12, %v3439_v48  ;;  %v958_v17 = vmul.f32 %v2476_v11, %v3465_v23  ;;  %2489 = vtanh.f32 %v727_v7  ;;  %v3513_v14 = vpop.f32.mrf.mxu1 }
 0x124   :  { %v477_v20 = vpop.f32.mrf.mxu0  ;;  %1026 = vadd.xlane.f32.xlu1 %v1025_v13  ;;  %v2478_v21 = vpop.eup %2477 }
 0x125   :  { %2491 = vtanh.f32 %v729_v15  ;;  %v733_v22 = vadd.f32 %v3462_v19, %v476_v16  ;;  %v478_v25 = vadd.f32 %v477_v20, %v3441_v50  ;;  %v1028_v27 = vsel %vm1015_vm1, %v958_v17, 0.0  ;;  %v3518_v35 = vpop.f32.mrf.mxu1 }
 0x126   :  { %v2480_v28 = vpop.eup %2479  ;;  %v481_v29 = vpop.f32.mrf.mxu0  ;;  %v1029_v31 = vadd.f32 %v1028_v27, %v957_v10  ;;  %v959_v19 = vmul.f32 %v2478_v21, %v3469_v26 }
 0x127   :  { %v735_v32 = vadd.f32 %v3467_v24, %v478_v25  ;;  %v482_v33 = vadd.f32 %v481_v29, %v3439_v48  ;;  %v960_v34 = vmul.f32 %v2480_v28, %v3465_v23  ;;  %2493 = vtanh.f32 %v733_v22  ;;  %v3524_v24 = vpop.f32.mrf.mxu1 }
 0x128   :  { %v483_v37 = vpop.f32.mrf.mxu0  ;;  %1030 = vadd.xlane.f32.xlu1 %v1029_v31  ;;  %v2482_v38 = vpop.eup %2481 }
 0x129   :  { %2495 = vtanh.f32 %v735_v32  ;;  %v739_v39 = vadd.f32 %v3472_v30, %v482_v33  ;;  %v484_v40 = vadd.f32 %v483_v37, %v3441_v50  ;;  %v1032_v41 = vsel %vm1015_vm1, %v960_v34, 0.0  ;;  %v3529_v51 = vpop.f32.mrf.mxu1 }
 0x12a   :  { %v2484_v42 = vpop.eup %2483  ;;  %v487_v44 = vpop.f32.mrf.mxu0  ;;  %v1033_v45 = vadd.f32 %v1032_v41, %v959_v19  ;;  %v961_v30 = vmul.f32 %v2482_v38, %v3469_v26 }
 0x12b   :  { %v741_v46 = vadd.f32 %v3476_v36, %v484_v40  ;;  %v488_v47 = vadd.f32 %v487_v44, %v3439_v48  ;;  %v962_v49 = vmul.f32 %v2484_v42, %v3465_v23  ;;  %2497 = vtanh.f32 %v739_v39  ;;  %v3535_v36 = vpop.f32.mrf.mxu1 }
 0x12c   :  { %v489_v53 = vpop.f32.mrf.mxu0  ;;  %1034 = vadd.xlane.f32.xlu0 %v1033_v45  ;;  %v2486_v54 = vpop.eup %2485 }
 0x12d   :  { %2499 = vtanh.f32 %v741_v46  ;;  %v745_v55 = vadd.f32 %v3481_v43, %v488_v47  ;;  %v490_v56 = vadd.f32 %v489_v53, %v3441_v50  ;;  %v1036_v57 = vsel %vm1015_vm1, %v962_v49, 0.0  ;;  %v3540_v1 = vpop.f32.mrf.mxu1 }
 0x12e   :  { %v2488_v58 = vpop.eup %2487  ;;  %v493_v60 = vpop.f32.mrf.mxu0  ;;  %v1037_v61 = vadd.f32 %v1036_v57, %v961_v30  ;;  %v963_v43 = vmul.f32 %v2486_v54, %v3469_v26 }
 0x12f   :  { %v747_v62 = vadd.f32 %v3485_v52, %v490_v56  ;;  %v494_v63 = vadd.f32 %v493_v60, %v3439_v48  ;;  %v964_v0 = vmul.f32 %v2488_v58, %v3465_v23  ;;  %2501 = vtanh.f32 %v745_v55  ;;  %v3546_v52 = vpop.f32.mrf.mxu1 }
 0x130   :  { %v495_v4 = vpop.f32.mrf.mxu0  ;;  %1038 = vadd.xlane.f32.xlu1 %v1037_v61  ;;  %v2490_v2 = vpop.eup %2489 }
 0x131   :  { %2503 = vtanh.f32 %v747_v62  ;;  %v751_v5 = vadd.f32 %v3491_v59, %v494_v63  ;;  %v496_v7 = vadd.f32 %v495_v4, %v3441_v50  ;;  %v1040_v8 = vsel %vm1015_vm1, %v964_v0, 0.0  ;;  %v3551_v17 = vpop.f32.mrf.mxu1 }
 0x132   :  { %v2492_v9 = vpop.eup %2491  ;;  %v499_v11 = vpop.f32.mrf.mxu0  ;;  %v1041_v12 = vadd.f32 %v1040_v8, %v963_v43  ;;  %v965_v59 = vmul.f32 %v2490_v2, %v3469_v26 }
 0x133   :  { %v753_v13 = vadd.f32 %v3496_v3, %v496_v7  ;;  %v500_v15 = vadd.f32 %v499_v11, %v3439_v48  ;;  %v966_v16 = vmul.f32 %v2492_v9, %v3465_v23  ;;  %2505 = vtanh.f32 %v751_v5  ;;  %v3557_v3 = vpop.f32.mrf.mxu1 }
 0x134   :  { %v501_v20 = vpop.f32.mrf.mxu0  ;;  %1042 = vadd.xlane.f32.xlu0 %v1041_v12  ;;  %v2494_v10 = vpop.eup %2493 }
 0x135   :  { %2507 = vtanh.f32 %v753_v13  ;;  %v757_v21 = vadd.f32 %v3502_v6, %v500_v15  ;;  %v502_v22 = vadd.f32 %v501_v20, %v3441_v50  ;;  %v1044_v25 = vsel %vm1015_vm1, %v966_v16, 0.0  ;;  %v3562_v34 = vpop.f32.mrf.mxu1 }
 0x136   :  { %v2496_v27 = vpop.eup %2495  ;;  %v505_v28 = vpop.f32.mrf.mxu0  ;;  %v1045_v29 = vadd.f32 %v1044_v25, %v965_v59  ;;  %v967_v6 = vmul.f32 %v2494_v10, %v3469_v26 }
 0x137   :  { %v759_v31 = vadd.f32 %v3507_v18, %v502_v22  ;;  %v506_v32 = vadd.f32 %v505_v28, %v3439_v48  ;;  %v968_v33 = vmul.f32 %v2496_v27, %v3465_v23  ;;  %2509 = vtanh.f32 %v757_v21  ;;  %v3568_v18 = vpop.f32.mrf.mxu1 }
 0x138   :  { %v507_v37 = vpop.f32.mrf.mxu0  ;;  %1046 = vadd.xlane.f32.xlu1 %v1045_v29  ;;  %v2498_v19 = vpop.eup %2497 }
 0x139   :  { %2511 = vtanh.f32 %v759_v31  ;;  %v763_v38 = vadd.f32 %v3513_v14, %v506_v32  ;;  %v508_v39 = vadd.f32 %v507_v37, %v3441_v50  ;;  %v1048_v40 = vsel %vm1015_vm1, %v968_v33, 0.0  ;;  %v3573_v49 = vpop.f32.mrf.mxu1 }
 0x13a   :  { %v2500_v41 = vpop.eup %2499  ;;  %v511_v42 = vpop.f32.mrf.mxu0  ;;  %v1049_v44 = vadd.f32 %v1048_v40, %v967_v6  ;;  %v969_v14 = vmul.f32 %v2498_v19, %v3469_v26 }
 0x13b   :  { %v765_v45 = vadd.f32 %v3518_v35, %v508_v39  ;;  %v512_v46 = vadd.f32 %v511_v42, %v3439_v48  ;;  %v970_v47 = vmul.f32 %v2500_v41, %v3465_v23  ;;  %2513 = vtanh.f32 %v763_v38  ;;  %v3579_v35 = vpop.f32.mrf.mxu1 }
 0x13c   :  { %v513_v53 = vpop.f32.mrf.mxu0  ;;  %1050 = vadd.xlane.f32.xlu0 %v1049_v44  ;;  %v2502_v30 = vpop.eup %2501 }
 0x13d   :  { %2515 = vtanh.f32 %v765_v45  ;;  %v769_v54 = vadd.f32 %v3524_v24, %v512_v46  ;;  %v514_v55 = vadd.f32 %v513_v53, %v3441_v50  ;;  %v1052_v56 = vsel %vm1015_vm1, %v970_v47, 0.0  ;;  %v3584_v0 = vpop.f32.mrf.mxu1 }
 0x13e   :  { %v2504_v57 = vpop.eup %2503  ;;  %v517_v58 = vpop.f32.mrf.mxu0  ;;  %v1053_v60 = vadd.f32 %v1052_v56, %v969_v14  ;;  %v971_v24 = vmul.f32 %v2502_v30, %v3469_v26 }
 0x13f   :  { %v771_v61 = vadd.f32 %v3529_v51, %v514_v55  ;;  %v518_v62 = vadd.f32 %v517_v58, %v3439_v48  ;;  %v972_v63 = vmul.f32 %v2504_v57, %v3465_v23  ;;  %2517 = vtanh.f32 %v769_v54  ;;  %v3590_v51 = vpop.f32.mrf.mxu1 }
 0x140   :  { %v519_v4 = vpop.f32.mrf.mxu0  ;;  %1054 = vadd.xlane.f32.xlu1 %v1053_v60  ;;  %v2506_v43 = vpop.eup %2505 }
 0x141   :  { %2519 = vtanh.f32 %v771_v61  ;;  %v775_v2 = vadd.f32 %v3535_v36, %v518_v62  ;;  %v520_v5 = vadd.f32 %v519_v4, %v3441_v50  ;;  %v1056_v7 = vsel %vm1015_vm1, %v972_v63, 0.0  ;;  %v3595_v16 = vpop.f32.mrf.mxu1 }
 0x142   :  { %v2508_v8 = vpop.eup %2507  ;;  %v523_v9 = vpop.f32.mrf.mxu0  ;;  %v1057_v11 = vadd.f32 %v1056_v7, %v971_v24  ;;  %v973_v36 = vmul.f32 %v2506_v43, %v3469_v26 }
 0x143   :  { %v777_v12 = vadd.f32 %v3540_v1, %v520_v5  ;;  %v524_v13 = vadd.f32 %v523_v9, %v3439_v48  ;;  %v974_v15 = vmul.f32 %v2508_v8, %v3465_v23  ;;  %2521 = vtanh.f32 %v775_v2  ;;  %v3601_v1 = vpop.f32.mrf.mxu1 }
 0x144   :  { %v525_v20 = vpop.f32.mrf.mxu0  ;;  %1058 = vadd.xlane.f32.xlu0 %v1057_v11  ;;  %v2510_v59 = vpop.eup %2509 }
 0x145   :  { %2523 = vtanh.f32 %v777_v12  ;;  %v781_v10 = vadd.f32 %v3546_v52, %v524_v13  ;;  %v526_v21 = vadd.f32 %v525_v20, %v3441_v50  ;;  %v1060_v22 = vsel %vm1015_vm1, %v974_v15, 0.0  ;;  %v3606_v33 = vpop.f32.mrf.mxu1 }
 0x146   :  { %v2512_v25 = vpop.eup %2511  ;;  %v529_v27 = vpop.f32.mrf.mxu0  ;;  %v1061_v28 = vadd.f32 %v1060_v22, %v973_v36  ;;  %v975_v52 = vmul.f32 %v2510_v59, %v3469_v26 }
 0x147   :  { %v783_v29 = vadd.f32 %v3551_v17, %v526_v21  ;;  %v530_v31 = vadd.f32 %v529_v27, %v3439_v48  ;;  %v976_v32 = vmul.f32 %v2512_v25, %v3465_v23  ;;  %2525 = vtanh.f32 %v781_v10  ;;  %v3612_v17 = vpop.f32.mrf.mxu1 }
 0x148   :  { %v531_v37 = vpop.f32.mrf.mxu0  ;;  %1062 = vadd.xlane.f32.xlu1 %v1061_v28  ;;  %v2514_v6 = vpop.eup %2513 }
 0x149   :  { %2527 = vtanh.f32 %v783_v29  ;;  %v787_v19 = vadd.f32 %v3557_v3, %v530_v31  ;;  %v532_v38 = vadd.f32 %v531_v37, %v3441_v50  ;;  %v1064_v39 = vsel %vm1015_vm1, %v976_v32, 0.0  ;;  %v3617_v47 = vpop.f32.mrf.mxu1 }
 0x14a   :  { %v2516_v40 = vpop.eup %2515  ;;  %v535_v41 = vpop.f32.mrf.mxu0  ;;  %v1065_v42 = vadd.f32 %v1064_v39, %v975_v52  ;;  %v977_v3 = vmul.f32 %v2514_v6, %v3469_v26 }
 0x14b   :  { %v789_v44 = vadd.f32 %v3562_v34, %v532_v38  ;;  %v536_v45 = vadd.f32 %v535_v41, %v3439_v48  ;;  %v978_v46 = vmul.f32 %v2516_v40, %v3465_v23  ;;  %2529 = vtanh.f32 %v787_v19  ;;  %v3623_v34 = vpop.f32.mrf.mxu1 }
 0x14c   :  { %v537_v53 = vpop.f32.mrf.mxu0  ;;  %1066 = vadd.xlane.f32.xlu0 %v1065_v42  ;;  %v2518_v14 = vpop.eup %2517 }
 0x14d   :  { %2531 = vtanh.f32 %v789_v44  ;;  %v793_v30 = vadd.f32 %v3568_v18, %v536_v45  ;;  %v538_v54 = vadd.f32 %v537_v53, %v3441_v50  ;;  %v1068_v55 = vsel %vm1015_vm1, %v978_v46, 0.0  ;;  %v3628_v63 = vpop.f32.mrf.mxu1 }
 0x14e   :  { %v2520_v56 = vpop.eup %2519  ;;  %v541_v57 = vpop.f32.mrf.mxu0  ;;  %v1069_v58 = vadd.f32 %v1068_v55, %v977_v3  ;;  %v979_v18 = vmul.f32 %v2518_v14, %v3469_v26 }
 0x14f   :  { %v795_v60 = vadd.f32 %v3573_v49, %v538_v54  ;;  %v542_v61 = vadd.f32 %v541_v57, %v3439_v48  ;;  %v980_v62 = vmul.f32 %v2520_v56, %v3465_v23  ;;  %2533 = vtanh.f32 %v793_v30  ;;  %v3634_v49 = vpop.f32.mrf.mxu1 }
 0x150   :  { %v543_v4 = vpop.f32.mrf.mxu0  ;;  %1070 = vadd.xlane.f32.xlu1 %v1069_v58  ;;  %v2522_v24 = vpop.eup %2521 }
 0x151   :  { %2535 = vtanh.f32 %v795_v60  ;;  %v799_v43 = vadd.f32 %v3579_v35, %v542_v61  ;;  %v544_v2 = vadd.f32 %v543_v4, %v3441_v50  ;;  %v1072_v5 = vsel %vm1015_vm1, %v980_v62, 0.0  ;;  %v3639_v15 = vpop.f32.mrf.mxu1 }
 0x152   :  { %v2524_v7 = vpop.eup %2523  ;;  %v547_v8 = vpop.f32.mrf.mxu0  ;;  %v1073_v9 = vadd.f32 %v1072_v5, %v979_v18  ;;  %v981_v35 = vmul.f32 %v2522_v24, %v3469_v26 }
 0x153   :  { %v801_v11 = vadd.f32 %v3584_v0, %v544_v2  ;;  %v548_v12 = vadd.f32 %v547_v8, %v3439_v48  ;;  %v982_v13 = vmul.f32 %v2524_v7, %v3465_v23  ;;  %2537 = vtanh.f32 %v799_v43  ;;  %v3645_v0 = vpop.f32.mrf.mxu1 }
 0x154   :  { %v549_v20 = vpop.f32.mrf.mxu0  ;;  %1074 = vadd.xlane.f32.xlu0 %v1073_v9  ;;  %v2526_v36 = vpop.eup %2525 }
 0x155   :  { %2539 = vtanh.f32 %v801_v11  ;;  %v805_v59 = vadd.f32 %v3590_v51, %v548_v12  ;;  %v550_v10 = vadd.f32 %v549_v20, %v3441_v50  ;;  %v1076_v21 = vsel %vm1015_vm1, %v982_v13, 0.0  ;;  %v3650_v32 = vpop.f32.mrf.mxu1 }
 0x156   :  { %v2528_v22 = vpop.eup %2527  ;;  %v553_v25 = vpop.f32.mrf.mxu0  ;;  %v1077_v27 = vadd.f32 %v1076_v21, %v981_v35  ;;  %v983_v51 = vmul.f32 %v2526_v36, %v3469_v26 }
 0x157   :  { %v807_v28 = vadd.f32 %v3595_v16, %v550_v10  ;;  %v554_v29 = vadd.f32 %v553_v25, %v3439_v48  ;;  %v984_v31 = vmul.f32 %v2528_v22, %v3465_v23  ;;  %2541 = vtanh.f32 %v805_v59  ;;  %v3656_v16 = vpop.f32.mrf.mxu1 }
 0x158   :  { %v555_v37 = vpop.f32.mrf.mxu0  ;;  %1078 = vadd.xlane.f32.xlu1 %v1077_v27  ;;  %v2530_v52 = vpop.eup %2529 }
 0x159   :  { %2543 = vtanh.f32 %v807_v28  ;;  %v811_v6 = vadd.f32 %v3601_v1, %v554_v29  ;;  %v556_v19 = vadd.f32 %v555_v37, %v3441_v50  ;;  %v1080_v38 = vsel %vm1015_vm1, %v984_v31, 0.0  ;;  %v3661_v46 = vpop.f32.mrf.mxu1 }
 0x15a   :  { %v2532_v39 = vpop.eup %2531  ;;  %v559_v40 = vpop.f32.mrf.mxu0  ;;  %v1081_v41 = vadd.f32 %v1080_v38, %v983_v51  ;;  %v985_v1 = vmul.f32 %v2530_v52, %v3469_v26 }
 0x15b   :  { %v813_v42 = vadd.f32 %v3606_v33, %v556_v19  ;;  %v560_v44 = vadd.f32 %v559_v40, %v3439_v48  ;;  %v986_v45 = vmul.f32 %v2532_v39, %v3465_v23  ;;  %2545 = vtanh.f32 %v811_v6  ;;  %v3667_v57 = vpop.f32.mrf.mxu1 }
 0x15c   :  { %v561_v53 = vpop.f32.mrf.mxu0  ;;  %1082 = vadd.xlane.f32.xlu0 %v1081_v41  ;;  %v2534_v3 = vpop.eup %2533 }
 0x15d   :  { %2547 = vtanh.f32 %v813_v42  ;;  %v817_v14 = vadd.f32 %v3612_v17, %v560_v44  ;;  %v562_v30 = vadd.f32 %v561_v53, %v3441_v50  ;;  %v1084_v54 = vsel %vm1015_vm1, %v986_v45, 0.0  ;;  %v3676_v7 = vpop.f32.mrf.mxu1 }
 0x15e   :  { %v2536_v33 = vpop.eup %2535  ;;  %v565_v55 = vpop.f32.mrf.mxu0  ;;  %v1085_v56 = vadd.f32 %v1084_v54, %v985_v1  ;;  %v987_v17 = vmul.f32 %v2534_v3, %v3469_v26 }
 0x15f   :  { %v819_v58 = vadd.f32 %v3617_v47, %v562_v30  ;;  %v566_v60 = vadd.f32 %v565_v55, %v3439_v48  ;;  %v988_v61 = vmul.f32 %v2536_v33, %v3465_v23  ;;  %2549 = vtanh.f32 %v817_v14  ;;  %v852_v21 = vpop.f32.mrf.mxu1 }
 0x160   :  { %v567_v62 = vpop.f32.mrf.mxu0  ;;  %1086 = vadd.xlane.f32.xlu1 %v1085_v56  ;;  %v2538_v4 = vpop.eup %2537 }
 0x161   :  { %2551 = vtanh.f32 %v819_v58  ;;  %v823_v18 = vadd.f32 %v3623_v34, %v566_v60  ;;  %v568_v24 = vadd.f32 %v567_v62, %v3441_v50  ;;  %v1088_v43 = vsel %vm1015_vm1, %v988_v61, 0.0  ;;  %v854_v19 = vpop.f32.mrf.mxu1 }
 0x162   :  { %v2540_v2 = vpop.eup %2539  ;;  %v571_v5 = vpop.f32.mrf.mxu0  ;;  %v1089_v47 = vadd.f32 %v1088_v43, %v987_v17  ;;  %v989_v34 = vmul.f32 %v2538_v4, %v3469_v26 }
 0x163   :  { %v825_v8 = vadd.f32 %v3628_v63, %v568_v24  ;;  %v572_v9 = vadd.f32 %v571_v5, %v3439_v48  ;;  %v990_v11 = vmul.f32 %v2540_v2, %v3465_v23  ;;  %2553 = vtanh.f32 %v823_v18  ;;  %v858_v14 = vpop.f32.mrf.mxu1 }
 0x164   :  { %v573_v12 = vpop.f32.mrf.mxu0  ;;  %1090 = vadd.xlane.f32.xlu0 %v1089_v47  ;;  %v2542_v13 = vpop.eup %2541 }
 0x165   :  { %2555 = vtanh.f32 %v825_v8  ;;  %v829_v20 = vadd.f32 %v3634_v49, %v572_v9  ;;  %v574_v35 = vadd.f32 %v573_v12, %v3441_v50  ;;  %v1092_v36 = vsel %vm1015_vm1, %v990_v11, 0.0  ;;  %v860_v4 = vpop.f32.mrf.mxu1 }
 0x166   :  { %v2544_v59 = vpop.eup %2543  ;;  %v577_v10 = vpop.f32.mrf.mxu0  ;;  %v1093_v63 = vadd.f32 %v1092_v36, %v989_v34  ;;  %v991_v29 = vmul.f32 %v2542_v13, %v3469_v26 }
 0x167   :  { %v831_v22 = vadd.f32 %v3639_v15, %v574_v35  ;;  %v578_v25 = vadd.f32 %v577_v10, %v3439_v48  ;;  %v992_v27 = vmul.f32 %v2544_v59, %v3465_v23  ;;  %2557 = vtanh.f32 %v829_v20 }
 0x168   :  { %v579_v28 = vpop.f32.mrf.mxu0  ;;  %1094 = vadd.xlane.f32.xlu1 %v1093_v63  ;;  %v2546_v49 = vpop.eup %2545 }
 0x169   :  { %2559 = vtanh.f32 %v831_v22  ;;  %v835_v31 = vadd.f32 %v3645_v0, %v578_v25  ;;  %v580_v37 = vadd.f32 %v579_v28, %v3441_v50  ;;  %v1096_v51 = vsel %vm1015_vm1, %v992_v27, 0.0 }
 0x16a   :  { %v2548_v52 = vpop.eup %2547  ;;  %v583_v6 = vpop.f32.mrf.mxu0  ;;  %v1097_v15 = vadd.f32 %v1096_v51, %v991_v29  ;;  %v993_v42 = vmul.f32 %v2546_v49, %v3469_v26 }
 0x16b   :  { %v837_v38 = vadd.f32 %v3650_v32, %v580_v37  ;;  %v584_v39 = vadd.f32 %v583_v6, %v3439_v48  ;;  %v994_v40 = vmul.f32 %v2548_v52, %v3465_v23  ;;  %2561 = vtanh.f32 %v835_v31 }
 0x16c   :  { %v585_v41 = vpop.f32.mrf.mxu0  ;;  %1098 = vadd.xlane.f32.xlu0 %v1097_v15  ;;  %v2550_v0 = vpop.eup %2549 }
 0x16d   :  { %2563 = vtanh.f32 %v837_v38  ;;  %v841_v44 = vadd.f32 %v3656_v16, %v584_v39  ;;  %v586_v45 = vadd.f32 %v585_v41, %v3441_v50  ;;  %v1100_v53 = vsel %vm1015_vm1, %v994_v40, 0.0 }
 0x16e   :  { %v2552_v1 = vpop.eup %2551  ;;  %v589_v3 = vpop.f32.mrf.mxu0  ;;  %v1101_v32 = vadd.f32 %v1100_v53, %v993_v42  ;;  %v995_v56 = vmul.f32 %v2550_v0, %v3469_v26 }
 0x16f   :  { %v843_v30 = vadd.f32 %v3661_v46, %v586_v45  ;;  %v590_v54 = vadd.f32 %v589_v3, %v3439_v48  ;;  %v996_v33 = vmul.f32 %v2552_v1, %v3465_v23  ;;  %2565 = vtanh.f32 %v841_v44 }
 0x170   :  { %v591_v55 = vpop.f32.mrf.mxu0  ;;  %1102 = vadd.xlane.f32.xlu1 %v1101_v32  ;;  %v2554_v16 = vpop.eup %2553 }
 0x171   :  { %2567 = vtanh.f32 %v843_v30  ;;  %v847_v58 = vadd.f32 %v3667_v57, %v590_v54  ;;  %v592_v60 = vadd.f32 %v591_v55, %v3441_v50  ;;  %v1104_v61 = vsel %vm1015_vm1, %v996_v33, 0.0 }
 0x172   :  { %v2556_v62 = vpop.eup %2555  ;;  %v595_v17 = vpop.f32.mrf.mxu0  ;;  %v1105_v46 = vadd.f32 %v1104_v61, %v995_v56  ;;  %v997_v5 = vmul.f32 %v2554_v16, %v3469_v26 }
 0x173   :  { %v849_v18 = vadd.f32 %v3676_v7, %v592_v60  ;;  %v596_v24 = vadd.f32 %v595_v17, %v3439_v48  ;;  %v998_v43 = vmul.f32 %v2556_v62, %v3465_v23  ;;  %2569 = vtanh.f32 %v847_v58  ;;  %v864_v7 = vpop.f32.mrf.mxu1 }
 0x174   :  { %v597_v2 = vpop.f32.mrf.mxu0  ;;  %1106 = vadd.xlane.f32.xlu0 %v1105_v46  ;;  %v2558_v57 = vpop.eup %2557 }
 0x175   :  { %2571 = vtanh.f32 %v849_v18  ;;  %v853_v47 = vadd.f32 %v852_v21, %v596_v24  ;;  %v598_v8 = vadd.f32 %v597_v2, %v3441_v50  ;;  %v1108_v9 = vsel %vm1015_vm1, %v998_v43, 0.0  ;;  %v866_v28 = vpop.f32.mrf.mxu1 }
 0x176   :  { %v2560_v11 = vpop.eup %2559  ;;  %v601_v12 = vpop.f32.mrf.mxu0  ;;  %v1109_v34 = vadd.f32 %v1108_v9, %v997_v5  ;;  %v999_v59 = vmul.f32 %v2558_v57, %v3469_v26 }
 0x177   :  { %v855_v13 = vadd.f32 %v854_v19, %v598_v8  ;;  %v602_v20 = vadd.f32 %v601_v12, %v3439_v48  ;;  %v1000_v35 = vmul.f32 %v2560_v11, %v3465_v23  ;;  %2573 = vtanh.f32 %v853_v47  ;;  %v870_v41 = vpop.f32.mrf.mxu1 }
 0x178   :  { %v603_v36 = vpop.f32.mrf.mxu0  ;;  %1110 = vadd.xlane.f32.xlu1 %v1109_v34  ;;  %v2562_v10 = vpop.eup %2561 }
 0x179   :  { %2575 = vtanh.f32 %v855_v13  ;;  %v859_v63 = vadd.f32 %v858_v14, %v602_v20  ;;  %v604_v21 = vadd.f32 %v603_v36, %v3441_v50  ;;  %v1112_v22 = vsel %vm1015_vm1, %v1000_v35, 0.0  ;;  %v872_v33 = vpop.f32.mrf.mxu1 }
 0x17a   :  { %v2564_v25 = vpop.eup %2563  ;;  %v607_v27 = vpop.f32.mrf.mxu0  ;;  %v1113_v29 = vadd.f32 %v1112_v22, %v999_v59  ;;  %v1001_v52 = vmul.f32 %v2562_v10, %v3469_v26 }
 0x17b   :  { %v861_v49 = vadd.f32 %v860_v4, %v604_v21  ;;  %v608_v31 = vadd.f32 %v607_v27, %v3439_v48  ;;  %v1002_v37 = vmul.f32 %v2564_v25, %v3465_v23  ;;  %2577 = vtanh.f32 %v859_v63 }
 0x17c   :  { %v609_v51 = vpop.f32.mrf.mxu0  ;;  %1114 = vadd.xlane.f32.xlu0 %v1113_v29  ;;  %v2566_v6 = vpop.eup %2565  ;;  %v3745_v63 = vstv %s4657_s5 }
 0x17d   :  { %2579 = vtanh.f32 %v861_v49  ;;  %v865_v15 = vadd.f32 %v864_v7, %v608_v31  ;;  %v610_v19 = vadd.f32 %v609_v51, %v3441_v50  ;;  %v1116_v38 = vsel %vm1015_vm1, %v1002_v37, 0.0 }
 0x17e   :  { %v2568_v39 = vpop.eup %2567  ;;  %v613_v40 = vpop.f32.mrf.mxu0  ;;  %v1117_v42 = vadd.f32 %v1116_v38, %v1001_v52  ;;  %v1003_v1 = vmul.f32 %v2566_v6, %v3469_v26 }
 0x17f   :  { %v867_v0 = vadd.f32 %v866_v28, %v610_v19  ;;  %v614_v44 = vadd.f32 %v613_v40, %v3439_v48  ;;  %v1004_v45 = vmul.f32 %v2568_v39, %v3465_v23  ;;  %2581 = vtanh.f32 %v865_v15 }
 0x180   :  { %v615_v53 = vpop.f32.mrf.mxu0  ;;  %1118 = vadd.xlane.f32.xlu1 %v1117_v42  ;;  %v2570_v3 = vpop.eup %2569 }
 0x181   :  { %2583 = vtanh.f32 %v867_v0  ;;  %v871_v32 = vadd.f32 %v870_v41, %v614_v44  ;;  %v616_v14 = vadd.f32 %v615_v53, %v3441_v50  ;;  %v1120_v30 = vsel %vm1015_vm1, %v1004_v45, 0.0 }
 0x182   :  { %v2572_v54 = vpop.eup %2571  ;;  %v1121_v55 = vadd.f32 %v1120_v30, %v1003_v1  ;;  %v1005_v16 = vmul.f32 %v2570_v3, %v3469_v26 }
 0x183   :  { %v873_v56 = vadd.f32 %v872_v33, %v616_v14  ;;  %v1006_v48 = vmul.f32 %v2572_v54, %v3465_v23  ;;  %2585 = vtanh.f32 %v871_v32 }
 0x184   :  { %1122 = vadd.xlane.f32.xlu0 %v1121_v55  ;;  %v2574_v58 = vpop.eup %2573 }
 0x185   :  { %2587 = vtanh.f32 %v873_v56  ;;  %v1124_v60 = vsel %vm1015_vm1, %v1006_v48, 0.0  ;;  %v1007_v17 = vmul.f32 %v2574_v58, %v3469_v26 }
 0x186   :  { %v2576_v61 = vpop.eup %2575  ;;  %v1125_v62 = vadd.f32 %v1124_v60, %v1005_v16 }
 0x187   :  { %v1008_v50 = vmul.f32 %v2576_v61, %v3465_v23 }
 0x188   :  { %1126 = vadd.xlane.f32.xlu1 %v1125_v62  ;;  %v2578_v46 = vpop.eup %2577 }
 0x189   :  { %v1128_v4 = vsel %vm1015_vm1, %v1008_v50, 0.0  ;;  %v1009_v2 = vmul.f32 %v2578_v46, %v3469_v26 }
 0x18a   :  { %v2580_v18 = vpop.eup %2579  ;;  %v1129_v24 = vadd.f32 %v1128_v4, %v1007_v17 }
 0x18b   :  { %v1010_v43 = vmul.f32 %v2580_v18, %v3465_v23 }
 0x18c   :  { %1130 = vadd.xlane.f32.xlu0 %v1129_v24  ;;  %v2582_v5 = vpop.eup %2581 }
 0x18d   :  { %v1132_v57 = vsel %vm1015_vm1, %v1010_v43, 0.0  ;;  %v1011_v11 = vmul.f32 %v2582_v5, %v3469_v26 }
 0x18e   :  { %v2584_v47 = vpop.eup %2583  ;;  %v1133_v8 = vadd.f32 %v1132_v57, %v1009_v2 }
 0x18f   :  { %v1012_v9 = vmul.f32 %v2584_v47, %v3465_v23 }
 0x190   :  { %1134 = vadd.xlane.f32.xlu1 %v1133_v8  ;;  %v2586_v12 = vpop.eup %2585 }
 0x191   :  { %v1136_v34 = vsel %vm1015_vm1, %v1012_v9, 0.0  ;;  %v1013_v35 = vmul.f32 %v2586_v12, %v3469_v26 }
 0x192   :  { %v2588_v7 = vpop.eup %2587  ;;  %v1137_v13 = vadd.f32 %v1136_v34, %v1011_v11 }
 0x193   :  { %v1014_v20 = vmul.f32 %v2588_v7, %v3465_v23 }
 0x194   :  { %1138 = vadd.xlane.f32.xlu0 %v1137_v13 }
 0x195   :  { %v1140_v36 = vsel %vm1015_vm1, %v1014_v20, 0.0 }
 0x196   :  { %v1141_v59 = vadd.f32 %v1140_v36, %v1013_v35 }
 0x198   :  { %1142 = vadd.xlane.f32.xlu1 %v1141_v59 }
 0x1a5   :  { %v1019_v10 = vpop.xlane.xlu0 %1018 }
 0x1a6   :  { %v1146_v22 = vadd.f32 %v3745_v63, %v1019_v10 }
 0x1a9   :  { %v1023_v21 = vpop.xlane.xlu0 %1022 }
 0x1aa   :  { %v1147_v25 = vadd.f32 %v3745_v63, %v1023_v21 }
 0x1ac   :  { %v1178_v27 = vmax.f32 %v1146_v22, %v1147_v25 }
 0x1ad   :  { %v1027_v23 = vpop.xlane.xlu1 %1026 }
 0x1ae   :  { %v1179_v28 = vrot.slane %v1178_v27, 4  ;;  %v1148_v31 = vadd.f32 %v3745_v63, %v1027_v23 }
 0x1b0   :  { %v1180_v29 = vmax.f32 %v1178_v27, %v1179_v28 }
 0x1b1   :  { %v1031_v26 = vpop.xlane.xlu1 %1030 }
 0x1b2   :  { %v1181_v49 = vrot.slane %v1180_v29, 2  ;;  %v1149_v37 = vadd.f32 %v3745_v63, %v1031_v26 }
 0x1b4   :  { %v1182_v51 = vmax.f32 %v1180_v29, %v1181_v49  ;;  %v1185_v52 = vmax.f32 %v1148_v31, %v1149_v37 }
 0x1b5   :  { %v1035_v19 = vpop.xlane.xlu0 %1034 }
 0x1b6   :  { %v1183_v6 = vrot.slane %v1182_v51, 1  ;;  %v1186_v15 = vrot.slane %v1185_v52, 4  ;;  %v1150_v40 = vadd.f32 %v3745_v63, %v1035_v19 }
 0x1b8   :  { %v1184_v38 = vmax.f32 %v1182_v51, %v1183_v6  ;;  %v1187_v39 = vmax.f32 %v1185_v52, %v1186_v15 }
 0x1b9   :  { %v1039_v41 = vpop.xlane.xlu1 %1038 }
 0x1ba   :  { %v1290_v42 = vsub.f32 %v1146_v22, %v1184_v38  ;;  %v1291_v0 = vsub.f32 %v1147_v25, %v1184_v38  ;;  %v1188_v44 = vrot.slane %v1187_v39, 2  ;;  %v1151_v45 = vadd.f32 %v3745_v63, %v1039_v41 }
 0x1bc   :  { %v1322_v53 = vmul.f32 1.442695, %v1290_v42  ;;  %v1324_v1 = vmul.f32 1.442695, %v1291_v0  ;;  %v1189_v3 = vmax.f32 %v1187_v39, %v1188_v44  ;;  %v1192_v32 = vmax.f32 %v1150_v40, %v1151_v45 }
 0x1bd   :  { %v1043_v54 = vpop.xlane.xlu0 %1042 }
 0x1be   :  { %2589 = vpow2.f32 %v1322_v53  ;;  %v1190_v14 = vrot.slane %v1189_v3, 1  ;;  %v1193_v30 = vrot.slane %v1192_v32, 4  ;;  %v1152_v56 = vadd.f32 %v3745_v63, %v1043_v54 }
 0x1bf   :  { %2591 = vpow2.f32 %v1324_v1 }
 0x1c0   :  { %v1191_v33 = vmax.f32 %v1189_v3, %v1190_v14  ;;  %v1194_v55 = vmax.f32 %v1192_v32, %v1193_v30 }
 0x1c1   :  { %v1047_v48 = vpop.xlane.xlu1 %1046 }
 0x1c2   :  { %v1292_v16 = vsub.f32 %v1148_v31, %v1191_v33  ;;  %v1293_v58 = vsub.f32 %v1149_v37, %v1191_v33  ;;  %v1195_v60 = vrot.slane %v1194_v55, 2  ;;  %v1153_v61 = vadd.f32 %v3745_v63, %v1047_v48 }
 0x1c4   :  { %v1326_v62 = vmul.f32 1.442695, %v1292_v16  ;;  %v1328_v50 = vmul.f32 1.442695, %v1293_v58  ;;  %v1196_v17 = vmax.f32 %v1194_v55, %v1195_v60  ;;  %v1199_v46 = vmax.f32 %v1152_v56, %v1153_v61 }
 0x1c5   :  { %v1051_v24 = vpop.xlane.xlu0 %1050 }
 0x1c6   :  { %2593 = vpow2.f32 %v1326_v62  ;;  %v1197_v4 = vrot.slane %v1196_v17, 1  ;;  %v1200_v18 = vrot.slane %v1199_v46, 4  ;;  %v3756_v5 = vadd.f32 %v3745_v63, %v1051_v24 }
 0x1c7   :  { %2595 = vpow2.f32 %v1328_v50 }
 0x1c8   :  { %v1198_v43 = vmax.f32 %v1196_v17, %v1197_v4  ;;  %v1201_v2 = vmax.f32 %v1199_v46, %v1200_v18 }
 0x1c9   :  { %v1055_v57 = vpop.xlane.xlu1 %1054 }
 0x1ca   :  { %v1294_v47 = vsub.f32 %v1150_v40, %v1198_v43  ;;  %v1295_v8 = vsub.f32 %v1151_v45, %v1198_v43  ;;  %v1202_v9 = vrot.slane %v1201_v2, 2  ;;  %v3759_v11 = vadd.f32 %v3745_v63, %v1055_v57 }
 0x1cb   :  { %v3761_v12 = vpop.eup %2589 }
 0x1cc   :  { %v3763_v34 = vpop.eup %2591  ;;  %v1330_v7 = vmul.f32 1.442695, %v1294_v47  ;;  %v1332_v13 = vmul.f32 1.442695, %v1295_v8  ;;  %v1203_v20 = vmax.f32 %v1201_v2, %v1202_v9  ;;  %v1206_v35 = vmax.f32 %v3756_v5, %v3759_v11 }
 0x1cd   :  { %v1386_v36 = vadd.f32 %v3763_v34, %v3761_v12  ;;  %v1059_v21 = vpop.xlane.xlu0 %1058 }
 0x1ce   :  { %2597 = vpow2.f32 %v1330_v7  ;;  %v1204_v59 = vrot.slane %v1203_v20, 1  ;;  %v1207_v10 = vrot.slane %v1206_v35, 4  ;;  %v3770_v28 = vadd.f32 %v3745_v63, %v1059_v21 }
 0x1cf   :  { %v1387_v22 = vrot.slane %v1386_v36, 4  ;;  %2599 = vpow2.f32 %v1332_v13 }
 0x1d0   :  { %v1205_v25 = vmax.f32 %v1203_v20, %v1204_v59  ;;  %v1208_v27 = vmax.f32 %v1206_v35, %v1207_v10 }
 0x1d1   :  { %v1388_v23 = vadd.f32 %v1387_v22, %v1386_v36  ;;  %v1063_v29 = vpop.xlane.xlu1 %1062 }
 0x1d2   :  { %v1296_v26 = vsub.f32 %v1152_v56, %v1205_v25  ;;  %v1297_v49 = vsub.f32 %v1153_v61, %v1205_v25  ;;  %v1209_v31 = vrot.slane %v1208_v27, 2  ;;  %v3773_v37 = vadd.f32 %v3745_v63, %v1063_v29 }
 0x1d3   :  { %v3775_v51 = vpop.eup %2593  ;;  %v1389_v52 = vrot.slane %v1388_v23, 2 }
 0x1d4   :  { %v3777_v6 = vpop.eup %2595  ;;  %v1210_v15 = vmax.f32 %v1208_v27, %v1209_v31  ;;  %v1213_v19 = vmax.f32 %v3770_v28, %v3773_v37  ;;  %v1334_v40 = vmul.f32 1.442695, %v1296_v26  ;;  %v1336_v41 = vmul.f32 1.442695, %v1297_v49  ;;  %v1546_v49 = vld [vmem:[%s4658_s1] sm:$0xff] }
 0x1d5   :  { %v1390_v38 = vadd.f32 %v1389_v52, %v1388_v23  ;;  %v1393_v39 = vadd.f32 %v3777_v6, %v3775_v51  ;;  %v1067_v44 = vpop.xlane.xlu0 %1066  ;;  %v1550_v31 = vld [vmem:[%s4658_s1 + $0x20] sm:$0xff] }
 0x1d6   :  { %v1211_v42 = vrot.slane %v1210_v15, 1  ;;  %v1214_v0 = vrot.slane %v1213_v19, 4  ;;  %2601 = vpow2.f32 %v1334_v40  ;;  %v3784_v14 = vadd.f32 %v3745_v63, %v1067_v44 }
 0x1d7   :  { %v1391_v45 = vrot.slane %v1390_v38, 1  ;;  %v1394_v53 = vrot.slane %v1393_v39, 4  ;;  %2603 = vpow2.f32 %v1336_v41 }
 0x1d8   :  { %v1215_v1 = vmax.f32 %v1213_v19, %v1214_v0  ;;  %v1212_v54 = vmax.f32 %v1210_v15, %v1211_v42  ;;  %v1553_v15 = vld [vmem:[%s4658_s1 + $0x38] sm:$0xff]  ;;  %v1548_v42 = vld [vmem:[%s4658_s1 + $0x10] sm:$0xff] }
 0x1d9   :  { %v1392_v3 = vadd.f32 %v1391_v45, %v1390_v38  ;;  %v1395_v32 = vadd.f32 %v1394_v53, %v1393_v39  ;;  %v1071_v30 = vpop.xlane.xlu1 %1070 }
 0x1da   :  { %v1216_v33 = vrot.slane %v1215_v1, 2  ;;  %v3787_v55 = vadd.f32 %v3745_v63, %v1071_v30  ;;  %v1298_v50 = vsub.f32 %v3756_v5, %v1212_v54  ;;  %v1299_v18 = vsub.f32 %v3759_v11, %v1212_v54  ;;  %v1554_v30 = vld [vmem:[%s4658_s1 + $0x40] sm:$0xff]  ;;  %v1555_v54 = vld [vmem:[%s4658_s1 + $0x48] sm:$0xff] }
 0x1db   :  { %v3789_v56 = vpop.eup %2597  ;;  %2605 = vrcp.f32 %v1392_v3  ;;  %v1396_v48 = vrot.slane %v1395_v32, 2 }
 0x1dc   :  { %v3791_v16 = vpop.eup %2599  ;;  %v1220_v58 = vmax.f32 %v3784_v14, %v3787_v55  ;;  %v1217_v62 = vmax.f32 %v1215_v1, %v1216_v33  ;;  %v1338_v57 = vmul.f32 1.442695, %v1298_v50  ;;  %v1340_v9 = vmul.f32 1.442695, %v1299_v18  ;;  %v1552_v1 = vld [vmem:[%s4658_s1 + $0x30] sm:$0xff]  ;;  %v1558_v50 = vld [vmem:[%s4658_s1 + $0x60] sm:$0xff] }
 0x1dd   :  { %v1397_v60 = vadd.f32 %v1396_v48, %v1395_v32  ;;  %v1400_v61 = vadd.f32 %v3791_v16, %v3789_v56  ;;  %v1075_v22 = vpop.xlane.xlu0 %1074  ;;  %v1556_v33 = vld [vmem:[%s4658_s1 + $0x50] sm:$0xff]  ;;  %v1557_v48 = vld [vmem:[%s4658_s1 + $0x58] sm:$0xff] }
 0x1de   :  { %v1221_v17 = vrot.slane %v1220_v58, 4  ;;  %v1218_v2 = vrot.slane %v1217_v62, 1  ;;  %v3821_v52 = vadd.f32 %v3745_v63, %v1075_v22 }
 0x1df   :  { %v1398_v46 = vrot.slane %v1397_v60, 1  ;;  %v1401_v4 = vrot.slane %v1400_v61, 4 }
 0x1e0   :  { %v1222_v47 = vmax.f32 %v1220_v58, %v1221_v17  ;;  %v1219_v13 = vmax.f32 %v1217_v62, %v1218_v2  ;;  %v1559_v17 = vld [vmem:[%s4658_s1 + $0x68] sm:$0xff] }
 0x1e1   :  { %v1399_v24 = vadd.f32 %v1398_v46, %v1397_v60  ;;  %v1402_v43 = vadd.f32 %v1401_v4, %v1400_v61  ;;  %v1079_v59 = vpop.xlane.xlu1 %1078  ;;  %v1560_v46 = vld [vmem:[%s4658_s1 + $0x70] sm:$0xff] }
 0x1e2   :  { %v1223_v35 = vrot.slane %v1222_v47, 2  ;;  %v1300_v21 = vsub.f32 %v3770_v28, %v1219_v13  ;;  %v3807_v23 = vadd.f32 %v3745_v63, %v1079_v59  ;;  %v1549_v28 = vld [vmem:[%s4658_s1 + $0x18] sm:$0xff]  ;;  %v1301_v19 = vsub.f32 %v3773_v37, %v1219_v13 }
 0x1e3   :  { %2607 = vrcp.f32 %v1399_v24  ;;  %v1403_v8 = vrot.slane %v1402_v43, 2  ;;  %v3799_v20 = vpop.eup %2601 }
 0x1e4   :  { %2609 = vpow2.f32 %v1338_v57  ;;  %v3801_v5 = vpop.eup %2603  ;;  %v1224_v27 = vmax.f32 %v1222_v47, %v1223_v35  ;;  %v1342_v38 = vmul.f32 1.442695, %v1300_v21  ;;  %v1227_v41 = vmax.f32 %v3821_v52, %v3807_v23  ;;  %v1561_v57 = vld [vmem:[%s4658_s1 + $0x78] sm:$0xff] }
 0x1e5   :  { %v1404_v7 = vadd.f32 %v1403_v8, %v1402_v43  ;;  %2611 = vpow2.f32 %v1340_v9  ;;  %v1407_v25 = vadd.f32 %v3801_v5, %v3799_v20  ;;  %v1344_v61 = vmul.f32 1.442695, %v1301_v19  ;;  %v1083_v21 = vpop.xlane.xlu0 %1082 }
 0x1e6   :  { %v1225_v40 = vrot.slane %v1224_v27, 1 }
 0x1e7   :  { %v1405_v36 = vrot.slane %v1404_v7, 1  ;;  %v1408_v39 = vrot.slane %v1407_v25, 4 }
 0x1e8   :  { %v2606_v11 = vpop.eup %2605  ;;  %v3864_v18 = vmax.f32 %v1224_v27, %v1225_v40 }
 0x1e9   :  { %v1406_v10 = vadd.f32 %v1405_v36, %v1404_v7  ;;  %v1499_v29 = vmul.f32 %v2606_v11, %v3761_v12  ;;  %v1500_v26 = vmul.f32 %v2606_v11, %v3763_v34  ;;  %v1547_v12 = vld [vmem:[%s4658_s1 + $0x8] sm:$0xff]  ;;  %v1409_v4 = vadd.f32 %v1408_v39, %v1407_v25  ;;  %v1087_v19 = vpop.xlane.xlu1 %1086 }
 0x1ea   :  { %v1551_v34 = vld [vmem:[%s4658_s1 + $0x28] sm:$0xff] }
 0x1eb   :  { %2613 = vrcp.f32 %v1406_v10  ;;  %v1674_v0 = vmul.f32 %v1546_v49, %v1499_v29  ;;  %v1677_v44 = vmul.f32 %v1549_v28, %v1499_v29  ;;  %v1678_v45 = vmul.f32 %v1550_v31, %v1500_v26 }
 0x1ec   :  { %v1675_v3 = vmul.f32 %v1547_v12, %v1499_v29  ;;  %v1679_v37 = vmul.f32 %v1551_v34, %v1500_v26  ;;  %v1681_v32 = vmul.f32 %v1553_v15, %v1500_v26  ;;  %2615 = vpow2.f32 %v1342_v38 }
 0x1ed   :  { %v1676_v62 = vmul.f32 %v1548_v42, %v1499_v29  ;;  %v1680_v24 = vmul.f32 %v1552_v1, %v1500_v26  ;;  %v1802_v43 = vadd.f32 %v1678_v45, %v1674_v0  ;;  %v1823_v2 = vsel %vm264_vm0, %v1677_v44, 0.0 }
 0x1ee   :  { %v1809_v9 = vadd.f32 %v1679_v37, %v1675_v3  ;;  %v1824_v7 = vsel %vm264_vm0, %v1681_v32, 0.0  ;;  %v1410_v25 = vrot.slane %v1409_v4, 2  ;;  %2617 = vpow2.f32 %v1344_v61  ;;  %v1563_v3 = vld [vmem:[%s4658_s1 + $0x88] sm:$0xff] }
 0x1ef   :  { %v1816_v29 = vadd.f32 %v1680_v24, %v1676_v62  ;;  %v1825_v26 = vadd.f32 %v1824_v7, %v1823_v2  ;;  %v1803_v31 = vrot.slane %v1802_v43, 4  ;;  %v1302_v12 = vsub.f32 %v3784_v14, %v3864_v18  ;;  %v1569_v7 = vld [vmem:[%s4658_s1 + $0xb8] sm:$0xff] }
 0x1f0   :  { %v2608_v53 = vpop.eup %2607  ;;  %v1303_v34 = vsub.f32 %v3787_v55, %v3864_v18  ;;  %v3884_v15 = vadd.f32 %v3745_v63, %v1083_v21  ;;  %v1810_v38 = vrot.slane %v1809_v9, 4  ;;  %v1411_v45 = vadd.f32 %v1410_v25, %v1409_v4  ;;  %v1562_v55 = vld [vmem:[%s4658_s1 + $0x80] sm:$0xff] }
 0x1f1   :  { %v1502_v58 = vmul.f32 %v2608_v53, %v3775_v51  ;;  %v1503_v60 = vmul.f32 %v2608_v53, %v3777_v6  ;;  %v1228_v51 = vrot.slane %v1227_v41, 4  ;;  %v3866_v6 = vpop.eup %2609  ;;  %v1817_v14 = vrot.slane %v1816_v29, 4 }
 0x1f2   :  { %v3872_v8 = vpop.eup %2611  ;;  %v1826_v1 = vrot.slane %v1825_v26, 4  ;;  %v3896_v32 = vadd.f32 %v3745_v63, %v1087_v19  ;;  %v1811_v61 = vadd.f32 %v1810_v38, %v1809_v9  ;;  %v1412_v24 = vrot.slane %v1411_v45, 1 }
 0x1f3   :  { %v1682_v47 = vmul.f32 %v1554_v30, %v1502_v58  ;;  %v1683_v13 = vmul.f32 %v1555_v54, %v1502_v58  ;;  %v1684_v35 = vmul.f32 %v1556_v33, %v1502_v58  ;;  %v1685_v36 = vmul.f32 %v1557_v48, %v1502_v58  ;;  %v1564_v54 = vld [vmem:[%s4658_s1 + $0x90] sm:$0xff] }
 0x1f4   :  { %v1686_v59 = vmul.f32 %v1558_v50, %v1503_v60  ;;  %v1687_v11 = vmul.f32 %v1559_v17, %v1503_v60  ;;  %v1688_v10 = vmul.f32 %v1560_v46, %v1503_v60  ;;  %v1689_v22 = vmul.f32 %v1561_v57, %v1503_v60  ;;  %v1566_v17 = vld [vmem:[%s4658_s1 + $0xa0] sm:$0xff]  ;;  %v1567_v46 = vld [vmem:[%s4658_s1 + $0xa8] sm:$0xff] }
 0x1f5   :  { %v3875_v27 = vmax.f32 %v1227_v41, %v1228_v51  ;;  %v1414_v28 = vadd.f32 %v3872_v8, %v3866_v6  ;;  %v1853_v41 = vsel %vm264_vm0, %v1685_v36, 0.0  ;;  %v3903_v58 = vmul.f32 1.442695, %v1302_v12 }
 0x1f6   :  { %v1832_v49 = vadd.f32 %v1686_v59, %v1682_v47  ;;  %v1839_v39 = vadd.f32 %v1687_v11, %v1683_v13  ;;  %v1846_v40 = vadd.f32 %v1688_v10, %v1684_v35  ;;  %v1854_v44 = vsel %vm264_vm0, %v1689_v22, 0.0  ;;  %v1565_v47 = vld [vmem:[%s4658_s1 + $0x98] sm:$0xff] }
 0x1f7   :  { %v1230_v53 = vrot.slane %v3875_v27, 2  ;;  %v1415_v37 = vrot.slane %v1414_v28, 4  ;;  %v1855_v30 = vadd.f32 %v1854_v44, %v1853_v41  ;;  %v1804_v60 = vadd.f32 %v1803_v31, %v1802_v43 }
 0x1f8   :  { %v2614_v42 = vpop.eup %2613  ;;  %v1833_v0 = vrot.slane %v1832_v49, 4  ;;  %v1840_v62 = vrot.slane %v1839_v39, 4  ;;  %v1847_v50 = vrot.slane %v1846_v40, 4  ;;  %v1818_v43 = vadd.f32 %v1817_v14, %v1816_v29 }
 0x1f9   :  { %v1505_v33 = vmul.f32 %v2614_v42, %v3789_v56  ;;  %v1506_v48 = vmul.f32 %v2614_v42, %v3791_v16  ;;  %v1568_v56 = vld [vmem:[%s4658_s1 + $0xb0] sm:$0xff]  ;;  %v3914_v4 = vpop.eup %2615  ;;  %v1827_v2 = vadd.f32 %v1826_v1, %v1825_v26  ;;  %v1856_v57 = vrot.slane %v1855_v30, 4 }
 0x1fa   :  { %v1834_v16 = vadd.f32 %v1833_v0, %v1832_v49  ;;  %v1416_v9 = vadd.f32 %v1415_v37, %v1414_v28  ;;  %v1805_v11 = vrot.slane %v1804_v60, 2  ;;  %v1812_v10 = vrot.slane %v1811_v61, 2 }
 0x1fb   :  { %v1690_v18 = vmul.f32 %v1562_v55, %v1505_v33  ;;  %v1691_v51 = vmul.f32 %v1563_v3, %v1505_v33  ;;  %v1692_v13 = vmul.f32 %v1564_v54, %v1505_v33  ;;  %v1694_v35 = vmul.f32 %v1566_v17, %v1506_v48  ;;  %v3922_v31 = vpop.eup %2617 }
 0x1fc   :  { %v1695_v36 = vmul.f32 %v1567_v46, %v1506_v48  ;;  %v1696_v59 = vmul.f32 %v1568_v56, %v1506_v48  ;;  %v1841_v21 = vadd.f32 %v1840_v62, %v1839_v39  ;;  %v1848_v22 = vadd.f32 %v1847_v50, %v1846_v40 }
 0x1fd   :  { %v1835_v25 = vrot.slane %v1834_v16, 2  ;;  %v1693_v29 = vmul.f32 %v1565_v47, %v1505_v33  ;;  %v1862_v26 = vadd.f32 %v1694_v35, %v1690_v18  ;;  %v1697_v12 = vmul.f32 %v1569_v7, %v1506_v48 }
 0x1fe   :  { %v1869_v49 = vadd.f32 %v1695_v36, %v1691_v51  ;;  %v1413_v28 = vadd.f32 %v1412_v24, %v1411_v45  ;;  %v1417_v19 = vrot.slane %v1416_v9, 2  ;;  %v3924_v38 = vmul.f32 1.442695, %v1303_v34 }
 0x1ff   :  { %v1819_v41 = vrot.slane %v1818_v43, 2  ;;  %v1857_v42 = vadd.f32 %v1856_v57, %v1855_v30  ;;  %v1863_v0 = vrot.slane %v1862_v26, 4  ;;  %v1876_v44 = vadd.f32 %v1696_v59, %v1692_v13 }
 0x200   :  { %v1806_v14 = vadd.f32 %v1805_v11, %v1804_v60  ;;  %v1813_v1 = vadd.f32 %v1812_v10, %v1811_v61  ;;  %v1828_v55 = vrot.slane %v1827_v2, 2  ;;  %v1842_v39 = vrot.slane %v1841_v21, 2 }
 0x201   :  { %v1836_v40 = vadd.f32 %v1835_v25, %v1834_v16  ;;  %v1849_v3 = vrot.slane %v1848_v22, 2  ;;  %v1870_v37 = vrot.slane %v1869_v49, 4  ;;  %v1883_v54 = vsel %vm264_vm0, %v1693_v29, 0.0 }
 0x202   :  { %v1884_v33 = vsel %vm264_vm0, %v1697_v12, 0.0  ;;  %2619 = vrcp.f32 %v1413_v28  ;;  %v1418_v45 = vadd.f32 %v1417_v19, %v1416_v9  ;;  %v1421_v34 = vadd.f32 %v3922_v31, %v3914_v4 }
 0x203   :  { %v1820_v48 = vadd.f32 %v1819_v41, %v1818_v43  ;;  %v1858_v30 = vrot.slane %v1857_v42, 2  ;;  %v1864_v62 = vadd.f32 %v1863_v0, %v1862_v26  ;;  %v1877_v60 = vrot.slane %v1876_v44, 4 }
 0x204   :  { %v1807_v61 = vrot.slane %v1806_v14, 1  ;;  %v1829_v50 = vadd.f32 %v1828_v55, %v1827_v2  ;;  %v1419_v17 = vrot.slane %v1418_v45, 1  ;;  %v1422_v46 = vrot.slane %v1421_v34, 4 }
 0x205   :  { %v1814_v56 = vrot.slane %v1813_v1, 1  ;;  %v1843_v16 = vadd.f32 %v1842_v39, %v1841_v21  ;;  %v1871_v18 = vadd.f32 %v1870_v37, %v1869_v49  ;;  %v1885_v51 = vadd.f32 %v1884_v33, %v1883_v54  ;;  %v1571_v54 = vld [vmem:[%s4658_s1 + $0xc8] sm:$0xff] }
 0x206   :  { %v1837_v24 = vrot.slane %v1836_v40, 1  ;;  %v1850_v57 = vadd.f32 %v1849_v3, %v1848_v22  ;;  %v1420_v47 = vadd.f32 %v1419_v17, %v1418_v45  ;;  %v1423_v9 = vadd.f32 %v1422_v46, %v1421_v34 }
 0x207   :  { %v1859_v7 = vadd.f32 %v1858_v30, %v1857_v42  ;;  %v1865_v13 = vrot.slane %v1864_v62, 2  ;;  %v1878_v35 = vadd.f32 %v1877_v60, %v1876_v44  ;;  %v1231_v43 = vmax.f32 %v3875_v27, %v1230_v53  ;;  %v1573_v30 = vld [vmem:[%s4658_s1 + $0xd8] sm:$0xff]  ;;  %v1576_v60 = vld [vmem:[%s4658_s1 + $0xf0] sm:$0xff] }
 0x208   :  { %v1821_v36 = vrot.slane %v1820_v48, 1  ;;  %v1830_v59 = vrot.slane %v1829_v50, 1  ;;  %2621 = vrcp.f32 %v1420_v47  ;;  %v1424_v2 = vrot.slane %v1423_v9, 2 }
 0x209   :  { %v1808_v11 = vadd.f32 %v1807_v61, %v1806_v14  ;;  %v1872_v10 = vrot.slane %v1871_v18, 2  ;;  %v1886_v21 = vrot.slane %v1885_v51, 4  ;;  %v1232_v25 = vrot.slane %v1231_v43, 1  ;;  %v1577_v61 = vld [vmem:[%s4658_s1 + $0xf8] sm:$0xff] }
 0x20a   :  { %v1838_v29 = vadd.f32 %v1837_v24, %v1836_v40  ;;  %v1844_v26 = vrot.slane %v1843_v16, 1  ;;  %v1851_v22 = vrot.slane %v1850_v57, 1  ;;  %v1425_v49 = vadd.f32 %v1424_v2, %v1423_v9  ;;  %v1095_v2 = vpop.xlane.xlu1 %1094 }
 0x20b   :  { %v1860_v12 = vrot.slane %v1859_v7, 1  ;;  %v1866_v28 = vadd.f32 %v1865_v13, %v1864_v62  ;;  %v1879_v19 = vrot.slane %v1878_v35, 2  ;;  %v1233_v41 = vmax.f32 %v1231_v43, %v1232_v25  ;;  %v1574_v62 = vld [vmem:[%s4658_s1 + $0xe0] sm:$0xff]  ;;  %v1091_v25 = vpop.xlane.xlu0 %1090 }
 0x20c   :  { %v1815_v42 = vadd.f32 %v1814_v56, %v1813_v1  ;;  %v1822_v0 = vadd.f32 %v1821_v36, %v1820_v48  ;;  %v3933_v44 = vadd.f32 %v1830_v59, %v1829_v50  ;;  %v1234_v27 = vmax.f32 %v3884_v15, %v3896_v32  ;;  %v1570_v1 = vld [vmem:[%s4658_s1 + $0xc0] sm:$0xff]  ;;  %v1572_v48 = vld [vmem:[%s4658_s1 + $0xd0] sm:$0xff] }
 0x20d   :  { %v1873_v53 = vadd.f32 %v1872_v10, %v1871_v18  ;;  %v1887_v14 = vadd.f32 %v1886_v21, %v1885_v51  ;;  %v1426_v55 = vrot.slane %v1425_v49, 1  ;;  %v1304_v39 = vsub.f32 %v3821_v52, %v1233_v41 }
 0x20e   :  { %v1845_v40 = vadd.f32 %v1844_v26, %v1843_v16  ;;  %v1852_v3 = vadd.f32 %v1851_v22, %v1850_v57  ;;  %v3939_v37 = vsel %vm2346_vm2, %v1838_v29, %v1808_v11  ;;  %2623 = vpow2.f32 %v3903_v58  ;;  %v1575_v58 = vld [vmem:[%s4658_s1 + $0xe8] sm:$0xff] }
 0x20f   :  { %v2620_v33 = vpop.eup %2619  ;;  %v1861_v45 = vadd.f32 %v1860_v12, %v1859_v7  ;;  %v1867_v34 = vrot.slane %v1866_v28, 1  ;;  %v1880_v52 = vadd.f32 %v1879_v19, %v1878_v35  ;;  %2625 = vpow2.f32 %v3924_v38 }
 0x210   :  { %v1508_v50 = vmul.f32 %v2620_v33, %v3799_v20  ;;  %v1509_v17 = vmul.f32 %v2620_v33, %v3801_v5  ;;  %v1305_v46 = vsub.f32 %v3807_v23, %v1233_v41  ;;  %v1235_v56 = vrot.slane %v1234_v27, 4 }
 0x211   :  { %v1874_v38 = vrot.slane %v1873_v53, 1  ;;  %v1888_v16 = vrot.slane %v1887_v14, 2  ;;  %v1427_v18 = vadd.f32 %v1426_v55, %v1425_v49  ;;  %v1350_v51 = vmul.f32 1.442695, %v1304_v39 }
 0x212   :  { %v1698_v24 = vmul.f32 %v1570_v1, %v1508_v50  ;;  %v1699_v57 = vmul.f32 %v1571_v54, %v1508_v50  ;;  %v1700_v47 = vmul.f32 %v1572_v48, %v1508_v50  ;;  %v1701_v9 = vmul.f32 %v1573_v30, %v1508_v50  ;;  %v1103_v1 = vpop.xlane.xlu1 %1102  ;;  %v1584_v30 = vld [vmem:[%s4658_s1 + $0x130] sm:$0xff] }
 0x213   :  { %v1702_v7 = vmul.f32 %v1574_v62, %v1509_v17  ;;  %v1703_v13 = vmul.f32 %v1575_v58, %v1509_v17  ;;  %v1704_v35 = vmul.f32 %v1576_v60, %v1509_v17  ;;  %v1705_v43 = vmul.f32 %v1577_v61, %v1509_v17 }
 0x214   :  { %v1881_v36 = vrot.slane %v1880_v52, 1  ;;  %v1913_v20 = vsel %vm264_vm0, %v1701_v9, 0.0  ;;  %v1352_v59 = vmul.f32 1.442695, %v1305_v46  ;;  %v1236_v5 = vmax.f32 %v1234_v27, %v1235_v56 }
 0x215   :  { %v2622_v23 = vpop.eup %2621  ;;  %v1892_v11 = vadd.f32 %v1702_v7, %v1698_v24  ;;  %v1899_v10 = vadd.f32 %v1703_v13, %v1699_v57  ;;  %v1914_v21 = vsel %vm264_vm0, %v1705_v43, 0.0  ;;  %2627 = vrcp.f32 %v1427_v18 }
 0x216   :  { %v2360_v29 = vsel %vm2346_vm2, %v1845_v40, %v1815_v42  ;;  %v1868_v26 = vadd.f32 %v1867_v34, %v1866_v28  ;;  %v1906_v22 = vadd.f32 %v1704_v35, %v1700_v47  ;;  %v1915_v49 = vadd.f32 %v1914_v21, %v1913_v20  ;;  %v1578_v28 = vld [vmem:[%s4658_s1 + $0x100] sm:$0xff]  ;;  %v1579_v40 = vld [vmem:[%s4658_s1 + $0x108] sm:$0xff] }
 0x217   :  { %v2367_v12 = vsel %vm2346_vm2, %v1852_v3, %v1822_v0  ;;  %v1875_v19 = vadd.f32 %v1874_v38, %v1873_v53  ;;  %v1889_v41 = vadd.f32 %v1888_v16, %v1887_v14  ;;  %2629 = vpow2.f32 %v1350_v51  ;;  %v1099_v0 = vpop.xlane.xlu0 %1098  ;;  %v1582_v3 = vld [vmem:[%s4658_s1 + $0x120] sm:$0xff]  ;;  %v1581_v38 = vld [vmem:[%s4658_s1 + $0x118] sm:$0xff] }
 0x218   :  { %v1893_v55 = vrot.slane %v1892_v11, 4  ;;  %v1511_v27 = vmul.f32 %v2622_v23, %v3866_v6  ;;  %2631 = vpow2.f32 %v1352_v59  ;;  %v1237_v39 = vrot.slane %v1236_v5, 2  ;;  %v1585_v16 = vld [vmem:[%s4658_s1 + $0x138] sm:$0xff] }
 0x219   :  { %v2374_v54 = vsel %vm2346_vm2, %v1861_v45, %v3933_v44  ;;  %v1882_v33 = vadd.f32 %v1881_v36, %v1880_v52  ;;  %v1900_v48 = vrot.slane %v1899_v10, 4  ;;  %v1512_v42 = vmul.f32 %v2622_v23, %v3872_v8  ;;  %v1580_v44 = vld [vmem:[%s4658_s1 + $0x110] sm:$0xff]  ;;  %v1583_v52 = vld [vmem:[%s4658_s1 + $0x128] sm:$0xff] }
 0x21a   :  { %v3983_v53 = vsel %vm2348_vm3, %v1868_v26, %v3939_v37  ;;  %v1907_v6 = vrot.slane %v1906_v22, 4  ;;  %v1916_v14 = vrot.slane %v1915_v49, 4  ;;  %v3995_v8 = vadd.f32 %v3745_v63, %v1091_v25 }
 0x21b   :  { %v3997_v45 = vpop.eup %2623  ;;  %v1890_v37 = vrot.slane %v1889_v41, 1  ;;  %v4000_v34 = vsel %vm2348_vm3, %v1875_v19, %v2360_v29  ;;  %v4009_v62 = vadd.f32 %v3745_v63, %v1095_v2  ;;  %v4012_v58 = vadd.f32 %v3745_v63, %v1103_v1  ;;  %v1107_v13 = vpop.xlane.xlu0 %1106 }
 0x21c   :  { %v4014_v60 = vpop.eup %2625  ;;  %v1894_v61 = vadd.f32 %v1893_v55, %v1892_v11  ;;  %v1706_v50 = vmul.f32 %v1578_v28, %v1511_v27  ;;  %v1238_v17 = vmax.f32 %v1236_v5, %v1237_v39  ;;  %v4017_v46 = vadd.f32 %v3745_v63, %v1099_v0  ;;  %v1586_v28 = vld [vmem:[%s4658_s1 + $0x140] sm:$0xff] }
 0x21d   :  { %v1901_v56 = vadd.f32 %v1900_v48, %v1899_v10  ;;  %v1707_v18 = vmul.f32 %v1579_v40, %v1511_v27  ;;  %v1708_v51 = vmul.f32 %v1580_v44, %v1511_v27  ;;  %v1710_v24 = vmul.f32 %v1582_v3, %v1512_v42  ;;  %v1589_v44 = vld [vmem:[%s4658_s1 + $0x158] sm:$0xff] }
 0x21e   :  { %v1908_v57 = vadd.f32 %v1907_v6, %v1906_v22  ;;  %v1917_v47 = vadd.f32 %v1916_v14, %v1915_v49  ;;  %v1711_v9 = vmul.f32 %v1583_v52, %v1512_v42  ;;  %v1712_v7 = vmul.f32 %v1584_v30, %v1512_v42 }
 0x21f   :  { %v1891_v35 = vadd.f32 %v1890_v37, %v1889_v41  ;;  %v1428_v43 = vadd.f32 %v4014_v60, %v3997_v45  ;;  %v4029_v36 = vmax.f32 %v3995_v8, %v4009_v62  ;;  %v4033_v20 = vmax.f32 %v4017_v46, %v4012_v58 }
 0x220   :  { %v1895_v59 = vrot.slane %v1894_v61, 2  ;;  %v1709_v5 = vmul.f32 %v1581_v38, %v1511_v27  ;;  %v1713_v2 = vmul.f32 %v1585_v16, %v1512_v42  ;;  %v1239_v23 = vrot.slane %v1238_v17, 1  ;;  %v1588_v42 = vld [vmem:[%s4658_s1 + $0x150] sm:$0xff] }
 0x221   :  { %v4036_v11 = vsel %vm2348_vm3, %v1882_v33, %v2367_v12  ;;  %v1902_v10 = vrot.slane %v1901_v56, 2  ;;  %v1922_v21 = vadd.f32 %v1710_v24, %v1706_v50  ;;  %v4039_v25 = vadd.f32 %v3745_v63, %v1107_v13 }
 0x222   :  { %v2628_v29 = vpop.eup %2627  ;;  %v1909_v26 = vrot.slane %v1908_v57, 2  ;;  %v1918_v22 = vrot.slane %v1917_v47, 2  ;;  %v1929_v49 = vadd.f32 %v1711_v9, %v1707_v18  ;;  %v1936_v19 = vadd.f32 %v1712_v7, %v1708_v51 }
 0x223   :  { %v4042_v41 = vsel %vm2348_vm3, %v1891_v35, %v2374_v54  ;;  %v1429_v55 = vrot.slane %v1428_v43, 4  ;;  %v1242_v27 = vrot.slane %v4029_v36, 4  ;;  %v1249_v39 = vrot.slane %v4033_v20, 4  ;;  %v1587_v54 = vld [vmem:[%s4658_s1 + $0x148] sm:$0xff] }
 0x224   :  { %v4046_v12 = vpop.eup %2629  ;;  %v4048_v1 = vadd.f32 %v1895_v59, %v1894_v61  ;;  %v1943_v33 = vsel %vm264_vm0, %v1709_v5, 0.0  ;;  %v1944_v48 = vsel %vm264_vm0, %v1713_v2, 0.0  ;;  %v4061_v0 = vmax.f32 %v1238_v17, %v1239_v23  ;;  %v1590_v17 = vld [vmem:[%s4658_s1 + $0x160] sm:$0xff] }
 0x225   :  { %v4063_v6 = vpop.eup %2631  ;;  %v4065_v14 = vadd.f32 %v1902_v10, %v1901_v56  ;;  %v1923_v40 = vrot.slane %v1922_v21, 4  ;;  %v1514_v3 = vmul.f32 %v2628_v29, %v3914_v4  ;;  %v1515_v37 = vmul.f32 %v2628_v29, %v3922_v31  ;;  %v1591_v56 = vld [vmem:[%s4658_s1 + $0x168] sm:$0xff]  ;;  %v1592_v4 = vld [vmem:[%s4658_s1 + $0x170] sm:$0xff]  ;;  %v1593_v31 = vld [vmem:[%s4658_s1 + $0x178] sm:$0xff] }
 0x226   :  { %v4072_v52 = vadd.f32 %v1909_v26, %v1908_v57  ;;  %v4074_v30 = vadd.f32 %v1918_v22, %v1917_v47  ;;  %v1930_v61 = vrot.slane %v1929_v49, 4  ;;  %v1937_v50 = vrot.slane %v1936_v19, 4 }
 0x227   :  { %v1945_v38 = vadd.f32 %v1944_v48, %v1943_v33  ;;  %v1714_v16 = vmul.f32 %v1586_v28, %v1514_v3  ;;  %v1715_v18 = vmul.f32 %v1587_v54, %v1514_v3  ;;  %v1716_v51 = vmul.f32 %v1588_v42, %v1514_v3 }
 0x228   :  { %v1897_v24 = vrot.slane %v4048_v1, 1  ;;  %v1717_v57 = vmul.f32 %v1589_v44, %v1514_v3  ;;  %v1430_v47 = vadd.f32 %v1429_v55, %v1428_v43  ;;  %v1435_v9 = vadd.f32 %v4063_v6, %v4046_v12 }
 0x229   :  { %v1924_v7 = vadd.f32 %v1923_v40, %v1922_v21  ;;  %v1718_v13 = vmul.f32 %v1590_v17, %v1515_v37  ;;  %v1719_v35 = vmul.f32 %v1591_v56, %v1515_v37  ;;  %v1720_v59 = vmul.f32 %v1592_v4, %v1515_v37 }
 0x22a   :  { %v1931_v2 = vadd.f32 %v1930_v61, %v1929_v49  ;;  %v1938_v23 = vadd.f32 %v1937_v50, %v1936_v19  ;;  %v1721_v10 = vmul.f32 %v1593_v31, %v1515_v37  ;;  %v1946_v29 = vrot.slane %v1945_v38, 4 }
 0x22b   :  { %v1952_v26 = vadd.f32 %v1718_v13, %v1714_v16  ;;  %v1959_v22 = vadd.f32 %v1719_v35, %v1715_v18  ;;  %v1966_v33 = vadd.f32 %v1720_v59, %v1716_v51  ;;  %v1973_v48 = vsel %vm264_vm0, %v1717_v57, 0.0 }
 0x22c   :  { %v1974_v43 = vsel %vm264_vm0, %v1721_v10, 0.0  ;;  %v1431_v55 = vrot.slane %v1430_v47, 2  ;;  %v1436_v28 = vrot.slane %v1435_v9, 4  ;;  %v1925_v54 = vrot.slane %v1924_v7, 2 }
 0x22d   :  { %v1953_v21 = vrot.slane %v1952_v26, 4  ;;  %v1960_v42 = vrot.slane %v1959_v22, 4  ;;  %v1967_v40 = vrot.slane %v1966_v33, 4  ;;  %v1932_v44 = vrot.slane %v1931_v2, 2 }
 0x22e   :  { %v1975_v3 = vadd.f32 %v1974_v43, %v1973_v48  ;;  %v1432_v17 = vadd.f32 %v1431_v55, %v1430_v47  ;;  %v1437_v49 = vadd.f32 %v1436_v28, %v1435_v9  ;;  %v1939_v19 = vrot.slane %v1938_v23, 2 }
 0x22f   :  { %v1954_v37 = vadd.f32 %v1953_v21, %v1952_v26  ;;  %v1961_v61 = vadd.f32 %v1960_v42, %v1959_v22  ;;  %v1968_v50 = vadd.f32 %v1967_v40, %v1966_v33  ;;  %v1947_v56 = vadd.f32 %v1946_v29, %v1945_v38 }
 0x230   :  { %v1976_v4 = vrot.slane %v1975_v3, 4  ;;  %v1433_v31 = vrot.slane %v1432_v17, 1  ;;  %v1438_v16 = vrot.slane %v1437_v49, 2  ;;  %v1926_v18 = vadd.f32 %v1925_v54, %v1924_v7 }
 0x231   :  { %v1955_v51 = vrot.slane %v1954_v37, 2  ;;  %v1962_v57 = vrot.slane %v1961_v61, 2  ;;  %v1969_v13 = vrot.slane %v1968_v50, 2  ;;  %v1933_v35 = vadd.f32 %v1932_v44, %v1931_v2  ;;  %v1111_v2 = vpop.xlane.xlu1 %1110 }
 0x232   :  { %v1977_v59 = vadd.f32 %v1976_v4, %v1975_v3  ;;  %v1434_v10 = vadd.f32 %v1433_v31, %v1432_v17  ;;  %v1439_v5 = vadd.f32 %v1438_v16, %v1437_v49  ;;  %v1898_v47 = vadd.f32 %v1897_v24, %v4048_v1 }
 0x233   :  { %v1911_v9 = vrot.slane %v4072_v52, 1  ;;  %v1920_v26 = vrot.slane %v4074_v30, 1  ;;  %v1940_v22 = vadd.f32 %v1939_v19, %v1938_v23  ;;  %v1948_v38 = vrot.slane %v1947_v56, 2 }
 0x234   :  { %2633 = vrcp.f32 %v1434_v10  ;;  %v1440_v29 = vrot.slane %v1439_v5, 1  ;;  %v1243_v7 = vmax.f32 %v4029_v36, %v1242_v27  ;;  %v1956_v33 = vadd.f32 %v1955_v51, %v1954_v37 }
 0x235   :  { %v1963_v48 = vadd.f32 %v1962_v57, %v1961_v61  ;;  %v1970_v43 = vadd.f32 %v1969_v13, %v1968_v50  ;;  %v1978_v55 = vrot.slane %v1977_v59, 2  ;;  %v1927_v28 = vrot.slane %v1926_v18, 1 }
 0x236   :  { %v1934_v1 = vrot.slane %v1933_v35, 1  ;;  %v1441_v24 = vadd.f32 %v1440_v29, %v1439_v5  ;;  %v1244_v54 = vrot.slane %v1243_v7, 2  ;;  %v1941_v21 = vrot.slane %v1940_v22, 1 }
 0x237   :  { %v1306_v23 = vsub.f32 %v3884_v15, %v4061_v0  ;;  %v1250_v42 = vmax.f32 %v4033_v20, %v1249_v39  ;;  %v4106_v36 = vadd.f32 %v3745_v63, %v1111_v2  ;;  %v1949_v27 = vadd.f32 %v1948_v38, %v1947_v56 }
 0x238   :  { %2635 = vrcp.f32 %v1441_v24  ;;  %v1307_v40 = vsub.f32 %v3896_v32, %v4061_v0  ;;  %v1245_v44 = vmax.f32 %v1243_v7, %v1244_v54  ;;  %v1957_v3 = vrot.slane %v1956_v33, 1  ;;  %v1600_v24 = vld [vmem:[%s4658_s1 + $0x1b0] sm:$0xff]  ;;  %v1601_v54 = vld [vmem:[%s4658_s1 + $0x1b8] sm:$0xff] }
 0x239   :  { %v1964_v5 = vrot.slane %v1963_v48, 1  ;;  %v1971_v17 = vrot.slane %v1970_v43, 1  ;;  %v1979_v49 = vadd.f32 %v1978_v55, %v1977_v59  ;;  %v4660_v15 = vrot.slane %v4065_v14, 1  ;;  %v1597_v55 = vld [vmem:[%s4658_s1 + $0x198] sm:$0xff] }
 0x23a   :  { %v1912_v37 = vadd.f32 %v1911_v9, %v4072_v52  ;;  %v4115_v20 = vadd.f32 %v1920_v26, %v4074_v30  ;;  %v1246_v39 = vrot.slane %v1245_v44, 1  ;;  %v1928_v61 = vadd.f32 %v1927_v28, %v1926_v18  ;;  %v1115_v26 = vpop.xlane.xlu0 %1114  ;;  %v1598_v28 = vld [vmem:[%s4658_s1 + $0x1a0] sm:$0xff] }
 0x23b   :  { %v1905_v19 = vadd.f32 %v4660_v15, %v4065_v14  ;;  %v1354_v50 = vmul.f32 1.442695, %v1306_v23  ;;  %v1251_v56 = vrot.slane %v1250_v42, 2  ;;  %v1255_v32 = vmax.f32 %v4039_v25, %v4106_v36 }
 0x23c   :  { %v1935_v0 = vadd.f32 %v1934_v1, %v1933_v35  ;;  %v1942_v4 = vadd.f32 %v1941_v21, %v1940_v22  ;;  %v1950_v31 = vrot.slane %v1949_v27, 1  ;;  %v1356_v16 = vmul.f32 1.442695, %v1307_v40  ;;  %v1599_v1 = vld [vmem:[%s4658_s1 + $0x1a8] sm:$0xff] }
 0x23d   :  { %v1958_v51 = vadd.f32 %v1957_v3, %v1956_v33  ;;  %v1965_v57 = vadd.f32 %v1964_v5, %v1963_v48  ;;  %v1972_v13 = vadd.f32 %v1971_v17, %v1970_v43  ;;  %v1980_v14 = vrot.slane %v1979_v49, 1  ;;  %v1596_v43 = vld [vmem:[%s4658_s1 + $0x190] sm:$0xff] }
 0x23e   :  { %v2351_v52 = vsel %vm2350_vm4, %v1898_v47, %v3983_v53  ;;  %v2362_v30 = vsel %vm2350_vm4, %v1905_v19, %v4000_v34  ;;  %v2369_v18 = vsel %vm2350_vm4, %v1912_v37, %v4036_v11  ;;  %v4125_v59 = vmax.f32 %v1245_v44, %v1246_v39  ;;  %v1594_v34 = vld [vmem:[%s4658_s1 + $0x180] sm:$0xff]  ;;  %v1595_v11 = vld [vmem:[%s4658_s1 + $0x188] sm:$0xff]  ;;  %v1119_v47 = vpop.xlane.xlu1 %1118 }
 0x23f   :  { %v2353_v35 = vsel %vm2352_vm5, %v1928_v61, %v2351_v52  ;;  %2637 = vpow2.f32 %v1354_v50  ;;  %v4128_v10 = vmax.f32 %v1250_v42, %v1251_v56  ;;  %v1256_v9 = vrot.slane %v1255_v32, 4  ;;  %v1602_v61 = vld [vmem:[%s4658_s1 + $0x1c0] sm:$0xff]  ;;  %v1603_v50 = vld [vmem:[%s4658_s1 + $0x1c8] sm:$0xff]  ;;  %v1604_v56 = vld [vmem:[%s4658_s1 + $0x1d0] sm:$0xff] }
 0x240   :  { %v4130_v22 = vadd.f32 %v1950_v31, %v1949_v27  ;;  %v2363_v38 = vsel %vm2352_vm5, %v1935_v0, %v2362_v30  ;;  %v2370_v53 = vsel %vm2352_vm5, %v1942_v4, %v2369_v18  ;;  %2639 = vpow2.f32 %v1356_v16  ;;  %v1605_v0 = vld [vmem:[%s4658_s1 + $0x1d8] sm:$0xff]  ;;  %v1606_v52 = vld [vmem:[%s4658_s1 + $0x1e0] sm:$0xff]  ;;  %v1607_v30 = vld [vmem:[%s4658_s1 + $0x1e8] sm:$0xff] }
 0x241   :  { %v2634_v29 = vpop.eup %2633  ;;  %v4140_v7 = vadd.f32 %v1980_v14, %v1979_v49  ;;  %v4143_v2 = vsel %vm2354_vm6, %v1958_v51, %v2353_v35  ;;  %v4146_v33 = vsel %vm2354_vm6, %v1965_v57, %v2363_v38  ;;  %v4149_v48 = vsel %vm2354_vm6, %v1972_v13, %v2370_v53 }
 0x242   :  { %v1517_v21 = vmul.f32 %v2634_v29, %v3997_v45  ;;  %v1518_v23 = vmul.f32 %v2634_v29, %v4014_v60  ;;  %v1308_v42 = vsub.f32 %v3995_v8, %v4125_v59  ;;  %v4174_v27 = vadd.f32 %v3745_v63, %v1115_v26 }
 0x243   :  { %v1309_v40 = vsub.f32 %v4009_v62, %v4125_v59  ;;  %v1253_v44 = vrot.slane %v4128_v10, 1  ;;  %v4179_v3 = vmax.f32 %v1255_v32, %v1256_v9  ;;  %v4182_v5 = vadd.f32 %v3745_v63, %v1119_v47 }
 0x244   :  { %v1722_v17 = vmul.f32 %v1594_v34, %v1517_v21  ;;  %v1723_v45 = vmul.f32 %v1595_v11, %v1517_v21  ;;  %v1724_v49 = vmul.f32 %v1596_v43, %v1517_v21  ;;  %v1725_v60 = vmul.f32 %v1597_v55, %v1517_v21 }
 0x245   :  { %v2636_v15 = vpop.eup %2635  ;;  %v1726_v19 = vmul.f32 %v1598_v28, %v1518_v23  ;;  %v1727_v8 = vmul.f32 %v1599_v1, %v1518_v23  ;;  %v1728_v37 = vmul.f32 %v1600_v24, %v1518_v23  ;;  %v1729_v39 = vmul.f32 %v1601_v54, %v1518_v23 }
 0x246   :  { %v2003_v32 = vsel %vm264_vm0, %v1725_v60, 0.0  ;;  %v1520_v4 = vmul.f32 %v2636_v15, %v4046_v12  ;;  %v1521_v31 = vmul.f32 %v2636_v15, %v4063_v6  ;;  %v1358_v16 = vmul.f32 1.442695, %v1308_v42  ;;  %v1608_v12 = vld [vmem:[%s4658_s1 + $0x1f0] sm:$0xff]  ;;  %v1609_v6 = vld [vmem:[%s4658_s1 + $0x1f8] sm:$0xff] }
 0x247   :  { %v1982_v51 = vadd.f32 %v1726_v19, %v1722_v17  ;;  %v1989_v57 = vadd.f32 %v1727_v8, %v1723_v45  ;;  %v1996_v13 = vadd.f32 %v1728_v37, %v1724_v49  ;;  %v2004_v14 = vsel %vm264_vm0, %v1729_v39, 0.0 }
 0x248   :  { %v2005_v18 = vadd.f32 %v2004_v14, %v2003_v32  ;;  %v1730_v35 = vmul.f32 %v1602_v61, %v1520_v4  ;;  %v1731_v9 = vmul.f32 %v1603_v50, %v1520_v4  ;;  %v1732_v26 = vmul.f32 %v1604_v56, %v1520_v4 }
 0x249   :  { %v1983_v38 = vrot.slane %v1982_v51, 4  ;;  %v1990_v53 = vrot.slane %v1989_v57, 4  ;;  %v1997_v34 = vrot.slane %v1996_v13, 4  ;;  %v1733_v11 = vmul.f32 %v1605_v0, %v1520_v4 }
 0x24a   :  { %v2006_v47 = vrot.slane %v2005_v18, 4  ;;  %v1734_v29 = vmul.f32 %v1606_v52, %v1521_v31  ;;  %v1735_v43 = vmul.f32 %v1607_v30, %v1521_v31  ;;  %v1736_v55 = vmul.f32 %v1608_v12, %v1521_v31 }
 0x24b   :  { %v1984_v28 = vadd.f32 %v1983_v38, %v1982_v51  ;;  %v1991_v1 = vadd.f32 %v1990_v53, %v1989_v57  ;;  %v1998_v24 = vadd.f32 %v1997_v34, %v1996_v13  ;;  %v1737_v54 = vmul.f32 %v1609_v6, %v1521_v31 }
 0x24c   :  { %v4212_v21 = vpop.eup %2637  ;;  %v2007_v23 = vadd.f32 %v2006_v47, %v2005_v18  ;;  %v2012_v42 = vadd.f32 %v1734_v29, %v1730_v35  ;;  %v2019_v17 = vadd.f32 %v1735_v43, %v1731_v9  ;;  %v2026_v45 = vadd.f32 %v1736_v55, %v1732_v26 }
 0x24d   :  { %v4214_v49 = vpop.eup %2639  ;;  %v1985_v60 = vrot.slane %v1984_v28, 2  ;;  %v1992_v15 = vrot.slane %v1991_v1, 2  ;;  %v1999_v19 = vrot.slane %v1998_v24, 2  ;;  %v2033_v8 = vsel %vm264_vm0, %v1733_v11, 0.0 }
 0x24e   :  { %v2008_v37 = vrot.slane %v2007_v23, 2  ;;  %v2013_v39 = vrot.slane %v2012_v42, 4  ;;  %v2020_v61 = vrot.slane %v2019_v17, 4  ;;  %v2027_v50 = vrot.slane %v2026_v45, 4 }
 0x24f   :  { %v1986_v56 = vadd.f32 %v1985_v60, %v1984_v28  ;;  %v1993_v32 = vadd.f32 %v1992_v15, %v1991_v1  ;;  %v2000_v0 = vadd.f32 %v1999_v19, %v1998_v24  ;;  %v2034_v4 = vsel %vm264_vm0, %v1737_v54, 0.0 }
 0x250   :  { %v2014_v31 = vadd.f32 %v2013_v39, %v2012_v42  ;;  %v2021_v51 = vadd.f32 %v2020_v61, %v2019_v17  ;;  %v2028_v57 = vadd.f32 %v2027_v50, %v2026_v45  ;;  %v1360_v13 = vmul.f32 1.442695, %v1309_v40  ;;  %v1127_v61 = vpop.xlane.xlu1 %1126 }
 0x251   :  { %v1987_v14 = vrot.slane %v1986_v56, 1  ;;  %v1994_v52 = vrot.slane %v1993_v32, 1  ;;  %v2001_v30 = vrot.slane %v2000_v0, 1  ;;  %v2035_v12 = vadd.f32 %v2034_v4, %v2033_v8 }
 0x252   :  { %v2009_v18 = vadd.f32 %v2008_v37, %v2007_v23  ;;  %v2015_v6 = vrot.slane %v2014_v31, 2  ;;  %v2022_v35 = vrot.slane %v2021_v51, 2  ;;  %v2029_v9 = vrot.slane %v2028_v57, 2 }
 0x253   :  { %v2036_v26 = vrot.slane %v2035_v12, 4  ;;  %2641 = vpow2.f32 %v1358_v16  ;;  %v1254_v38 = vmax.f32 %v4128_v10, %v1253_v44  ;;  %v1262_v53 = vmax.f32 %v4174_v27, %v4182_v5 }
 0x254   :  { %v2016_v34 = vadd.f32 %v2015_v6, %v2014_v31  ;;  %v2023_v62 = vadd.f32 %v2022_v35, %v2021_v51  ;;  %v2030_v59 = vadd.f32 %v2029_v9, %v2028_v57  ;;  %2643 = vpow2.f32 %v1360_v13 }
 0x255   :  { %v1988_v40 = vadd.f32 %v1987_v14, %v1986_v56  ;;  %v1995_v11 = vadd.f32 %v1994_v52, %v1993_v32  ;;  %v2002_v47 = vadd.f32 %v2001_v30, %v2000_v0  ;;  %v2037_v29 = vadd.f32 %v2036_v26, %v2035_v12 }
 0x256   :  { %v2010_v43 = vrot.slane %v2009_v18, 1  ;;  %v2017_v55 = vrot.slane %v2016_v34, 1  ;;  %v2024_v28 = vrot.slane %v2023_v62, 1  ;;  %v2031_v1 = vrot.slane %v2030_v59, 1 }
 0x257   :  { %v2038_v16 = vrot.slane %v2037_v29, 2  ;;  %v1310_v24 = vsub.f32 %v4017_v46, %v1254_v38  ;;  %v1258_v10 = vrot.slane %v4179_v3, 2  ;;  %v1263_v44 = vrot.slane %v1262_v53, 4 }
 0x258   :  { %v2018_v54 = vadd.f32 %v2017_v55, %v2016_v34  ;;  %v2025_v23 = vadd.f32 %v2024_v28, %v2023_v62  ;;  %v2032_v42 = vadd.f32 %v2031_v1, %v2030_v59  ;;  %v1442_v17 = vadd.f32 %v4214_v49, %v4212_v21 }
 0x259   :  { %v2357_v45 = vsel %vm2356_vm7, %v1988_v40, %v4143_v2  ;;  %v2365_v60 = vsel %vm2356_vm7, %v1995_v11, %v4146_v33  ;;  %v2372_v15 = vsel %vm2356_vm7, %v2002_v47, %v4149_v48  ;;  %v2039_v19 = vadd.f32 %v2038_v16, %v2037_v29 }
 0x25a   :  { %v2011_v46 = vadd.f32 %v2010_v43, %v2009_v18  ;;  %v2359_v8 = vsel %vm2358_vm8, %v2018_v54, %v2357_v45  ;;  %v2366_v37 = vsel %vm2358_vm8, %v2025_v23, %v2365_v60  ;;  %v2373_v39 = vsel %vm2358_vm8, %v2032_v42, %v2372_v15 }
 0x25b   :  { %v2376_v50 = vsel %vm2350_vm4, %v4115_v20, %v4042_v41  ;;  %v2040_v2 = vrot.slane %v2039_v19, 1  ;;  %2417 = vst [vmem:[%s4659_s6] sm:$0xff] %v2359_v8  ;;  %2418 = vst [vmem:[%s4659_s6 + $0x8] sm:$0xff] %v2366_v37  ;;  %v1311_v33 = vsub.f32 %v4012_v58, %v1254_v38  ;;  %v1264_v48 = vmax.f32 %v1262_v53, %v1263_v44  ;;  %v1123_v41 = vpop.xlane.xlu0 %1122 }
 0x25c   :  { %2419 = vst [vmem:[%s4659_s6 + $0x10] sm:$0xff] %v2373_v39  ;;  %v2377_v56 = vsel %vm2352_vm5, %v4130_v22, %v2376_v50  ;;  %v4257_v0 = vadd.f32 %v3745_v63, %v1127_v61  ;;  %v1443_v31 = vrot.slane %v1442_v17, 4  ;;  %v1362_v51 = vmul.f32 1.442695, %v1310_v24 }
 0x25d   :  { %v2378_v20 = vsel %vm2354_vm6, %v4140_v7, %v2377_v56  ;;  %v2041_v32 = vadd.f32 %v2040_v2, %v2039_v19  ;;  %v1259_v57 = vmax.f32 %v4179_v3, %v1258_v10  ;;  %v1364_v13 = vmul.f32 1.442695, %v1311_v33  ;;  %v1135_v7 = vpop.xlane.xlu1 %1134 }
 0x25e   :  { %v2379_v4 = vsel %vm2356_vm7, %v2011_v46, %v2378_v20  ;;  %v1265_v14 = vrot.slane %v1264_v48, 2  ;;  %v4263_v22 = vadd.f32 %v3745_v63, %v1123_v41  ;;  %v1444_v12 = vadd.f32 %v1443_v31, %v1442_v17 }
 0x25f   :  { %v2380_v58 = vsel %vm2358_vm8, %v2041_v32, %v2379_v4  ;;  %2645 = vpow2.f32 %v1362_v51  ;;  %v1260_v18 = vrot.slane %v1259_v57, 1  ;;  %v1131_v6 = vpop.xlane.xlu0 %1130  ;;  %v4276_v9 = vadd.f32 %v3745_v63, %v1135_v7 }
 0x260   :  { %v4265_v52 = vpop.eup %2641  ;;  %2420 = vst.msk [vmem:[%s4659_s6 + $0x18] sm:$0xff] %vm264_vm0, %v2380_v58  ;;  %v1269_v3 = vmax.f32 %v4263_v22, %v4257_v0  ;;  %2647 = vpow2.f32 %v1364_v13  ;;  %v1266_v35 = vmax.f32 %v1264_v48, %v1265_v14  ;;  %v4281_v53 = vadd.f32 %v3745_v63, %v1131_v6 }
 0x261   :  { %v4271_v30 = vpop.eup %2643  ;;  %v1445_v34 = vrot.slane %v1444_v12, 2  ;;  %v1261_v62 = vmax.f32 %v1259_v57, %v1260_v18  ;;  %v1143_v57 = vpop.xlane.xlu1 %1142 }
 0x262   :  { %v1449_v26 = vadd.f32 %v4271_v30, %v4265_v52  ;;  %v1270_v38 = vrot.slane %v1269_v3, 4  ;;  %v1267_v59 = vrot.slane %v1266_v35, 1  ;;  %v1276_v40 = vmax.f32 %v4281_v53, %v4276_v9 }
 0x263   :  { %v1446_v29 = vadd.f32 %v1445_v34, %v1444_v12  ;;  %v1312_v43 = vsub.f32 %v4039_v25, %v1261_v62  ;;  %v1313_v55 = vsub.f32 %v4106_v36, %v1261_v62  ;;  %v1139_v14 = vpop.xlane.xlu0 %1138 }
 0x264   :  { %v1450_v11 = vrot.slane %v1449_v26, 4  ;;  %v1271_v47 = vmax.f32 %v1269_v3, %v1270_v38  ;;  %v1268_v28 = vmax.f32 %v1266_v35, %v1267_v59  ;;  %v1277_v1 = vrot.slane %v1276_v40, 4 }
 0x265   :  { %v1447_v10 = vrot.slane %v1446_v29, 1  ;;  %v1366_v44 = vmul.f32 1.442695, %v1312_v43  ;;  %v1368_v23 = vmul.f32 1.442695, %v1313_v55  ;;  %v1615_v43 = vld [vmem:[%s4658_s1 + $0x228] sm:$0xff] }
 0x266   :  { %v1451_v16 = vadd.f32 %v1450_v11, %v1449_v26  ;;  %v1272_v24 = vrot.slane %v1271_v47, 2  ;;  %v1314_v42 = vsub.f32 %v4174_v27, %v1268_v28  ;;  %v1278_v17 = vmax.f32 %v1276_v40, %v1277_v1  ;;  %v1617_v55 = vld [vmem:[%s4658_s1 + $0x238] sm:$0xff] }
 0x267   :  { %v1315_v60 = vsub.f32 %v4182_v5, %v1268_v28  ;;  %v1448_v19 = vadd.f32 %v1447_v10, %v1446_v29  ;;  %2649 = vpow2.f32 %v1366_v44  ;;  %v4313_v26 = vadd.f32 %v3745_v63, %v1139_v14  ;;  %v1612_v28 = vld [vmem:[%s4658_s1 + $0x210] sm:$0xff] }
 0x268   :  { %v1452_v15 = vrot.slane %v1451_v16, 2  ;;  %v1273_v25 = vmax.f32 %v1271_v47, %v1272_v24  ;;  %2651 = vpow2.f32 %v1368_v23  ;;  %v1370_v46 = vmul.f32 1.442695, %v1314_v42  ;;  %v1613_v47 = vld [vmem:[%s4658_s1 + $0x218] sm:$0xff] }
 0x269   :  { %v1279_v8 = vrot.slane %v1278_v17, 2  ;;  %v1372_v37 = vmul.f32 1.442695, %v1315_v60  ;;  %2653 = vrcp.f32 %v1448_v19 }
 0x26a   :  { %v1453_v39 = vadd.f32 %v1452_v15, %v1451_v16  ;;  %v1274_v61 = vrot.slane %v1273_v25, 1  ;;  %2655 = vpow2.f32 %v1370_v46 }
 0x26b   :  { %v1280_v50 = vmax.f32 %v1278_v17, %v1279_v8  ;;  %2657 = vpow2.f32 %v1372_v37 }
 0x26c   :  { %v4287_v54 = vpop.eup %2645  ;;  %v1454_v2 = vrot.slane %v1453_v39, 1  ;;  %v1275_v5 = vmax.f32 %v1273_v25, %v1274_v61 }
 0x26d   :  { %v4290_v45 = vpop.eup %2647  ;;  %v1281_v48 = vrot.slane %v1280_v50, 1 }
 0x26e   :  { %v1456_v36 = vadd.f32 %v4290_v45, %v4287_v54  ;;  %v1455_v56 = vadd.f32 %v1454_v2, %v1453_v39  ;;  %v1316_v41 = vsub.f32 %v4263_v22, %v1275_v5  ;;  %v1317_v20 = vsub.f32 %v4257_v0, %v1275_v5 }
 0x26f   :  { %v1282_v31 = vmax.f32 %v1280_v50, %v1281_v48  ;;  %v4305_v0 = vadd.f32 %v3745_v63, %v1143_v57  ;;  %v1611_v63 = vld [vmem:[%s4658_s1 + $0x208] sm:$0xff]  ;;  %v1618_v48 = vld [vmem:[%s4658_s1 + $0x240] sm:$0xff] }
 0x270   :  { %v1457_v27 = vrot.slane %v1456_v36, 4  ;;  %2659 = vrcp.f32 %v1455_v56  ;;  %v1374_v58 = vmul.f32 1.442695, %v1316_v41  ;;  %v1376_v13 = vmul.f32 1.442695, %v1317_v20  ;;  %v1619_v56 = vld [vmem:[%s4658_s1 + $0x248] sm:$0xff] }
 0x271   :  { %v1318_v22 = vsub.f32 %v4281_v53, %v1282_v31  ;;  %v1319_v6 = vsub.f32 %v4276_v9, %v1282_v31  ;;  %v1283_v53 = vmax.f32 %v4313_v26, %v4305_v0  ;;  %v1610_v9 = vld [vmem:[%s4658_s1 + $0x200] sm:$0xff] }
 0x272   :  { %v1458_v33 = vadd.f32 %v1457_v27, %v1456_v36  ;;  %2661 = vpow2.f32 %v1374_v58  ;;  %v1620_v58 = vld [vmem:[%s4658_s1 + $0x250] sm:$0xff] }
 0x273   :  { %2663 = vpow2.f32 %v1376_v13  ;;  %v1378_v62 = vmul.f32 1.442695, %v1318_v22  ;;  %v1380_v11 = vmul.f32 1.442695, %v1319_v6  ;;  %v1284_v24 = vrot.slane %v1283_v53, 4 }
 0x274   :  { %v4297_v32 = vpop.eup %2649  ;;  %v1459_v4 = vrot.slane %v1458_v33, 2 }
 0x275   :  { %v4299_v51 = vpop.eup %2651  ;;  %2665 = vpow2.f32 %v1378_v62  ;;  %v1285_v39 = vmax.f32 %v1283_v53, %v1284_v24 }
 0x276   :  { %v2654_v7 = vpop.eup %2653  ;;  %v1460_v3 = vadd.f32 %v1459_v4, %v1458_v33  ;;  %v1463_v12 = vadd.f32 %v4299_v51, %v4297_v32  ;;  %2667 = vpow2.f32 %v1380_v11  ;;  %v1622_v4 = vld [vmem:[%s4658_s1 + $0x260] sm:$0xff] }
 0x277   :  { %v4307_v18 = vpop.eup %2655  ;;  %v1523_v59 = vmul.f32 %v2654_v7, %v4212_v21  ;;  %v1524_v29 = vmul.f32 %v2654_v7, %v4214_v49  ;;  %v1614_v21 = vld [vmem:[%s4658_s1 + $0x220] sm:$0xff]  ;;  %v1616_v49 = vld [vmem:[%s4658_s1 + $0x230] sm:$0xff]  ;;  %v1286_v14 = vrot.slane %v1285_v39, 2 }
 0x278   :  { %v4310_v35 = vpop.eup %2657  ;;  %v1461_v38 = vrot.slane %v1460_v3, 1  ;;  %v1464_v34 = vrot.slane %v1463_v12, 4 }
 0x279   :  { %v1470_v40 = vadd.f32 %v4310_v35, %v4307_v18  ;;  %v1738_v10 = vmul.f32 %v1610_v9, %v1523_v59  ;;  %v1741_v44 = vmul.f32 %v1613_v47, %v1523_v59  ;;  %v1739_v42 = vmul.f32 %v1611_v63, %v1523_v59 }
 0x27a   :  { %v1462_v1 = vadd.f32 %v1461_v38, %v1460_v3  ;;  %v1465_v16 = vadd.f32 %v1464_v34, %v1463_v12  ;;  %v1742_v17 = vmul.f32 %v1614_v21, %v1524_v29  ;;  %v1743_v60 = vmul.f32 %v1615_v43, %v1524_v29 }
 0x27b   :  { %v1471_v23 = vrot.slane %v1470_v40, 4  ;;  %v1745_v15 = vmul.f32 %v1617_v55, %v1524_v29  ;;  %v1740_v19 = vmul.f32 %v1612_v28, %v1523_v59  ;;  %v1744_v36 = vmul.f32 %v1616_v49, %v1524_v29  ;;  %v1621_v55 = vld [vmem:[%s4658_s1 + $0x258] sm:$0xff] }
 0x27c   :  { %2669 = vrcp.f32 %v1462_v1  ;;  %v1466_v46 = vrot.slane %v1465_v16, 2  ;;  %v2063_v8 = vsel %vm264_vm0, %v1741_v44, 0.0  ;;  %v2042_v61 = vadd.f32 %v1742_v17, %v1738_v10  ;;  %v1625_v49 = vld [vmem:[%s4658_s1 + $0x278] sm:$0xff] }
 0x27d   :  { %v2660_v25 = vpop.eup %2659  ;;  %v1472_v37 = vadd.f32 %v1471_v23, %v1470_v40  ;;  %v2049_v27 = vadd.f32 %v1743_v60, %v1739_v42  ;;  %v2064_v50 = vsel %vm264_vm0, %v1745_v15, 0.0  ;;  %v2056_v33 = vadd.f32 %v1744_v36, %v1740_v19 }
 0x27e   :  { %v1526_v2 = vmul.f32 %v2660_v25, %v4265_v52  ;;  %v1527_v41 = vmul.f32 %v2660_v25, %v4271_v30  ;;  %v1623_v52 = vld [vmem:[%s4658_s1 + $0x268] sm:$0xff]  ;;  %v1467_v31 = vadd.f32 %v1466_v46, %v1465_v16  ;;  %v2065_v57 = vadd.f32 %v2064_v50, %v2063_v8  ;;  %v1624_v30 = vld [vmem:[%s4658_s1 + $0x270] sm:$0xff] }
 0x27f   :  { %v4348_v5 = vpop.eup %2661  ;;  %v1473_v13 = vrot.slane %v1472_v37, 2  ;;  %v2043_v7 = vrot.slane %v2042_v61, 4  ;;  %v2050_v3 = vrot.slane %v2049_v27, 4  ;;  %v2057_v6 = vrot.slane %v2056_v33, 4 }
 0x280   :  { %v4357_v20 = vpop.eup %2663  ;;  %v1746_v12 = vmul.f32 %v1618_v48, %v1526_v2  ;;  %v1747_v22 = vmul.f32 %v1619_v56, %v1526_v2  ;;  %v1750_v38 = vmul.f32 %v1622_v4, %v1527_v41  ;;  %v1751_v34 = vmul.f32 %v1623_v52, %v1527_v41  ;;  %v1633_v48 = vld [vmem:[%s4658_s1 + $0x2b8] sm:$0xff] }
 0x281   :  { %v1477_v62 = vadd.f32 %v4357_v20, %v4348_v5  ;;  %v1748_v53 = vmul.f32 %v1620_v58, %v1526_v2  ;;  %v1752_v59 = vmul.f32 %v1624_v30, %v1527_v41  ;;  %v1468_v40 = vrot.slane %v1467_v31, 1  ;;  %v1628_v30 = vld [vmem:[%s4658_s1 + $0x290] sm:$0xff] }
 0x282   :  { %v4373_v11 = vpop.eup %2665  ;;  %v1474_v9 = vadd.f32 %v1473_v13, %v1472_v37  ;;  %v1287_v63 = vmax.f32 %v1285_v39, %v1286_v14  ;;  %v2044_v29 = vadd.f32 %v2043_v7, %v2042_v61  ;;  %v2051_v21 = vadd.f32 %v2050_v3, %v2049_v27  ;;  %v1630_v3 = vld [vmem:[%s4658_s1 + $0x2a0] sm:$0xff] }
 0x283   :  { %v4375_v47 = vpop.eup %2667  ;;  %v2066_v43 = vrot.slane %v2065_v57, 4  ;;  %v2058_v28 = vadd.f32 %v2057_v6, %v2056_v33  ;;  %v2072_v1 = vadd.f32 %v1750_v38, %v1746_v12  ;;  %v2079_v16 = vadd.f32 %v1751_v34, %v1747_v22  ;;  %v1631_v12 = vld [vmem:[%s4658_s1 + $0x2a8] sm:$0xff]  ;;  %v1632_v22 = vld [vmem:[%s4658_s1 + $0x2b0] sm:$0xff] }
 0x284   :  { %v1478_v24 = vrot.slane %v1477_v62, 4  ;;  %v2086_v10 = vadd.f32 %v1752_v59, %v1748_v53  ;;  %v1469_v44 = vadd.f32 %v1468_v40, %v1467_v31  ;;  %v1749_v42 = vmul.f32 %v1621_v55, %v1526_v2  ;;  %v1629_v2 = vld [vmem:[%s4658_s1 + $0x298] sm:$0xff] }
 0x285   :  { %v1475_v17 = vrot.slane %v1474_v9, 1  ;;  %v1484_v60 = vadd.f32 %v4375_v47, %v4373_v11  ;;  %v1288_v15 = vrot.slane %v1287_v63, 1  ;;  %v2045_v25 = vrot.slane %v2044_v29, 2 }
 0x286   :  { %v2052_v19 = vrot.slane %v2051_v21, 2  ;;  %v2067_v36 = vadd.f32 %v2066_v43, %v2065_v57  ;;  %v1753_v46 = vmul.f32 %v1625_v49, %v1527_v41  ;;  %v2059_v8 = vrot.slane %v2058_v28, 2 }
 0x287   :  { %v2073_v37 = vrot.slane %v2072_v1, 4  ;;  %v2080_v39 = vrot.slane %v2079_v16, 4  ;;  %v1479_v61 = vadd.f32 %v1478_v24, %v1477_v62  ;;  %v2087_v27 = vrot.slane %v2086_v10, 4 }
 0x288   :  { %2671 = vrcp.f32 %v1469_v44  ;;  %v1476_v56 = vadd.f32 %v1475_v17, %v1474_v9  ;;  %v1485_v41 = vrot.slane %v1484_v60, 4  ;;  %v1289_v4 = vmax.f32 %v1287_v63, %v1288_v15 }
 0x289   :  { %v2670_v23 = vpop.eup %2669  ;;  %v2046_v52 = vadd.f32 %v2045_v25, %v2044_v29  ;;  %v2053_v31 = vadd.f32 %v2052_v19, %v2051_v21  ;;  %v2068_v57 = vrot.slane %v2067_v36, 2  ;;  %v2093_v58 = vsel %vm264_vm0, %v1749_v42, 0.0 }
 0x28a   :  { %v1529_v50 = vmul.f32 %v2670_v23, %v4287_v54  ;;  %v1530_v33 = vmul.f32 %v2670_v23, %v4290_v45  ;;  %v1626_v54 = vld [vmem:[%s4658_s1 + $0x280] sm:$0xff]  ;;  %v1627_v45 = vld [vmem:[%s4658_s1 + $0x288] sm:$0xff]  ;;  %v2060_v13 = vadd.f32 %v2059_v8, %v2058_v28  ;;  %v2074_v14 = vadd.f32 %v2073_v37, %v2072_v1 }
 0x28b   :  { %v2094_v7 = vsel %vm264_vm0, %v1753_v46, 0.0  ;;  %v1480_v6 = vrot.slane %v1479_v61, 2  ;;  %v2081_v38 = vadd.f32 %v2080_v39, %v2079_v16  ;;  %v2088_v34 = vadd.f32 %v2087_v27, %v2086_v10 }
 0x28c   :  { %v1757_v62 = vmul.f32 %v1629_v2, %v1529_v50  ;;  %v1761_v53 = vmul.f32 %v1633_v48, %v1530_v33  ;;  %v1754_v59 = vmul.f32 %v1626_v54, %v1529_v50  ;;  %v1755_v40 = vmul.f32 %v1627_v45, %v1529_v50 }
 0x28d   :  { %2673 = vrcp.f32 %v1476_v56  ;;  %v1486_v9 = vadd.f32 %v1485_v41, %v1484_v60  ;;  %v1756_v63 = vmul.f32 %v1628_v30, %v1529_v50  ;;  %v1758_v29 = vmul.f32 %v1630_v3, %v1530_v33 }
 0x28e   :  { %v1759_v21 = vmul.f32 %v1631_v12, %v1530_v33  ;;  %v1760_v43 = vmul.f32 %v1632_v22, %v1530_v33  ;;  %v2069_v55 = vadd.f32 %v2068_v57, %v2067_v36  ;;  %v2075_v28 = vrot.slane %v2074_v14, 2 }
 0x28f   :  { %v2095_v49 = vadd.f32 %v2094_v7, %v2093_v58  ;;  %v1481_v1 = vadd.f32 %v1480_v6, %v1479_v61  ;;  %v2047_v24 = vrot.slane %v2046_v52, 1  ;;  %v2054_v44 = vrot.slane %v2053_v31, 1 }
 0x290   :  { %v2123_v23 = vsel %vm264_vm0, %v1757_v62, 0.0  ;;  %v2124_v16 = vsel %vm264_vm0, %v1761_v53, 0.0  ;;  %v2082_v10 = vrot.slane %v2081_v38, 2  ;;  %v2089_v42 = vrot.slane %v2088_v34, 2 }
 0x291   :  { %v1487_v17 = vrot.slane %v1486_v9, 2  ;;  %v1320_v15 = vsub.f32 %v4313_v26, %v1289_v4  ;;  %v2102_v60 = vadd.f32 %v1758_v29, %v1754_v59  ;;  %v2109_v25 = vadd.f32 %v1759_v21, %v1755_v40  ;;  %v1637_v40 = vld [vmem:[%s4658_s1 + $0x2d8] sm:$0xff] }
 0x292   :  { %v2116_v19 = vadd.f32 %v1760_v43, %v1756_v63  ;;  %v1321_v46 = vsub.f32 %v4305_v0, %v1289_v4  ;;  %v2076_v36 = vadd.f32 %v2075_v28, %v2074_v14  ;;  %v2096_v8 = vrot.slane %v2095_v49, 4  ;;  %v1636_v43 = vld [vmem:[%s4658_s1 + $0x2d0] sm:$0xff] }
 0x293   :  { %v2125_v37 = vadd.f32 %v2124_v16, %v2123_v23  ;;  %v1482_v39 = vrot.slane %v1481_v1, 1  ;;  %v4417_v61 = vadd.f32 %v2047_v24, %v2046_v52  ;;  %v4419_v27 = vadd.f32 %v2054_v44, %v2053_v31  ;;  %v1634_v31 = vld [vmem:[%s4658_s1 + $0x2c0] sm:$0xff] }
 0x294   :  { %v2061_v50 = vrot.slane %v2060_v13, 1  ;;  %v2070_v33 = vrot.slane %v2069_v55, 1  ;;  %v2083_v48 = vadd.f32 %v2082_v10, %v2081_v38  ;;  %v2090_v56 = vadd.f32 %v2089_v42, %v2088_v34  ;;  %v1635_v38 = vld [vmem:[%s4658_s1 + $0x2c8] sm:$0xff] }
 0x295   :  { %v2672_v2 = vpop.eup %2671  ;;  %v1488_v41 = vadd.f32 %v1487_v17, %v1486_v9  ;;  %v1382_v26 = vmul.f32 1.442695, %v1320_v15  ;;  %v2103_v57 = vrot.slane %v2102_v60, 4  ;;  %v2110_v58 = vrot.slane %v2109_v25, 4  ;;  %v1639_v34 = vld [vmem:[%s4658_s1 + $0x2e8] sm:$0xff]  ;;  %v1641_v9 = vld [vmem:[%s4658_s1 + $0x2f8] sm:$0xff] }
 0x296   :  { %v2117_v54 = vrot.slane %v2116_v19, 4  ;;  %v1384_v45 = vmul.f32 1.442695, %v1321_v46  ;;  %v2077_v0 = vrot.slane %v2076_v36, 1  ;;  %v2097_v4 = vadd.f32 %v2096_v8, %v2095_v49 }
 0x297   :  { %v2126_v30 = vrot.slane %v2125_v37, 4  ;;  %v1483_v14 = vadd.f32 %v1482_v39, %v1481_v1  ;;  %v4421_v7 = vadd.f32 %v2061_v50, %v2060_v13  ;;  %v4423_v52 = vadd.f32 %v2070_v33, %v2069_v55  ;;  %v1638_v13 = vld [vmem:[%s4658_s1 + $0x2e0] sm:$0xff]  ;;  %v1640_v55 = vld [vmem:[%s4658_s1 + $0x2f0] sm:$0xff] }
 0x298   :  { %v1532_v3 = vmul.f32 %v2672_v2, %v4297_v32  ;;  %v1533_v12 = vmul.f32 %v2672_v2, %v4299_v51  ;;  %v2084_v22 = vrot.slane %v2083_v48, 1  ;;  %v2091_v6 = vrot.slane %v2090_v56, 1 }
 0x299   :  { %v1489_v62 = vrot.slane %v1488_v41, 1  ;;  %2675 = vpow2.f32 %v1382_v26  ;;  %v2104_v32 = vadd.f32 %v2103_v57, %v2102_v60  ;;  %v2111_v59 = vadd.f32 %v2110_v58, %v2109_v25  ;;  %v1642_v60 = vld [vmem:[%s4658_s1 + $0x300] sm:$0xff]  ;;  %v1643_v26 = vld [vmem:[%s4658_s1 + $0x308] sm:$0xff] }
 0x29a   :  { %v2674_v53 = vpop.eup %2673  ;;  %v2118_v51 = vadd.f32 %v2117_v54, %v2116_v19  ;;  %2677 = vpow2.f32 %v1384_v45  ;;  %v2078_v63 = vadd.f32 %v2077_v0, %v2076_v36  ;;  %v2098_v29 = vrot.slane %v2097_v4, 2  ;;  %v1646_v25 = vld [vmem:[%s4658_s1 + $0x320] sm:$0xff]  ;;  %v1648_v0 = vld [vmem:[%s4658_s1 + $0x330] sm:$0xff] }
 0x29b   :  { %v2127_v21 = vadd.f32 %v2126_v30, %v2125_v37  ;;  %2679 = vrcp.f32 %v1483_v14  ;;  %v1762_v28 = vmul.f32 %v1634_v31, %v1532_v3  ;;  %v1763_v49 = vmul.f32 %v1635_v38, %v1532_v3  ;;  %v1649_v38 = vld [vmem:[%s4658_s1 + $0x338] sm:$0xff] }
 0x29c   :  { %v1766_v1 = vmul.f32 %v1638_v13, %v1533_v12  ;;  %v1767_v24 = vmul.f32 %v1639_v34, %v1533_v12  ;;  %v1765_v44 = vmul.f32 %v1637_v40, %v1532_v3  ;;  %v1769_v23 = vmul.f32 %v1641_v9, %v1533_v12 }
 0x29d   :  { %v1535_v16 = vmul.f32 %v2674_v53, %v4307_v18  ;;  %v1536_v10 = vmul.f32 %v2674_v53, %v4310_v35  ;;  %v2105_v42 = vrot.slane %v2104_v32, 2  ;;  %v2112_v17 = vrot.slane %v2111_v59, 2 }
 0x29e   :  { %v2119_v15 = vrot.slane %v2118_v51, 2  ;;  %v1490_v19 = vadd.f32 %v1489_v62, %v1488_v41  ;;  %v2099_v46 = vadd.f32 %v2098_v29, %v2097_v4  ;;  %v2128_v36 = vrot.slane %v2127_v21, 2 }
 0x29f   :  { %v1764_v8 = vmul.f32 %v1636_v43, %v1532_v3  ;;  %v1768_v37 = vmul.f32 %v1640_v55, %v1533_v12  ;;  %v2085_v39 = vadd.f32 %v2084_v22, %v2083_v48  ;;  %v2092_v18 = vadd.f32 %v2091_v6, %v2090_v56  ;;  %v1644_v48 = vld [vmem:[%s4658_s1 + $0x310] sm:$0xff]  ;;  %v1647_v56 = vld [vmem:[%s4658_s1 + $0x328] sm:$0xff]  ;;  %v1645_v6 = vld [vmem:[%s4658_s1 + $0x318] sm:$0xff] }
 0x2a0   :  { %v2132_v50 = vadd.f32 %v1766_v1, %v1762_v28  ;;  %v2139_v35 = vadd.f32 %v1767_v24, %v1763_v49  ;;  %v2153_v33 = vsel %vm264_vm0, %v1765_v44, 0.0  ;;  %v2154_v2 = vsel %vm264_vm0, %v1769_v23, 0.0 }
 0x2a1   :  { %v1770_v57 = vmul.f32 %v1642_v60, %v1535_v16  ;;  %v1774_v58 = vmul.f32 %v1646_v25, %v1536_v10  ;;  %v2106_v54 = vadd.f32 %v2105_v42, %v2104_v32  ;;  %v2113_v41 = vadd.f32 %v2112_v17, %v2111_v59 }
 0x2a2   :  { %v2120_v45 = vadd.f32 %v2119_v15, %v2118_v51  ;;  %2681 = vrcp.f32 %v1490_v19  ;;  %v2100_v4 = vrot.slane %v2099_v46, 1  ;;  %v2381_v30 = vsel %vm2346_vm2, %v2078_v63, %v4417_v61 }
 0x2a3   :  { %v2129_v14 = vadd.f32 %v2128_v36, %v2127_v21  ;;  %v2146_v31 = vadd.f32 %v1768_v37, %v1764_v8  ;;  %v2133_v3 = vrot.slane %v2132_v50, 4  ;;  %v2140_v12 = vrot.slane %v2139_v35, 4 }
 0x2a4   :  { %v2155_v22 = vadd.f32 %v2154_v2, %v2153_v33  ;;  %v1771_v13 = vmul.f32 %v1643_v26, %v1535_v16  ;;  %v1772_v34 = vmul.f32 %v1644_v48, %v1535_v16  ;;  %v1775_v62 = vmul.f32 %v1647_v56, %v1536_v10  ;;  %v1651_v48 = vld [vmem:[%s4658_s1 + $0x348] sm:$0xff] }
 0x2a5   :  { %v1776_v53 = vmul.f32 %v1648_v0, %v1536_v10  ;;  %v2162_v32 = vadd.f32 %v1774_v58, %v1770_v57  ;;  %v2388_v61 = vsel %vm2346_vm2, %v2085_v39, %v4419_v27  ;;  %v2107_v51 = vrot.slane %v2106_v54, 1  ;;  %v1650_v58 = vld [vmem:[%s4658_s1 + $0x340] sm:$0xff] }
 0x2a6   :  { %v4481_v59 = vpop.eup %2675  ;;  %v2114_v40 = vrot.slane %v2113_v41, 1  ;;  %v2121_v9 = vrot.slane %v2120_v45, 1  ;;  %v2130_v29 = vrot.slane %v2129_v14, 1  ;;  %v2147_v21 = vrot.slane %v2146_v31, 4 }
 0x2a7   :  { %v4485_v63 = vpop.eup %2677  ;;  %v1773_v43 = vmul.f32 %v1645_v6, %v1535_v16  ;;  %v1777_v55 = vmul.f32 %v1649_v38, %v1536_v10  ;;  %v2101_v49 = vadd.f32 %v2100_v4, %v2099_v46  ;;  %v2134_v1 = vadd.f32 %v2133_v3, %v2132_v50  ;;  %v1655_v3 = vld [vmem:[%s4658_s1 + $0x368] sm:$0xff]  ;;  %v1657_v38 = vld [vmem:[%s4658_s1 + $0x378] sm:$0xff] }
 0x2a8   :  { %v2680_v28 = vpop.eup %2679  ;;  %v2141_v24 = vadd.f32 %v2140_v12, %v2139_v35  ;;  %v2156_v44 = vrot.slane %v2155_v22, 4  ;;  %v2395_v23 = vsel %vm2346_vm2, %v2092_v18, %v4421_v7  ;;  %v2163_v42 = vrot.slane %v2162_v32, 4 }
 0x2a9   :  { %v2169_v17 = vadd.f32 %v1775_v62, %v1771_v13  ;;  %v2176_v27 = vadd.f32 %v1776_v53, %v1772_v34  ;;  %v2108_v15 = vadd.f32 %v2107_v51, %v2106_v54  ;;  %v2115_v60 = vadd.f32 %v2114_v40, %v2113_v41  ;;  %v1652_v62 = vld [vmem:[%s4658_s1 + $0x350] sm:$0xff] }
 0x2aa   :  { %v2122_v25 = vadd.f32 %v2121_v9, %v2120_v45  ;;  %v1491_v19 = vadd.f32 %v4485_v63, %v4481_v59  ;;  %v2131_v36 = vadd.f32 %v2130_v29, %v2129_v14  ;;  %v2148_v16 = vadd.f32 %v2147_v21, %v2146_v31  ;;  %v1653_v14 = vld [vmem:[%s4658_s1 + $0x358] sm:$0xff]  ;;  %v1654_v31 = vld [vmem:[%s4658_s1 + $0x360] sm:$0xff] }
 0x2ab   :  { %v2183_v10 = vsel %vm264_vm0, %v1773_v43, 0.0  ;;  %v2184_v46 = vsel %vm264_vm0, %v1777_v55, 0.0  ;;  %v2402_v8 = vsel %vm2346_vm2, %v2101_v49, %v4423_v52  ;;  %v2135_v37 = vrot.slane %v2134_v1, 2  ;;  %v1661_v21 = vld [vmem:[%s4658_s1 + $0x398] sm:$0xff] }
 0x2ac   :  { %v2142_v7 = vrot.slane %v2141_v24, 2  ;;  %v2157_v39 = vadd.f32 %v2156_v44, %v2155_v22  ;;  %v2164_v18 = vadd.f32 %v2163_v42, %v2162_v32  ;;  %v2170_v50 = vrot.slane %v2169_v17, 4  ;;  %v1665_v43 = vld [vmem:[%s4658_s1 + $0x3b8] sm:$0xff]  ;;  %v1658_v42 = vld [vmem:[%s4658_s1 + $0x380] sm:$0xff] }
 0x2ad   :  { %v2177_v35 = vrot.slane %v2176_v27, 4  ;;  %v1538_v33 = vmul.f32 %v2680_v28, %v4348_v5  ;;  %v4497_v2 = vsel %vm2348_vm3, %v2108_v15, %v2381_v30  ;;  %v4500_v26 = vsel %vm2348_vm3, %v2115_v60, %v2388_v61  ;;  %v1662_v60 = vld [vmem:[%s4658_s1 + $0x3a0] sm:$0xff] }
 0x2ae   :  { %v2185_v57 = vadd.f32 %v2184_v46, %v2183_v10  ;;  %v1492_v52 = vrot.slane %v1491_v19, 4  ;;  %v4506_v41 = vsel %vm2348_vm3, %v2122_v25, %v2395_v23  ;;  %v4509_v45 = vsel %vm2348_vm3, %v2131_v36, %v2402_v8  ;;  %v1663_v25 = vld [vmem:[%s4658_s1 + $0x3a8] sm:$0xff] }
 0x2af   :  { %v2682_v54 = vpop.eup %2681  ;;  %v2149_v5 = vrot.slane %v2148_v16, 2  ;;  %v1539_v56 = vmul.f32 %v2680_v28, %v4357_v20  ;;  %v4515_v0 = vadd.f32 %v2135_v37, %v2134_v1  ;;  %v4517_v4 = vadd.f32 %v2142_v7, %v2141_v24 }
 0x2b0   :  { %v2158_v30 = vrot.slane %v2157_v39, 2  ;;  %v1493_v12 = vadd.f32 %v1492_v52, %v1491_v19  ;;  %v2165_v22 = vrot.slane %v2164_v18, 2  ;;  %v2171_v20 = vadd.f32 %v2170_v50, %v2169_v17  ;;  %v1659_v17 = vld [vmem:[%s4658_s1 + $0x388] sm:$0xff]  ;;  %v1664_v19 = vld [vmem:[%s4658_s1 + $0x3b0] sm:$0xff] }
 0x2b1   :  { %v2178_v6 = vadd.f32 %v2177_v35, %v2176_v27  ;;  %v1778_v13 = vmul.f32 %v1650_v58, %v1538_v33  ;;  %v2186_v34 = vrot.slane %v2185_v57, 4  ;;  %v1541_v53 = vmul.f32 %v2682_v54, %v4373_v11  ;;  %v1656_v11 = vld [vmem:[%s4658_s1 + $0x370] sm:$0xff] }
 0x2b2   :  { %v1542_v32 = vmul.f32 %v2682_v54, %v4375_v47  ;;  %v1494_v61 = vrot.slane %v1493_v12, 2  ;;  %v1779_v51 = vmul.f32 %v1651_v48, %v1538_v33  ;;  %v1781_v40 = vmul.f32 %v1653_v14, %v1538_v33  ;;  %v1660_v27 = vld [vmem:[%s4658_s1 + $0x390] sm:$0xff] }
 0x2b3   :  { %v1782_v9 = vmul.f32 %v1654_v31, %v1539_v56  ;;  %v1783_v29 = vmul.f32 %v1655_v3, %v1539_v56  ;;  %v4542_v55 = vadd.f32 %v2149_v5, %v2148_v16  ;;  %v4544_v28 = vadd.f32 %v2158_v30, %v2157_v39 }
 0x2b4   :  { %v1785_v47 = vmul.f32 %v1657_v38, %v1539_v56  ;;  %v1495_v49 = vadd.f32 %v1494_v61, %v1493_v12  ;;  %v2166_v1 = vadd.f32 %v2165_v22, %v2164_v18  ;;  %v2172_v24 = vrot.slane %v2171_v20, 2 }
 0x2b5   :  { %v2179_v44 = vrot.slane %v2178_v6, 2  ;;  %v1780_v23 = vmul.f32 %v1652_v62, %v1538_v33  ;;  %v2187_v15 = vadd.f32 %v2186_v34, %v2185_v57  ;;  %v1789_v36 = vmul.f32 %v1661_v21, %v1541_v53 }
 0x2b6   :  { %v1793_v16 = vmul.f32 %v1665_v43, %v1542_v32  ;;  %v1496_v10 = vrot.slane %v1495_v49, 1  ;;  %v1784_v46 = vmul.f32 %v1656_v11, %v1539_v56  ;;  %v2192_v8 = vadd.f32 %v1782_v9, %v1778_v13 }
 0x2b7   :  { %v2199_v37 = vadd.f32 %v1783_v29, %v1779_v51  ;;  %v2213_v7 = vsel %vm264_vm0, %v1781_v40, 0.0  ;;  %v2214_v39 = vsel %vm264_vm0, %v1785_v47, 0.0  ;;  %v1786_v18 = vmul.f32 %v1658_v42, %v1541_v53 }
 0x2b8   :  { %v1787_v50 = vmul.f32 %v1659_v17, %v1541_v53  ;;  %v1497_v35 = vadd.f32 %v1496_v10, %v1495_v49  ;;  %v1788_v33 = vmul.f32 %v1660_v27, %v1541_v53  ;;  %v1790_v57 = vmul.f32 %v1662_v60, %v1542_v32 }
 0x2b9   :  { %v1791_v58 = vmul.f32 %v1663_v25, %v1542_v32  ;;  %v1792_v52 = vmul.f32 %v1664_v19, %v1542_v32  ;;  %v2173_v54 = vadd.f32 %v2172_v24, %v2171_v20  ;;  %v2243_v5 = vsel %vm264_vm0, %v1789_v36, 0.0 }
 0x2ba   :  { %v2244_v48 = vsel %vm264_vm0, %v1793_v16, 0.0  ;;  %2683 = vrcp.f32 %v1497_v35  ;;  %v2180_v56 = vadd.f32 %v2179_v44, %v2178_v6  ;;  %v2188_v30 = vrot.slane %v2187_v15, 2 }
 0x2bb   :  { %v2193_v14 = vrot.slane %v2192_v8, 4  ;;  %v2206_v31 = vadd.f32 %v1784_v46, %v1780_v23  ;;  %v2137_v3 = vrot.slane %v4515_v0, 1  ;;  %v2144_v12 = vrot.slane %v4517_v4, 1 }
 0x2bc   :  { %v2200_v22 = vrot.slane %v2199_v37, 4  ;;  %v2215_v38 = vadd.f32 %v2214_v39, %v2213_v7  ;;  %v2222_v13 = vadd.f32 %v1790_v57, %v1786_v18  ;;  %v2229_v34 = vadd.f32 %v1791_v58, %v1787_v50  ;;  %v1667_v39 = vld [vmem:[%s4658_s1 + $0x3c8] sm:$0xff]  ;;  %v1669_v57 = vld [vmem:[%s4658_s1 + $0x3d8] sm:$0xff]  ;;  %v1670_v58 = vld [vmem:[%s4658_s1 + $0x3e0] sm:$0xff] }
 0x2bd   :  { %v2236_v62 = vadd.f32 %v1792_v52, %v1788_v33  ;;  %v2245_v53 = vadd.f32 %v2244_v48, %v2243_v5  ;;  %v2151_v20 = vrot.slane %v4542_v55, 1  ;;  %v2160_v32 = vrot.slane %v4544_v28, 1  ;;  %v1668_v33 = vld [vmem:[%s4658_s1 + $0x3d0] sm:$0xff]  ;;  %v1671_v5 = vld [vmem:[%s4658_s1 + $0x3e8] sm:$0xff] }
 0x2be   :  { %v2167_v61 = vrot.slane %v2166_v1, 1  ;;  %v2174_v51 = vrot.slane %v2173_v54, 1  ;;  %v2181_v6 = vrot.slane %v2180_v56, 1  ;;  %v2189_v40 = vadd.f32 %v2188_v30, %v2187_v15  ;;  %v1672_v48 = vld [vmem:[%s4658_s1 + $0x3f0] sm:$0xff] }
 0x2bf   :  { %v2194_v9 = vadd.f32 %v2193_v14, %v2192_v8  ;;  %v2207_v29 = vrot.slane %v2206_v31, 4  ;;  %v2138_v21 = vadd.f32 %v2137_v3, %v4515_v0  ;;  %v2145_v43 = vadd.f32 %v2144_v12, %v4517_v4 }
 0x2c0   :  { %v2201_v11 = vadd.f32 %v2200_v22, %v2199_v37  ;;  %v2216_v47 = vrot.slane %v2215_v38, 4  ;;  %v2223_v49 = vrot.slane %v2222_v13, 4  ;;  %v2230_v24 = vrot.slane %v2229_v34, 4 }
 0x2c1   :  { %v2237_v44 = vrot.slane %v2236_v62, 4  ;;  %v2246_v23 = vrot.slane %v2245_v53, 4  ;;  %v2152_v42 = vadd.f32 %v2151_v20, %v4542_v55  ;;  %v2161_v17 = vadd.f32 %v2160_v32, %v4544_v28 }
 0x2c2   :  { %v2168_v27 = vadd.f32 %v2167_v61, %v2166_v1  ;;  %v2175_v60 = vadd.f32 %v2174_v51, %v2173_v54  ;;  %v2182_v25 = vadd.f32 %v2181_v6, %v2180_v56  ;;  %v2190_v15 = vrot.slane %v2189_v40, 1  ;;  %v1673_v56 = vld [vmem:[%s4658_s1 + $0x3f8] sm:$0xff] }
 0x2c3   :  { %v2195_v19 = vrot.slane %v2194_v9, 2  ;;  %v2208_v36 = vadd.f32 %v2207_v29, %v2206_v31  ;;  %v2383_v0 = vsel %vm2350_vm4, %v2138_v21, %v4497_v2  ;;  %v2390_v4 = vsel %vm2350_vm4, %v2145_v43, %v4500_v26  ;;  %v1666_v26 = vld [vmem:[%s4658_s1 + $0x3c0] sm:$0xff] }
 0x2c4   :  { %v2202_v16 = vrot.slane %v2201_v11, 2  ;;  %v2217_v10 = vadd.f32 %v2216_v47, %v2215_v38  ;;  %v2224_v46 = vadd.f32 %v2223_v49, %v2222_v13  ;;  %v2231_v8 = vadd.f32 %v2230_v24, %v2229_v34 }
 0x2c5   :  { %v2238_v37 = vadd.f32 %v2237_v44, %v2236_v62  ;;  %v2247_v55 = vadd.f32 %v2246_v23, %v2245_v53  ;;  %v2397_v28 = vsel %vm2350_vm4, %v2152_v42, %v4506_v41  ;;  %v2404_v1 = vsel %vm2350_vm4, %v2161_v17, %v4509_v45 }
 0x2c6   :  { %v4588_v7 = vsel %vm2352_vm5, %v2168_v27, %v2383_v0  ;;  %v4591_v2 = vsel %vm2352_vm5, %v2175_v60, %v2390_v4  ;;  %v2191_v50 = vadd.f32 %v2190_v15, %v2189_v40  ;;  %v4600_v41 = vsel %vm2352_vm5, %v2182_v25, %v2397_v28 }
 0x2c7   :  { %v2684_v18 = vpop.eup %2683  ;;  %v2196_v45 = vadd.f32 %v2195_v19, %v2194_v9  ;;  %v2209_v35 = vrot.slane %v2208_v36, 2  ;;  %v2203_v52 = vadd.f32 %v2202_v16, %v2201_v11  ;;  %v2218_v54 = vrot.slane %v2217_v10, 2 }
 0x2c8   :  { %v1544_v30 = vmul.f32 %v2684_v18, %v4481_v59  ;;  %v1545_v14 = vmul.f32 %v2684_v18, %v4485_v63  ;;  %v2225_v31 = vrot.slane %v2224_v46, 2  ;;  %v2232_v3 = vrot.slane %v2231_v8, 2 }
 0x2c9   :  { %v2239_v12 = vrot.slane %v2238_v37, 2  ;;  %v2248_v22 = vrot.slane %v2247_v55, 2  ;;  %v2405_v51 = vsel %vm2352_vm5, %v2191_v50, %v2404_v1  ;;  %v2210_v6 = vadd.f32 %v2209_v35, %v2208_v36 }
 0x2ca   :  { %v1794_v38 = vmul.f32 %v1666_v26, %v1544_v30  ;;  %v1795_v13 = vmul.f32 %v1667_v39, %v1544_v30  ;;  %v1796_v34 = vmul.f32 %v1668_v33, %v1544_v30  ;;  %v1797_v62 = vmul.f32 %v1669_v57, %v1544_v30 }
 0x2cb   :  { %v1798_v53 = vmul.f32 %v1670_v58, %v1545_v14  ;;  %v1799_v20 = vmul.f32 %v1671_v5, %v1545_v14  ;;  %v1800_v32 = vmul.f32 %v1672_v48, %v1545_v14  ;;  %v1801_v61 = vmul.f32 %v1673_v56, %v1545_v14 }
 0x2cc   :  { %v2219_v40 = vadd.f32 %v2218_v54, %v2217_v10  ;;  %v2273_v59 = vsel %vm264_vm0, %v1797_v62, 0.0  ;;  %v2226_v43 = vadd.f32 %v2225_v31, %v2224_v46  ;;  %v2233_v11 = vadd.f32 %v2232_v3, %v2231_v8 }
 0x2cd   :  { %v2252_v9 = vadd.f32 %v1798_v53, %v1794_v38  ;;  %v2259_v63 = vadd.f32 %v1799_v20, %v1795_v13  ;;  %v2266_v29 = vadd.f32 %v1800_v32, %v1796_v34  ;;  %v2274_v21 = vsel %vm264_vm0, %v1801_v61, 0.0 }
 0x2ce   :  { %v2240_v47 = vadd.f32 %v2239_v12, %v2238_v37  ;;  %v2275_v49 = vadd.f32 %v2274_v21, %v2273_v59  ;;  %v2249_v24 = vadd.f32 %v2248_v22, %v2247_v55  ;;  %v2197_v17 = vrot.slane %v2196_v45, 1 }
 0x2cf   :  { %v2253_v44 = vrot.slane %v2252_v9, 4  ;;  %v2260_v23 = vrot.slane %v2259_v63, 4  ;;  %v2267_v42 = vrot.slane %v2266_v29, 4  ;;  %v2204_v27 = vrot.slane %v2203_v52, 1 }
 0x2d0   :  { %v2211_v60 = vrot.slane %v2210_v6, 1  ;;  %v2276_v25 = vrot.slane %v2275_v49, 4  ;;  %v2220_v15 = vrot.slane %v2219_v40, 1  ;;  %v2227_v4 = vrot.slane %v2226_v43, 1 }
 0x2d1   :  { %v2254_v19 = vadd.f32 %v2253_v44, %v2252_v9  ;;  %v2261_v36 = vadd.f32 %v2260_v23, %v2259_v63  ;;  %v2268_v0 = vadd.f32 %v2267_v42, %v2266_v29  ;;  %v2234_v16 = vrot.slane %v2233_v11, 1 }
 0x2d2   :  { %v2241_v10 = vrot.slane %v2240_v47, 1  ;;  %v2277_v28 = vadd.f32 %v2276_v25, %v2275_v49  ;;  %v2250_v46 = vrot.slane %v2249_v24, 1  ;;  %v2198_v55 = vadd.f32 %v2197_v17, %v2196_v45 }
 0x2d3   :  { %v2255_v8 = vrot.slane %v2254_v19, 2  ;;  %v2262_v37 = vrot.slane %v2261_v36, 2  ;;  %v2269_v1 = vrot.slane %v2268_v0, 2  ;;  %v2205_v26 = vadd.f32 %v2204_v27, %v2203_v52 }
 0x2d4   :  { %v2212_v39 = vadd.f32 %v2211_v60, %v2210_v6  ;;  %v2278_v18 = vrot.slane %v2277_v28, 2  ;;  %v2221_v50 = vadd.f32 %v2220_v15, %v2219_v40  ;;  %v2228_v58 = vadd.f32 %v2227_v4, %v2226_v43 }
 0x2d5   :  { %v2256_v35 = vadd.f32 %v2255_v8, %v2254_v19  ;;  %v2263_v33 = vadd.f32 %v2262_v37, %v2261_v36  ;;  %v2270_v57 = vadd.f32 %v2269_v1, %v2268_v0  ;;  %v2235_v54 = vadd.f32 %v2234_v16, %v2233_v11 }
 0x2d6   :  { %v2242_v5 = vadd.f32 %v2241_v10, %v2240_v47  ;;  %v2279_v48 = vadd.f32 %v2278_v18, %v2277_v28  ;;  %v2251_v56 = vadd.f32 %v2250_v46, %v2249_v24  ;;  %v2385_v3 = vsel %vm2354_vm6, %v2198_v55, %v4588_v7 }
 0x2d7   :  { %v2257_v30 = vrot.slane %v2256_v35, 1  ;;  %v2264_v14 = vrot.slane %v2263_v33, 1  ;;  %v2271_v31 = vrot.slane %v2270_v57, 1  ;;  %v2392_v45 = vsel %vm2354_vm6, %v2205_v26, %v4591_v2 }
 0x2d8   :  { %v2399_v52 = vsel %vm2354_vm6, %v2212_v39, %v4600_v41  ;;  %v2280_v12 = vrot.slane %v2279_v48, 1  ;;  %v2406_v22 = vsel %vm2354_vm6, %v2221_v50, %v2405_v51  ;;  %v2386_v62 = vsel %vm2356_vm7, %v2228_v58, %v2385_v3 }
 0x2d9   :  { %v2258_v38 = vadd.f32 %v2257_v30, %v2256_v35  ;;  %v2265_v13 = vadd.f32 %v2264_v14, %v2263_v33  ;;  %v2272_v34 = vadd.f32 %v2271_v31, %v2270_v57  ;;  %v2393_v53 = vsel %vm2356_vm7, %v2235_v54, %v2392_v45 }
 0x2da   :  { %v2400_v20 = vsel %vm2356_vm7, %v2242_v5, %v2399_v52  ;;  %v2281_v32 = vadd.f32 %v2280_v12, %v2279_v48  ;;  %v2407_v7 = vsel %vm2356_vm7, %v2251_v56, %v2406_v22 }
 0x2db   :  { %v2387_v2 = vsel %vm2358_vm8, %v2258_v38, %v2386_v62  ;;  %v2394_v61 = vsel %vm2358_vm8, %v2265_v13, %v2393_v53  ;;  %v2401_v41 = vsel %vm2358_vm8, %v2272_v34, %v2400_v20 }
 0x2dc   :  { %v2408_v51 = vsel %vm2358_vm8, %v2281_v32, %v2407_v7  ;;  %2421 = vst [vmem:[%s4659_s6 + $0x20] sm:$0xff] %v2387_v2  ;;  %2422 = vst [vmem:[%s4659_s6 + $0x28] sm:$0xff] %v2394_v61 }
 0x2dd   :  { %2423 = vst [vmem:[%s4659_s6 + $0x30] sm:$0xff] %v2401_v41  ;;  %2424 = vst.msk [vmem:[%s4659_s6 + $0x38] sm:$0xff] %vm264_vm0, %v2408_v51 }

// kernel: forward.5
= control target key start
LH: loop header
LB: loop body
LE: loop exit
PB: predicated region body
PF: predicated region fallthrough
CT: control target
= control target key end

     0   :  { %vm168_vm0 = vcmask 130048   ;;  %vm463_vm1 = vcmask 588800   ;;  %vm949_vm3 = vcmask 1041409   ;;  %vm951_vm4 = vcmask 1042434   ;;  %s1822_s2 = inlined_call_operand.vmem [shape: f32[400,200], index: 2, kind: input, shape index: {}]   ;;  %s1823_s0 = inlined_call_operand.vmem [shape: f32[64,400], index: 0, kind: input, shape index: {}]   ;;  %s1824_s3 = inlined_call_operand.vmem [shape: f32[1,200], index: 3, kind: input, shape index: {}]   ;;  %s1825_s4 = inlined_call_operand.vmem [shape: f32[1,200], index: 4, kind: input, shape index: {}]   ;;  %s1826_s5 = inlined_call_operand.<no memory space> [shape: f32[1,1], index: 5, kind: input, shape index: {}]   ;;  %s1827_s1 = inlined_call_operand.vmem [shape: f32[8,8,400], index: 1, kind: input, shape index: {}]   ;;  %s1828_s6 = inlined_call_operand.vmem [shape: f32[8,400], index: 6, kind: output, shape index: {}]  }
   0x1   :  { %v87_v0 = vld [vmem:[%s1822_s2 + $0xf8] sm:$0xff]  ;;  %v86_v1 = vld [vmem:[%s1822_s2 + $0xf0] sm:$0xff]  ;;  %v85_v2 = vld [vmem:[%s1822_s2 + $0xe8] sm:$0xff]  ;;  %vm953_vm5 = vcmask 1043459   ;;  %vm955_vm6 = vcmask 1044484   ;;  %vm957_vm7 = vcmask 1045509  }
   0x2   :  { %193 = vmatprep.subr.mxu0 %v87_v0  ;;  %v84_v3 = vld [vmem:[%s1822_s2 + $0xe0] sm:$0xff]  ;;  %v83_v4 = vld [vmem:[%s1822_s2 + $0xd8] sm:$0xff]  ;;  %v82_v5 = vld [vmem:[%s1822_s2 + $0xd0] sm:$0xff]  ;;  %vm959_vm8 = vcmask 1046534   ;;  %vm961_vm9 = vcmask 1047559  }
   0x3   :  { %194 = vmatpush1.msra.mxu0 %v86_v1  ;;  %v81_v6 = vld [vmem:[%s1822_s2 + $0xc8] sm:$0xff]  ;;  %v80_v7 = vld [vmem:[%s1822_s2 + $0xc0] sm:$0xff]  ;;  %v79_v8 = vld [vmem:[%s1822_s2 + $0xb8] sm:$0xff] }
   0x4   :  { %195 = vmatprep.subr.mxu0 %v85_v2  ;;  %v78_v9 = vld [vmem:[%s1822_s2 + $0xb0] sm:$0xff]  ;;  %v77_v10 = vld [vmem:[%s1822_s2 + $0xa8] sm:$0xff]  ;;  %v76_v11 = vld [vmem:[%s1822_s2 + $0xa0] sm:$0xff] }
   0x5   :  { %196 = vmatpush1.msra.mxu0 %v84_v3  ;;  %v151_v12 = vld [vmem:[%s1822_s2 + $0x2f8] sm:$0xff]  ;;  %v150_v14 = vld [vmem:[%s1822_s2 + $0x2f0] sm:$0xff]  ;;  %v149_v16 = vld [vmem:[%s1822_s2 + $0x2e8] sm:$0xff] }
   0x6   :  { %197 = vmatprep.subr.mxu0 %v83_v4  ;;  %v75_v13 = vld [vmem:[%s1822_s2 + $0x98] sm:$0xff]  ;;  %306 = vmatprep.subr.mxu1 %v151_v12  ;;  %v74_v15 = vld [vmem:[%s1822_s2 + $0x90] sm:$0xff]  ;;  %v148_v17 = vld [vmem:[%s1822_s2 + $0x2e0] sm:$0xff] }
   0x7   :  { %198 = vmatpush1.msra.mxu0 %v82_v5  ;;  %307 = vmatpush1.msra.mxu1 %v150_v14  ;;  %v73_v18 = vld [vmem:[%s1822_s2 + $0x88] sm:$0xff]  ;;  %v147_v19 = vld [vmem:[%s1822_s2 + $0x2d8] sm:$0xff]  ;;  %v72_v20 = vld [vmem:[%s1822_s2 + $0x80] sm:$0xff] }
   0x8   :  { %199 = vmatprep.subr.mxu0 %v81_v6  ;;  %308 = vmatprep.subr.mxu1 %v149_v16  ;;  %v146_v21 = vld [vmem:[%s1822_s2 + $0x2d0] sm:$0xff]  ;;  %v145_v22 = vld [vmem:[%s1822_s2 + $0x2c8] sm:$0xff]  ;;  %v71_v23 = vld [vmem:[%s1822_s2 + $0x78] sm:$0xff] }
   0x9   :  { %200 = vmatpush1.msra.mxu0 %v80_v7  ;;  %309 = vmatpush1.msra.mxu1 %v148_v17  ;;  %v144_v24 = vld [vmem:[%s1822_s2 + $0x2c0] sm:$0xff]  ;;  %v70_v25 = vld [vmem:[%s1822_s2 + $0x70] sm:$0xff]  ;;  %v143_v26 = vld [vmem:[%s1822_s2 + $0x2b8] sm:$0xff] }
   0xa   :  { %201 = vmatprep.subr.mxu0 %v79_v8  ;;  %310 = vmatprep.subr.mxu1 %v147_v19  ;;  %v69_v27 = vld [vmem:[%s1822_s2 + $0x68] sm:$0xff]  ;;  %v142_v28 = vld [vmem:[%s1822_s2 + $0x2b0] sm:$0xff]  ;;  %v68_v29 = vld [vmem:[%s1822_s2 + $0x60] sm:$0xff] }
   0xb   :  { %202 = vmatpush1.msra.mxu0 %v78_v9  ;;  %311 = vmatpush1.msra.mxu1 %v146_v21  ;;  %v141_v30 = vld [vmem:[%s1822_s2 + $0x2a8] sm:$0xff]  ;;  %v67_v31 = vld [vmem:[%s1822_s2 + $0x58] sm:$0xff]  ;;  %v140_v32 = vld [vmem:[%s1822_s2 + $0x2a0] sm:$0xff] }
   0xc   :  { %203 = vmatprep.subr.mxu0 %v77_v10  ;;  %312 = vmatprep.subr.mxu1 %v145_v22  ;;  %v66_v33 = vld [vmem:[%s1822_s2 + $0x50] sm:$0xff]  ;;  %v139_v34 = vld [vmem:[%s1822_s2 + $0x298] sm:$0xff]  ;;  %v65_v35 = vld [vmem:[%s1822_s2 + $0x48] sm:$0xff] }
   0xd   :  { %204 = vmatpush1.msra.mxu0 %v76_v11  ;;  %313 = vmatpush1.msra.mxu1 %v144_v24  ;;  %v138_v36 = vld [vmem:[%s1822_s2 + $0x290] sm:$0xff]  ;;  %v64_v37 = vld [vmem:[%s1822_s2 + $0x40] sm:$0xff]  ;;  %v137_v38 = vld [vmem:[%s1822_s2 + $0x288] sm:$0xff] }
   0xe   :  { %205 = vmatprep.subr.mxu0 %v75_v13  ;;  %314 = vmatprep.subr.mxu1 %v143_v26  ;;  %v63_v39 = vld [vmem:[%s1822_s2 + $0x38] sm:$0xff]  ;;  %v136_v40 = vld [vmem:[%s1822_s2 + $0x280] sm:$0xff]  ;;  %v62_v41 = vld [vmem:[%s1822_s2 + $0x30] sm:$0xff] }
   0xf   :  { %206 = vmatpush1.msra.mxu0 %v74_v15  ;;  %315 = vmatpush1.msra.mxu1 %v142_v28  ;;  %v135_v42 = vld [vmem:[%s1822_s2 + $0x278] sm:$0xff]  ;;  %v61_v43 = vld [vmem:[%s1822_s2 + $0x28] sm:$0xff]  ;;  %v134_v44 = vld [vmem:[%s1822_s2 + $0x270] sm:$0xff] }
  0x10   :  { %207 = vmatprep.subr.mxu0 %v73_v18  ;;  %316 = vmatprep.subr.mxu1 %v141_v30  ;;  %v60_v45 = vld [vmem:[%s1822_s2 + $0x20] sm:$0xff]  ;;  %v133_v46 = vld [vmem:[%s1822_s2 + $0x268] sm:$0xff]  ;;  %v59_v47 = vld [vmem:[%s1822_s2 + $0x18] sm:$0xff] }
  0x11   :  { %208 = vmatpush1.msra.mxu0 %v72_v20  ;;  %317 = vmatpush1.msra.mxu1 %v140_v32  ;;  %v132_v48 = vld [vmem:[%s1822_s2 + $0x260] sm:$0xff]  ;;  %v58_v49 = vld [vmem:[%s1822_s2 + $0x10] sm:$0xff]  ;;  %v131_v50 = vld [vmem:[%s1822_s2 + $0x258] sm:$0xff] }
  0x12   :  { %209 = vmatprep.subr.mxu0 %v71_v23  ;;  %318 = vmatprep.subr.mxu1 %v139_v34  ;;  %v57_v51 = vld [vmem:[%s1822_s2 + $0x8] sm:$0xff]  ;;  %v130_v52 = vld [vmem:[%s1822_s2 + $0x250] sm:$0xff]  ;;  %v56_v53 = vld [vmem:[%s1822_s2] sm:$0xff] }
  0x13   :  { %210 = vmatpush1.msra.mxu0 %v70_v25  ;;  %319 = vmatpush1.msra.mxu1 %v138_v36  ;;  %v129_v54 = vld [vmem:[%s1822_s2 + $0x248] sm:$0xff]  ;;  %v119_v55 = vld [vmem:[%s1822_s2 + $0x1f8] sm:$0xff]  ;;  %v128_v56 = vld [vmem:[%s1822_s2 + $0x240] sm:$0xff] }
  0x14   :  { %211 = vmatprep.subr.mxu0 %v69_v27  ;;  %320 = vmatprep.subr.mxu1 %v137_v38  ;;  %v118_v57 = vld [vmem:[%s1822_s2 + $0x1f0] sm:$0xff]  ;;  %v127_v58 = vld [vmem:[%s1822_s2 + $0x238] sm:$0xff]  ;;  %v117_v59 = vld [vmem:[%s1822_s2 + $0x1e8] sm:$0xff] }
  0x15   :  { %212 = vmatpush1.msra.mxu0 %v68_v29  ;;  %321 = vmatpush1.msra.mxu1 %v136_v40  ;;  %v126_v60 = vld [vmem:[%s1822_s2 + $0x230] sm:$0xff]  ;;  %v116_v61 = vld [vmem:[%s1822_s2 + $0x1e0] sm:$0xff]  ;;  %v125_v62 = vld [vmem:[%s1822_s2 + $0x228] sm:$0xff] }
  0x16   :  { %213 = vmatprep.subr.mxu0 %v67_v31  ;;  %322 = vmatprep.subr.mxu1 %v135_v42  ;;  %v115_v63 = vld [vmem:[%s1822_s2 + $0x1d8] sm:$0xff]  ;;  %v124_v0 = vld [vmem:[%s1822_s2 + $0x220] sm:$0xff]  ;;  %v114_v1 = vld [vmem:[%s1822_s2 + $0x1d0] sm:$0xff] }
  0x17   :  { %214 = vmatpush1.msra.mxu0 %v66_v33  ;;  %323 = vmatpush1.msra.mxu1 %v134_v44  ;;  %v123_v2 = vld [vmem:[%s1822_s2 + $0x218] sm:$0xff]  ;;  %v113_v3 = vld [vmem:[%s1822_s2 + $0x1c8] sm:$0xff]  ;;  %v122_v4 = vld [vmem:[%s1822_s2 + $0x210] sm:$0xff] }
  0x18   :  { %215 = vmatprep.subr.mxu0 %v65_v35  ;;  %324 = vmatprep.subr.mxu1 %v133_v46  ;;  %v112_v5 = vld [vmem:[%s1822_s2 + $0x1c0] sm:$0xff]  ;;  %v121_v6 = vld [vmem:[%s1822_s2 + $0x208] sm:$0xff]  ;;  %v111_v7 = vld [vmem:[%s1822_s2 + $0x1b8] sm:$0xff] }
  0x19   :  { %216 = vmatpush1.msra.mxu0 %v64_v37  ;;  %325 = vmatpush1.msra.mxu1 %v132_v48  ;;  %v120_v8 = vld [vmem:[%s1822_s2 + $0x200] sm:$0xff]  ;;  %v110_v9 = vld [vmem:[%s1822_s2 + $0x1b0] sm:$0xff]  ;;  %v155_v10 = vld [vmem:[%s1822_s2 + $0x318] sm:$0xff] }
  0x1a   :  { %217 = vmatprep.subr.mxu0 %v63_v39  ;;  %326 = vmatprep.subr.mxu1 %v131_v50  ;;  %v109_v11 = vld [vmem:[%s1822_s2 + $0x1a8] sm:$0xff]  ;;  %v154_v12 = vld [vmem:[%s1822_s2 + $0x310] sm:$0xff]  ;;  %v108_v13 = vld [vmem:[%s1822_s2 + $0x1a0] sm:$0xff] }
  0x1b   :  { %218 = vmatpush1.msra.mxu0 %v62_v41  ;;  %327 = vmatpush1.msra.mxu1 %v130_v52  ;;  %v153_v14 = vld [vmem:[%s1822_s2 + $0x308] sm:$0xff]  ;;  %v107_v15 = vld [vmem:[%s1822_s2 + $0x198] sm:$0xff]  ;;  %v106_v17 = vld [vmem:[%s1822_s2 + $0x190] sm:$0xff] }
  0x1c   :  { %219 = vmatprep.subr.mxu0 %v61_v43  ;;  %328 = vmatprep.subr.mxu1 %v129_v54  ;;  %v25_v16 = vld [vmem:[%s1823_s0 + $0x8] sm:$0xff]  ;;  %v152_v18 = vld [vmem:[%s1822_s2 + $0x300] sm:$0xff]  ;;  %v27_v20 = vld [vmem:[%s1823_s0 + $0x18] sm:$0xff] }
  0x1d   :  { %220 = vmatpush1.msra.mxu0 %v60_v45  ;;  %329 = vmatpush1.msra.mxu1 %v128_v56  ;;  %v105_v19 = vld [vmem:[%s1822_s2 + $0x188] sm:$0xff]  ;;  %v104_v21 = vld [vmem:[%s1822_s2 + $0x180] sm:$0xff]  ;;  %v26_v22 = vld [vmem:[%s1823_s0 + $0x10] sm:$0xff] }
  0x1e   :  { %221 = vmatprep.subr.mxu0 %v59_v47  ;;  %330 = vmatprep.subr.mxu1 %v127_v58  ;;  %v103_v23 = vld [vmem:[%s1822_s2 + $0x178] sm:$0xff]  ;;  %v102_v25 = vld [vmem:[%s1822_s2 + $0x170] sm:$0xff]  ;;  %v101_v26 = vld [vmem:[%s1822_s2 + $0x168] sm:$0xff] }
  0x1f   :  { %222 = vmatpush1.msra.mxu0 %v58_v49  ;;  %331 = vmatpush1.msra.mxu1 %v126_v60  ;;  %v31_v24 = vld [vmem:[%s1823_s0 + $0x38] sm:$0xff]  ;;  %v100_v27 = vld [vmem:[%s1822_s2 + $0x160] sm:$0xff]  ;;  %v30_v28 = vld [vmem:[%s1823_s0 + $0x30] sm:$0xff] }
  0x20   :  { %223 = vmatprep.subr.mxu0 %v57_v51  ;;  %332 = vmatprep.subr.mxu1 %v125_v62  ;;  %v99_v29 = vld [vmem:[%s1822_s2 + $0x158] sm:$0xff]  ;;  %v98_v31 = vld [vmem:[%s1822_s2 + $0x150] sm:$0xff]  ;;  %v97_v32 = vld [vmem:[%s1822_s2 + $0x148] sm:$0xff] }
  0x21   :  { %224 = vmatpush1.msra.mxu0 %v56_v53  ;;  %333 = vmatpush1.msra.mxu1 %v124_v0  ;;  %v35_v30 = vld [vmem:[%s1823_s0 + $0x58] sm:$0xff]  ;;  %v96_v33 = vld [vmem:[%s1822_s2 + $0x140] sm:$0xff]  ;;  %v34_v34 = vld [vmem:[%s1823_s0 + $0x50] sm:$0xff] }
  0x22   :  { %225 = vmatprep.subr.mxu0 %v119_v55  ;;  %334 = vmatprep.subr.mxu1 %v123_v2  ;;  %v95_v35 = vld [vmem:[%s1822_s2 + $0x138] sm:$0xff]  ;;  %v94_v37 = vld [vmem:[%s1822_s2 + $0x130] sm:$0xff]  ;;  %v93_v38 = vld [vmem:[%s1822_s2 + $0x128] sm:$0xff] }
  0x23   :  { %226 = vmatpush2.msra.mxu0 %v118_v57  ;;  %335 = vmatpush1.msra.mxu1 %v122_v4  ;;  %v39_v36 = vld [vmem:[%s1823_s0 + $0x78] sm:$0xff]  ;;  %v92_v39 = vld [vmem:[%s1822_s2 + $0x120] sm:$0xff]  ;;  %v38_v40 = vld [vmem:[%s1823_s0 + $0x70] sm:$0xff] }
  0x24   :  { %227 = vmatprep.subr.mxu0 %v117_v59  ;;  %336 = vmatprep.subr.mxu1 %v121_v6  ;;  %v91_v41 = vld [vmem:[%s1822_s2 + $0x118] sm:$0xff]  ;;  %v90_v43 = vld [vmem:[%s1822_s2 + $0x110] sm:$0xff]  ;;  %v89_v44 = vld [vmem:[%s1822_s2 + $0x108] sm:$0xff] }
  0x25   :  { %228 = vmatpush2.msra.mxu0 %v116_v61  ;;  %337 = vmatpush1.msra.mxu1 %v120_v8  ;;  %v43_v42 = vld [vmem:[%s1823_s0 + $0x98] sm:$0xff]  ;;  %v88_v45 = vld [vmem:[%s1822_s2 + $0x100] sm:$0xff]  ;;  %v42_v46 = vld [vmem:[%s1823_s0 + $0x90] sm:$0xff] }
  0x26   :  { %229 = vmatprep.subr.mxu0 %v115_v63  ;;  %366 = vmatprep.subr.mxu1 %v155_v10  ;;  %v24_v47 = vld [vmem:[%s1823_s0] sm:$0xff]  ;;  %v47_v48 = vld [vmem:[%s1823_s0 + $0xb8] sm:$0xff]  ;;  %v29_v49 = vld [vmem:[%s1823_s0 + $0x28] sm:$0xff] }
  0x27   :  { %230 = vmatpush2.msra.mxu0 %v114_v1  ;;  %367 = vmatpush2.msra.mxu1 %v154_v12  ;;  %v46_v50 = vld [vmem:[%s1823_s0 + $0xb0] sm:$0xff]  ;;  %v28_v51 = vld [vmem:[%s1823_s0 + $0x20] sm:$0xff]  ;;  %v51_v52 = vld [vmem:[%s1823_s0 + $0xd8] sm:$0xff] }
  0x28   :  { %231 = vmatprep.subr.mxu0 %v113_v3  ;;  %368 = vmatprep.subr.mxu1 %v153_v14  ;;  %v33_v53 = vld [vmem:[%s1823_s0 + $0x48] sm:$0xff]  ;;  %v50_v54 = vld [vmem:[%s1823_s0 + $0xd0] sm:$0xff]  ;;  %v32_v55 = vld [vmem:[%s1823_s0 + $0x40] sm:$0xff] }
  0x29   :  { %232 = vmatpush2.msra.mxu0 %v112_v5  ;;  %257 = vmatprep.mubr.f32.mxu0 %v25_v16  ;;  %v55_v56 = vld [vmem:[%s1823_s0 + $0xf8] sm:$0xff]  ;;  %v37_v57 = vld [vmem:[%s1823_s0 + $0x68] sm:$0xff]  ;;  %v54_v58 = vld [vmem:[%s1823_s0 + $0xf0] sm:$0xff]  ;;  %v158_v5 = vlaneseq }
  0x2a   :  { %233 = vmatprep.subr.mxu0 %v111_v7  ;;  %369 = vmatpush2.msra.mxu1 %v152_v18  ;;  %v36_v59 = vld [vmem:[%s1823_s0 + $0x60] sm:$0xff]  ;;  %v41_v60 = vld [vmem:[%s1823_s0 + $0x88] sm:$0xff] }
  0x2b   :  { %234 = vmatpush2.msra.mxu0 %v110_v9  ;;  %996 = vmatprep.mubr.msk.f32.mxu1 %vm168_vm0, %v27_v20  ;;  %v40_v61 = vld [vmem:[%s1823_s0 + $0x80] sm:$0xff]  ;;  %v45_v62 = vld [vmem:[%s1823_s0 + $0xa8] sm:$0xff]  ;;  %v1507_v8 = vshrl.u32 %v158_v5, 7 }
  0x2c   :  { %235 = vmatprep.subr.mxu0 %v109_v11  ;;  %371 = vmatmul.mubr.f32.vlgmr.msra.gmra.mxu1 %v26_v22  ;;  %v44_v63 = vld [vmem:[%s1823_s0 + $0xa0] sm:$0xff]  ;;  %v49_v0 = vld [vmem:[%s1823_s0 + $0xc8] sm:$0xff] }
  0x2d   :  { %236 = vmatpush2.msra.mxu0 %v108_v13  ;;  %997 = vmatprep.mubr.msk.f32.mxu1 %vm168_vm0, %v31_v24  ;;  %v48_v1 = vld [vmem:[%s1823_s0 + $0xc0] sm:$0xff]  ;;  %v53_v2 = vld [vmem:[%s1823_s0 + $0xe8] sm:$0xff]  ;;  %v160_v11 = vsub.s32 0, %v1507_v8  ;;  %v164_v14 = vsub.s32 1, %v1507_v8  ;;  %vm508_vm2 = vcmp.lt.s32.totalorder %v1507_v8, 4 }
  0x2e   :  { %237 = vmatprep.subr.mxu0 %v107_v15  ;;  %v52_v3 = vld [vmem:[%s1823_s0 + $0xe0] sm:$0xff] }
  0x2f   :  { %238 = vmatpush2.msra.mxu0 %v106_v17  ;;  %v156_v13 = vld [vmem:[%s1824_s3] sm:$0x3] }
  0x30   :  { %239 = vmatprep.subr.mxu0 %v105_v19  ;;  %377 = vmatmul.mubr.f32.gmra.mxu1 %v30_v28  ;;  %v1514_v16 = vrot.slane %v156_v13, %v160_v11  ;;  %v1516_v17 = vrot.slane %v156_v13, %v164_v14 }
  0x31   :  { %240 = vmatpush2.msra.mxu0 %v104_v21  ;;  %998 = vmatprep.mubr.msk.f32.mxu1 %vm168_vm0, %v35_v30 }
  0x32   :  { %241 = vmatprep.subr.mxu0 %v103_v23 }
  0x33   :  { %242 = vmatpush2.msra.mxu0 %v102_v25 }
  0x34   :  { %243 = vmatprep.subr.mxu0 %v101_v26  ;;  %383 = vmatmul.mubr.f32.gmra.mxu1 %v34_v34 }
  0x35   :  { %244 = vmatpush2.msra.mxu0 %v100_v27  ;;  %999 = vmatprep.mubr.msk.f32.mxu1 %vm168_vm0, %v39_v36 }
  0x36   :  { %245 = vmatprep.subr.mxu0 %v99_v29 }
  0x37   :  { %246 = vmatpush2.msra.mxu0 %v98_v31 }
  0x38   :  { %247 = vmatprep.subr.mxu0 %v97_v32  ;;  %389 = vmatmul.mubr.f32.gmra.mxu1 %v38_v40 }
  0x39   :  { %248 = vmatpush2.msra.mxu0 %v96_v33  ;;  %1000 = vmatprep.mubr.msk.f32.mxu1 %vm168_vm0, %v43_v42 }
  0x3a   :  { %249 = vmatprep.subr.mxu0 %v95_v35 }
  0x3b   :  { %250 = vmatpush2.msra.mxu0 %v94_v37 }
  0x3c   :  { %251 = vmatprep.subr.mxu0 %v93_v38  ;;  %395 = vmatmul.mubr.f32.gmra.mxu1 %v42_v46 }
  0x3d   :  { %252 = vmatpush2.msra.mxu0 %v92_v39  ;;  %1001 = vmatprep.mubr.msk.f32.mxu1 %vm168_vm0, %v47_v48 }
  0x3e   :  { %253 = vmatprep.subr.mxu0 %v91_v41 }
  0x3f   :  { %254 = vmatpush2.msra.mxu0 %v90_v43 }
  0x40   :  { %255 = vmatprep.subr.mxu0 %v89_v44  ;;  %401 = vmatmul.mubr.f32.gmra.mxu1 %v46_v50 }
  0x41   :  { %256 = vmatpush2.msra.mxu0 %v88_v45  ;;  %1002 = vmatprep.mubr.msk.f32.mxu1 %vm168_vm0, %v51_v52  ;;  %v435_v45 = vld [vmem:[%s1825_s4] sm:$0x3] }
  0x42   :  { %258 = vmatmul.mubr.f32.vlgmr.msra.gmra.mxu0 %v24_v47  ;;  %v1530_v50 = vrot.slane %v435_v45, %v164_v14  ;;  %v1532_v52 = vrot.slane %v435_v45, %v160_v11 }
  0x43   :  { %263 = vmatprep.mubr.f32.mxu0 %v29_v49 }
  0x44   :  { %407 = vmatmul.mubr.f32.gmra.mxu1 %v50_v54 }
  0x45   :  { %1003 = vmatprep.mubr.msk.f32.mxu1 %vm168_vm0, %v55_v56 }
  0x46   :  { %264 = vmatmul.mubr.f32.gmra.mxu0 %v28_v51 }
  0x47   :  { %269 = vmatprep.mubr.f32.mxu0 %v33_v53 }
  0x48   :  { %413 = vmatmul.mubr.f32.gmra.mxu1 %v54_v58 }
  0x4a   :  { %270 = vmatmul.mubr.f32.gmra.mxu0 %v32_v55 }
  0x4b   :  { %275 = vmatprep.mubr.f32.mxu0 %v37_v57 }
  0x4e   :  { %276 = vmatmul.mubr.f32.gmra.mxu0 %v36_v59 }
  0x4f   :  { %281 = vmatprep.mubr.f32.mxu0 %v41_v60 }
  0x52   :  { %282 = vmatmul.mubr.f32.gmra.mxu0 %v40_v61 }
  0x53   :  { %287 = vmatprep.mubr.f32.mxu0 %v45_v62 }
  0x56   :  { %288 = vmatmul.mubr.f32.gmra.mxu0 %v44_v63 }
  0x57   :  { %293 = vmatprep.mubr.f32.mxu0 %v49_v0 }
  0x5a   :  { %294 = vmatmul.mubr.f32.gmra.mxu0 %v48_v1 }
  0x5b   :  { %299 = vmatprep.mubr.f32.mxu0 %v53_v2 }
  0x5e   :  { %300 = vmatmul.mubr.f32.gmra.mxu0 %v52_v3 }
  0xec   :  { %v372_v4 = vpop.f32.mrf.mxu1 }
  0xee   :  { %v374_v6 = vpop.f32.mrf.mxu1 }
  0xf0   :  { %v378_v7 = vpop.f32.mrf.mxu1 }
  0xf2   :  { %v380_v9 = vpop.f32.mrf.mxu1 }
  0xf4   :  { %v384_v10 = vpop.f32.mrf.mxu1 }
  0xf6   :  { %v386_v12 = vpop.f32.mrf.mxu1 }
  0xf8   :  { %v390_v15 = vpop.f32.mrf.mxu1 }
  0xfa   :  { %v392_v19 = vpop.f32.mrf.mxu1 }
  0xfc   :  { %v396_v25 = vpop.f32.mrf.mxu1 }
  0xfe   :  { %v398_v32 = vpop.f32.mrf.mxu1 }
 0x100   :  { %v402_v39 = vpop.f32.mrf.mxu1 }
 0x102   :  { %v259_v18 = vpop.f32.mrf.mxu0  ;;  %v404_v47 = vpop.f32.mrf.mxu1 }
 0x103   :  { %v260_v20 = vadd.f32 %v259_v18, %v1514_v16 }
 0x104   :  { %v261_v21 = vpop.f32.mrf.mxu0  ;;  %v408_v58 = vpop.f32.mrf.mxu1 }
 0x105   :  { %v373_v22 = vadd.f32 %v372_v4, %v260_v20  ;;  %v262_v23 = vadd.f32 %v261_v21, %v1516_v17 }
 0x106   :  { %v265_v24 = vpop.f32.mrf.mxu0 }
 0x107   :  { %v375_v26 = vadd.f32 %v374_v6, %v262_v23  ;;  %v266_v27 = vadd.f32 %v265_v24, %v1514_v16  ;;  %1004 = vtanh.f32 %v373_v22  ;;  %v410_v6 = vpop.f32.mrf.mxu1 }
 0x108   :  { %v267_v28 = vpop.f32.mrf.mxu0 }
 0x109   :  { %1006 = vtanh.f32 %v375_v26  ;;  %v379_v29 = vadd.f32 %v378_v7, %v266_v27  ;;  %v268_v30 = vadd.f32 %v267_v28, %v1516_v17  ;;  %v414_v22 = vpop.f32.mrf.mxu1 }
 0x10a   :  { %v271_v31 = vpop.f32.mrf.mxu0 }
 0x10b   :  { %v381_v33 = vadd.f32 %v380_v9, %v268_v30  ;;  %v272_v34 = vadd.f32 %v271_v31, %v1514_v16  ;;  %1008 = vtanh.f32 %v379_v29 }
 0x10c   :  { %v273_v35 = vpop.f32.mrf.mxu0 }
 0x10d   :  { %1010 = vtanh.f32 %v381_v33  ;;  %v385_v36 = vadd.f32 %v384_v10, %v272_v34  ;;  %v274_v37 = vadd.f32 %v273_v35, %v1516_v17  ;;  %v416_v34 = vpop.f32.mrf.mxu1 }
 0x10e   :  { %v277_v38 = vpop.f32.mrf.mxu0 }
 0x10f   :  { %v387_v40 = vadd.f32 %v386_v12, %v274_v37  ;;  %v278_v41 = vadd.f32 %v277_v38, %v1514_v16  ;;  %1012 = vtanh.f32 %v385_v36 }
 0x110   :  { %v279_v42 = vpop.f32.mrf.mxu0 }
 0x111   :  { %1014 = vtanh.f32 %v387_v40  ;;  %v391_v43 = vadd.f32 %v390_v15, %v278_v41  ;;  %v280_v44 = vadd.f32 %v279_v42, %v1516_v17 }
 0x112   :  { %v283_v46 = vpop.f32.mrf.mxu0 }
 0x113   :  { %v393_v48 = vadd.f32 %v392_v19, %v280_v44  ;;  %v284_v49 = vadd.f32 %v283_v46, %v1514_v16  ;;  %1016 = vtanh.f32 %v391_v43 }
 0x114   :  { %v285_v51 = vpop.f32.mrf.mxu0  ;;  %v1005_v53 = vpop.eup %1004 }
 0x115   :  { %1018 = vtanh.f32 %v393_v48  ;;  %v397_v54 = vadd.f32 %v396_v25, %v284_v49  ;;  %v286_v55 = vadd.f32 %v285_v51, %v1516_v17  ;;  %v447_v63 = vmul.f32 %v1005_v53, %v1532_v52 }
 0x116   :  { %v1007_v56 = vpop.eup %1006  ;;  %v289_v57 = vpop.f32.mrf.mxu0 }
 0x117   :  { %v399_v59 = vadd.f32 %v398_v32, %v286_v55  ;;  %v290_v60 = vadd.f32 %v289_v57, %v1514_v16  ;;  %v448_v61 = vmul.f32 %v1007_v56, %v1530_v50  ;;  %1020 = vtanh.f32 %v397_v54 }
 0x118   :  { %v291_v62 = vpop.f32.mrf.mxu0  ;;  %v1009_v0 = vpop.eup %1008 }
 0x119   :  { %1022 = vtanh.f32 %v399_v59  ;;  %v403_v1 = vadd.f32 %v402_v39, %v290_v60  ;;  %v292_v2 = vadd.f32 %v291_v62, %v1516_v17  ;;  %v464_v3 = vsel %vm463_vm1, %v448_v61, 0.0 }
 0x11a   :  { %v1011_v4 = vpop.eup %1010  ;;  %v295_v5 = vpop.f32.mrf.mxu0  ;;  %v465_v7 = vadd.f32 %v464_v3, %v447_v63  ;;  %v449_v13 = vmul.f32 %v1009_v0, %v1532_v52 }
 0x11b   :  { %v405_v9 = vadd.f32 %v404_v47, %v292_v2  ;;  %v296_v10 = vadd.f32 %v295_v5, %v1514_v16  ;;  %v450_v11 = vmul.f32 %v1011_v4, %v1530_v50  ;;  %1024 = vtanh.f32 %v403_v1 }
 0x11c   :  { %v297_v12 = vpop.f32.mrf.mxu0  ;;  %466 = vadd.xlane.f32.xlu0 %v465_v7  ;;  %v1013_v14 = vpop.eup %1012  ;;  %v1568_v1 = vstv %s1826_s5 }
 0x11d   :  { %1026 = vtanh.f32 %v405_v9  ;;  %v409_v15 = vadd.f32 %v408_v58, %v296_v10  ;;  %v298_v18 = vadd.f32 %v297_v12, %v1516_v17  ;;  %v468_v19 = vsel %vm463_vm1, %v450_v11, 0.0 }
 0x11e   :  { %v1015_v20 = vpop.eup %1014  ;;  %v301_v21 = vpop.f32.mrf.mxu0  ;;  %v469_v23 = vadd.f32 %v468_v19, %v449_v13  ;;  %v451_v28 = vmul.f32 %v1013_v14, %v1532_v52 }
 0x11f   :  { %v411_v24 = vadd.f32 %v410_v6, %v298_v18  ;;  %v302_v25 = vadd.f32 %v301_v21, %v1514_v16  ;;  %v452_v26 = vmul.f32 %v1015_v20, %v1530_v50  ;;  %1028 = vtanh.f32 %v409_v15 }
 0x120   :  { %v303_v27 = vpop.f32.mrf.mxu0  ;;  %470 = vadd.xlane.f32.xlu0 %v469_v23  ;;  %v1017_v29 = vpop.eup %1016 }
 0x121   :  { %1030 = vtanh.f32 %v411_v24  ;;  %v415_v30 = vadd.f32 %v414_v22, %v302_v25  ;;  %v304_v31 = vadd.f32 %v303_v27, %v1516_v17  ;;  %v472_v32 = vsel %vm463_vm1, %v452_v26, 0.0 }
 0x122   :  { %v1019_v33 = vpop.eup %1018  ;;  %v473_v35 = vadd.f32 %v472_v32, %v451_v28  ;;  %v453_v37 = vmul.f32 %v1017_v29, %v1532_v52 }
 0x123   :  { %v417_v36 = vadd.f32 %v416_v34, %v304_v31  ;;  %v454_v16 = vmul.f32 %v1019_v33, %v1530_v50  ;;  %1032 = vtanh.f32 %v415_v30 }
 0x124   :  { %474 = vadd.xlane.f32.xlu1 %v473_v35  ;;  %v1021_v38 = vpop.eup %1020 }
 0x125   :  { %1034 = vtanh.f32 %v417_v36  ;;  %v476_v39 = vsel %vm463_vm1, %v454_v16, 0.0  ;;  %v455_v42 = vmul.f32 %v1021_v38, %v1532_v52 }
 0x126   :  { %v1023_v40 = vpop.eup %1022  ;;  %v477_v41 = vadd.f32 %v476_v39, %v453_v37 }
 0x127   :  { %v456_v17 = vmul.f32 %v1023_v40, %v1530_v50 }
 0x128   :  { %478 = vadd.xlane.f32.xlu1 %v477_v41  ;;  %v1025_v43 = vpop.eup %1024 }
 0x129   :  { %v480_v44 = vsel %vm463_vm1, %v456_v17, 0.0  ;;  %v457_v48 = vmul.f32 %v1025_v43, %v1532_v52 }
 0x12a   :  { %v1027_v45 = vpop.eup %1026  ;;  %v481_v46 = vadd.f32 %v480_v44, %v455_v42 }
 0x12b   :  { %v458_v47 = vmul.f32 %v1027_v45, %v1530_v50 }
 0x12c   :  { %482 = vadd.xlane.f32.xlu0 %v481_v46  ;;  %v1029_v49 = vpop.eup %1028 }
 0x12d   :  { %v484_v51 = vsel %vm463_vm1, %v458_v47, 0.0  ;;  %v459_v56 = vmul.f32 %v1029_v49, %v1532_v52 }
 0x12e   :  { %v1031_v53 = vpop.eup %1030  ;;  %v485_v54 = vadd.f32 %v484_v51, %v457_v48 }
 0x12f   :  { %v460_v55 = vmul.f32 %v1031_v53, %v1530_v50 }
 0x130   :  { %486 = vadd.xlane.f32.xlu1 %v485_v54  ;;  %v1033_v57 = vpop.eup %1032 }
 0x131   :  { %v488_v58 = vsel %vm463_vm1, %v460_v55, 0.0  ;;  %v461_v62 = vmul.f32 %v1033_v57, %v1532_v52 }
 0x132   :  { %v1035_v59 = vpop.eup %1034  ;;  %v489_v60 = vadd.f32 %v488_v58, %v459_v56 }
 0x133   :  { %v462_v61 = vmul.f32 %v1035_v59, %v1530_v50 }
 0x134   :  { %490 = vadd.xlane.f32.xlu0 %v489_v60 }
 0x135   :  { %v492_v63 = vsel %vm463_vm1, %v462_v61, 0.0 }
 0x136   :  { %v493_v0 = vadd.f32 %v492_v63, %v461_v62 }
 0x138   :  { %494 = vadd.xlane.f32.xlu1 %v493_v0 }
 0x1a5   :  { %v467_v2 = vpop.xlane.xlu0 %466 }
 0x1a6   :  { %v498_v3 = vadd.f32 %v1568_v1, %v467_v2 }
 0x1a8   :  { %v509_v50 = vsel %vm508_vm2, %v498_v3, -1e+30 }
 0x1a9   :  { %v517_v4 = vrot.slane %v509_v50, 4  ;;  %v471_v5 = vpop.xlane.xlu0 %470 }
 0x1aa   :  { %v499_v52 = vadd.f32 %v1568_v1, %v471_v5 }
 0x1ab   :  { %v518_v6 = vmax.f32 %v509_v50, %v517_v4 }
 0x1ac   :  { %v510_v7 = vsel %vm508_vm2, %v499_v52, -1e+30 }
 0x1ad   :  { %v519_v9 = vrot.slane %v518_v6, 2  ;;  %v523_v10 = vrot.slane %v510_v7, 4  ;;  %v475_v11 = vpop.xlane.xlu1 %474 }
 0x1ae   :  { %v500_v12 = vadd.f32 %v1568_v1, %v475_v11 }
 0x1af   :  { %v520_v13 = vmax.f32 %v518_v6, %v519_v9  ;;  %v524_v14 = vmax.f32 %v510_v7, %v523_v10 }
 0x1b0   :  { %v511_v15 = vsel %vm508_vm2, %v500_v12, -1e+30 }
 0x1b1   :  { %v521_v18 = vrot.slane %v520_v13, 1  ;;  %v525_v19 = vrot.slane %v524_v14, 2  ;;  %v529_v20 = vrot.slane %v511_v15, 4  ;;  %v479_v21 = vpop.xlane.xlu1 %478 }
 0x1b2   :  { %v501_v22 = vadd.f32 %v1568_v1, %v479_v21 }
 0x1b3   :  { %v522_v23 = vmax.f32 %v520_v13, %v521_v18  ;;  %v526_v24 = vmax.f32 %v524_v14, %v525_v19  ;;  %v530_v25 = vmax.f32 %v511_v15, %v529_v20 }
 0x1b4   :  { %v512_v26 = vsel %vm508_vm2, %v501_v22, -1e+30 }
 0x1b5   :  { %v565_v27 = vsub.f32 %v509_v50, %v522_v23  ;;  %v527_v28 = vrot.slane %v526_v24, 1  ;;  %v531_v29 = vrot.slane %v530_v25, 2  ;;  %v535_v30 = vrot.slane %v512_v26, 4  ;;  %v483_v31 = vpop.xlane.xlu0 %482 }
 0x1b6   :  { %v502_v32 = vadd.f32 %v1568_v1, %v483_v31 }
 0x1b7   :  { %v573_v33 = vmul.f32 1.442695, %v565_v27  ;;  %v528_v34 = vmax.f32 %v526_v24, %v527_v28  ;;  %v532_v35 = vmax.f32 %v530_v25, %v531_v29  ;;  %v536_v36 = vmax.f32 %v512_v26, %v535_v30 }
 0x1b8   :  { %v513_v16 = vsel %vm508_vm2, %v502_v32, -1e+30 }
 0x1b9   :  { %1036 = vpow2.f32 %v573_v33  ;;  %v566_v37 = vsub.f32 %v510_v7, %v528_v34  ;;  %v533_v38 = vrot.slane %v532_v35, 1  ;;  %v537_v39 = vrot.slane %v536_v36, 2  ;;  %v487_v40 = vpop.xlane.xlu1 %486 }
 0x1ba   :  { %v541_v41 = vrot.slane %v513_v16, 4  ;;  %v503_v17 = vadd.f32 %v1568_v1, %v487_v40 }
 0x1bb   :  { %v575_v42 = vmul.f32 1.442695, %v566_v37  ;;  %v534_v43 = vmax.f32 %v532_v35, %v533_v38  ;;  %v538_v44 = vmax.f32 %v536_v36, %v537_v39 }
 0x1bc   :  { %v542_v45 = vmax.f32 %v513_v16, %v541_v41  ;;  %v514_v46 = vsel %vm508_vm2, %v503_v17, -1e+30 }
 0x1bd   :  { %1038 = vpow2.f32 %v575_v42  ;;  %v567_v47 = vsub.f32 %v511_v15, %v534_v43  ;;  %v539_v48 = vrot.slane %v538_v44, 1  ;;  %v547_v49 = vrot.slane %v514_v46, 4  ;;  %v491_v51 = vpop.xlane.xlu0 %490 }
 0x1be   :  { %v543_v53 = vrot.slane %v542_v45, 2  ;;  %v504_v54 = vadd.f32 %v1568_v1, %v491_v51 }
 0x1bf   :  { %v577_v55 = vmul.f32 1.442695, %v567_v47  ;;  %v540_v56 = vmax.f32 %v538_v44, %v539_v48  ;;  %v548_v57 = vmax.f32 %v514_v46, %v547_v49 }
 0x1c0   :  { %v544_v58 = vmax.f32 %v542_v45, %v543_v53  ;;  %v515_v61 = vsel %vm508_vm2, %v504_v54, -1e+30 }
 0x1c1   :  { %1040 = vpow2.f32 %v577_v55  ;;  %v568_v59 = vsub.f32 %v512_v26, %v540_v56  ;;  %v549_v60 = vrot.slane %v548_v57, 2  ;;  %v495_v0 = vpop.xlane.xlu1 %494  ;;  %v553_v50 = vrot.slane %v515_v61, 4 }
 0x1c2   :  { %v545_v62 = vrot.slane %v544_v58, 1  ;;  %v505_v6 = vadd.f32 %v1568_v1, %v495_v0 }
 0x1c3   :  { %v550_v63 = vmax.f32 %v548_v57, %v549_v60  ;;  %v579_v2 = vmul.f32 1.442695, %v568_v59  ;;  %v554_v10 = vmax.f32 %v515_v61, %v553_v50 }
 0x1c4   :  { %v546_v3 = vmax.f32 %v544_v58, %v545_v62  ;;  %v516_v14 = vsel %vm508_vm2, %v505_v6, -1e+30  ;;  %v656_v62 = vld [vmem:[%s1827_s1 + $0x18] sm:$0xff] }
 0x1c5   :  { %v551_v52 = vrot.slane %v550_v63, 1  ;;  %1042 = vpow2.f32 %v579_v2  ;;  %v555_v19 = vrot.slane %v554_v10, 2  ;;  %v559_v22 = vrot.slane %v516_v14, 4 }
 0x1c6   :  { %v1592_v4 = vpop.eup %1036  ;;  %v569_v5 = vsub.f32 %v513_v16, %v546_v3  ;;  %v654_v3 = vld [vmem:[%s1827_s1 + $0x8] sm:$0xff] }
 0x1c7   :  { %v589_v7 = vrot.slane %v1592_v4, 4  ;;  %v552_v13 = vmax.f32 %v550_v63, %v551_v52  ;;  %v556_v26 = vmax.f32 %v554_v10, %v555_v19  ;;  %v560_v29 = vmax.f32 %v516_v14, %v559_v22  ;;  %v659_v10 = vld [vmem:[%s1827_s1 + $0x30] sm:$0xff] }
 0x1c8   :  { %v581_v9 = vmul.f32 1.442695, %v569_v5 }
 0x1c9   :  { %v590_v11 = vadd.f32 %v1592_v4, %v589_v7  ;;  %v570_v23 = vsub.f32 %v514_v46, %v552_v13  ;;  %v557_v32 = vrot.slane %v556_v26, 1  ;;  %v561_v35 = vrot.slane %v560_v29, 2  ;;  %v657_v7 = vld [vmem:[%s1827_s1 + $0x20] sm:$0xff] }
 0x1ca   :  { %v1039_v12 = vpop.eup %1038  ;;  %1044 = vpow2.f32 %v581_v9  ;;  %v658_v9 = vld [vmem:[%s1827_s1 + $0x28] sm:$0xff] }
 0x1cb   :  { %v591_v15 = vrot.slane %v590_v11, 2  ;;  %v595_v18 = vrot.slane %v1039_v12, 4  ;;  %v583_v30 = vmul.f32 1.442695, %v570_v23  ;;  %v558_v37 = vmax.f32 %v556_v26, %v557_v32 }
 0x1cc   :  { %v562_v40 = vmax.f32 %v560_v29, %v561_v35 }
 0x1cd   :  { %v592_v20 = vadd.f32 %v591_v15, %v590_v11  ;;  %v596_v21 = vadd.f32 %v1039_v12, %v595_v18  ;;  %1046 = vpow2.f32 %v583_v30  ;;  %v571_v42 = vsub.f32 %v515_v61, %v558_v37  ;;  %v653_v61 = vld [vmem:[%s1827_s1] sm:$0xff] }
 0x1ce   :  { %v1599_v1 = vpop.eup %1040  ;;  %v563_v44 = vrot.slane %v562_v40, 1 }
 0x1cf   :  { %v593_v24 = vrot.slane %v592_v20, 1  ;;  %v597_v25 = vrot.slane %v596_v21, 2  ;;  %v601_v28 = vrot.slane %v1599_v1, 4  ;;  %v585_v47 = vmul.f32 1.442695, %v571_v42 }
 0x1d0   :  { %v564_v49 = vmax.f32 %v562_v40, %v563_v44 }
 0x1d1   :  { %v598_v27 = vadd.f32 %v597_v25, %v596_v21  ;;  %v594_v8 = vadd.f32 %v593_v24, %v592_v20  ;;  %v602_v34 = vadd.f32 %v1599_v1, %v601_v28 }
 0x1d2   :  { %v1602_v33 = vpop.eup %1042  ;;  %v572_v57 = vsub.f32 %v516_v14, %v564_v49  ;;  %v660_v14 = vld [vmem:[%s1827_s1 + $0x38] sm:$0xff] }
 0x1d3   :  { %v599_v31 = vrot.slane %v598_v27, 1  ;;  %1048 = vrcp.f32 %v594_v8  ;;  %v607_v16 = vrot.slane %v1602_v33, 4  ;;  %v603_v39 = vrot.slane %v602_v34, 2 }
 0x1d4   :  { %v587_v2 = vmul.f32 1.442695, %v572_v57  ;;  %v662_v57 = vld [vmem:[%s1827_s1 + $0x48] sm:$0xff] }
 0x1d5   :  { %v600_v36 = vadd.f32 %v599_v31, %v598_v27  ;;  %v608_v41 = vadd.f32 %v1602_v33, %v607_v16  ;;  %v604_v43 = vadd.f32 %v603_v39, %v602_v34 }
 0x1d7   :  { %v1606_v38 = vpop.eup %1044  ;;  %1050 = vrcp.f32 %v600_v36  ;;  %v609_v45 = vrot.slane %v608_v41, 2  ;;  %v605_v48 = vrot.slane %v604_v43, 1 }
 0x1d8   :  { %v613_v17 = vrot.slane %v1606_v38, 4  ;;  %1052 = vpow2.f32 %v585_v47 }
 0x1d9   :  { %v610_v54 = vadd.f32 %v609_v45, %v608_v41  ;;  %v606_v56 = vadd.f32 %v605_v48, %v604_v43 }
 0x1da   :  { %v614_v46 = vadd.f32 %v1606_v38, %v613_v17  ;;  %v1611_v51 = vpop.eup %1046 }
 0x1db   :  { %v619_v58 = vrot.slane %v1611_v51, 4  ;;  %v611_v63 = vrot.slane %v610_v54, 1  ;;  %1054 = vrcp.f32 %v606_v56  ;;  %v661_v56 = vld [vmem:[%s1827_s1 + $0x40] sm:$0xff] }
 0x1dc   :  { %v615_v55 = vrot.slane %v614_v46, 2  ;;  %1056 = vpow2.f32 %v587_v2  ;;  %v663_v2 = vld [vmem:[%s1827_s1 + $0x50] sm:$0xff] }
 0x1dd   :  { %v620_v5 = vadd.f32 %v1611_v51, %v619_v58  ;;  %v612_v11 = vadd.f32 %v611_v63, %v610_v54 }
 0x1de   :  { %v616_v0 = vadd.f32 %v615_v55, %v614_v46 }
 0x1df   :  { %v621_v19 = vrot.slane %v620_v5, 2  ;;  %1058 = vrcp.f32 %v612_v11 }
 0x1e0   :  { %v1049_v53 = vpop.eup %1048 }
 0x1e1   :  { %v638_v60 = vmul.f32 %v1049_v53, %v1592_v4  ;;  %v655_v4 = vld [vmem:[%s1827_s1 + $0x10] sm:$0xff]  ;;  %v622_v8 = vadd.f32 %v621_v19, %v620_v5 }
 0x1e3   :  { %v685_v52 = vmul.f32 %v653_v61, %v638_v60  ;;  %v688_v6 = vmul.f32 %v656_v62, %v638_v60  ;;  %v686_v13 = vmul.f32 %v654_v3, %v638_v60  ;;  %v687_v15 = vmul.f32 %v655_v4, %v638_v60  ;;  %v664_v3 = vld [vmem:[%s1827_s1 + $0x58] sm:$0xff] }
 0x1e4   :  { %v1051_v59 = vpop.eup %1050  ;;  %v623_v17 = vrot.slane %v622_v8, 1 }
 0x1e5   :  { %v640_v50 = vmul.f32 %v1051_v59, %v1039_v12  ;;  %v617_v12 = vrot.slane %v616_v0, 1  ;;  %v717_v20 = vrot.slane %v685_v52, 4  ;;  %v735_v21 = vsel %vm168_vm0, %v688_v6, 0.0  ;;  %v1641_v26 = vpop.eup %1052 }
 0x1e6   :  { %v723_v27 = vrot.slane %v686_v13, 4  ;;  %v729_v28 = vrot.slane %v687_v15, 4  ;;  %v736_v29 = vrot.slane %v735_v21, 4  ;;  %v625_v36 = vrot.slane %v1641_v26, 4 }
 0x1e7   :  { %v689_v18 = vmul.f32 %v657_v7, %v640_v50  ;;  %v690_v22 = vmul.f32 %v658_v9, %v640_v50  ;;  %v691_v23 = vmul.f32 %v659_v10, %v640_v50  ;;  %v692_v24 = vmul.f32 %v660_v14, %v640_v50 }
 0x1e8   :  { %v618_v25 = vadd.f32 %v617_v12, %v616_v0  ;;  %v718_v31 = vadd.f32 %v717_v20, %v685_v52  ;;  %v724_v16 = vadd.f32 %v723_v27, %v686_v13  ;;  %v1055_v37 = vpop.eup %1054  ;;  %v730_v39 = vadd.f32 %v729_v28, %v687_v15 }
 0x1e9   :  { %v742_v30 = vrot.slane %v689_v18, 4  ;;  %v748_v32 = vrot.slane %v690_v22, 4  ;;  %v754_v34 = vrot.slane %v691_v23, 4  ;;  %v760_v35 = vsel %vm168_vm0, %v692_v24, 0.0  ;;  %v1647_v49 = vpop.eup %1056 }
 0x1ea   :  { %1060 = vrcp.f32 %v618_v25  ;;  %v737_v40 = vadd.f32 %v736_v29, %v735_v21  ;;  %v719_v42 = vrot.slane %v718_v31, 2  ;;  %v761_v45 = vrot.slane %v760_v35, 4  ;;  %v668_v21 = vld [vmem:[%s1827_s1 + $0x78] sm:$0xff]  ;;  %v666_v29 = vld [vmem:[%s1827_s1 + $0x68] sm:$0xff] }
 0x1eb   :  { %v743_v41 = vadd.f32 %v742_v30, %v689_v18  ;;  %v749_v43 = vadd.f32 %v748_v32, %v690_v22  ;;  %v755_v44 = vadd.f32 %v754_v34, %v691_v23  ;;  %v626_v46 = vadd.f32 %v1641_v26, %v625_v36  ;;  %v667_v34 = vld [vmem:[%s1827_s1 + $0x70] sm:$0xff] }
 0x1ec   :  { %v725_v47 = vrot.slane %v724_v16, 2  ;;  %v642_v48 = vmul.f32 %v1055_v37, %v1599_v1  ;;  %v731_v53 = vrot.slane %v730_v39, 2  ;;  %v738_v54 = vrot.slane %v737_v40, 2  ;;  %v1059_v1 = vpop.eup %1058 }
 0x1ed   :  { %v744_v55 = vrot.slane %v743_v41, 2  ;;  %v624_v58 = vadd.f32 %v623_v17, %v622_v8  ;;  %v720_v59 = vadd.f32 %v719_v42, %v718_v31  ;;  %v750_v60 = vrot.slane %v749_v43, 2  ;;  %v669_v42 = vld [vmem:[%s1827_s1 + $0x80] sm:$0xff] }
 0x1ee   :  { %v756_v61 = vrot.slane %v755_v44, 2  ;;  %v762_v62 = vadd.f32 %v761_v45, %v760_v35  ;;  %v627_v63 = vrot.slane %v626_v46, 2  ;;  %v726_v0 = vadd.f32 %v725_v47, %v724_v16 }
 0x1ef   :  { %v693_v50 = vmul.f32 %v661_v56, %v642_v48  ;;  %v694_v5 = vmul.f32 %v662_v57, %v642_v48  ;;  %v631_v4 = vrot.slane %v1647_v49, 4  ;;  %v732_v52 = vadd.f32 %v731_v53, %v730_v39 }
 0x1f0   :  { %v739_v6 = vadd.f32 %v738_v54, %v737_v40  ;;  %v745_v7 = vadd.f32 %v744_v55, %v743_v41  ;;  %1062 = vrcp.f32 %v624_v58  ;;  %v721_v9 = vrot.slane %v720_v59, 1  ;;  %v671_v55 = vld [vmem:[%s1827_s1 + $0x90] sm:$0xff] }
 0x1f1   :  { %v751_v10 = vadd.f32 %v750_v60, %v749_v43  ;;  %v757_v11 = vadd.f32 %v756_v61, %v755_v44  ;;  %v763_v12 = vrot.slane %v762_v62, 2  ;;  %v695_v13 = vmul.f32 %v663_v2, %v642_v48 }
 0x1f2   :  { %v696_v14 = vmul.f32 %v664_v3, %v642_v48  ;;  %v644_v15 = vmul.f32 %v1059_v1, %v1602_v33  ;;  %v767_v19 = vrot.slane %v693_v50, 4  ;;  %v773_v20 = vrot.slane %v694_v5, 4  ;;  %v665_v33 = vld [vmem:[%s1827_s1 + $0x60] sm:$0xff] }
 0x1f3   :  { %v1666_v22 = vadd.f32 %v627_v63, %v626_v46  ;;  %v1669_v23 = vadd.f32 %v1647_v49, %v631_v4  ;;  %v727_v24 = vrot.slane %v726_v0, 1  ;;  %v733_v25 = vrot.slane %v732_v52, 1 }
 0x1f4   :  { %v740_v27 = vrot.slane %v739_v6, 1  ;;  %v746_v28 = vrot.slane %v745_v7, 1  ;;  %v722_v30 = vadd.f32 %v721_v9, %v720_v59  ;;  %v752_v8 = vrot.slane %v751_v10, 1  ;;  %v672_v59 = vld [vmem:[%s1827_s1 + $0x98] sm:$0xff] }
 0x1f5   :  { %v758_v31 = vrot.slane %v757_v11, 1  ;;  %v764_v32 = vadd.f32 %v763_v12, %v762_v62  ;;  %v779_v35 = vrot.slane %v695_v13, 4  ;;  %v785_v36 = vsel %vm168_vm0, %v696_v14, 0.0 }
 0x1f6   :  { %v700_v16 = vmul.f32 %v668_v21, %v644_v15  ;;  %v768_v39 = vadd.f32 %v767_v19, %v693_v50  ;;  %v774_v40 = vadd.f32 %v773_v20, %v694_v5  ;;  %v697_v41 = vmul.f32 %v665_v33, %v644_v15 }
 0x1f7   :  { %v1061_v18 = vpop.eup %1060  ;;  %v698_v17 = vmul.f32 %v666_v29, %v644_v15  ;;  %v728_v43 = vadd.f32 %v727_v24, %v726_v0  ;;  %v734_v44 = vadd.f32 %v733_v25, %v732_v52  ;;  %v747_v45 = vadd.f32 %v746_v28, %v745_v7  ;;  %v673_v28 = vld [vmem:[%s1827_s1 + $0xa0] sm:$0xff] }
 0x1f8   :  { %v646_v37 = vmul.f32 %v1061_v18, %v1606_v38  ;;  %v699_v46 = vmul.f32 %v667_v34, %v644_v15  ;;  %v741_v47 = vadd.f32 %v740_v27, %v739_v6  ;;  %v753_v48 = vadd.f32 %v752_v8, %v751_v10  ;;  %v670_v38 = vld [vmem:[%s1827_s1 + $0x88] sm:$0xff] }
 0x1f9   :  { %v759_v53 = vadd.f32 %v758_v31, %v757_v11  ;;  %v765_v54 = vrot.slane %v764_v32, 1  ;;  %v780_v56 = vadd.f32 %v779_v35, %v695_v13  ;;  %v786_v57 = vrot.slane %v785_v36, 4 }
 0x1fa   :  { %v810_v58 = vsel %vm168_vm0, %v700_v16, 0.0  ;;  %v701_v60 = vmul.f32 %v669_v42, %v646_v37  ;;  %v769_v61 = vrot.slane %v768_v39, 2  ;;  %v775_v62 = vrot.slane %v774_v40, 2  ;;  %v674_v16 = vld [vmem:[%s1827_s1 + $0xa8] sm:$0xff] }
 0x1fb   :  { %v792_v63 = vrot.slane %v697_v41, 4  ;;  %v798_v1 = vrot.slane %v698_v17, 4  ;;  %v1696_v0 = vsel %vm949_vm3, %v747_v45, %v722_v30  ;;  %v804_v2 = vrot.slane %v699_v46, 4 }
 0x1fc   :  { %v702_v3 = vmul.f32 %v670_v38, %v646_v37  ;;  %v703_v50 = vmul.f32 %v671_v55, %v646_v37  ;;  %v1699_v4 = vsel %vm949_vm3, %v753_v48, %v728_v43  ;;  %v1702_v52 = vsel %vm949_vm3, %v759_v53, %v734_v44 }
 0x1fd   :  { %v1063_v5 = vpop.eup %1062  ;;  %v811_v6 = vrot.slane %v810_v58, 4  ;;  %v704_v7 = vmul.f32 %v672_v59, %v646_v37  ;;  %v766_v9 = vadd.f32 %v765_v54, %v764_v32  ;;  %v781_v10 = vrot.slane %v780_v56, 2  ;;  %v675_v37 = vld [vmem:[%s1827_s1 + $0xb0] sm:$0xff] }
 0x1fe   :  { %v787_v11 = vadd.f32 %v786_v57, %v785_v36  ;;  %v817_v12 = vrot.slane %v701_v60, 4  ;;  %v1704_v13 = vadd.f32 %v769_v61, %v768_v39  ;;  %v1706_v14 = vadd.f32 %v775_v62, %v774_v40 }
 0x1ff   :  { %v793_v15 = vadd.f32 %v792_v63, %v697_v41  ;;  %v799_v18 = vadd.f32 %v798_v1, %v698_v17  ;;  %v805_v19 = vadd.f32 %v804_v2, %v699_v46  ;;  %v823_v20 = vrot.slane %v702_v3, 4  ;;  %v676_v17 = vld [vmem:[%s1827_s1 + $0xb8] sm:$0xff] }
 0x200   :  { %v829_v21 = vrot.slane %v703_v50, 4  ;;  %v648_v24 = vmul.f32 %v1063_v5, %v1611_v51  ;;  %v812_v25 = vadd.f32 %v811_v6, %v810_v58  ;;  %v835_v27 = vsel %vm168_vm0, %v704_v7, 0.0 }
 0x201   :  { %v629_v33 = vrot.slane %v1666_v22, 1  ;;  %v633_v29 = vrot.slane %v1669_v23, 2  ;;  %v1716_v30 = vsel %vm949_vm3, %v766_v9, %v741_v47  ;;  %v782_v8 = vadd.f32 %v781_v10, %v780_v56 }
 0x202   :  { %v788_v31 = vrot.slane %v787_v11, 2  ;;  %v818_v32 = vadd.f32 %v817_v12, %v701_v60  ;;  %v771_v34 = vrot.slane %v1704_v13, 1  ;;  %v777_v51 = vrot.slane %v1706_v14, 1 }
 0x203   :  { %v794_v35 = vrot.slane %v793_v15, 2  ;;  %v800_v36 = vrot.slane %v799_v18, 2  ;;  %v824_v39 = vadd.f32 %v823_v20, %v702_v3  ;;  %v830_v40 = vadd.f32 %v829_v21, %v703_v50 }
 0x204   :  { %v836_v41 = vrot.slane %v835_v27, 4  ;;  %v705_v42 = vmul.f32 %v673_v28, %v648_v24  ;;  %v806_v43 = vrot.slane %v805_v19, 2  ;;  %v813_v44 = vrot.slane %v812_v25, 2 }
 0x205   :  { %v630_v45 = vadd.f32 %v629_v33, %v1666_v22  ;;  %v634_v46 = vadd.f32 %v633_v29, %v1669_v23  ;;  %v789_v47 = vadd.f32 %v788_v31, %v787_v11  ;;  %v819_v48 = vrot.slane %v818_v32, 2 }
 0x206   :  { %v706_v53 = vmul.f32 %v674_v16, %v648_v24  ;;  %v707_v54 = vmul.f32 %v675_v37, %v648_v24  ;;  %v795_v38 = vadd.f32 %v794_v35, %v793_v15  ;;  %v708_v55 = vmul.f32 %v676_v17, %v648_v24 }
 0x207   :  { %1064 = vrcp.f32 %v630_v45  ;;  %v635_v56 = vrot.slane %v634_v46, 1  ;;  %v825_v57 = vrot.slane %v824_v39, 2  ;;  %v831_v58 = vrot.slane %v830_v40, 2 }
 0x208   :  { %v837_v59 = vadd.f32 %v836_v41, %v835_v27  ;;  %v842_v60 = vrot.slane %v705_v42, 4  ;;  %v801_v61 = vadd.f32 %v800_v36, %v799_v18  ;;  %v807_v62 = vadd.f32 %v806_v43, %v805_v19 }
 0x209   :  { %v814_v63 = vadd.f32 %v813_v44, %v812_v25  ;;  %v636_v22 = vadd.f32 %v635_v56, %v634_v46  ;;  %v783_v1 = vrot.slane %v782_v8, 1  ;;  %v820_v23 = vadd.f32 %v819_v48, %v818_v32 }
 0x20a   :  { %v848_v2 = vrot.slane %v706_v53, 4  ;;  %v854_v3 = vrot.slane %v707_v54, 4  ;;  %v790_v50 = vrot.slane %v789_v47, 1  ;;  %v796_v5 = vrot.slane %v795_v38, 1 }
 0x20b   :  { %v860_v6 = vsel %vm168_vm0, %v708_v55, 0.0  ;;  %1066 = vrcp.f32 %v636_v22  ;;  %v826_v7 = vadd.f32 %v825_v57, %v824_v39  ;;  %v832_v9 = vadd.f32 %v831_v58, %v830_v40 }
 0x20c   :  { %v838_v10 = vrot.slane %v837_v59, 2  ;;  %v843_v11 = vadd.f32 %v842_v60, %v705_v42  ;;  %v772_v12 = vadd.f32 %v771_v34, %v1704_v13  ;;  %v802_v15 = vrot.slane %v801_v61, 1 }
 0x20d   :  { %v808_v18 = vrot.slane %v807_v62, 1  ;;  %v815_v19 = vrot.slane %v814_v63, 1  ;;  %v821_v20 = vrot.slane %v820_v23, 1  ;;  %v849_v21 = vadd.f32 %v848_v2, %v706_v53  ;;  %v681_v2 = vld [vmem:[%s1827_s1 + $0xe0] sm:$0xff] }
 0x20e   :  { %v855_v24 = vadd.f32 %v854_v3, %v707_v54  ;;  %v861_v25 = vrot.slane %v860_v6, 4  ;;  %v778_v27 = vadd.f32 %v777_v51, %v1706_v14  ;;  %v784_v28 = vadd.f32 %v783_v1, %v782_v8 }
 0x20f   :  { %v791_v33 = vadd.f32 %v790_v50, %v789_v47  ;;  %v797_v29 = vadd.f32 %v796_v5, %v795_v38  ;;  %v827_v31 = vrot.slane %v826_v7, 1  ;;  %v833_v32 = vrot.slane %v832_v9, 1 }
 0x210   :  { %v839_v35 = vadd.f32 %v838_v10, %v837_v59  ;;  %v844_v36 = vrot.slane %v843_v11, 2  ;;  %v952_v16 = vsel %vm951_vm4, %v772_v12, %v1696_v0  ;;  %v803_v13 = vadd.f32 %v802_v15, %v801_v61  ;;  %v677_v0 = vld [vmem:[%s1827_s1 + $0xc0] sm:$0xff]  ;;  %v684_v15 = vld [vmem:[%s1827_s1 + $0xf8] sm:$0xff] }
 0x211   :  { %v809_v34 = vadd.f32 %v808_v18, %v807_v62  ;;  %v816_v37 = vadd.f32 %v815_v19, %v814_v63  ;;  %v822_v39 = vadd.f32 %v821_v20, %v820_v23  ;;  %v850_v40 = vrot.slane %v849_v21, 2 }
 0x212   :  { %v856_v41 = vrot.slane %v855_v24, 2  ;;  %v862_v17 = vadd.f32 %v861_v25, %v860_v6  ;;  %v964_v14 = vsel %vm951_vm4, %v778_v27, %v1699_v4  ;;  %v971_v8 = vsel %vm951_vm4, %v784_v28, %v1702_v52  ;;  %v678_v4 = vld [vmem:[%s1827_s1 + $0xc8] sm:$0xff]  ;;  %v679_v52 = vld [vmem:[%s1827_s1 + $0xd0] sm:$0xff] }
 0x213   :  { %v978_v51 = vsel %vm951_vm4, %v791_v33, %v1716_v30  ;;  %v954_v42 = vsel %vm953_vm5, %v797_v29, %v952_v16  ;;  %v828_v44 = vadd.f32 %v827_v31, %v826_v7  ;;  %v834_v45 = vadd.f32 %v833_v32, %v832_v9  ;;  %v680_v30 = vld [vmem:[%s1827_s1 + $0xd8] sm:$0xff]  ;;  %v682_v7 = vld [vmem:[%s1827_s1 + $0xe8] sm:$0xff]  ;;  %v683_v9 = vld [vmem:[%s1827_s1 + $0xf0] sm:$0xff] }
 0x214   :  { %v1065_v43 = vpop.eup %1064  ;;  %v840_v46 = vrot.slane %v839_v35, 1  ;;  %v1746_v47 = vadd.f32 %v844_v36, %v843_v11  ;;  %v965_v48 = vsel %vm953_vm5, %v803_v13, %v964_v14  ;;  %v972_v53 = vsel %vm953_vm5, %v809_v34, %v971_v8 }
 0x215   :  { %v1760_v54 = vsel %vm953_vm5, %v816_v37, %v978_v51  ;;  %v650_v38 = vmul.f32 %v1065_v43, %v1641_v26  ;;  %v1764_v55 = vsel %vm955_vm6, %v822_v39, %v954_v42  ;;  %v851_v56 = vadd.f32 %v850_v40, %v849_v21 }
 0x216   :  { %v857_v57 = vadd.f32 %v856_v41, %v855_v24  ;;  %v863_v58 = vrot.slane %v862_v17, 2  ;;  %v1766_v22 = vadd.f32 %v840_v46, %v839_v35  ;;  %v1769_v1 = vsel %vm955_vm6, %v828_v44, %v965_v48 }
 0x217   :  { %v709_v59 = vmul.f32 %v677_v0, %v650_v38  ;;  %v710_v60 = vmul.f32 %v678_v4, %v650_v38  ;;  %v711_v61 = vmul.f32 %v679_v52, %v650_v38  ;;  %v712_v62 = vmul.f32 %v680_v30, %v650_v38 }
 0x218   :  { %v1067_v63 = vpop.eup %1066  ;;  %v1772_v23 = vsel %vm955_vm6, %v834_v45, %v972_v53  ;;  %v846_v26 = vrot.slane %v1746_v47, 1  ;;  %v852_v10 = vrot.slane %v851_v56, 1  ;;  %v858_v11 = vrot.slane %v857_v57, 1 }
 0x219   :  { %v867_v3 = vrot.slane %v709_v59, 4  ;;  %v873_v50 = vrot.slane %v710_v60, 4  ;;  %v879_v5 = vrot.slane %v711_v61, 4  ;;  %v885_v6 = vsel %vm168_vm0, %v712_v62, 0.0 }
 0x21a   :  { %v886_v12 = vrot.slane %v885_v6, 4  ;;  %v652_v18 = vmul.f32 %v1067_v63, %v1647_v49  ;;  %v864_v19 = vadd.f32 %v863_v58, %v862_v17  ;;  %v847_v44 = vadd.f32 %v846_v26, %v1746_v47 }
 0x21b   :  { %v868_v20 = vadd.f32 %v867_v3, %v709_v59  ;;  %v874_v21 = vadd.f32 %v873_v50, %v710_v60  ;;  %v880_v24 = vadd.f32 %v879_v5, %v711_v61  ;;  %v853_v52 = vadd.f32 %v852_v10, %v851_v56 }
 0x21c   :  { %v887_v25 = vadd.f32 %v886_v12, %v885_v6  ;;  %v713_v27 = vmul.f32 %v681_v2, %v652_v18  ;;  %v714_v28 = vmul.f32 %v682_v7, %v652_v18  ;;  %v715_v33 = vmul.f32 %v683_v9, %v652_v18 }
 0x21d   :  { %v869_v29 = vrot.slane %v868_v20, 2  ;;  %v875_v31 = vrot.slane %v874_v21, 2  ;;  %v881_v32 = vrot.slane %v880_v24, 2  ;;  %v716_v35 = vmul.f32 %v684_v15, %v652_v18 }
 0x21e   :  { %v888_v36 = vrot.slane %v887_v25, 2  ;;  %v892_v16 = vrot.slane %v713_v27, 4  ;;  %v898_v13 = vrot.slane %v714_v28, 4  ;;  %v904_v34 = vrot.slane %v715_v33, 4 }
 0x21f   :  { %v870_v37 = vadd.f32 %v869_v29, %v868_v20  ;;  %v876_v49 = vadd.f32 %v875_v31, %v874_v21  ;;  %v882_v39 = vadd.f32 %v881_v32, %v880_v24  ;;  %v910_v40 = vsel %vm168_vm0, %v716_v35, 0.0 }
 0x220   :  { %v889_v41 = vadd.f32 %v888_v36, %v887_v25  ;;  %v893_v17 = vadd.f32 %v892_v16, %v713_v27  ;;  %v899_v14 = vadd.f32 %v898_v13, %v714_v28  ;;  %v905_v8 = vadd.f32 %v904_v34, %v715_v33 }
 0x221   :  { %v871_v51 = vrot.slane %v870_v37, 1  ;;  %v877_v42 = vrot.slane %v876_v49, 1  ;;  %v883_v0 = vrot.slane %v882_v39, 1  ;;  %v911_v43 = vrot.slane %v910_v40, 4 }
 0x222   :  { %v894_v45 = vrot.slane %v893_v17, 2  ;;  %v900_v46 = vrot.slane %v899_v14, 2  ;;  %v906_v4 = vrot.slane %v905_v8, 2  ;;  %v859_v30 = vadd.f32 %v858_v11, %v857_v57 }
 0x223   :  { %v865_v48 = vrot.slane %v864_v19, 1  ;;  %v912_v53 = vadd.f32 %v911_v43, %v910_v40  ;;  %v890_v38 = vrot.slane %v889_v41, 1  ;;  %v872_v61 = vadd.f32 %v871_v51, %v870_v37 }
 0x224   :  { %v895_v58 = vadd.f32 %v894_v45, %v893_v17  ;;  %v901_v59 = vadd.f32 %v900_v46, %v899_v14  ;;  %v907_v60 = vadd.f32 %v906_v4, %v905_v8  ;;  %v878_v62 = vadd.f32 %v877_v42, %v876_v49 }
 0x225   :  { %v884_v63 = vadd.f32 %v883_v0, %v882_v39  ;;  %v913_v2 = vrot.slane %v912_v53, 2  ;;  %v958_v3 = vsel %vm957_vm7, %v847_v44, %v1764_v55  ;;  %v866_v5 = vadd.f32 %v865_v48, %v864_v19 }
 0x226   :  { %v896_v50 = vrot.slane %v895_v58, 1  ;;  %v902_v47 = vrot.slane %v901_v59, 1  ;;  %v908_v26 = vrot.slane %v907_v60, 1  ;;  %v967_v56 = vsel %vm957_vm7, %v853_v52, %v1769_v1 }
 0x227   :  { %v974_v57 = vsel %vm957_vm7, %v859_v30, %v1772_v23  ;;  %v914_v6 = vadd.f32 %v913_v2, %v912_v53  ;;  %v891_v7 = vadd.f32 %v890_v38, %v889_v41  ;;  %v960_v12 = vsel %vm959_vm8, %v872_v61, %v958_v3 }
 0x228   :  { %v897_v9 = vadd.f32 %v896_v50, %v895_v58  ;;  %v903_v10 = vadd.f32 %v902_v47, %v901_v59  ;;  %v909_v11 = vadd.f32 %v908_v26, %v907_v60  ;;  %v968_v15 = vsel %vm959_vm8, %v878_v62, %v967_v56 }
 0x229   :  { %v975_v55 = vsel %vm959_vm8, %v884_v63, %v974_v57  ;;  %v915_v18 = vrot.slane %v914_v6, 1  ;;  %v980_v19 = vsel %vm955_vm6, %v1766_v22, %v1760_v54 }
 0x22a   :  { %v962_v1 = vsel %vm961_vm9, %v897_v9, %v960_v12  ;;  %v969_v23 = vsel %vm961_vm9, %v903_v10, %v968_v15  ;;  %v976_v20 = vsel %vm961_vm9, %v909_v11, %v975_v55  ;;  %v981_v21 = vsel %vm957_vm7, %v866_v5, %v980_v19 }
 0x22b   :  { %v916_v24 = vadd.f32 %v915_v18, %v914_v6  ;;  %988 = vst [vmem:[%s1828_s6] sm:$0xff] %v962_v1  ;;  %989 = vst [vmem:[%s1828_s6 + $0x8] sm:$0xff] %v969_v23  ;;  %v982_v54 = vsel %vm959_vm8, %v891_v7, %v981_v21 }
 0x22c   :  { %990 = vst [vmem:[%s1828_s6 + $0x10] sm:$0xff] %v976_v20 }
 0x22d   :  { %v983_v22 = vsel %vm961_vm9, %v916_v24, %v982_v54 }
 0x22e   :  { %991 = vst.msk [vmem:[%s1828_s6 + $0x18] sm:$0xff] %vm168_vm0, %v983_v22 }

</bundles_post_ra>
